<compile_context>
chip_gen: v6e
topology: v6e:2x2x1
jax: 0.10.0
libtpu: 0.0.40
codegen_flags: <defaults>
</compile_context>

<pallas_src>
import jax
import jax.numpy as jnp
from jax.experimental import pallas as pl
from jax.experimental.pallas import tpu as pltpu


# ----------------------------------------------------------------------------
# helpers
# ----------------------------------------------------------------------------
def _rup(c, m=128):
    return ((c + m - 1) // m) * m


def _silu(x, approx=True):
    # x * sigmoid(x); exp + reciprocal land on the EUP slot, keeping the VALU free.
    return x * pl.reciprocal(1.0 + jnp.exp(-x), approx=approx)


def _pick_row_tile(n):
    for t in (1024, 512, 256, 128, 64, 32, 16, 8):
        if n % t == 0:
            return t
    return n


def _pick_h_tile(h):
    for t in (32, 16, 8, 4, 2):
        if h % t == 0 and h // t >= 2:
            return t
    return h


def _vmem_limit_bytes(frac=0.75, fallback=64 * 1024 * 1024):
    try:
        cap = int(getattr(pltpu.get_tpu_info(), "vmem_capacity_bytes", fallback))
    except Exception:
        cap = fallback
    return int(cap * frac)


# ----------------------------------------------------------------------------
# Kernel 1 ("front"): cv1 + cv2 packed into one N=2*Cp dot, plus bottleneck.cv1.
#   x:   (N, C1p) bf16
#   out: y12 (N, 2*Cp) bf16  (y1 = lanes [0,Cp), y2 = lanes [Cp,2Cp))
#        z   (N, Cp)   bf16  (bottleneck.cv1 output)
# ----------------------------------------------------------------------------
def _front_kernel(x_ref, w12_ref, b12_ref, wm_ref, bm_ref, y12_ref, z_ref):
    cp = z_ref.shape[-1]
    x = x_ref[...]                                                   # (TM, C1p) bf16
    y12 = _silu(jnp.dot(x, w12_ref[...], preferred_element_type=jnp.float32)
                + b12_ref[...])
    y12b = y12.astype(y12_ref.dtype)
    y1b = y12b[:, :cp]                                               # lane-group slice
    z = _silu(jnp.dot(y1b, wm_ref[...], preferred_element_type=jnp.float32)
              + bm_ref[...])
    y12_ref[...] = y12b
    z_ref[...] = z.astype(z_ref.dtype)


def fused_front(x2d, w12, b12, wm, bm, tm):
    n, c1p = x2d.shape
    cp2 = w12.shape[1]
    cp = cp2 // 2
    flops = 2 * n * c1p * cp2 + 2 * n * cp * cp
    bytes_accessed = (n * c1p * 2 + c1p * cp2 * 2 + cp * cp * 2
                      + (cp2 + cp) * 4 + n * (cp2 + cp) * 2)

    def wfull(shape):
        return pl.BlockSpec(shape, lambda i, _s=shape: tuple(0 for _ in _s))

    return pl.pallas_call(
        _front_kernel,
        out_shape=(jax.ShapeDtypeStruct((n, cp2), jnp.bfloat16),
                   jax.ShapeDtypeStruct((n, cp), jnp.bfloat16)),
        grid=(n // tm,),
        in_specs=[
            pl.BlockSpec((tm, c1p), lambda i: (i, 0)),
            wfull((c1p, cp2)), wfull((1, cp2)),
            wfull((cp, cp)), wfull((1, cp)),
        ],
        out_specs=(pl.BlockSpec((tm, cp2), lambda i: (i, 0)),
                   pl.BlockSpec((tm, cp), lambda i: (i, 0))),
        compiler_params=pltpu.CompilerParams(dimension_semantics=("parallel",)),
        cost_estimate=pl.CostEstimate(flops=flops, transcendentals=n * (cp2 + cp),
                                      bytes_accessed=bytes_accessed),
    )(x2d, w12, b12, wm, bm)


# ----------------------------------------------------------------------------
# Kernel 2 ("conv+back"): bottleneck 3x3 conv (folded BN) + SiLU + residual add,
# then fused concat + cv3 (two dots against the split cv3 weight) — all per H-strip.
#   z:   (B, H, W, Cp)  bf16  (unpadded; halo built in-kernel)
#   y12: (B, H, W, 2Cp) bf16  (y1 = residual, y2 = cv2 branch)
#   w9:  (9, Cp, Cp)    bf16  (taps row-major (dy, dx)),   b3: (1, Cp)  f32
#   wa, wb: (Cp, C2p)   bf16  (cv3 weight split),          bo: (1, C2p) f32
#   out: (B, H, W, C2p) bf16
# Grid (B, H//TH); both axes "parallel" (no carried state, scratch rebuilt each step).
# ----------------------------------------------------------------------------
def _conv_back_kernel(z_ref, y12_ref, w9_ref, b3_ref, wa_ref, wb_ref, bo_ref,
                      o_ref, zs_ref):
    th, wd, c2p = o_ref.shape
    cin = z_ref.shape[-1]
    cout = w9_ref.shape[-1]
    cp = cin
    hi = pl.program_id(1)
    nh = pl.num_programs(1)
    row0 = pl.multiple_of(hi * th, th)
    bf = zs_ref.dtype

    # --- build the (th+2, wd+2, cin) halo strip in VMEM (replaces the XLA pad) ---
    # interior rows straight from z
    zs_ref[1:th + 1, 1:wd + 1, :] = z_ref[pl.ds(row0, th), :, :]
    # left / right halo columns are always zero
    zcol = jnp.zeros((th + 2, 1, cin), bf)
    zs_ref[:, 0:1, :] = zcol
    zs_ref[:, wd + 1:wd + 2, :] = zcol

    # top halo row
    @pl.when(hi > 0)
    def _():
        zs_ref[0:1, 1:wd + 1, :] = z_ref[pl.ds(row0 - 1, 1), :, :]

    @pl.when(hi == 0)
    def _():
        zs_ref[0:1, :, :] = jnp.zeros((1, wd + 2, cin), bf)

    # bottom halo row
    @pl.when(hi < nh - 1)
    def _():
        zs_ref[th + 1:th + 2, 1:wd + 1, :] = z_ref[pl.ds(row0 + th, 1), :, :]

    @pl.when(hi == nh - 1)
    def _():
        zs_ref[th + 1:th + 2, :, :] = jnp.zeros((1, wd + 2, cin), bf)

    # --- 3x3 conv: 9 taps, value-accumulated in f32 (single logical store) ---
    # NOTE: wd should be a multiple of 8 so the (th, wd, cin)->(th*wd, cin) reshape
    # is layout-preserving; true for typical feature-map widths here.
    acc = jnp.zeros((th * wd, cout), jnp.float32)
    for dy in range(3):
        for dx in range(3):
            patch = zs_ref[dy:dy + th, dx:dx + wd, :].reshape(th * wd, cin)
            acc = acc + jnp.dot(patch, w9_ref[3 * dy + dx],
                                preferred_element_type=jnp.float32)

    # --- bottleneck epilogue: SiLU + residual, then fused concat + cv3 ---
    y12 = y12_ref[...]                                               # (th, wd, 2Cp) bf16
    y1 = y12[..., :cp].reshape(th * wd, cp)
    y2 = y12[..., cp:].reshape(th * wd, cp)
    m = _silu(acc + b3_ref[...]) + y1.astype(jnp.float32)
    out = jnp.dot(m.astype(jnp.bfloat16), wa_ref[...],
                  preferred_element_type=jnp.float32)
    out = out + jnp.dot(y2, wb_ref[...], preferred_element_type=jnp.float32)
    out = _silu(out + bo_ref[...], approx=False)                     # exact final act
    o_ref[...] = out.reshape(th, wd, c2p).astype(o_ref.dtype)


def conv3x3_back(z_img, y12_img, w9, b3, wa, wb, bo, th, vmem_limit):
    bsz, h, w, cin = z_img.shape
    cout = w9.shape[-1]
    c2p = wa.shape[-1]
    flops = 2 * bsz * h * w * (9 * cin * cout + 2 * cin * c2p)
    transc = bsz * h * w * (cout + c2p)
    bytes_accessed = (bsz * h * w * cin * 2 + bsz * h * w * 2 * cin * 2
                      + 9 * cin * cout * 2 + 2 * cin * c2p * 2
                      + (cout + c2p) * 4 + bsz * h * w * c2p * 2)
    return pl.pallas_call(
        _conv_back_kernel,
        out_shape=jax.ShapeDtypeStruct((bsz, h, w, c2p), jnp.bfloat16),
        grid=(bsz, h // th),
        in_specs=[
            pl.BlockSpec((None, h, w, cin), lambda bi, hi: (bi, 0, 0, 0)),
            pl.BlockSpec((None, th, w, 2 * cin), lambda bi, hi: (bi, hi, 0, 0)),
            pl.BlockSpec((9, cin, cout), lambda bi, hi: (0, 0, 0)),
            pl.BlockSpec((1, cout), lambda bi, hi: (0, 0)),
            pl.BlockSpec((cin, c2p), lambda bi, hi: (0, 0)),
            pl.BlockSpec((cin, c2p), lambda bi, hi: (0, 0)),
            pl.BlockSpec((1, c2p), lambda bi, hi: (0, 0)),
        ],
        out_specs=pl.BlockSpec((None, th, w, c2p), lambda bi, hi: (bi, hi, 0, 0)),
        scratch_shapes=[pltpu.VMEM((th + 2, w + 2, cin), jnp.bfloat16)],
        compiler_params=pltpu.CompilerParams(
            dimension_semantics=("parallel", "parallel"),
            vmem_limit_bytes=vmem_limit),
        cost_estimate=pl.CostEstimate(flops=flops, transcendentals=transc,
                                      bytes_accessed=bytes_accessed),
    )(z_img, y12_img, w9, b3, wa, wb, bo)


# ----------------------------------------------------------------------------
# Parameter init (deterministic, synthetic) with BatchNorm folded into conv.
# Returns (f32 unpadded params for the reference, bf16 lane-padded params for kernels).
# ----------------------------------------------------------------------------
def init_c3_params(key, c1, c2, e=0.5, bn_eps=1e-5):
    c_ = int(c2 * e)
    c1p, cp, c2p = _rup(c1), _rup(c_), _rup(c2)
    keys = jax.random.split(key, 5)

    def conv_bn(k, w_shape, cout):
        kw, kg, kb, km, kv = jax.random.split(k, 5)
        w = jax.random.normal(kw, w_shape, jnp.float32) * 0.1
        gamma = 1.0 + 0.1 * jax.random.normal(kg, (cout,), jnp.float32)
        beta = 0.1 * jax.random.normal(kb, (cout,), jnp.float32)
        mean = 0.1 * jax.random.normal(km, (cout,), jnp.float32)
        var = jax.random.uniform(kv, (cout,), jnp.float32, minval=0.5, maxval=1.5)
        scale = gamma / jnp.sqrt(var + bn_eps)
        return w * scale, beta - mean * scale            # BN folded; bias (cout,)

    ref = {}
    ref["cv1_w"], ref["cv1_b"] = conv_bn(keys[0], (c1, c_), c_)
    ref["cv2_w"], ref["cv2_b"] = conv_bn(keys[1], (c1, c_), c_)
    ref["m_cv1_w"], ref["m_cv1_b"] = conv_bn(keys[2], (c_, c_), c_)
    ref["m_cv2_w"], ref["m_cv2_b"] = conv_bn(keys[3], (3, 3, c_, c_), c_)   # HWIO
    ref["cv3_w"], ref["cv3_b"] = conv_bn(keys[4], (2 * c_, c2), c2)

    bf = jnp.bfloat16

    def pad_w(wt, r, c):
        return jnp.pad(wt, ((0, r - wt.shape[0]), (0, c - wt.shape[1]))).astype(bf)

    def pad_b(bv, c):
        return jnp.pad(bv, (0, c - bv.shape[0])).reshape(1, c)      # stays f32

    w3 = jnp.pad(ref["m_cv2_w"], ((0, 0), (0, 0), (0, cp - c_), (0, cp - c_)))
    krn = {
        # cv1 || cv2 packed along the output dim (fills the 256-wide MXU on v6e/v7x).
        "w12": jnp.concatenate([pad_w(ref["cv1_w"], c1p, cp),
                                pad_w(ref["cv2_w"], c1p, cp)], axis=1),
        "b12": jnp.concatenate([pad_b(ref["cv1_b"], cp),
                                pad_b(ref["cv2_b"], cp)], axis=1),
        "wm": pad_w(ref["m_cv1_w"], cp, cp), "bm": pad_b(ref["m_cv1_b"], cp),
        "w3": w3.reshape(9, cp, cp).astype(bf), "b3": pad_b(ref["m_cv2_b"], cp),
        "wa": pad_w(ref["cv3_w"][:c_], cp, c2p),
        "wb": pad_w(ref["cv3_w"][c_:], cp, c2p),
        "bo": pad_b(ref["cv3_b"], c2p),
    }
    return ref, krn, c_


# ----------------------------------------------------------------------------
# C3 forward (Pallas path). Input/output are NCHW like the PyTorch module.
# ----------------------------------------------------------------------------
def c3_forward(x_nchw, kp, c1, c2, c_):
    b, c, h, w = x_nchw.shape
    c1p, cp, c2p = _rup(c1), _rup(c_), _rup(c2)
    n = b * h * w

    x = jnp.transpose(x_nchw, (0, 2, 3, 1)).reshape(n, c)
    # TODO(synk): for true C1 << 128 the HBM-side channel pad inflates the front read;
    # a (N, c1) full-dim block + in-kernel pad would avoid it, kept padded here for safety.
    x = jnp.pad(x, ((0, 0), (0, c1p - c))).astype(jnp.bfloat16)

    tm = _pick_row_tile(n)
    th = _pick_h_tile(h)
    vmem_limit = _vmem_limit_bytes()

    # Stage 1: cv1 + cv2 (one N=2*Cp dot) + bottleneck.cv1, x read from HBM once.
    y12, z = fused_front(x, kp["w12"], kp["b12"], kp["wm"], kp["bm"], tm)

    # Stage 2: bottleneck 3x3 conv + SiLU + residual + fused concat+cv3 epilogue.
    out = conv3x3_back(z.reshape(b, h, w, cp), y12.reshape(b, h, w, 2 * cp),
                       kp["w3"], kp["b3"], kp["wa"], kp["wb"], kp["bo"],
                       th, vmem_limit)
    out = out[..., :c2]
    return jnp.transpose(out, (0, 3, 1, 2)).astype(jnp.float32)


# ----------------------------------------------------------------------------
# Pure-JAX reference (same folded params, same bf16 cast points) for checking.
# ----------------------------------------------------------------------------
def c3_reference(x_nchw, rp, c_):
    bf = jnp.bfloat16
    x = jnp.transpose(x_nchw, (0, 2, 3, 1)).astype(bf)

    def silu(v):
        return v * jax.nn.sigmoid(v)

    def pw(t, wt, bv):
        y = jnp.einsum("bhwc,cd->bhwd", t, wt.astype(bf),
                       preferred_element_type=jnp.float32) + bv
        return silu(y)

    y1 = pw(x, rp["cv1_w"], rp["cv1_b"])
    y1b = y1.astype(bf)
    y2b = pw(x, rp["cv2_w"], rp["cv2_b"]).astype(bf)
    zb = pw(y1b, rp["m_cv1_w"], rp["m_cv1_b"]).astype(bf)
    conv = jax.lax.conv_general_dilated(
        zb, rp["m_cv2_w"].astype(bf), (1, 1), "SAME",
        dimension_numbers=("NHWC", "HWIO", "NHWC"),
        preferred_element_type=jnp.float32)
    m = silu(conv + rp["m_cv2_b"]) + y1b.astype(jnp.float32)
    cat = jnp.concatenate([m.astype(bf), y2b], axis=-1)
    out = pw(cat, rp["cv3_w"], rp["cv3_b"])
    return jnp.transpose(out, (0, 3, 1, 2)).astype(jnp.float32)


if __name__ == "__main__":
    key = jax.random.PRNGKey(0)
    kx, kp = jax.random.split(key)

    B, c1, H, W = 2, 4, 16, 16
    c2 = 8
    x = jax.random.normal(kx, (B, c1, H, W), jnp.float32)

    ref_params, krn_params, c_ = init_c3_params(kp, c1, c2)

    fwd = jax.jit(lambda xx: c3_forward(xx, krn_params, c1, c2, c_))
    out = jax.block_until_ready(fwd(x))

    ref = jax.block_until_ready(c3_reference(x, ref_params, c_))

    assert out.shape == (B, c2, H, W), out.shape
    max_err = float(jnp.max(jnp.abs(out - ref)))
    assert jnp.allclose(out, ref, atol=2e-2, rtol=2e-2), max_err

    print("KERNEL_OK")
</pallas_src>

<mosaic_0001>
module attributes {stable_mosaic.version = 11 : i64} {
  func.func @_front_kernel(%arg0: i32, %arg1: memref<512x128xbf16, #tpu.memory_space<vmem>>, %arg2: memref<128x256xbf16, #tpu.memory_space<vmem>>, %arg3: memref<1x256xf32, #tpu.memory_space<vmem>>, %arg4: memref<128x128xbf16, #tpu.memory_space<vmem>>, %arg5: memref<1x128xf32, #tpu.memory_space<vmem>>, %arg6: memref<512x256xbf16, #tpu.memory_space<vmem>>, %arg7: memref<512x128xbf16, #tpu.memory_space<vmem>>) attributes {dimension_semantics = [#tpu.dimension_semantics<parallel>], iteration_bounds = array<i64: 1>, scalar_prefetch = 0 : i64, scratch_operands = 0 : i64, tpu.core_type = #tpu.core_type<tc>, window_params = [{transform_indices = @transform_0, window_bounds = array<i64: 512, 128>}, {pipeline_mode = #tpu.pipeline_mode<synchronous>, transform_indices = @transform_1, window_bounds = array<i64: 128, 256>}, {pipeline_mode = #tpu.pipeline_mode<synchronous>, transform_indices = @transform_2, window_bounds = array<i64: 1, 256>}, {pipeline_mode = #tpu.pipeline_mode<synchronous>, transform_indices = @transform_3, window_bounds = array<i64: 128, 128>}, {pipeline_mode = #tpu.pipeline_mode<synchronous>, transform_indices = @transform_4, window_bounds = array<i64: 1, 128>}, {transform_indices = @transform_5, window_bounds = array<i64: 512, 256>}, {transform_indices = @transform_6, window_bounds = array<i64: 512, 128>}]} {
    %c0 = arith.constant 0 : index
    %c0_0 = arith.constant 0 : index
    %0 = vector.load %arg1[%c0, %c0_0] : memref<512x128xbf16, #tpu.memory_space<vmem>>, vector<512x128xbf16>
    %c0_1 = arith.constant 0 : index
    %c0_2 = arith.constant 0 : index
    %1 = vector.load %arg2[%c0_1, %c0_2] : memref<128x256xbf16, #tpu.memory_space<vmem>>, vector<128x256xbf16>
    %cst = arith.constant dense<0.000000e+00> : vector<512x256xf32>
    %2 = tpu.matmul %0, %1, %cst {dimension_numbers = #tpu.dot_dimension_numbers<[1], [0], [0], [1], [0, 0, 1, 1], [], []>} : vector<512x128xbf16>, vector<128x256xbf16>, vector<512x256xf32> -> vector<512x256xf32>
    %c0_3 = arith.constant 0 : index
    %c0_4 = arith.constant 0 : index
    %3 = vector.load %arg3[%c0_3, %c0_4] : memref<1x256xf32, #tpu.memory_space<vmem>>, vector<1x256xf32>
    %4 = vector.broadcast %3 : vector<1x256xf32> to vector<512x256xf32>
    %5 = arith.addf %2, %4 : vector<512x256xf32>
    %cst_5 = arith.constant 0.000000e+00 : f32
    %6 = vector.broadcast %cst_5 : f32 to vector<512x256xf32>
    %7 = arith.subf %6, %5 : vector<512x256xf32>
    %8 = math.exp %7 : vector<512x256xf32>
    %cst_6 = arith.constant 1.000000e+00 : f32
    %9 = vector.broadcast %cst_6 : f32 to vector<512x256xf32>
    %10 = arith.addf %9, %8 : vector<512x256xf32>
    %11 = tpu.reciprocal %10 {approx = true} : vector<512x256xf32> -> vector<512x256xf32>
    %12 = arith.mulf %5, %11 : vector<512x256xf32>
    %13 = arith.truncf %12 : vector<512x256xf32> to vector<512x256xbf16>
    %14 = vector.extract_strided_slice %13 {offsets = [0, 0], sizes = [512, 128], strides = [1, 1]} : vector<512x256xbf16> to vector<512x128xbf16>
    %c0_7 = arith.constant 0 : index
    %c0_8 = arith.constant 0 : index
    %15 = vector.load %arg4[%c0_7, %c0_8] : memref<128x128xbf16, #tpu.memory_space<vmem>>, vector<128x128xbf16>
    %cst_9 = arith.constant dense<0.000000e+00> : vector<512x128xf32>
    %16 = tpu.matmul %14, %15, %cst_9 {dimension_numbers = #tpu.dot_dimension_numbers<[1], [0], [0], [1], [0, 0, 1, 1], [], []>} : vector<512x128xbf16>, vector<128x128xbf16>, vector<512x128xf32> -> vector<512x128xf32>
    %c0_10 = arith.constant 0 : index
    %c0_11 = arith.constant 0 : index
    %17 = vector.load %arg5[%c0_10, %c0_11] : memref<1x128xf32, #tpu.memory_space<vmem>>, vector<1x128xf32>
    %18 = vector.broadcast %17 : vector<1x128xf32> to vector<512x128xf32>
    %19 = arith.addf %16, %18 : vector<512x128xf32>
    %cst_12 = arith.constant 0.000000e+00 : f32
    %20 = vector.broadcast %cst_12 : f32 to vector<512x128xf32>
    %21 = arith.subf %20, %19 : vector<512x128xf32>
    %22 = math.exp %21 : vector<512x128xf32>
    %cst_13 = arith.constant 1.000000e+00 : f32
    %23 = vector.broadcast %cst_13 : f32 to vector<512x128xf32>
    %24 = arith.addf %23, %22 : vector<512x128xf32>
    %25 = tpu.reciprocal %24 {approx = true} : vector<512x128xf32> -> vector<512x128xf32>
    %26 = arith.mulf %19, %25 : vector<512x128xf32>
    %c0_14 = arith.constant 0 : index
    %c0_15 = arith.constant 0 : index
    %27 = vector.load %arg6[%c0_14, %c0_15] : memref<512x256xbf16, #tpu.memory_space<vmem>>, vector<512x256xbf16>
    tpu.vector_store %arg6[%c0_14, %c0_15], %13 {strides = array<i32>} : memref<512x256xbf16, #tpu.memory_space<vmem>>, vector<512x256xbf16>,
    %28 = arith.truncf %26 : vector<512x128xf32> to vector<512x128xbf16>
    %c0_16 = arith.constant 0 : index
    %c0_17 = arith.constant 0 : index
    %29 = vector.load %arg7[%c0_16, %c0_17] : memref<512x128xbf16, #tpu.memory_space<vmem>>, vector<512x128xbf16>
    tpu.vector_store %arg7[%c0_16, %c0_17], %28 {strides = array<i32>} : memref<512x128xbf16, #tpu.memory_space<vmem>>, vector<512x128xbf16>,
    return
  }
  func.func @transform_0(%arg0: i32) -> (i32, i32) {
    %c0_i32 = arith.constant 0 : i32
    %c0_i32_0 = arith.constant 0 : i32
    return %arg0, %c0_i32 : i32, i32
  }
  func.func @transform_1(%arg0: i32) -> (i32, i32) {
    %c0_i32 = arith.constant 0 : i32
    %c0_i32_0 = arith.constant 0 : i32
    %c0_i32_1 = arith.constant 0 : i32
    return %c0_i32, %c0_i32_0 : i32, i32
  }
  func.func @transform_2(%arg0: i32) -> (i32, i32) {
    %c0_i32 = arith.constant 0 : i32
    %c0_i32_0 = arith.constant 0 : i32
    %c0_i32_1 = arith.constant 0 : i32
    return %c0_i32, %c0_i32_0 : i32, i32
  }
  func.func @transform_3(%arg0: i32) -> (i32, i32) {
    %c0_i32 = arith.constant 0 : i32
    %c0_i32_0 = arith.constant 0 : i32
    %c0_i32_1 = arith.constant 0 : i32
    return %c0_i32, %c0_i32_0 : i32, i32
  }
  func.func @transform_4(%arg0: i32) -> (i32, i32) {
    %c0_i32 = arith.constant 0 : i32
    %c0_i32_0 = arith.constant 0 : i32
    %c0_i32_1 = arith.constant 0 : i32
    return %c0_i32, %c0_i32_0 : i32, i32
  }
  func.func @transform_5(%arg0: i32) -> (i32, i32) {
    %c0_i32 = arith.constant 0 : i32
    %c0_i32_0 = arith.constant 0 : i32
    return %arg0, %c0_i32 : i32, i32
  }
  func.func @transform_6(%arg0: i32) -> (i32, i32) {
    %c0_i32 = arith.constant 0 : i32
    %c0_i32_0 = arith.constant 0 : i32
    return %arg0, %c0_i32 : i32, i32
  }
}

module attributes {stable_mosaic.version = 11 : i64} {
  func.func @_conv_back_kernel(%arg0: i32, %arg1: i32, %arg2: memref<1x16x16x128xbf16, #tpu.memory_space<vmem>>, %arg3: memref<1x8x16x256xbf16, #tpu.memory_space<vmem>>, %arg4: memref<9x128x128xbf16, #tpu.memory_space<vmem>>, %arg5: memref<1x128xf32, #tpu.memory_space<vmem>>, %arg6: memref<128x128xbf16, #tpu.memory_space<vmem>>, %arg7: memref<128x128xbf16, #tpu.memory_space<vmem>>, %arg8: memref<1x128xf32, #tpu.memory_space<vmem>>, %arg9: memref<1x8x16x128xbf16, #tpu.memory_space<vmem>>, %arg10: memref<10x18x128xbf16, #tpu.memory_space<vmem>>) attributes {dimension_semantics = [#tpu.dimension_semantics<parallel>, #tpu.dimension_semantics<parallel>], iteration_bounds = array<i64: 2, 2>, scalar_prefetch = 0 : i64, scratch_operands = 1 : i64, tpu.core_type = #tpu.core_type<tc>, window_params = [{transform_indices = @transform_0, window_bounds = array<i64: 1, 16, 16, 128>}, {transform_indices = @transform_1, window_bounds = array<i64: 1, 8, 16, 256>}, {pipeline_mode = #tpu.pipeline_mode<synchronous>, transform_indices = @transform_2, window_bounds = array<i64: 9, 128, 128>}, {pipeline_mode = #tpu.pipeline_mode<synchronous>, transform_indices = @transform_3, window_bounds = array<i64: 1, 128>}, {pipeline_mode = #tpu.pipeline_mode<synchronous>, transform_indices = @transform_4, window_bounds = array<i64: 128, 128>}, {pipeline_mode = #tpu.pipeline_mode<synchronous>, transform_indices = @transform_5, window_bounds = array<i64: 128, 128>}, {pipeline_mode = #tpu.pipeline_mode<synchronous>, transform_indices = @transform_6, window_bounds = array<i64: 1, 128>}, {transform_indices = @transform_7, window_bounds = array<i64: 1, 8, 16, 128>}]} {
    %c8_i32 = arith.constant 8 : i32
    %0 = arith.muli %arg1, %c8_i32 : i32
    %1 = tpu.assume_multiple %0, 8 : i32
    %c0 = arith.constant 0 : index
    %2 = arith.index_cast %1 : i32 to index
    %c0_0 = arith.constant 0 : index
    %c0_1 = arith.constant 0 : index
    %3 = vector.load %arg2[%c0, %2, %c0_0, %c0_1] : memref<1x16x16x128xbf16, #tpu.memory_space<vmem>>, vector<1x8x16x128xbf16>
    %4 = vector.shape_cast %3 : vector<1x8x16x128xbf16> to vector<8x16x128xbf16>
    %c1 = arith.constant 1 : index
    %c1_2 = arith.constant 1 : index
    %c0_3 = arith.constant 0 : index
    %5 = vector.load %arg10[%c1, %c1_2, %c0_3] : memref<10x18x128xbf16, #tpu.memory_space<vmem>>, vector<8x16x128xbf16>
    tpu.vector_store %arg10[%c1, %c1_2, %c0_3], %4 {strides = array<i32>} : memref<10x18x128xbf16, #tpu.memory_space<vmem>>, vector<8x16x128xbf16>,
    %cst = arith.constant 0.000000e+00 : bf16
    %6 = vector.broadcast %cst : bf16 to vector<10x1x128xbf16>
    %c0_4 = arith.constant 0 : index
    %c0_5 = arith.constant 0 : index
    %c0_6 = arith.constant 0 : index
    %7 = vector.load %arg10[%c0_4, %c0_5, %c0_6] : memref<10x18x128xbf16, #tpu.memory_space<vmem>>, vector<10x1x128xbf16>
    tpu.vector_store %arg10[%c0_4, %c0_5, %c0_6], %6 {strides = array<i32>} : memref<10x18x128xbf16, #tpu.memory_space<vmem>>, vector<10x1x128xbf16>,
    %c0_7 = arith.constant 0 : index
    %c17 = arith.constant 17 : index
    %c0_8 = arith.constant 0 : index
    %8 = vector.load %arg10[%c0_7, %c17, %c0_8] : memref<10x18x128xbf16, #tpu.memory_space<vmem>>, vector<10x1x128xbf16>
    tpu.vector_store %arg10[%c0_7, %c17, %c0_8], %6 {strides = array<i32>} : memref<10x18x128xbf16, #tpu.memory_space<vmem>>, vector<10x1x128xbf16>,
    %c0_i32 = arith.constant 0 : i32
    %9 = arith.cmpi sgt, %arg1, %c0_i32 : i32
    %10 = arith.extui %9 : i1 to i32
    %c0_i32_9 = arith.constant 0 : i32
    %11 = arith.cmpi ne, %10, %c0_i32_9 : i32
    scf.if %11 {
      %c1_i32_94 = arith.constant 1 : i32
      %115 = arith.subi %1, %c1_i32_94 : i32
      %c0_95 = arith.constant 0 : index
      %116 = arith.index_cast %115 : i32 to index
      %c0_96 = arith.constant 0 : index
      %c0_97 = arith.constant 0 : index
      %117 = vector.load %arg2[%c0_95, %116, %c0_96, %c0_97] : memref<1x16x16x128xbf16, #tpu.memory_space<vmem>>, vector<1x1x16x128xbf16>
      %118 = vector.shape_cast %117 : vector<1x1x16x128xbf16> to vector<1x16x128xbf16>
      %c0_98 = arith.constant 0 : index
      %c1_99 = arith.constant 1 : index
      %c0_100 = arith.constant 0 : index
      %119 = vector.load %arg10[%c0_98, %c1_99, %c0_100] : memref<10x18x128xbf16, #tpu.memory_space<vmem>>, vector<1x16x128xbf16>
      tpu.vector_store %arg10[%c0_98, %c1_99, %c0_100], %118 {strides = array<i32>} : memref<10x18x128xbf16, #tpu.memory_space<vmem>>, vector<1x16x128xbf16>,
    } else {
    }
    %c0_i32_10 = arith.constant 0 : i32
    %12 = arith.cmpi eq, %arg1, %c0_i32_10 : i32
    %13 = arith.extui %12 : i1 to i32
    %c0_i32_11 = arith.constant 0 : i32
    %14 = arith.cmpi ne, %13, %c0_i32_11 : i32
    scf.if %14 {
      %cst_94 = arith.constant 0.000000e+00 : bf16
      %115 = vector.broadcast %cst_94 : bf16 to vector<1x18x128xbf16>
      %c0_95 = arith.constant 0 : index
      %c0_96 = arith.constant 0 : index
      %c0_97 = arith.constant 0 : index
      %116 = vector.load %arg10[%c0_95, %c0_96, %c0_97] : memref<10x18x128xbf16, #tpu.memory_space<vmem>>, vector<1x18x128xbf16>
      tpu.vector_store %arg10[%c0_95, %c0_96, %c0_97], %115 {strides = array<i32>} : memref<10x18x128xbf16, #tpu.memory_space<vmem>>, vector<1x18x128xbf16>,
    } else {
    }
    %c1_i32 = arith.constant 1 : i32
    %15 = arith.cmpi slt, %arg1, %c1_i32 : i32
    %16 = arith.extui %15 : i1 to i32
    %c0_i32_12 = arith.constant 0 : i32
    %17 = arith.cmpi ne, %16, %c0_i32_12 : i32
    scf.if %17 {
      %c8_i32_94 = arith.constant 8 : i32
      %115 = arith.addi %1, %c8_i32_94 : i32
      %c0_95 = arith.constant 0 : index
      %116 = arith.index_cast %115 : i32 to index
      %c0_96 = arith.constant 0 : index
      %c0_97 = arith.constant 0 : index
      %117 = vector.load %arg2[%c0_95, %116, %c0_96, %c0_97] : memref<1x16x16x128xbf16, #tpu.memory_space<vmem>>, vector<1x1x16x128xbf16>
      %118 = vector.shape_cast %117 : vector<1x1x16x128xbf16> to vector<1x16x128xbf16>
      %c9 = arith.constant 9 : index
      %c1_98 = arith.constant 1 : index
      %c0_99 = arith.constant 0 : index
      %119 = vector.load %arg10[%c9, %c1_98, %c0_99] : memref<10x18x128xbf16, #tpu.memory_space<vmem>>, vector<1x16x128xbf16>
      tpu.vector_store %arg10[%c9, %c1_98, %c0_99], %118 {strides = array<i32>} : memref<10x18x128xbf16, #tpu.memory_space<vmem>>, vector<1x16x128xbf16>,
    } else {
    }
    %c1_i32_13 = arith.constant 1 : i32
    %18 = arith.cmpi eq, %arg1, %c1_i32_13 : i32
    %19 = arith.extui %18 : i1 to i32
    %c0_i32_14 = arith.constant 0 : i32
    %20 = arith.cmpi ne, %19, %c0_i32_14 : i32
    scf.if %20 {
      %cst_94 = arith.constant 0.000000e+00 : bf16
      %115 = vector.broadcast %cst_94 : bf16 to vector<1x18x128xbf16>
      %c9 = arith.constant 9 : index
      %c0_95 = arith.constant 0 : index
      %c0_96 = arith.constant 0 : index
      %116 = vector.load %arg10[%c9, %c0_95, %c0_96] : memref<10x18x128xbf16, #tpu.memory_space<vmem>>, vector<1x18x128xbf16>
      tpu.vector_store %arg10[%c9, %c0_95, %c0_96], %115 {strides = array<i32>} : memref<10x18x128xbf16, #tpu.memory_space<vmem>>, vector<1x18x128xbf16>,
    } else {
    }
    %cst_15 = arith.constant 0.000000e+00 : f32
    %21 = vector.broadcast %cst_15 : f32 to vector<128x128xf32>
    %c0_16 = arith.constant 0 : index
    %c0_17 = arith.constant 0 : index
    %c0_18 = arith.constant 0 : index
    %22 = vector.load %arg10[%c0_16, %c0_17, %c0_18] : memref<10x18x128xbf16, #tpu.memory_space<vmem>>, vector<8x16x128xbf16>
    %23 = vector.shape_cast %22 : vector<8x16x128xbf16> to vector<128x128xbf16>
    %c0_19 = arith.constant 0 : index
    %c0_20 = arith.constant 0 : index
    %c0_21 = arith.constant 0 : index
    %24 = vector.load %arg4[%c0_19, %c0_20, %c0_21] : memref<9x128x128xbf16, #tpu.memory_space<vmem>>, vector<1x128x128xbf16>
    %25 = vector.shape_cast %24 : vector<1x128x128xbf16> to vector<128x128xbf16>
    %cst_22 = arith.constant dense<0.000000e+00> : vector<128x128xf32>
    %26 = tpu.matmul %23, %25, %cst_22 {dimension_numbers = #tpu.dot_dimension_numbers<[1], [0], [0], [1], [0, 0, 1, 1], [], []>} : vector<128x128xbf16>, vector<128x128xbf16>, vector<128x128xf32> -> vector<128x128xf32>
    %27 = arith.addf %21, %26 : vector<128x128xf32>
    %c0_23 = arith.constant 0 : index
    %c1_24 = arith.constant 1 : index
    %c0_25 = arith.constant 0 : index
    %28 = vector.load %arg10[%c0_23, %c1_24, %c0_25] : memref<10x18x128xbf16, #tpu.memory_space<vmem>>, vector<8x16x128xbf16>
    %29 = vector.shape_cast %28 : vector<8x16x128xbf16> to vector<128x128xbf16>
    %c1_26 = arith.constant 1 : index
    %c0_27 = arith.constant 0 : index
    %c0_28 = arith.constant 0 : index
    %30 = vector.load %arg4[%c1_26, %c0_27, %c0_28] : memref<9x128x128xbf16, #tpu.memory_space<vmem>>, vector<1x128x128xbf16>
    %31 = vector.shape_cast %30 : vector<1x128x128xbf16> to vector<128x128xbf16>
    %cst_29 = arith.constant dense<0.000000e+00> : vector<128x128xf32>
    %32 = tpu.matmul %29, %31, %cst_29 {dimension_numbers = #tpu.dot_dimension_numbers<[1], [0], [0], [1], [0, 0, 1, 1], [], []>} : vector<128x128xbf16>, vector<128x128xbf16>, vector<128x128xf32> -> vector<128x128xf32>
    %33 = arith.addf %27, %32 : vector<128x128xf32>
    %c0_30 = arith.constant 0 : index
    %c2 = arith.constant 2 : index
    %c0_31 = arith.constant 0 : index
    %34 = vector.load %arg10[%c0_30, %c2, %c0_31] : memref<10x18x128xbf16, #tpu.memory_space<vmem>>, vector<8x16x128xbf16>
    %35 = vector.shape_cast %34 : vector<8x16x128xbf16> to vector<128x128xbf16>
    %c2_32 = arith.constant 2 : index
    %c0_33 = arith.constant 0 : index
    %c0_34 = arith.constant 0 : index
    %36 = vector.load %arg4[%c2_32, %c0_33, %c0_34] : memref<9x128x128xbf16, #tpu.memory_space<vmem>>, vector<1x128x128xbf16>
    %37 = vector.shape_cast %36 : vector<1x128x128xbf16> to vector<128x128xbf16>
    %cst_35 = arith.constant dense<0.000000e+00> : vector<128x128xf32>
    %38 = tpu.matmul %35, %37, %cst_35 {dimension_numbers = #tpu.dot_dimension_numbers<[1], [0], [0], [1], [0, 0, 1, 1], [], []>} : vector<128x128xbf16>, vector<128x128xbf16>, vector<128x128xf32> -> vector<128x128xf32>
    %39 = arith.addf %33, %38 : vector<128x128xf32>
    %c1_36 = arith.constant 1 : index
    %c0_37 = arith.constant 0 : index
    %c0_38 = arith.constant 0 : index
    %40 = vector.load %arg10[%c1_36, %c0_37, %c0_38] : memref<10x18x128xbf16, #tpu.memory_space<vmem>>, vector<8x16x128xbf16>
    %41 = vector.shape_cast %40 : vector<8x16x128xbf16> to vector<128x128xbf16>
    %c3 = arith.constant 3 : index
    %c0_39 = arith.constant 0 : index
    %c0_40 = arith.constant 0 : index
    %42 = vector.load %arg4[%c3, %c0_39, %c0_40] : memref<9x128x128xbf16, #tpu.memory_space<vmem>>, vector<1x128x128xbf16>
    %43 = vector.shape_cast %42 : vector<1x128x128xbf16> to vector<128x128xbf16>
    %cst_41 = arith.constant dense<0.000000e+00> : vector<128x128xf32>
    %44 = tpu.matmul %41, %43, %cst_41 {dimension_numbers = #tpu.dot_dimension_numbers<[1], [0], [0], [1], [0, 0, 1, 1], [], []>} : vector<128x128xbf16>, vector<128x128xbf16>, vector<128x128xf32> -> vector<128x128xf32>
    %45 = arith.addf %39, %44 : vector<128x128xf32>
    %c1_42 = arith.constant 1 : index
    %c1_43 = arith.constant 1 : index
    %c0_44 = arith.constant 0 : index
    %46 = vector.load %arg10[%c1_42, %c1_43, %c0_44] : memref<10x18x128xbf16, #tpu.memory_space<vmem>>, vector<8x16x128xbf16>
    %47 = vector.shape_cast %46 : vector<8x16x128xbf16> to vector<128x128xbf16>
    %c4 = arith.constant 4 : index
    %c0_45 = arith.constant 0 : index
    %c0_46 = arith.constant 0 : index
    %48 = vector.load %arg4[%c4, %c0_45, %c0_46] : memref<9x128x128xbf16, #tpu.memory_space<vmem>>, vector<1x128x128xbf16>
    %49 = vector.shape_cast %48 : vector<1x128x128xbf16> to vector<128x128xbf16>
    %cst_47 = arith.constant dense<0.000000e+00> : vector<128x128xf32>
    %50 = tpu.matmul %47, %49, %cst_47 {dimension_numbers = #tpu.dot_dimension_numbers<[1], [0], [0], [1], [0, 0, 1, 1], [], []>} : vector<128x128xbf16>, vector<128x128xbf16>, vector<128x128xf32> -> vector<128x128xf32>
    %51 = arith.addf %45, %50 : vector<128x128xf32>
    %c1_48 = arith.constant 1 : index
    %c2_49 = arith.constant 2 : index
    %c0_50 = arith.constant 0 : index
    %52 = vector.load %arg10[%c1_48, %c2_49, %c0_50] : memref<10x18x128xbf16, #tpu.memory_space<vmem>>, vector<8x16x128xbf16>
    %53 = vector.shape_cast %52 : vector<8x16x128xbf16> to vector<128x128xbf16>
    %c5 = arith.constant 5 : index
    %c0_51 = arith.constant 0 : index
    %c0_52 = arith.constant 0 : index
    %54 = vector.load %arg4[%c5, %c0_51, %c0_52] : memref<9x128x128xbf16, #tpu.memory_space<vmem>>, vector<1x128x128xbf16>
    %55 = vector.shape_cast %54 : vector<1x128x128xbf16> to vector<128x128xbf16>
    %cst_53 = arith.constant dense<0.000000e+00> : vector<128x128xf32>
    %56 = tpu.matmul %53, %55, %cst_53 {dimension_numbers = #tpu.dot_dimension_numbers<[1], [0], [0], [1], [0, 0, 1, 1], [], []>} : vector<128x128xbf16>, vector<128x128xbf16>, vector<128x128xf32> -> vector<128x128xf32>
    %57 = arith.addf %51, %56 : vector<128x128xf32>
    %c2_54 = arith.constant 2 : index
    %c0_55 = arith.constant 0 : index
    %c0_56 = arith.constant 0 : index
    %58 = vector.load %arg10[%c2_54, %c0_55, %c0_56] : memref<10x18x128xbf16, #tpu.memory_space<vmem>>, vector<8x16x128xbf16>
    %59 = vector.shape_cast %58 : vector<8x16x128xbf16> to vector<128x128xbf16>
    %c6 = arith.constant 6 : index
    %c0_57 = arith.constant 0 : index
    %c0_58 = arith.constant 0 : index
    %60 = vector.load %arg4[%c6, %c0_57, %c0_58] : memref<9x128x128xbf16, #tpu.memory_space<vmem>>, vector<1x128x128xbf16>
    %61 = vector.shape_cast %60 : vector<1x128x128xbf16> to vector<128x128xbf16>
    %cst_59 = arith.constant dense<0.000000e+00> : vector<128x128xf32>
    %62 = tpu.matmul %59, %61, %cst_59 {dimension_numbers = #tpu.dot_dimension_numbers<[1], [0], [0], [1], [0, 0, 1, 1], [], []>} : vector<128x128xbf16>, vector<128x128xbf16>, vector<128x128xf32> -> vector<128x128xf32>
    %63 = arith.addf %57, %62 : vector<128x128xf32>
    %c2_60 = arith.constant 2 : index
    %c1_61 = arith.constant 1 : index
    %c0_62 = arith.constant 0 : index
    %64 = vector.load %arg10[%c2_60, %c1_61, %c0_62] : memref<10x18x128xbf16, #tpu.memory_space<vmem>>, vector<8x16x128xbf16>
    %65 = vector.shape_cast %64 : vector<8x16x128xbf16> to vector<128x128xbf16>
    %c7 = arith.constant 7 : index
    %c0_63 = arith.constant 0 : index
    %c0_64 = arith.constant 0 : index
    %66 = vector.load %arg4[%c7, %c0_63, %c0_64] : memref<9x128x128xbf16, #tpu.memory_space<vmem>>, vector<1x128x128xbf16>
    %67 = vector.shape_cast %66 : vector<1x128x128xbf16> to vector<128x128xbf16>
    %cst_65 = arith.constant dense<0.000000e+00> : vector<128x128xf32>
    %68 = tpu.matmul %65, %67, %cst_65 {dimension_numbers = #tpu.dot_dimension_numbers<[1], [0], [0], [1], [0, 0, 1, 1], [], []>} : vector<128x128xbf16>, vector<128x128xbf16>, vector<128x128xf32> -> vector<128x128xf32>
    %69 = arith.addf %63, %68 : vector<128x128xf32>
    %c2_66 = arith.constant 2 : index
    %c2_67 = arith.constant 2 : index
    %c0_68 = arith.constant 0 : index
    %70 = vector.load %arg10[%c2_66, %c2_67, %c0_68] : memref<10x18x128xbf16, #tpu.memory_space<vmem>>, vector<8x16x128xbf16>
    %71 = vector.shape_cast %70 : vector<8x16x128xbf16> to vector<128x128xbf16>
    %c8 = arith.constant 8 : index
    %c0_69 = arith.constant 0 : index
    %c0_70 = arith.constant 0 : index
    %72 = vector.load %arg4[%c8, %c0_69, %c0_70] : memref<9x128x128xbf16, #tpu.memory_space<vmem>>, vector<1x128x128xbf16>
    %73 = vector.shape_cast %72 : vector<1x128x128xbf16> to vector<128x128xbf16>
    %cst_71 = arith.constant dense<0.000000e+00> : vector<128x128xf32>
    %74 = tpu.matmul %71, %73, %cst_71 {dimension_numbers = #tpu.dot_dimension_numbers<[1], [0], [0], [1], [0, 0, 1, 1], [], []>} : vector<128x128xbf16>, vector<128x128xbf16>, vector<128x128xf32> -> vector<128x128xf32>
    %75 = arith.addf %69, %74 : vector<128x128xf32>
    %c0_72 = arith.constant 0 : index
    %c0_73 = arith.constant 0 : index
    %c0_74 = arith.constant 0 : index
    %c0_75 = arith.constant 0 : index
    %76 = vector.load %arg3[%c0_72, %c0_73, %c0_74, %c0_75] : memref<1x8x16x256xbf16, #tpu.memory_space<vmem>>, vector<1x8x16x256xbf16>
    %77 = vector.shape_cast %76 : vector<1x8x16x256xbf16> to vector<8x16x256xbf16>
    %78 = vector.extract_strided_slice %77 {offsets = [0, 0, 0], sizes = [8, 16, 128], strides = [1, 1, 1]} : vector<8x16x256xbf16> to vector<8x16x128xbf16>
    %79 = vector.shape_cast %78 : vector<8x16x128xbf16> to vector<128x128xbf16>
    %80 = vector.extract_strided_slice %77 {offsets = [0, 0, 128], sizes = [8, 16, 128], strides = [1, 1, 1]} : vector<8x16x256xbf16> to vector<8x16x128xbf16>
    %81 = vector.shape_cast %80 : vector<8x16x128xbf16> to vector<128x128xbf16>
    %c0_76 = arith.constant 0 : index
    %c0_77 = arith.constant 0 : index
    %82 = vector.load %arg5[%c0_76, %c0_77] : memref<1x128xf32, #tpu.memory_space<vmem>>, vector<1x128xf32>
    %83 = vector.broadcast %82 : vector<1x128xf32> to vector<128x128xf32>
    %84 = arith.addf %75, %83 : vector<128x128xf32>
    %cst_78 = arith.constant 0.000000e+00 : f32
    %85 = vector.broadcast %cst_78 : f32 to vector<128x128xf32>
    %86 = arith.subf %85, %84 : vector<128x128xf32>
    %87 = math.exp %86 : vector<128x128xf32>
    %cst_79 = arith.constant 1.000000e+00 : f32
    %88 = vector.broadcast %cst_79 : f32 to vector<128x128xf32>
    %89 = arith.addf %88, %87 : vector<128x128xf32>
    %90 = tpu.reciprocal %89 {approx = true} : vector<128x128xf32> -> vector<128x128xf32>
    %91 = arith.mulf %84, %90 : vector<128x128xf32>
    %92 = arith.extf %79 : vector<128x128xbf16> to vector<128x128xf32>
    %93 = arith.addf %91, %92 : vector<128x128xf32>
    %94 = arith.truncf %93 : vector<128x128xf32> to vector<128x128xbf16>
    %c0_80 = arith.constant 0 : index
    %c0_81 = arith.constant 0 : index
    %95 = vector.load %arg6[%c0_80, %c0_81] : memref<128x128xbf16, #tpu.memory_space<vmem>>, vector<128x128xbf16>
    %cst_82 = arith.constant dense<0.000000e+00> : vector<128x128xf32>
    %96 = tpu.matmul %94, %95, %cst_82 {dimension_numbers = #tpu.dot_dimension_numbers<[1], [0], [0], [1], [0, 0, 1, 1], [], []>} : vector<128x128xbf16>, vector<128x128xbf16>, vector<128x128xf32> -> vector<128x128xf32>
    %c0_83 = arith.constant 0 : index
    %c0_84 = arith.constant 0 : index
    %97 = vector.load %arg7[%c0_83, %c0_84] : memref<128x128xbf16, #tpu.memory_space<vmem>>, vector<128x128xbf16>
    %cst_85 = arith.constant dense<0.000000e+00> : vector<128x128xf32>
    %98 = tpu.matmul %81, %97, %cst_85 {dimension_numbers = #tpu.dot_dimension_numbers<[1], [0], [0], [1], [0, 0, 1, 1], [], []>} : vector<128x128xbf16>, vector<128x128xbf16>, vector<128x128xf32> -> vector<128x128xf32>
    %99 = arith.addf %96, %98 : vector<128x128xf32>
    %c0_86 = arith.constant 0 : index
    %c0_87 = arith.constant 0 : index
    %100 = vector.load %arg8[%c0_86, %c0_87] : memref<1x128xf32, #tpu.memory_space<vmem>>, vector<1x128xf32>
    %101 = vector.broadcast %100 : vector<1x128xf32> to vector<128x128xf32>
    %102 = arith.addf %99, %101 : vector<128x128xf32>
    %cst_88 = arith.constant 0.000000e+00 : f32
    %103 = vector.broadcast %cst_88 : f32 to vector<128x128xf32>
    %104 = arith.subf %103, %102 : vector<128x128xf32>
    %105 = math.exp %104 : vector<128x128xf32>
    %cst_89 = arith.constant 1.000000e+00 : f32
    %106 = vector.broadcast %cst_89 : f32 to vector<128x128xf32>
    %107 = arith.addf %106, %105 : vector<128x128xf32>
    %108 = tpu.reciprocal %107 : vector<128x128xf32> -> vector<128x128xf32>
    %109 = arith.mulf %102, %108 : vector<128x128xf32>
    %110 = vector.shape_cast %109 : vector<128x128xf32> to vector<8x16x128xf32>
    %111 = arith.truncf %110 : vector<8x16x128xf32> to vector<8x16x128xbf16>
    %c0_90 = arith.constant 0 : index
    %c0_91 = arith.constant 0 : index
    %c0_92 = arith.constant 0 : index
    %c0_93 = arith.constant 0 : index
    %112 = vector.load %arg9[%c0_90, %c0_91, %c0_92, %c0_93] : memref<1x8x16x128xbf16, #tpu.memory_space<vmem>>, vector<1x8x16x128xbf16>
    %113 = vector.shape_cast %112 : vector<1x8x16x128xbf16> to vector<8x16x128xbf16>
    %114 = vector.shape_cast %111 : vector<8x16x128xbf16> to vector<1x8x16x128xbf16>
    tpu.vector_store %arg9[%c0_90, %c0_91, %c0_92, %c0_93], %114 {strides = array<i32>} : memref<1x8x16x128xbf16, #tpu.memory_space<vmem>>, vector<1x8x16x128xbf16>,
    return
  }
  func.func @transform_0(%arg0: i32, %arg1: i32) -> (i32, i32, i32, i32) {
    %c0_i32 = arith.constant 0 : i32
    %c0_i32_0 = arith.constant 0 : i32
    %c0_i32_1 = arith.constant 0 : i32
    %c0_i32_2 = arith.constant 0 : i32
    return %arg0, %c0_i32, %c0_i32_0, %c0_i32_1 : i32, i32, i32, i32
  }
  func.func @transform_1(%arg0: i32, %arg1: i32) -> (i32, i32, i32, i32) {
    %c0_i32 = arith.constant 0 : i32
    %c0_i32_0 = arith.constant 0 : i32
    %c0_i32_1 = arith.constant 0 : i32
    return %arg0, %arg1, %c0_i32, %c0_i32_0 : i32, i32, i32, i32
  }
  func.func @transform_2(%arg0: i32, %arg1: i32) -> (i32, i32, i32) {
    %c0_i32 = arith.constant 0 : i32
    %c0_i32_0 = arith.constant 0 : i32
    %c0_i32_1 = arith.constant 0 : i32
    %c0_i32_2 = arith.constant 0 : i32
    return %c0_i32, %c0_i32_0, %c0_i32_1 : i32, i32, i32
  }
  func.func @transform_3(%arg0: i32, %arg1: i32) -> (i32, i32) {
    %c0_i32 = arith.constant 0 : i32
    %c0_i32_0 = arith.constant 0 : i32
    %c0_i32_1 = arith.constant 0 : i32
    return %c0_i32, %c0_i32_0 : i32, i32
  }
  func.func @transform_4(%arg0: i32, %arg1: i32) -> (i32, i32) {
    %c0_i32 = arith.constant 0 : i32
    %c0_i32_0 = arith.constant 0 : i32
    %c0_i32_1 = arith.constant 0 : i32
    return %c0_i32, %c0_i32_0 : i32, i32
  }
  func.func @transform_5(%arg0: i32, %arg1: i32) -> (i32, i32) {
    %c0_i32 = arith.constant 0 : i32
    %c0_i32_0 = arith.constant 0 : i32
    %c0_i32_1 = arith.constant 0 : i32
    return %c0_i32, %c0_i32_0 : i32, i32
  }
  func.func @transform_6(%arg0: i32, %arg1: i32) -> (i32, i32) {
    %c0_i32 = arith.constant 0 : i32
    %c0_i32_0 = arith.constant 0 : i32
    %c0_i32_1 = arith.constant 0 : i32
    return %c0_i32, %c0_i32_0 : i32, i32
  }
  func.func @transform_7(%arg0: i32, %arg1: i32) -> (i32, i32, i32, i32) {
    %c0_i32 = arith.constant 0 : i32
    %c0_i32_0 = arith.constant 0 : i32
    %c0_i32_1 = arith.constant 0 : i32
    return %arg0, %arg1, %c0_i32, %c0_i32_0 : i32, i32, i32, i32
  }
}

</mosaic_0001>

<bundles_post_ra>
// kernel: _lambda_.2
= control target key start
LH: loop header
LB: loop body
LE: loop exit
PB: predicated region body
PF: predicated region fallthrough
CT: control target
= control target key end

     0   :  { %v4502_v1 = vmov 0   ;;  %v105_v56 = vlaneseq  ;;  %s6174_s1 = inlined_call_operand.vmem [shape: bf16[128,256], index: 1, kind: input, shape index: {}]   ;;  %s6175_s0 = inlined_call_operand.vmem [shape: bf16[512,128], index: 0, kind: input, shape index: {}]   ;;  %s6176_s3 = inlined_call_operand.vmem [shape: bf16[128,128], index: 3, kind: input, shape index: {}]   ;;  %s6177_s2 = inlined_call_operand.vmem [shape: f32[1,256], index: 2, kind: input, shape index: {}]   ;;  %s6178_s5 = inlined_call_operand.vmem [shape: bf16[512,256], index: 5, kind: output, shape index: {0}]   ;;  %s6179_s4 = inlined_call_operand.vmem [shape: f32[1,128], index: 4, kind: input, shape index: {}]   ;;  %s6180_s6 = inlined_call_operand.vmem [shape: bf16[512,128], index: 6, kind: output, shape index: {1}]  }
   0x1   :  { %v3669_v0 = vld [vmem:[%s6174_s1 + $0x74] ss:$8 sps:$4 sm:$0xff]   ;;  %419 = vmatprep.mubr.bf16.mxu0 %v4502_v1  ;;  %659 = vmatprep.mubr.bf16.mxu1 %v4502_v1  ;;  %v3671_v2 = vld [vmem:[%s6174_s1 + $0x70] ss:$8 sps:$4 sm:$0xff]   ;;  %v3672_v3 = vld [vmem:[%s6174_s1 + $0x64] ss:$8 sps:$4 sm:$0xff]  }
   0x2   :  { %387 = vmatprep.subr.bf16.mxu0 %v3669_v0  ;;  %3652 = vmatprep.subr.bf16.mxu1 %v3669_v0  ;;  %v3674_v4 = vld [vmem:[%s6174_s1 + $0x60] ss:$8 sps:$4 sm:$0xff]   ;;  %v3675_v5 = vld [vmem:[%s6174_s1 + $0x54] ss:$8 sps:$4 sm:$0xff]   ;;  %v3677_v6 = vld [vmem:[%s6174_s1 + $0x50] ss:$8 sps:$4 sm:$0xff]  }
   0x3   :  { %388 = vmatpush1.bf16.msra.mxu0 %v3671_v2  ;;  %3660 = vmatpush1.bf16.msra.mxu1 %v3671_v2  ;;  %v3678_v7 = vld [vmem:[%s6174_s1 + $0x44] ss:$8 sps:$4 sm:$0xff]   ;;  %v3680_v8 = vld [vmem:[%s6174_s1 + $0x40] ss:$8 sps:$4 sm:$0xff]   ;;  %v3681_v9 = vld [vmem:[%s6174_s1 + $0x34] ss:$8 sps:$4 sm:$0xff]  }
   0x4   :  { %389 = vmatprep.subr.bf16.mxu0 %v3672_v3  ;;  %3653 = vmatprep.subr.bf16.mxu1 %v3672_v3  ;;  %v3683_v10 = vld [vmem:[%s6174_s1 + $0x30] ss:$8 sps:$4 sm:$0xff]   ;;  %v3684_v11 = vld [vmem:[%s6174_s1 + $0x24] ss:$8 sps:$4 sm:$0xff]   ;;  %v3686_v12 = vld [vmem:[%s6174_s1 + $0x20] ss:$8 sps:$4 sm:$0xff]  }
   0x5   :  { %v3687_v13 = vld [vmem:[%s6174_s1 + $0x14] ss:$8 sps:$4 sm:$0xff]   ;;  %v3689_v14 = vld [vmem:[%s6174_s1 + $0x10] ss:$8 sps:$4 sm:$0xff]   ;;  %v3690_v15 = vld [vmem:[%s6174_s1 + $0x4] ss:$8 sps:$4 sm:$0xff]  }
   0x6   :  { %v3692_v16 = vld [vmem:[%s6174_s1] ss:$8 sps:$4 sm:$0xff]   ;;  %v3695_v21 = vld [vmem:[%s6175_s0 + $0x10] sm:$0xff]   ;;  %v3696_v23 = vld [vmem:[%s6175_s0 + $0x18] sm:$0xff]   ;;  %v106_v58 = vshrl.u32 %v105_v56, 7 }
   0x7   :  { %390 = vmatpush1.bf16.msra.mxu0 %v3674_v4  ;;  %3661 = vmatpush1.bf16.msra.mxu1 %v3674_v4  ;;  %v3693_v17 = vld [vmem:[%s6175_s0] sm:$0xff]   ;;  %v3694_v19 = vld [vmem:[%s6175_s0 + $0x8] sm:$0xff]   ;;  %v3713_v22 = vld [vmem:[%s6175_s0 + $0xd0] sm:$0xff]  }
   0x8   :  { %391 = vmatprep.subr.bf16.mxu0 %v3675_v5  ;;  %3654 = vmatprep.subr.bf16.mxu1 %v3675_v5  ;;  %v3709_v18 = vld [vmem:[%s6175_s0 + $0xc0] sm:$0xff]   ;;  %v3711_v20 = vld [vmem:[%s6175_s0 + $0xc8] sm:$0xff]   ;;  %v3715_v24 = vld [vmem:[%s6175_s0 + $0xd8] sm:$0xff]   ;;  %v107_v59 = vsub.s32 0, %v106_v58  ;;  %v111_v61 = vsub.s32 1, %v106_v58 }
   0x9   :  { %v3697_v25 = vld [vmem:[%s6175_s0 + $0x20] sm:$0xff]   ;;  %v3698_v27 = vld [vmem:[%s6175_s0 + $0x28] sm:$0xff]   ;;  %v3699_v29 = vld [vmem:[%s6175_s0 + $0x30] sm:$0xff]  }
   0xa   :  { %v3717_v26 = vld [vmem:[%s6175_s0 + $0xe0] sm:$0xff]   ;;  %v3719_v28 = vld [vmem:[%s6175_s0 + $0xe8] sm:$0xff]   ;;  %v3721_v30 = vld [vmem:[%s6175_s0 + $0xf0] sm:$0xff]  }
   0xb   :  { %392 = vmatpush1.bf16.msra.mxu0 %v3677_v6  ;;  %3662 = vmatpush1.bf16.msra.mxu1 %v3677_v6  ;;  %v3700_v31 = vld [vmem:[%s6175_s0 + $0x38] sm:$0xff]   ;;  %v3701_v33 = vld [vmem:[%s6175_s0 + $0x40] sm:$0xff]   ;;  %v3702_v34 = vld [vmem:[%s6175_s0 + $0x48] sm:$0xff]  }
   0xc   :  { %393 = vmatprep.subr.bf16.mxu0 %v3678_v7  ;;  %3655 = vmatprep.subr.bf16.mxu1 %v3678_v7  ;;  %v3723_v32 = vld [vmem:[%s6175_s0 + $0xf8] sm:$0xff]   ;;  %v3703_v35 = vld [vmem:[%s6175_s0 + $0x50] sm:$0xff]   ;;  %v3705_v39 = vld [vmem:[%s6175_s0 + $0x60] sm:$0xff]  }
   0xd   :  { %v3704_v36 = vld [vmem:[%s6175_s0 + $0x58] sm:$0xff]   ;;  %v3726_v38 = vld [vmem:[%s6176_s3 + $0x30] sm:$0xff]   ;;  %v3727_v40 = vld [vmem:[%s6176_s3 + $0x28] sm:$0xff]  }
   0xe   :  { %v3725_v37 = vld [vmem:[%s6176_s3 + $0x38] sm:$0xff]   ;;  %v3728_v41 = vld [vmem:[%s6176_s3 + $0x20] sm:$0xff]   ;;  %v3706_v42 = vld [vmem:[%s6175_s0 + $0x68] sm:$0xff]  }
   0xf   :  { %394 = vmatpush1.bf16.msra.mxu0 %v3680_v8  ;;  %3663 = vmatpush1.bf16.msra.mxu1 %v3680_v8  ;;  %v3729_v43 = vld [vmem:[%s6176_s3 + $0x18] sm:$0xff]   ;;  %v3730_v44 = vld [vmem:[%s6176_s3 + $0x10] sm:$0xff]   ;;  %v3731_v46 = vld [vmem:[%s6176_s3 + $0x8] sm:$0xff]  }
  0x10   :  { %395 = vmatprep.subr.bf16.mxu0 %v3681_v9  ;;  %3656 = vmatprep.subr.bf16.mxu1 %v3681_v9  ;;  %v3707_v45 = vld [vmem:[%s6175_s0 + $0x70] sm:$0xff]   ;;  %v3732_v47 = vld [vmem:[%s6176_s3] sm:$0xff]   ;;  %v3708_v48 = vld [vmem:[%s6175_s0 + $0x78] sm:$0xff]  }
  0x11   :  { %v3710_v49 = vld [vmem:[%s6175_s0 + $0x80] sm:$0xff]   ;;  %v3712_v50 = vld [vmem:[%s6175_s0 + $0x88] sm:$0xff]   ;;  %v3714_v51 = vld [vmem:[%s6175_s0 + $0x90] sm:$0xff]  }
  0x12   :  { %v3716_v52 = vld [vmem:[%s6175_s0 + $0x98] sm:$0xff]   ;;  %v3718_v53 = vld [vmem:[%s6175_s0 + $0xa0] sm:$0xff]   ;;  %v3720_v54 = vld [vmem:[%s6175_s0 + $0xa8] sm:$0xff]  }
  0x13   :  { %396 = vmatpush1.bf16.msra.mxu0 %v3683_v10  ;;  %3664 = vmatpush1.bf16.msra.mxu1 %v3683_v10  ;;  %v3722_v55 = vld [vmem:[%s6175_s0 + $0xb0] sm:$0xff]   ;;  %v3724_v57 = vld [vmem:[%s6175_s0 + $0xb8] sm:$0xff]   ;;  %v103_v60 = vld [vmem:[%s6177_s2] sm:$0x3] }
  0x14   :  { %397 = vmatprep.subr.bf16.mxu0 %v3684_v11  ;;  %3657 = vmatprep.subr.bf16.mxu1 %v3684_v11  ;;  %v4741_v62 = vrot.slane %v103_v60, %v107_v59  ;;  %v4743_v63 = vrot.slane %v103_v60, %v111_v61 }
  0x17   :  { %398 = vmatpush1.bf16.msra.mxu0 %v3686_v12  ;;  %3665 = vmatpush1.bf16.msra.mxu1 %v3686_v12 }
  0x18   :  { %399 = vmatprep.subr.bf16.mxu0 %v3687_v13  ;;  %3658 = vmatprep.subr.bf16.mxu1 %v3687_v13 }
  0x1b   :  { %400 = vmatpush1.bf16.msra.mxu0 %v3689_v14  ;;  %3666 = vmatpush1.bf16.msra.mxu1 %v3689_v14 }
  0x1c   :  { %401 = vmatprep.subr.bf16.mxu0 %v3690_v15  ;;  %3659 = vmatprep.subr.bf16.mxu1 %v3690_v15 }
  0x1f   :  { %402 = vmatpush1.bf16.msra.mxu0 %v3692_v16  ;;  %3667 = vmatpush1.bf16.msra.mxu1 %v3692_v16 }
  0x20   :  { %3572 = vmatprep.subr.bf16.mxu1 %v3725_v37 }
  0x22   :  { %420 = vmatmul.mubr.bf16.vlgmr.msra.gmra.mxu0 %v3693_v17  ;;  %660 = vmatmul.mubr.bf16.vlgmr.msra.gmra.mxu1 %v3709_v18 }
  0x23   :  { %429 = vmatprep.mubr.bf16.mxu0 %v4502_v1  ;;  %669 = vmatprep.mubr.bf16.mxu1 %v4502_v1 }
  0x24   :  { %3573 = vmatpush3.bf16.msra.mxu1 %v3725_v37 }
  0x25   :  { %3574 = vmatprep.subr.bf16.mxu1 %v3726_v38 }
  0x28   :  { %3575 = vmatpush3.bf16.msra.mxu1 %v3726_v38 }
  0x29   :  { %3576 = vmatprep.subr.bf16.mxu1 %v3727_v40 }
  0x2a   :  { %430 = vmatmul.mubr.bf16.gmra.mxu0 %v3694_v19  ;;  %670 = vmatmul.mubr.bf16.gmra.mxu1 %v3711_v20 }
  0x2b   :  { %439 = vmatprep.mubr.bf16.mxu0 %v4502_v1  ;;  %679 = vmatprep.mubr.bf16.mxu1 %v4502_v1 }
  0x2c   :  { %3577 = vmatpush3.bf16.msra.mxu1 %v3727_v40 }
  0x2d   :  { %3578 = vmatprep.subr.bf16.mxu1 %v3728_v41 }
  0x30   :  { %3579 = vmatpush3.bf16.msra.mxu1 %v3728_v41 }
  0x31   :  { %3580 = vmatprep.subr.bf16.mxu1 %v3729_v43 }
  0x32   :  { %440 = vmatmul.mubr.bf16.gmra.mxu0 %v3695_v21  ;;  %680 = vmatmul.mubr.bf16.gmra.mxu1 %v3713_v22 }
  0x33   :  { %449 = vmatprep.mubr.bf16.mxu0 %v4502_v1  ;;  %689 = vmatprep.mubr.bf16.mxu1 %v4502_v1 }
  0x34   :  { %3581 = vmatpush3.bf16.msra.mxu1 %v3729_v43 }
  0x35   :  { %3582 = vmatprep.subr.bf16.mxu1 %v3730_v44 }
  0x38   :  { %3583 = vmatpush3.bf16.msra.mxu1 %v3730_v44 }
  0x39   :  { %3584 = vmatprep.subr.bf16.mxu1 %v3731_v46 }
  0x3a   :  { %450 = vmatmul.mubr.bf16.gmra.mxu0 %v3696_v23  ;;  %690 = vmatmul.mubr.bf16.gmra.mxu1 %v3715_v24 }
  0x3b   :  { %459 = vmatprep.mubr.bf16.mxu0 %v4502_v1  ;;  %699 = vmatprep.mubr.bf16.mxu1 %v4502_v1 }
  0x3c   :  { %3585 = vmatpush3.bf16.msra.mxu1 %v3731_v46 }
  0x3d   :  { %3586 = vmatprep.subr.bf16.mxu1 %v3732_v47 }
  0x40   :  { %3587 = vmatpush3.bf16.msra.mxu1 %v3732_v47 }
  0x42   :  { %460 = vmatmul.mubr.bf16.gmra.mxu0 %v3697_v25  ;;  %700 = vmatmul.mubr.bf16.gmra.mxu1 %v3717_v26 }
  0x43   :  { %469 = vmatprep.mubr.bf16.mxu0 %v4502_v1  ;;  %709 = vmatprep.mubr.bf16.mxu1 %v4502_v1 }
  0x4a   :  { %470 = vmatmul.mubr.bf16.gmra.mxu0 %v3698_v27  ;;  %710 = vmatmul.mubr.bf16.gmra.mxu1 %v3719_v28 }
  0x4b   :  { %479 = vmatprep.mubr.bf16.mxu0 %v4502_v1  ;;  %719 = vmatprep.mubr.bf16.mxu1 %v4502_v1 }
  0x52   :  { %480 = vmatmul.mubr.bf16.gmra.mxu0 %v3699_v29  ;;  %720 = vmatmul.mubr.bf16.gmra.mxu1 %v3721_v30 }
  0x53   :  { %489 = vmatprep.mubr.bf16.mxu0 %v4502_v1  ;;  %729 = vmatprep.mubr.bf16.mxu1 %v4502_v1 }
  0x5a   :  { %490 = vmatmul.mubr.bf16.gmra.mxu0 %v3700_v31  ;;  %730 = vmatmul.mubr.bf16.gmra.mxu1 %v3723_v32 }
  0x5b   :  { %499 = vmatprep.mubr.bf16.mxu0 %v4502_v1 }
  0x62   :  { %500 = vmatmul.mubr.bf16.gmra.mxu0 %v3701_v33 }
  0x63   :  { %509 = vmatprep.mubr.bf16.mxu0 %v4502_v1 }
  0x6a   :  { %510 = vmatmul.mubr.bf16.gmra.mxu0 %v3702_v34 }
  0x6b   :  { %519 = vmatprep.mubr.bf16.mxu0 %v4502_v1 }
  0x72   :  { %520 = vmatmul.mubr.bf16.gmra.mxu0 %v3703_v35 }
  0x73   :  { %529 = vmatprep.mubr.bf16.mxu0 %v4502_v1 }
  0x7a   :  { %530 = vmatmul.mubr.bf16.gmra.mxu0 %v3704_v36 }
  0x7b   :  { %539 = vmatprep.mubr.bf16.mxu0 %v4502_v1 }
  0x82   :  { %540 = vmatmul.mubr.bf16.gmra.mxu0 %v3705_v39 }
  0x83   :  { %549 = vmatprep.mubr.bf16.mxu0 %v4502_v1 }
  0x8a   :  { %550 = vmatmul.mubr.bf16.gmra.mxu0 %v3706_v42 }
  0x8b   :  { %559 = vmatprep.mubr.bf16.mxu0 %v4502_v1 }
  0x92   :  { %560 = vmatmul.mubr.bf16.gmra.mxu0 %v3707_v45 }
  0x93   :  { %569 = vmatprep.mubr.bf16.mxu0 %v4502_v1 }
  0x9a   :  { %570 = vmatmul.mubr.bf16.gmra.mxu0 %v3708_v48 }
  0x9b   :  { %579 = vmatprep.mubr.bf16.mxu0 %v4502_v1 }
  0xa2   :  { %580 = vmatmul.mubr.bf16.gmra.mxu0 %v3710_v49 }
  0xa3   :  { %589 = vmatprep.mubr.bf16.mxu0 %v4502_v1 }
  0xaa   :  { %590 = vmatmul.mubr.bf16.gmra.mxu0 %v3712_v50 }
  0xab   :  { %599 = vmatprep.mubr.bf16.mxu0 %v4502_v1 }
  0xb2   :  { %600 = vmatmul.mubr.bf16.gmra.mxu0 %v3714_v51 }
  0xb3   :  { %609 = vmatprep.mubr.bf16.mxu0 %v4502_v1 }
  0xba   :  { %610 = vmatmul.mubr.bf16.gmra.mxu0 %v3716_v52 }
  0xbb   :  { %619 = vmatprep.mubr.bf16.mxu0 %v4502_v1 }
  0xc2   :  { %620 = vmatmul.mubr.bf16.gmra.mxu0 %v3718_v53 }
  0xc3   :  { %629 = vmatprep.mubr.bf16.mxu0 %v4502_v1 }
  0xca   :  { %630 = vmatmul.mubr.bf16.gmra.mxu0 %v3720_v54 }
  0xcb   :  { %639 = vmatprep.mubr.bf16.mxu0 %v4502_v1 }
  0xd2   :  { %640 = vmatmul.mubr.bf16.gmra.mxu0 %v3722_v55 }
  0xd3   :  { %649 = vmatprep.mubr.bf16.mxu0 %v4502_v1 }
  0xda   :  { %650 = vmatmul.mubr.bf16.gmra.mxu0 %v3724_v57 }
  0xe2   :  { %v421_v0 = vpop.f32.mrf.mxu0  ;;  %v661_v2 = vpop.f32.mrf.mxu1 }
  0xe3   :  { %v4746_v1 = vadd.f32 %v421_v0, %v4741_v62  ;;  %v4753_v8 = vadd.f32 %v661_v2, %v4741_v62 }
  0xe4   :  { %v423_v3 = vpop.f32.mrf.mxu0  ;;  %v663_v4 = vpop.f32.mrf.mxu1 }
  0xe5   :  { %v740_v5 = vsub.f32 0.0, %v4746_v1  ;;  %v4750_v6 = vadd.f32 %v423_v3, %v4743_v63  ;;  %v4760_v14 = vadd.f32 %v663_v4, %v4743_v63  ;;  %v836_v20 = vsub.f32 0.0, %v4753_v8 }
  0xe6   :  { %v425_v7 = vpop.f32.mrf.mxu0  ;;  %v665_v9 = vpop.f32.mrf.mxu1 }
  0xe7   :  { %v868_v10 = vmul.f32 1.442695, %v740_v5  ;;  %v741_v11 = vsub.f32 0.0, %v4750_v6  ;;  %v4757_v12 = vadd.f32 %v425_v7, %v4741_v62  ;;  %v4768_v21 = vadd.f32 %v665_v9, %v4741_v62 }
  0xe8   :  { %v427_v13 = vpop.f32.mrf.mxu0  ;;  %v667_v18 = vpop.f32.mrf.mxu1  ;;  %v837_v26 = vsub.f32 0.0, %v4760_v14  ;;  %v1060_v32 = vmul.f32 1.442695, %v836_v20 }
  0xe9   :  { %3733 = vpow2.f32 %v868_v10  ;;  %v870_v15 = vmul.f32 1.442695, %v741_v11  ;;  %v742_v16 = vsub.f32 0.0, %v4757_v12  ;;  %v4764_v17 = vadd.f32 %v427_v13, %v4743_v63 }
  0xea   :  { %v431_v19 = vpop.f32.mrf.mxu0  ;;  %v4776_v27 = vadd.f32 %v667_v18, %v4743_v63  ;;  %v838_v33 = vsub.f32 0.0, %v4768_v21  ;;  %v1062_v38 = vmul.f32 1.442695, %v837_v26 }
  0xeb   :  { %3735 = vpow2.f32 %v870_v15  ;;  %v872_v22 = vmul.f32 1.442695, %v742_v16  ;;  %v743_v23 = vsub.f32 0.0, %v4764_v17  ;;  %v4772_v24 = vadd.f32 %v431_v19, %v4741_v62 }
  0xec   :  { %v433_v25 = vpop.f32.mrf.mxu0  ;;  %v839_v39 = vsub.f32 0.0, %v4776_v27  ;;  %v1064_v44 = vmul.f32 1.442695, %v838_v33 }
  0xed   :  { %3737 = vpow2.f32 %v872_v22  ;;  %v874_v28 = vmul.f32 1.442695, %v743_v23  ;;  %v744_v29 = vsub.f32 0.0, %v4772_v24  ;;  %v4780_v30 = vadd.f32 %v433_v25, %v4743_v63 }
  0xee   :  { %v435_v31 = vpop.f32.mrf.mxu0  ;;  %v1066_v49 = vmul.f32 1.442695, %v839_v39 }
  0xef   :  { %3739 = vpow2.f32 %v874_v28  ;;  %v876_v34 = vmul.f32 1.442695, %v744_v29  ;;  %v745_v35 = vsub.f32 0.0, %v4780_v30  ;;  %v4785_v36 = vadd.f32 %v435_v31, %v4741_v62 }
  0xf0   :  { %v437_v37 = vpop.f32.mrf.mxu0 }
  0xf1   :  { %3741 = vpow2.f32 %v876_v34  ;;  %v878_v40 = vmul.f32 1.442695, %v745_v35  ;;  %v746_v41 = vsub.f32 0.0, %v4785_v36  ;;  %v4790_v42 = vadd.f32 %v437_v37, %v4743_v63 }
  0xf2   :  { %v441_v43 = vpop.f32.mrf.mxu0  ;;  %3743 = vpow2.f32 %v1060_v32 }
  0xf3   :  { %3745 = vpow2.f32 %v878_v40  ;;  %v880_v45 = vmul.f32 1.442695, %v746_v41  ;;  %v747_v46 = vsub.f32 0.0, %v4790_v42  ;;  %v4794_v47 = vadd.f32 %v441_v43, %v4741_v62 }
  0xf4   :  { %v443_v48 = vpop.f32.mrf.mxu0  ;;  %3747 = vpow2.f32 %v1062_v38 }
  0xf5   :  { %3749 = vpow2.f32 %v880_v45  ;;  %v882_v50 = vmul.f32 1.442695, %v747_v46  ;;  %v748_v51 = vsub.f32 0.0, %v4794_v47  ;;  %v4798_v52 = vadd.f32 %v443_v48, %v4743_v63 }
  0xf6   :  { %v3734_v53 = vpop.eup %3733  ;;  %v445_v54 = vpop.f32.mrf.mxu0  ;;  %3751 = vpow2.f32 %v1064_v44 }
  0xf7   :  { %v1124_v55 = vadd.f32 1.0, %v3734_v53  ;;  %3753 = vpow2.f32 %v882_v50  ;;  %v884_v56 = vmul.f32 1.442695, %v748_v51  ;;  %v749_v57 = vsub.f32 0.0, %v4798_v52 }
  0xf8   :  { %v3736_v58 = vpop.eup %3735  ;;  %v4802_v59 = vadd.f32 %v445_v54, %v4741_v62  ;;  %v447_v60 = vpop.f32.mrf.mxu0  ;;  %3755 = vpow2.f32 %v1066_v49 }
  0xf9   :  { %3757 = vrcp.f32 %v1124_v55  ;;  %v1125_v61 = vadd.f32 1.0, %v3736_v58  ;;  %v886_v0 = vmul.f32 1.442695, %v749_v57  ;;  %v4805_v2 = vadd.f32 %v447_v60, %v4743_v63 }
  0xfa   :  { %v3738_v3 = vpop.eup %3737  ;;  %3759 = vpow2.f32 %v884_v56  ;;  %v750_v4 = vsub.f32 0.0, %v4802_v59  ;;  %v451_v5 = vpop.f32.mrf.mxu0 }
  0xfb   :  { %3761 = vrcp.f32 %v1125_v61  ;;  %v1126_v7 = vadd.f32 1.0, %v3738_v3  ;;  %v751_v9 = vsub.f32 0.0, %v4805_v2  ;;  %v4810_v10 = vadd.f32 %v451_v5, %v4741_v62 }
  0xfc   :  { %v3740_v11 = vpop.eup %3739  ;;  %3763 = vpow2.f32 %v886_v0  ;;  %v888_v13 = vmul.f32 1.442695, %v750_v4  ;;  %v453_v15 = vpop.f32.mrf.mxu0 }
  0xfd   :  { %3765 = vrcp.f32 %v1126_v7  ;;  %v1127_v16 = vadd.f32 1.0, %v3740_v11  ;;  %v890_v18 = vmul.f32 1.442695, %v751_v9  ;;  %v752_v19 = vsub.f32 0.0, %v4810_v10 }
  0xfe   :  { %v3742_v20 = vpop.eup %3741  ;;  %3767 = vpow2.f32 %v888_v13  ;;  %v4814_v22 = vadd.f32 %v453_v15, %v4743_v63  ;;  %v455_v23 = vpop.f32.mrf.mxu0 }
  0xff   :  { %v4816_v25 = vpop.eup %3743  ;;  %3769 = vrcp.f32 %v1127_v16  ;;  %v1128_v26 = vadd.f32 1.0, %v3742_v20  ;;  %v892_v28 = vmul.f32 1.442695, %v752_v19  ;;  %v4819_v29 = vadd.f32 %v455_v23, %v4741_v62 }
 0x100   :  { %v3746_v31 = vpop.eup %3745  ;;  %3771 = vpow2.f32 %v890_v18  ;;  %v753_v32 = vsub.f32 0.0, %v4814_v22  ;;  %v457_v33 = vpop.f32.mrf.mxu0 }
 0x101   :  { %v4822_v34 = vpop.eup %3747  ;;  %3773 = vrcp.f32 %v1128_v26  ;;  %v1129_v35 = vadd.f32 1.0, %v3746_v31  ;;  %v754_v37 = vsub.f32 0.0, %v4819_v29  ;;  %v4826_v38 = vadd.f32 %v457_v33, %v4743_v63 }
 0x102   :  { %v3750_v39 = vpop.eup %3749  ;;  %3775 = vpow2.f32 %v892_v28  ;;  %v894_v40 = vmul.f32 1.442695, %v753_v32  ;;  %v461_v41 = vpop.f32.mrf.mxu0 }
 0x103   :  { %v4828_v43 = vpop.eup %3751  ;;  %3777 = vrcp.f32 %v1129_v35  ;;  %v1130_v44 = vadd.f32 1.0, %v3750_v39  ;;  %v896_v45 = vmul.f32 1.442695, %v754_v37  ;;  %v755_v46 = vsub.f32 0.0, %v4826_v38 }
 0x104   :  { %v3754_v48 = vpop.eup %3753  ;;  %3779 = vpow2.f32 %v894_v40  ;;  %v4832_v49 = vadd.f32 %v461_v41, %v4741_v62  ;;  %v463_v50 = vpop.f32.mrf.mxu0 }
 0x105   :  { %v4834_v51 = vpop.eup %3755  ;;  %3781 = vrcp.f32 %v1130_v44  ;;  %v1131_v53 = vadd.f32 1.0, %v3754_v48  ;;  %v898_v54 = vmul.f32 1.442695, %v755_v46  ;;  %v4837_v55 = vadd.f32 %v463_v50, %v4743_v63 }
 0x106   :  { %v3758_v56 = vpop.eup %3757  ;;  %3783 = vpow2.f32 %v896_v45  ;;  %v756_v57 = vsub.f32 0.0, %v4832_v49  ;;  %v465_v58 = vpop.f32.mrf.mxu0 }
 0x107   :  { %v3760_v60 = vpop.eup %3759  ;;  %3785 = vrcp.f32 %v1131_v53  ;;  %v757_v61 = vsub.f32 0.0, %v4837_v55  ;;  %v4842_v0 = vadd.f32 %v465_v58, %v4741_v62  ;;  %v1380_v4 = vmul.f32 %v3758_v56, %v4746_v1 }
 0x108   :  { %v3762_v3 = vpop.eup %3761  ;;  %v1132_v5 = vadd.f32 1.0, %v3760_v60  ;;  %3787 = vpow2.f32 %v898_v54  ;;  %v900_v7 = vmul.f32 1.442695, %v756_v57  ;;  %v467_v9 = vpop.f32.mrf.mxu0 }
 0x109   :  { %v3764_v11 = vpop.eup %3763  ;;  %v1381_v13 = vmul.f32 %v3762_v3, %v4750_v6  ;;  %v902_v15 = vmul.f32 1.442695, %v757_v61  ;;  %v758_v16 = vsub.f32 0.0, %v4842_v0  ;;  %v4848_v18 = vadd.f32 %v467_v9, %v4743_v63 }
 0x10a   :  { %v3766_v19 = vpop.eup %3765  ;;  %3789 = vrcp.f32 %v1132_v5  ;;  %v1133_v20 = vadd.f32 1.0, %v3764_v11  ;;  %v471_v23 = vpop.f32.mrf.mxu0 }
 0x10b   :  { %v3768_v26 = vpop.eup %3767  ;;  %v3213_v28 = vpack.c.bf16 %v1381_v13, %v1380_v4  ;;  %v1382_v1 = vmul.f32 %v3766_v19, %v4757_v12  ;;  %3791 = vpow2.f32 %v900_v7  ;;  %v904_v31 = vmul.f32 1.442695, %v758_v16 }
 0x10c   :  { %v3770_v32 = vpop.eup %3769  ;;  %3793 = vrcp.f32 %v1133_v20  ;;  %v1134_v33 = vadd.f32 1.0, %v3768_v26  ;;  %v759_v6 = vsub.f32 0.0, %v4848_v18  ;;  %v4853_v35 = vadd.f32 %v471_v23, %v4741_v62  ;;  %v473_v37 = vpop.f32.mrf.mxu0 }
 0x10d   :  { %v3772_v39 = vpop.eup %3771  ;;  %2636 = vst [vmem:[%s6178_s5] sm:$0xff] %v3213_v28  ;;  %v1383_v40 = vmul.f32 %v3770_v32, %v4764_v17  ;;  %3795 = vpow2.f32 %v902_v15  ;;  %v4860_v12 = vadd.f32 %v473_v37, %v4743_v63  ;;  %v1508_v41 = vpack.c.bf16 %v1382_v1, %v1380_v4 }
 0x10e   :  { %v3774_v44 = vpop.eup %3773  ;;  %3797 = vrcp.f32 %v1134_v33  ;;  %v1135_v45 = vadd.f32 1.0, %v3772_v39  ;;  %v906_v46 = vmul.f32 1.442695, %v759_v6  ;;  %v760_v48 = vsub.f32 0.0, %v4853_v35  ;;  %v475_v50 = vpop.f32.mrf.mxu0 }
 0x10f   :  { %v3776_v53 = vpop.eup %3775  ;;  %v3214_v54 = vpack.c.bf16 %v1383_v40, %v1382_v1  ;;  %v1384_v56 = vmul.f32 %v3774_v44, %v4772_v24  ;;  %3799 = vpow2.f32 %v904_v31  ;;  %v761_v57 = vsub.f32 0.0, %v4860_v12  ;;  %3588 = vmatprep.mubr.bf16.mxu1 %v1508_v41 }
 0x110   :  { %v3778_v17 = vpop.eup %3777  ;;  %3801 = vrcp.f32 %v1135_v45  ;;  %v1136_v58 = vadd.f32 1.0, %v3776_v53  ;;  %v908_v60 = vmul.f32 1.442695, %v760_v48  ;;  %v4866_v61 = vadd.f32 %v475_v50, %v4741_v62  ;;  %v477_v3 = vpop.f32.mrf.mxu0 }
 0x111   :  { %v3780_v4 = vpop.eup %3779  ;;  %2637 = vst [vmem:[%s6178_s5 + $0x8] sm:$0xff] %v3214_v54  ;;  %v1385_v5 = vmul.f32 %v3778_v17, %v4780_v30  ;;  %3803 = vpow2.f32 %v906_v46  ;;  %v910_v24 = vmul.f32 1.442695, %v761_v57  ;;  %v4873_v7 = vadd.f32 %v477_v3, %v4743_v63 }
 0x112   :  { %v3782_v9 = vpop.eup %3781  ;;  %3805 = vrcp.f32 %v1136_v58  ;;  %v1137_v11 = vadd.f32 1.0, %v3780_v4  ;;  %v762_v13 = vsub.f32 0.0, %v4866_v61  ;;  %v481_v15 = vpop.f32.mrf.mxu0 }
 0x113   :  { %v3784_v16 = vpop.eup %3783  ;;  %v3215_v19 = vpack.c.bf16 %v1385_v5, %v1384_v56  ;;  %v1386_v20 = vmul.f32 %v3782_v9, %v4785_v36  ;;  %3807 = vpow2.f32 %v908_v60  ;;  %v763_v23 = vsub.f32 0.0, %v4873_v7 }
 0x114   :  { %v3786_v26 = vpop.eup %3785  ;;  %3809 = vrcp.f32 %v1137_v11  ;;  %v1138_v30 = vadd.f32 1.0, %v3784_v16  ;;  %v912_v28 = vmul.f32 1.442695, %v762_v13  ;;  %v4879_v1 = vadd.f32 %v481_v15, %v4741_v62  ;;  %v483_v31 = vpop.f32.mrf.mxu0 }
 0x115   :  { %v3788_v32 = vpop.eup %3787  ;;  %2638 = vst [vmem:[%s6178_s5 + $0x10] sm:$0xff] %v3215_v19  ;;  %v1510_v33 = vpack.c.bf16 %v1386_v20, %v1384_v56  ;;  %v1387_v6 = vmul.f32 %v3786_v26, %v4790_v42  ;;  %3811 = vpow2.f32 %v910_v24  ;;  %v914_v36 = vmul.f32 1.442695, %v763_v23 }
 0x116   :  { %3813 = vrcp.f32 %v1138_v30  ;;  %v1139_v37 = vadd.f32 1.0, %v3788_v32  ;;  %v764_v39 = vsub.f32 0.0, %v4879_v1  ;;  %v4887_v40 = vadd.f32 %v483_v31, %v4743_v63  ;;  %v485_v41 = vpop.f32.mrf.mxu0 }
 0x117   :  { %v3790_v44 = vpop.eup %3789  ;;  %v3216_v45 = vpack.c.bf16 %v1387_v6, %v1386_v20  ;;  %3815 = vpow2.f32 %v912_v28  ;;  %v4890_v46 = vadd.f32 %v485_v41, %v4741_v62  ;;  %3589 = vmatmul.mubr.bf16.vlgmr.msra.gmra.mxu1 %v1510_v33 }
 0x118   :  { %v3792_v48 = vpop.eup %3791  ;;  %3817 = vrcp.f32 %v1139_v37  ;;  %v916_v42 = vmul.f32 1.442695, %v764_v39  ;;  %v765_v50 = vsub.f32 0.0, %v4887_v40  ;;  %v487_v53 = vpop.f32.mrf.mxu0  ;;  %v1388_v60 = vmul.f32 %v3790_v44, %v4794_v47 }
 0x119   :  { %v3794_v54 = vpop.eup %3793  ;;  %2639 = vst [vmem:[%s6178_s5 + $0x18] sm:$0xff] %v3216_v45  ;;  %v1140_v56 = vadd.f32 1.0, %v3792_v48  ;;  %3819 = vpow2.f32 %v914_v36  ;;  %v766_v57 = vsub.f32 0.0, %v4890_v46  ;;  %v4898_v17 = vadd.f32 %v487_v53, %v4743_v63 }
 0x11a   :  { %v3796_v58 = vpop.eup %3795  ;;  %v1389_v3 = vmul.f32 %v3794_v54, %v4798_v52  ;;  %3821 = vpow2.f32 %v916_v42  ;;  %v918_v4 = vmul.f32 1.442695, %v765_v50  ;;  %v491_v5 = vpop.f32.mrf.mxu0 }
 0x11b   :  { %v3798_v24 = vpop.eup %3797  ;;  %3823 = vrcp.f32 %v1140_v56  ;;  %v1141_v9 = vadd.f32 1.0, %v3796_v58  ;;  %v920_v11 = vmul.f32 1.442695, %v766_v57  ;;  %v767_v13 = vsub.f32 0.0, %v4898_v17 }
 0x11c   :  { %v3800_v15 = vpop.eup %3799  ;;  %v3217_v16 = vpack.c.bf16 %v1389_v3, %v1388_v60  ;;  %v1390_v19 = vmul.f32 %v3798_v24, %v4802_v59  ;;  %3825 = vpow2.f32 %v918_v4  ;;  %v4905_v20 = vadd.f32 %v491_v5, %v4741_v62  ;;  %v493_v47 = vpop.f32.mrf.mxu0 }
 0x11d   :  { %v3802_v23 = vpop.eup %3801  ;;  %3827 = vrcp.f32 %v1141_v9  ;;  %v1142_v52 = vadd.f32 1.0, %v3800_v15  ;;  %v922_v26 = vmul.f32 1.442695, %v767_v13  ;;  %v4908_v30 = vadd.f32 %v493_v47, %v4743_v63 }
 0x11e   :  { %v3804_v28 = vpop.eup %3803  ;;  %2640 = vst [vmem:[%s6178_s5 + $0x20] sm:$0xff] %v3217_v16  ;;  %v1391_v31 = vmul.f32 %v3802_v23, %v4805_v2  ;;  %3829 = vpow2.f32 %v920_v11  ;;  %v768_v59 = vsub.f32 0.0, %v4905_v20  ;;  %v495_v32 = vpop.f32.mrf.mxu0  ;;  %v1512_v33 = vpack.c.bf16 %v1390_v19, %v1388_v60 }
 0x11f   :  { %v3806_v6 = vpop.eup %3805  ;;  %3831 = vrcp.f32 %v1142_v52  ;;  %v1143_v36 = vadd.f32 1.0, %v3804_v28  ;;  %v769_v37 = vsub.f32 0.0, %v4908_v30  ;;  %v4917_v39 = vadd.f32 %v495_v32, %v4741_v62 }
 0x120   :  { %v3808_v41 = vpop.eup %3807  ;;  %v3218_v44 = vpack.c.bf16 %v1391_v31, %v1390_v19  ;;  %3833 = vpow2.f32 %v922_v26  ;;  %v924_v45 = vmul.f32 1.442695, %v768_v59  ;;  %3592 = vmatprep.mubr.bf16.mxu1 %v1512_v33  ;;  %v497_v48 = vpop.f32.mrf.mxu0  ;;  %v1392_v56 = vmul.f32 %v3806_v6, %v4810_v10 }
 0x121   :  { %v3810_v2 = vpop.eup %3809  ;;  %3835 = vrcp.f32 %v1143_v36  ;;  %v1144_v42 = vadd.f32 1.0, %v3808_v41  ;;  %v926_v50 = vmul.f32 1.442695, %v769_v37  ;;  %v770_v53 = vsub.f32 0.0, %v4917_v39 }
 0x122   :  { %v3812_v54 = vpop.eup %3811  ;;  %2641 = vst [vmem:[%s6178_s5 + $0x28] sm:$0xff] %v3218_v44  ;;  %v1393_v57 = vmul.f32 %v3810_v2, %v4814_v22  ;;  %3837 = vpow2.f32 %v924_v45  ;;  %v4926_v58 = vadd.f32 %v497_v48, %v4743_v63  ;;  %v501_v60 = vpop.f32.mrf.mxu0 }
 0x123   :  { %v3814_v3 = vpop.eup %3813  ;;  %3839 = vrcp.f32 %v1144_v42  ;;  %v1145_v4 = vadd.f32 1.0, %v3812_v54  ;;  %v928_v5 = vmul.f32 1.442695, %v770_v53  ;;  %v4929_v24 = vadd.f32 %v501_v60, %v4741_v62 }
 0x124   :  { %v3816_v9 = vpop.eup %3815  ;;  %v3219_v11 = vpack.c.bf16 %v1393_v57, %v1392_v56  ;;  %v1394_v13 = vmul.f32 %v3814_v3, %v4819_v29  ;;  %3841 = vpow2.f32 %v926_v50  ;;  %v771_v10 = vsub.f32 0.0, %v4926_v58  ;;  %v503_v22 = vpop.f32.mrf.mxu0 }
 0x125   :  { %v3818_v15 = vpop.eup %3817  ;;  %3843 = vrcp.f32 %v1145_v4  ;;  %v1146_v16 = vadd.f32 1.0, %v3816_v9  ;;  %v772_v19 = vsub.f32 0.0, %v4929_v24  ;;  %v4935_v47 = vadd.f32 %v503_v22, %v4743_v63 }
 0x126   :  { %v3820_v23 = vpop.eup %3819  ;;  %2642 = vst [vmem:[%s6178_s5 + $0x30] sm:$0xff] %v3219_v11  ;;  %v1395_v52 = vmul.f32 %v3818_v15, %v4826_v38  ;;  %3845 = vpow2.f32 %v928_v5  ;;  %v930_v29 = vmul.f32 1.442695, %v771_v10  ;;  %v505_v26 = vpop.f32.mrf.mxu0  ;;  %v1514_v28 = vpack.c.bf16 %v1394_v13, %v1392_v56 }
 0x127   :  { %v3822_v31 = vpop.eup %3821  ;;  %3847 = vrcp.f32 %v1146_v16  ;;  %v1147_v59 = vadd.f32 1.0, %v3820_v23  ;;  %v932_v32 = vmul.f32 1.442695, %v772_v19  ;;  %v773_v33 = vsub.f32 0.0, %v4935_v47 }
 0x128   :  { %v3824_v6 = vpop.eup %3823  ;;  %v3220_v36 = vpack.c.bf16 %v1395_v52, %v1394_v13  ;;  %v1148_v37 = vadd.f32 1.0, %v3822_v31  ;;  %3849 = vpow2.f32 %v930_v29  ;;  %v4943_v41 = vadd.f32 %v505_v26, %v4741_v62  ;;  %3593 = vmatmul.mubr.bf16.gmra.mxu1 %v1514_v28  ;;  %v507_v44 = vpop.f32.mrf.mxu0 }
 0x129   :  { %v3826_v38 = vpop.eup %3825  ;;  %3851 = vrcp.f32 %v1147_v59  ;;  %v934_v45 = vmul.f32 1.442695, %v773_v33  ;;  %v4946_v48 = vadd.f32 %v507_v44, %v4743_v63  ;;  %v1396_v42 = vmul.f32 %v3824_v6, %v4832_v49 }
 0x12a   :  { %v3828_v2 = vpop.eup %3827  ;;  %2643 = vst [vmem:[%s6178_s5 + $0x38] sm:$0xff] %v3220_v36  ;;  %3853 = vrcp.f32 %v1148_v37  ;;  %v1149_v50 = vadd.f32 1.0, %v3826_v38  ;;  %v774_v53 = vsub.f32 0.0, %v4943_v41  ;;  %v511_v54 = vpop.f32.mrf.mxu0 }
 0x12b   :  { %v3830_v56 = vpop.eup %3829  ;;  %v1397_v57 = vmul.f32 %v3828_v2, %v4837_v55  ;;  %3855 = vpow2.f32 %v932_v32  ;;  %v775_v60 = vsub.f32 0.0, %v4946_v48  ;;  %v4956_v3 = vadd.f32 %v511_v54, %v4741_v62 }
 0x12c   :  { %v3832_v4 = vpop.eup %3831  ;;  %3857 = vrcp.f32 %v1149_v50  ;;  %v1150_v5 = vadd.f32 1.0, %v3830_v56  ;;  %v936_v9 = vmul.f32 1.442695, %v774_v53  ;;  %v513_v11 = vpop.f32.mrf.mxu0 }
 0x12d   :  { %v3834_v49 = vpop.eup %3833  ;;  %v3221_v13 = vpack.c.bf16 %v1397_v57, %v1396_v42  ;;  %v1398_v10 = vmul.f32 %v3832_v4, %v4842_v0  ;;  %3859 = vpow2.f32 %v934_v45  ;;  %v938_v22 = vmul.f32 1.442695, %v775_v60  ;;  %v671_v56 = vpop.f32.mrf.mxu1 }
 0x12e   :  { %v3836_v15 = vpop.eup %3835  ;;  %3861 = vrcp.f32 %v1150_v5  ;;  %v1151_v55 = vadd.f32 1.0, %v3834_v49  ;;  %v776_v16 = vsub.f32 0.0, %v4956_v3  ;;  %v4961_v19 = vadd.f32 %v513_v11, %v4743_v63  ;;  %v515_v23 = vpop.f32.mrf.mxu0 }
 0x12f   :  { %v3838_v52 = vpop.eup %3837  ;;  %2644 = vst [vmem:[%s6178_s5 + $0x40] sm:$0xff] %v3221_v13  ;;  %v1399_v29 = vmul.f32 %v3836_v15, %v4848_v18  ;;  %3863 = vpow2.f32 %v936_v9  ;;  %v4968_v0 = vadd.f32 %v515_v23, %v4741_v62  ;;  %v1516_v26 = vpack.c.bf16 %v1398_v10, %v1396_v42 }
 0x130   :  { %v3840_v28 = vpop.eup %3839  ;;  %3865 = vrcp.f32 %v1151_v55  ;;  %v1152_v31 = vadd.f32 1.0, %v3838_v52  ;;  %v940_v59 = vmul.f32 1.442695, %v776_v16  ;;  %v777_v32 = vsub.f32 0.0, %v4961_v19  ;;  %v517_v33 = vpop.f32.mrf.mxu0 }
 0x131   :  { %v3842_v6 = vpop.eup %3841  ;;  %v3222_v36 = vpack.c.bf16 %v1399_v29, %v1398_v10  ;;  %v1400_v37 = vmul.f32 %v3840_v28, %v4853_v35  ;;  %3867 = vpow2.f32 %v938_v22  ;;  %v778_v44 = vsub.f32 0.0, %v4968_v0  ;;  %3596 = vmatprep.mubr.bf16.mxu1 %v1516_v26 }
 0x132   :  { %v3844_v18 = vpop.eup %3843  ;;  %3869 = vrcp.f32 %v1152_v31  ;;  %v1153_v38 = vadd.f32 1.0, %v3842_v6  ;;  %v942_v45 = vmul.f32 1.442695, %v777_v32  ;;  %v4974_v2 = vadd.f32 %v517_v33, %v4743_v63  ;;  %v521_v42 = vpop.f32.mrf.mxu0 }
 0x133   :  { %v3846_v50 = vpop.eup %3845  ;;  %2645 = vst [vmem:[%s6178_s5 + $0x48] sm:$0xff] %v3222_v36  ;;  %v1401_v53 = vmul.f32 %v3844_v18, %v4860_v12  ;;  %3871 = vpow2.f32 %v940_v59  ;;  %v944_v35 = vmul.f32 1.442695, %v778_v44  ;;  %v4981_v54 = vadd.f32 %v521_v42, %v4741_v62 }
 0x134   :  { %v3848_v57 = vpop.eup %3847  ;;  %3873 = vrcp.f32 %v1153_v38  ;;  %v1154_v60 = vadd.f32 1.0, %v3846_v50  ;;  %v779_v4 = vsub.f32 0.0, %v4974_v2  ;;  %v523_v5 = vpop.f32.mrf.mxu0  ;;  %v4985_v9 = vadd.f32 %v671_v56, %v4741_v62 }
 0x135   :  { %v3850_v11 = vpop.eup %3849  ;;  %v3223_v49 = vpack.c.bf16 %v1401_v53, %v1400_v37  ;;  %v1402_v13 = vmul.f32 %v3848_v57, %v4866_v61  ;;  %3875 = vpow2.f32 %v942_v45  ;;  %v780_v12 = vsub.f32 0.0, %v4981_v54 }
 0x136   :  { %v3852_v10 = vpop.eup %3851  ;;  %3877 = vrcp.f32 %v1154_v60  ;;  %v1155_v22 = vadd.f32 1.0, %v3850_v11  ;;  %v946_v15 = vmul.f32 1.442695, %v779_v4  ;;  %v4990_v55 = vadd.f32 %v523_v5, %v4743_v63  ;;  %v525_v16 = vpop.f32.mrf.mxu0 }
 0x137   :  { %v3854_v23 = vpop.eup %3853  ;;  %2646 = vst [vmem:[%s6178_s5 + $0x50] sm:$0xff] %v3223_v49  ;;  %v1403_v52 = vmul.f32 %v3852_v10, %v4873_v7  ;;  %3879 = vpow2.f32 %v944_v35  ;;  %v948_v61 = vmul.f32 1.442695, %v780_v12  ;;  %v4997_v29 = vadd.f32 %v525_v16, %v4741_v62 }
 0x138   :  { %v3856_v26 = vpop.eup %3855  ;;  %v1404_v28 = vmul.f32 %v3854_v23, %v4879_v1  ;;  %3881 = vrcp.f32 %v1155_v22  ;;  %v781_v31 = vsub.f32 0.0, %v4990_v55  ;;  %v1518_v59 = vpack.c.bf16 %v1402_v13, %v1400_v37  ;;  %v527_v32 = vpop.f32.mrf.mxu0 }
 0x139   :  { %v3858_v33 = vpop.eup %3857  ;;  %v3224_v6 = vpack.c.bf16 %v1403_v52, %v1402_v13  ;;  %v1156_v36 = vadd.f32 1.0, %v3856_v26  ;;  %3883 = vpow2.f32 %v946_v15  ;;  %v782_v44 = vsub.f32 0.0, %v4997_v29 }
 0x13a   :  { %v3860_v7 = vpop.eup %3859  ;;  %v1405_v18 = vmul.f32 %v3858_v33, %v4887_v40  ;;  %3885 = vpow2.f32 %v948_v61  ;;  %v950_v38 = vmul.f32 1.442695, %v781_v31  ;;  %3597 = vmatmul.mubr.bf16.gmra.mxu1 %v1518_v59  ;;  %v5004_v45 = vadd.f32 %v527_v32, %v4743_v63  ;;  %v531_v1 = vpop.f32.mrf.mxu0 }
 0x13b   :  { %v3862_v42 = vpop.eup %3861  ;;  %2647 = vst [vmem:[%s6178_s5 + $0x58] sm:$0xff] %v3224_v6  ;;  %3887 = vrcp.f32 %v1156_v36  ;;  %v1157_v37 = vadd.f32 1.0, %v3860_v7  ;;  %v952_v50 = vmul.f32 1.442695, %v782_v44  ;;  %v5010_v53 = vadd.f32 %v531_v1, %v4741_v62  ;;  %v673_v61 = vpop.f32.mrf.mxu1 }
 0x13c   :  { %v3864_v35 = vpop.eup %3863  ;;  %v3225_v40 = vpack.c.bf16 %v1405_v18, %v1404_v28  ;;  %v1406_v56 = vmul.f32 %v3862_v42, %v4890_v46  ;;  %3889 = vpow2.f32 %v950_v38  ;;  %v783_v57 = vsub.f32 0.0, %v5004_v45  ;;  %v533_v60 = vpop.f32.mrf.mxu0 }
 0x13d   :  { %v3866_v4 = vpop.eup %3865  ;;  %3891 = vrcp.f32 %v1157_v37  ;;  %v1158_v5 = vadd.f32 1.0, %v3864_v35  ;;  %v784_v11 = vsub.f32 0.0, %v5010_v53  ;;  %v5016_v49 = vadd.f32 %v533_v60, %v4743_v63 }
 0x13e   :  { %v3868_v13 = vpop.eup %3867  ;;  %2648 = vst [vmem:[%s6178_s5 + $0x60] sm:$0xff] %v3225_v40  ;;  %v1407_v12 = vmul.f32 %v3866_v4, %v4898_v17  ;;  %3893 = vpow2.f32 %v952_v50  ;;  %v954_v46 = vmul.f32 1.442695, %v783_v57  ;;  %v535_v10 = vpop.f32.mrf.mxu0  ;;  %v1520_v22 = vpack.c.bf16 %v1406_v56, %v1404_v28 }
 0x13f   :  { %v3870_v15 = vpop.eup %3869  ;;  %3895 = vrcp.f32 %v1158_v5  ;;  %v1159_v16 = vadd.f32 1.0, %v3868_v13  ;;  %v956_v23 = vmul.f32 1.442695, %v784_v11  ;;  %v785_v52 = vsub.f32 0.0, %v5016_v49  ;;  %v675_v13 = vpop.f32.mrf.mxu1 }
 0x140   :  { %v3872_v26 = vpop.eup %3871  ;;  %v3226_v31 = vpack.c.bf16 %v1407_v12, %v1406_v56  ;;  %3897 = vpow2.f32 %v954_v46  ;;  %v5024_v59 = vadd.f32 %v535_v10, %v4741_v62  ;;  %3600 = vmatprep.mubr.bf16.mxu1 %v1520_v22  ;;  %v537_v32 = vpop.f32.mrf.mxu0  ;;  %v5027_v17 = vadd.f32 %v673_v61, %v4743_v63 }
 0x141   :  { %v3874_v33 = vpop.eup %3873  ;;  %3899 = vrcp.f32 %v1159_v16  ;;  %v1160_v28 = vadd.f32 1.0, %v3872_v26  ;;  %v958_v6 = vmul.f32 1.442695, %v785_v52  ;;  %v5030_v36 = vadd.f32 %v537_v32, %v4743_v63 }
 0x142   :  { %v3876_v44 = vpop.eup %3875  ;;  %2649 = vst [vmem:[%s6178_s5 + $0x68] sm:$0xff] %v3226_v31  ;;  %v1408_v7 = vmul.f32 %v3870_v15, %v4905_v20  ;;  %v1409_v18 = vmul.f32 %v3874_v33, %v4908_v30  ;;  %3901 = vpow2.f32 %v956_v23  ;;  %v786_v38 = vsub.f32 0.0, %v5024_v59  ;;  %v541_v1 = vpop.f32.mrf.mxu0 }
 0x143   :  { %v3878_v42 = vpop.eup %3877  ;;  %3903 = vrcp.f32 %v1160_v28  ;;  %v1161_v37 = vadd.f32 1.0, %v3876_v44  ;;  %v787_v50 = vsub.f32 0.0, %v5030_v36  ;;  %v5040_v35 = vadd.f32 %v541_v1, %v4741_v62 }
 0x144   :  { %v3880_v40 = vpop.eup %3879  ;;  %v3227_v56 = vpack.c.bf16 %v1409_v18, %v1408_v7  ;;  %v1410_v57 = vmul.f32 %v3878_v42, %v4917_v39  ;;  %3905 = vpow2.f32 %v958_v6  ;;  %v960_v20 = vmul.f32 1.442695, %v786_v38  ;;  %v543_v60 = vpop.f32.mrf.mxu0 }
 0x145   :  { %v3882_v30 = vpop.eup %3881  ;;  %3907 = vrcp.f32 %v1161_v37  ;;  %v1162_v4 = vadd.f32 1.0, %v3880_v40  ;;  %v962_v5 = vmul.f32 1.442695, %v787_v50  ;;  %v788_v11 = vsub.f32 0.0, %v5040_v35 }
 0x146   :  { %v3884_v12 = vpop.eup %3883  ;;  %2650 = vst [vmem:[%s6178_s5 + $0x70] sm:$0xff] %v3227_v56  ;;  %v1411_v46 = vmul.f32 %v3882_v30, %v4926_v58  ;;  %3909 = vpow2.f32 %v960_v20  ;;  %v5049_v39 = vadd.f32 %v543_v60, %v4743_v63  ;;  %v545_v10 = vpop.f32.mrf.mxu0  ;;  %v1522_v22 = vpack.c.bf16 %v1410_v57, %v1408_v7 }
 0x147   :  { %v3886_v15 = vpop.eup %3885  ;;  %3911 = vrcp.f32 %v1162_v4  ;;  %v1163_v16 = vadd.f32 1.0, %v3884_v12  ;;  %v964_v23 = vmul.f32 1.442695, %v788_v11  ;;  %v5052_v52 = vadd.f32 %v545_v10, %v4741_v62  ;;  %v677_v7 = vpop.f32.mrf.mxu1 }
 0x148   :  { %v3888_v61 = vpop.eup %3887  ;;  %v3228_v26 = vpack.c.bf16 %v1411_v46, %v1410_v57  ;;  %v1164_v31 = vadd.f32 1.0, %v3886_v15  ;;  %3913 = vpow2.f32 %v962_v5  ;;  %v789_v32 = vsub.f32 0.0, %v5049_v39  ;;  %3601 = vmatmul.mubr.bf16.gmra.mxu1 %v1522_v22  ;;  %v547_v58 = vpop.f32.mrf.mxu0 }
 0x149   :  { %v3890_v33 = vpop.eup %3889  ;;  %3915 = vrcp.f32 %v1163_v16  ;;  %v790_v28 = vsub.f32 0.0, %v5052_v52  ;;  %v5057_v6 = vadd.f32 %v547_v58, %v4743_v63  ;;  %v5060_v44 = vadd.f32 %v675_v13, %v4741_v62 }
 0x14a   :  { %v3892_v18 = vpop.eup %3891  ;;  %2651 = vst [vmem:[%s6178_s5 + $0x78] sm:$0xff] %v3228_v26  ;;  %v1412_v38 = vmul.f32 %v3888_v61, %v4929_v24  ;;  %3917 = vrcp.f32 %v1164_v31  ;;  %v1165_v1 = vadd.f32 1.0, %v3890_v33  ;;  %v966_v42 = vmul.f32 1.442695, %v789_v32  ;;  %v551_v37 = vpop.f32.mrf.mxu0 }
 0x14b   :  { %v3894_v50 = vpop.eup %3893  ;;  %v1413_v40 = vmul.f32 %v3892_v18, %v4935_v47  ;;  %3919 = vpow2.f32 %v964_v23  ;;  %v968_v56 = vmul.f32 1.442695, %v790_v28  ;;  %v791_v57 = vsub.f32 0.0, %v5057_v6 }
 0x14c   :  { %v3896_v20 = vpop.eup %3895  ;;  %3921 = vrcp.f32 %v1165_v1  ;;  %v1166_v60 = vadd.f32 1.0, %v3894_v50  ;;  %v5069_v30 = vadd.f32 %v551_v37, %v4741_v62  ;;  %v553_v4 = vpop.f32.mrf.mxu0  ;;  %v5072_v24 = vadd.f32 %v677_v7, %v4743_v63 }
 0x14d   :  { %v3898_v5 = vpop.eup %3897  ;;  %v3229_v11 = vpack.c.bf16 %v1413_v40, %v1412_v38  ;;  %v1414_v13 = vmul.f32 %v3896_v20, %v4943_v41  ;;  %3923 = vpow2.f32 %v966_v42  ;;  %v970_v47 = vmul.f32 1.442695, %v791_v57 }
 0x14e   :  { %v3900_v12 = vpop.eup %3899  ;;  %3925 = vrcp.f32 %v1166_v60  ;;  %v1167_v46 = vadd.f32 1.0, %v3898_v5  ;;  %v792_v10 = vsub.f32 0.0, %v5069_v30  ;;  %v5077_v22 = vadd.f32 %v553_v4, %v4743_v63  ;;  %v555_v15 = vpop.f32.mrf.mxu0 }
 0x14f   :  { %v3902_v16 = vpop.eup %3901  ;;  %2652 = vst [vmem:[%s6178_s5 + $0x80] sm:$0xff] %v3229_v11  ;;  %v1415_v23 = vmul.f32 %v3900_v12, %v4946_v48  ;;  %3927 = vpow2.f32 %v968_v56  ;;  %v5084_v41 = vadd.f32 %v555_v15, %v4741_v62  ;;  %v1524_v61 = vpack.c.bf16 %v1414_v13, %v1412_v38 }
 0x150   :  { %v3904_v26 = vpop.eup %3903  ;;  %3929 = vrcp.f32 %v1167_v46  ;;  %v1168_v31 = vadd.f32 1.0, %v3902_v16  ;;  %v972_v32 = vmul.f32 1.442695, %v792_v10  ;;  %v793_v58 = vsub.f32 0.0, %v5077_v22  ;;  %v557_v33 = vpop.f32.mrf.mxu0 }
 0x151   :  { %v3906_v28 = vpop.eup %3905  ;;  %v3230_v7 = vpack.c.bf16 %v1415_v23, %v1414_v13  ;;  %v1416_v18 = vmul.f32 %v3904_v26, %v4956_v3  ;;  %3931 = vpow2.f32 %v970_v47  ;;  %v794_v1 = vsub.f32 0.0, %v5084_v41  ;;  %3604 = vmatprep.mubr.bf16.mxu1 %v1524_v61 }
 0x152   :  { %v3908_v48 = vpop.eup %3907  ;;  %3933 = vrcp.f32 %v1168_v31  ;;  %v1169_v42 = vadd.f32 1.0, %v3906_v28  ;;  %v974_v37 = vmul.f32 1.442695, %v793_v58  ;;  %v5090_v38 = vadd.f32 %v557_v33, %v4743_v63  ;;  %v561_v50 = vpop.f32.mrf.mxu0 }
 0x153   :  { %v3910_v40 = vpop.eup %3909  ;;  %2653 = vst [vmem:[%s6178_s5 + $0x88] sm:$0xff] %v3230_v7  ;;  %v1417_v56 = vmul.f32 %v3908_v48, %v4961_v19  ;;  %3935 = vpow2.f32 %v972_v32  ;;  %v976_v3 = vmul.f32 1.442695, %v794_v1  ;;  %v5097_v57 = vadd.f32 %v561_v50, %v4741_v62 }
 0x154   :  { %v3912_v20 = vpop.eup %3911  ;;  %3937 = vrcp.f32 %v1169_v42  ;;  %v1170_v60 = vadd.f32 1.0, %v3910_v40  ;;  %v795_v4 = vsub.f32 0.0, %v5090_v38  ;;  %v563_v5 = vpop.f32.mrf.mxu0  ;;  %v840_v11 = vsub.f32 0.0, %v4985_v9 }
 0x155   :  { %v3914_v13 = vpop.eup %3913  ;;  %v3231_v47 = vpack.c.bf16 %v1417_v56, %v1416_v18  ;;  %v1418_v12 = vmul.f32 %v3912_v20, %v4968_v0  ;;  %3939 = vpow2.f32 %v974_v37  ;;  %v796_v19 = vsub.f32 0.0, %v5097_v57 }
 0x156   :  { %v3916_v46 = vpop.eup %3915  ;;  %3941 = vrcp.f32 %v1170_v60  ;;  %v1171_v10 = vadd.f32 1.0, %v3914_v13  ;;  %v978_v15 = vmul.f32 1.442695, %v795_v4  ;;  %v5104_v16 = vadd.f32 %v563_v5, %v4743_v63  ;;  %v565_v23 = vpop.f32.mrf.mxu0 }
 0x157   :  { %v3918_v61 = vpop.eup %3917  ;;  %2654 = vst [vmem:[%s6178_s5 + $0x90] sm:$0xff] %v3231_v47  ;;  %v1419_v26 = vmul.f32 %v3916_v46, %v4974_v2  ;;  %3943 = vpow2.f32 %v976_v3  ;;  %v980_v0 = vmul.f32 1.442695, %v796_v19  ;;  %v5111_v31 = vadd.f32 %v565_v23, %v4741_v62 }
 0x158   :  { %v3920_v32 = vpop.eup %3919  ;;  %v1420_v58 = vmul.f32 %v3918_v61, %v4981_v54  ;;  %3945 = vrcp.f32 %v1171_v10  ;;  %v797_v33 = vsub.f32 0.0, %v5104_v16  ;;  %v1526_v28 = vpack.c.bf16 %v1418_v12, %v1416_v18  ;;  %v567_v7 = vpop.f32.mrf.mxu0 }
 0x159   :  { %v3922_v1 = vpop.eup %3921  ;;  %v3232_v48 = vpack.c.bf16 %v1419_v26, %v1418_v12  ;;  %v1172_v42 = vadd.f32 1.0, %v3920_v32  ;;  %3947 = vpow2.f32 %v978_v15  ;;  %v798_v37 = vsub.f32 0.0, %v5111_v31 }
 0x15a   :  { %v3924_v2 = vpop.eup %3923  ;;  %v1421_v50 = vmul.f32 %v3922_v1, %v4990_v55  ;;  %3949 = vpow2.f32 %v980_v0  ;;  %v982_v40 = vmul.f32 1.442695, %v797_v33  ;;  %3605 = vmatmul.mubr.bf16.gmra.mxu1 %v1526_v28  ;;  %v5118_v56 = vadd.f32 %v567_v7, %v4743_v63  ;;  %v571_v54 = vpop.f32.mrf.mxu0 }
 0x15b   :  { %v3926_v3 = vpop.eup %3925  ;;  %2655 = vst [vmem:[%s6178_s5 + $0x98] sm:$0xff] %v3232_v48  ;;  %3951 = vrcp.f32 %v1172_v42  ;;  %v1173_v18 = vadd.f32 1.0, %v3924_v2  ;;  %v984_v20 = vmul.f32 1.442695, %v798_v37  ;;  %v5124_v60 = vadd.f32 %v571_v54, %v4741_v62 }
 0x15c   :  { %v3928_v4 = vpop.eup %3927  ;;  %v3233_v55 = vpack.c.bf16 %v1421_v50, %v1420_v58  ;;  %v1422_v5 = vmul.f32 %v3926_v3, %v4997_v29  ;;  %3953 = vpow2.f32 %v982_v40  ;;  %v799_v13 = vsub.f32 0.0, %v5118_v56  ;;  %v573_v47 = vpop.f32.mrf.mxu0 }
 0x15d   :  { %v3930_v12 = vpop.eup %3929  ;;  %3955 = vrcp.f32 %v1173_v18  ;;  %v1174_v19 = vadd.f32 1.0, %v3928_v4  ;;  %v800_v46 = vsub.f32 0.0, %v5124_v60  ;;  %v5130_v10 = vadd.f32 %v573_v47, %v4743_v63 }
 0x15e   :  { %v3932_v15 = vpop.eup %3931  ;;  %2656 = vst [vmem:[%s6178_s5 + $0xa0] sm:$0xff] %v3233_v55  ;;  %v1423_v23 = vmul.f32 %v3930_v12, %v5004_v45  ;;  %3957 = vpow2.f32 %v984_v20  ;;  %v986_v29 = vmul.f32 1.442695, %v799_v13  ;;  %v575_v61 = vpop.f32.mrf.mxu0  ;;  %v1528_v26 = vpack.c.bf16 %v1422_v5, %v1420_v58 }
 0x15f   :  { %v3934_v0 = vpop.eup %3933  ;;  %3959 = vrcp.f32 %v1174_v19  ;;  %v1175_v32 = vadd.f32 1.0, %v3932_v15  ;;  %v988_v33 = vmul.f32 1.442695, %v800_v46  ;;  %v801_v28 = vsub.f32 0.0, %v5130_v10 }
 0x160   :  { %v3936_v7 = vpop.eup %3935  ;;  %v3234_v1 = vpack.c.bf16 %v1423_v23, %v1422_v5  ;;  %3961 = vpow2.f32 %v986_v29  ;;  %v1220_v48 = vadd.f32 1.0, %v4816_v25  ;;  %v5139_v42 = vadd.f32 %v575_v61, %v4741_v62  ;;  %3608 = vmatprep.mubr.bf16.mxu1 %v1528_v26  ;;  %v577_v45 = vpop.f32.mrf.mxu0 }
 0x161   :  { %v3938_v37 = vpop.eup %3937  ;;  %3963 = vrcp.f32 %v1175_v32  ;;  %v1176_v2 = vadd.f32 1.0, %v3936_v7  ;;  %v1221_v58 = vadd.f32 1.0, %v4822_v34  ;;  %v841_v50 = vsub.f32 0.0, %v5027_v17  ;;  %v681_v7 = vpop.f32.mrf.mxu1 }
 0x162   :  { %v3940_v40 = vpop.eup %3939  ;;  %2657 = vst [vmem:[%s6178_s5 + $0xa8] sm:$0xff] %v3234_v1  ;;  %v1424_v54 = vmul.f32 %v3934_v0, %v5010_v53  ;;  %v1425_v25 = vmul.f32 %v3938_v37, %v5016_v49  ;;  %3965 = vpow2.f32 %v988_v33  ;;  %v990_v3 = vmul.f32 1.442695, %v801_v28  ;;  %v581_v18 = vpop.f32.mrf.mxu0 }
 0x163   :  { %v3942_v20 = vpop.eup %3941  ;;  %3967 = vrcp.f32 %v1176_v2  ;;  %v1177_v4 = vadd.f32 1.0, %v3940_v40  ;;  %v802_v55 = vsub.f32 0.0, %v5139_v42  ;;  %v5150_v34 = vadd.f32 %v577_v45, %v4743_v63 }
 0x164   :  { %v3944_v5 = vpop.eup %3943  ;;  %v3235_v13 = vpack.c.bf16 %v1425_v25, %v1424_v54  ;;  %v1426_v47 = vmul.f32 %v3942_v20, %v5024_v59  ;;  %3969 = vrcp.f32 %v1220_v48  ;;  %v5154_v53 = vadd.f32 %v581_v18, %v4741_v62  ;;  %v583_v49 = vpop.f32.mrf.mxu0 }
 0x165   :  { %v3946_v12 = vpop.eup %3945  ;;  %3971 = vrcp.f32 %v1177_v4  ;;  %v1178_v19 = vadd.f32 1.0, %v3944_v5  ;;  %v842_v46 = vsub.f32 0.0, %v5060_v44  ;;  %v843_v15 = vsub.f32 0.0, %v5072_v24  ;;  %v683_v5 = vpop.f32.mrf.mxu1 }
 0x166   :  { %v3948_v23 = vpop.eup %3947  ;;  %2658 = vst [vmem:[%s6178_s5 + $0xb0] sm:$0xff] %v3235_v13  ;;  %v1427_v29 = vmul.f32 %v3946_v12, %v5030_v36  ;;  %3973 = vpow2.f32 %v990_v3  ;;  %v5164_v59 = vmul.f32 1.442695, %v840_v11  ;;  %v585_v61 = vpop.f32.mrf.mxu0  ;;  %v1530_v26 = vpack.c.bf16 %v1426_v47, %v1424_v54 }
 0x167   :  { %v3950_v0 = vpop.eup %3949  ;;  %3975 = vrcp.f32 %v1178_v19  ;;  %v1179_v32 = vadd.f32 1.0, %v3948_v23  ;;  %v992_v33 = vmul.f32 1.442695, %v802_v55  ;;  %v803_v28 = vsub.f32 0.0, %v5150_v34 }
 0x168   :  { %v3952_v1 = vpop.eup %3951  ;;  %v3236_v48 = vpack.c.bf16 %v1427_v29, %v1426_v47  ;;  %v1180_v45 = vadd.f32 1.0, %v3950_v0  ;;  %3977 = vrcp.f32 %v1221_v58  ;;  %v804_v36 = vsub.f32 0.0, %v5154_v53  ;;  %3609 = vmatmul.mubr.bf16.gmra.mxu1 %v1530_v26  ;;  %v587_v37 = vpop.f32.mrf.mxu0 }
 0x169   :  { %v3954_v2 = vpop.eup %3953  ;;  %3979 = vrcp.f32 %v1179_v32  ;;  %v1222_v11 = vadd.f32 1.0, %v4828_v43  ;;  %v5170_v40 = vadd.f32 %v583_v49, %v4743_v63  ;;  %v5172_v54 = vmul.f32 1.442695, %v841_v50 }
 0x16a   :  { %v3956_v25 = vpop.eup %3955  ;;  %2659 = vst [vmem:[%s6178_s5 + $0xb8] sm:$0xff] %v3236_v48  ;;  %3981 = vrcp.f32 %v1180_v45  ;;  %v1181_v58 = vadd.f32 1.0, %v3954_v2  ;;  %v1223_v3 = vadd.f32 1.0, %v4834_v51  ;;  %v5179_v18 = vadd.f32 %v585_v61, %v4741_v62  ;;  %v591_v20 = vpop.f32.mrf.mxu0 }
 0x16b   :  { %v3958_v4 = vpop.eup %3957  ;;  %v1428_v43 = vmul.f32 %v3952_v1, %v5040_v35  ;;  %v1429_v55 = vmul.f32 %v3956_v25, %v5049_v39  ;;  %3983 = vpow2.f32 %v992_v33  ;;  %v994_v50 = vmul.f32 1.442695, %v803_v28 }
 0x16c   :  { %v3960_v13 = vpop.eup %3959  ;;  %3985 = vrcp.f32 %v1181_v58  ;;  %v1182_v47 = vadd.f32 1.0, %v3958_v4  ;;  %v996_v49 = vmul.f32 1.442695, %v804_v36  ;;  %v5184_v12 = vadd.f32 %v681_v7, %v4741_v62  ;;  %v593_v51 = vpop.f32.mrf.mxu0 }
 0x16d   :  { %v3962_v19 = vpop.eup %3961  ;;  %v3237_v23 = vpack.c.bf16 %v1429_v55, %v1428_v43  ;;  %v1430_v29 = vmul.f32 %v3960_v13, %v5052_v52  ;;  %3987 = vrcp.f32 %v1222_v11  ;;  %v805_v35 = vsub.f32 0.0, %v5170_v40  ;;  %v685_v7 = vpop.f32.mrf.mxu1 }
 0x16e   :  { %v3964_v61 = vpop.eup %3963  ;;  %3989 = vrcp.f32 %v1182_v47  ;;  %v1183_v39 = vadd.f32 1.0, %v3962_v19  ;;  %v806_v26 = vsub.f32 0.0, %v5179_v18  ;;  %v5190_v0 = vadd.f32 %v587_v37, %v4743_v63  ;;  %v595_v32 = vpop.f32.mrf.mxu0 }
 0x16f   :  { %v3966_v33 = vpop.eup %3965  ;;  %2660 = vst [vmem:[%s6178_s5 + $0xc0] sm:$0xff] %v3237_v23  ;;  %v1431_v28 = vmul.f32 %v3964_v61, %v5057_v6  ;;  %3991 = vpow2.f32 %v994_v50  ;;  %v5197_v52 = vadd.f32 %v591_v20, %v4741_v62  ;;  %v1532_v1 = vpack.c.bf16 %v1430_v29, %v1428_v43  ;;  %v687_v13 = vpop.f32.mrf.mxu1 }
 0x170   :  { %v3968_v48 = vpop.eup %3967  ;;  %3993 = vrcp.f32 %v1183_v39  ;;  %v1184_v45 = vadd.f32 1.0, %v3966_v33  ;;  %v1072_v36 = vmul.f32 1.442695, %v842_v46  ;;  %v5203_v37 = vmul.f32 1.442695, %v843_v15  ;;  %v5205_v2 = vpop.f32.mrf.mxu0 }
 0x171   :  { %v3970_v11 = vpop.eup %3969  ;;  %v3238_v6 = vpack.c.bf16 %v1431_v28, %v1430_v29  ;;  %3995 = vrcp.f32 %v1223_v3  ;;  %v998_v25 = vmul.f32 1.442695, %v805_v35  ;;  %v844_v58 = vsub.f32 0.0, %v5184_v12  ;;  %3612 = vmatprep.mubr.bf16.mxu1 %v1532_v1  ;;  %v691_v28 = vpop.f32.mrf.mxu1 }
 0x172   :  { %v3972_v20 = vpop.eup %3971  ;;  %3997 = vrcp.f32 %v1184_v45  ;;  %v1000_v4 = vmul.f32 1.442695, %v806_v26  ;;  %v807_v43 = vsub.f32 0.0, %v5190_v0  ;;  %v5210_v46 = vadd.f32 %v683_v5, %v4743_v63  ;;  %v5218_v47 = vpop.f32.mrf.mxu0 }
 0x173   :  { %v3974_v55 = vpop.eup %3973  ;;  %2661 = vst [vmem:[%s6178_s5 + $0xc8] sm:$0xff] %v3238_v6  ;;  %v1432_v15 = vmul.f32 %v3968_v48, %v5069_v30  ;;  %v1433_v3 = vmul.f32 %v3972_v20, %v5077_v22  ;;  %3999 = vpow2.f32 %v996_v49  ;;  %v808_v50 = vsub.f32 0.0, %v5197_v52 }
 0x174   :  { %v3976_v19 = vpop.eup %3975  ;;  %v5221_v23 = vmul.f32 %v3970_v11, %v4753_v8  ;;  %v1185_v5 = vadd.f32 1.0, %v3974_v55  ;;  %4001 = vpow2.f32 %v5164_v59  ;;  %v5225_v29 = vadd.f32 %v593_v51, %v4743_v63 }
 0x175   :  { %v3978_v35 = vpop.eup %3977  ;;  %v3239_v30 = vpack.c.bf16 %v1433_v3, %v1432_v15  ;;  %4003 = vpow2.f32 %v998_v25  ;;  %v1076_v22 = vmul.f32 1.442695, %v844_v58  ;;  %v5228_v49 = vadd.f32 %v595_v32, %v4741_v62 }
 0x176   :  { %v3980_v61 = vpop.eup %3979  ;;  %v1434_v39 = vmul.f32 %v3976_v19, %v5084_v41  ;;  %4005 = vrcp.f32 %v1185_v5  ;;  %v1477_v8 = vmul.f32 %v3978_v35, %v4760_v14  ;;  %v1002_v26 = vmul.f32 1.442695, %v807_v43  ;;  %v5241_v41 = vpop.f32.mrf.mxu0 }
 0x177   :  { %v3982_v33 = vpop.eup %3981  ;;  %2662 = vst [vmem:[%s6178_s5 + $0xd0] sm:$0xff] %v3239_v30  ;;  %v1435_v59 = vmul.f32 %v3980_v61, %v5090_v38  ;;  %4007 = vpow2.f32 %v5172_v54  ;;  %v845_v51 = vsub.f32 0.0, %v5210_v46  ;;  %v5239_v32 = vadd.f32 %v685_v7, %v4741_v62  ;;  %v693_v43 = vpop.f32.mrf.mxu1 }
 0x178   :  { %v3984_v1 = vpop.eup %3983  ;;  %v3261_v14 = vpack.c.bf16 %v1477_v8, %v5221_v23  ;;  %4009 = vpow2.f32 %v1000_v4  ;;  %v1004_v48 = vmul.f32 1.442695, %v808_v50  ;;  %v809_v45 = vsub.f32 0.0, %v5225_v29  ;;  %v5256_v55 = vpop.f32.mrf.mxu0 }
 0x179   :  { %v3986_v11 = vpop.eup %3985  ;;  %v3240_v6 = vpack.c.bf16 %v1435_v59, %v1434_v39  ;;  %v1186_v38 = vadd.f32 1.0, %v3984_v1  ;;  %4011 = vpow2.f32 %v1072_v36  ;;  %v810_v54 = vsub.f32 0.0, %v5228_v49 }
 0x17a   :  { %v3988_v25 = vpop.eup %3987  ;;  %v5247_v7 = vmul.f32 %v3982_v33, %v5097_v57  ;;  %v1437_v58 = vmul.f32 %v3986_v11, %v5104_v16  ;;  %2684 = vst [vmem:[%s6178_s5 + $0x180] sm:$0xff] %v3261_v14  ;;  %4013 = vpow2.f32 %v1002_v26  ;;  %v1534_v20 = vpack.c.bf16 %v1434_v39, %v1432_v15  ;;  %v695_v33 = vpop.f32.mrf.mxu1 }
 0x17b   :  { %v3990_v4 = vpop.eup %3989  ;;  %2663 = vst [vmem:[%s6178_s5 + $0xd8] sm:$0xff] %v3240_v6  ;;  %4015 = vrcp.f32 %v1186_v38  ;;  %v1078_v36 = vmul.f32 1.442695, %v845_v51  ;;  %v1006_v16 = vmul.f32 1.442695, %v809_v45  ;;  %v846_v50 = vsub.f32 0.0, %v5239_v32  ;;  %v5280_v59 = vpop.f32.mrf.mxu0 }
 0x17c   :  { %v3992_v57 = vpop.eup %3991  ;;  %v3241_v3 = vpack.c.bf16 %v1437_v58, %v5247_v7  ;;  %4017 = vpow2.f32 %v5203_v37  ;;  %3613 = vmatmul.mubr.bf16.gmra.mxu1 %v1534_v20  ;;  %v5262_v19 = vmul.f32 %v3988_v25, %v4768_v21  ;;  %v5265_v35 = vadd.f32 %v687_v13, %v4743_v63  ;;  %v697_v25 = vpop.f32.mrf.mxu1 }
 0x17d   :  { %v3994_v15 = vpop.eup %3993  ;;  %v1187_v5 = vadd.f32 1.0, %v3992_v57  ;;  %4019 = vpow2.f32 %v1004_v48  ;;  %v1438_v37 = vmul.f32 %v3990_v4, %v5111_v31  ;;  %v1008_v39 = vmul.f32 1.442695, %v810_v54  ;;  %v5298_v58 = vpop.f32.mrf.mxu0 }
 0x17e   :  { %v3996_v30 = vpop.eup %3995  ;;  %2664 = vst [vmem:[%s6178_s5 + $0xe0] sm:$0xff] %v3241_v3  ;;  %v1439_v61 = vmul.f32 %v3994_v15, %v5118_v56  ;;  %4021 = vpow2.f32 %v1076_v22  ;;  %v5275_v26 = vadd.f32 %v5205_v2, %v4743_v63  ;;  %v5278_v13 = vadd.f32 %v691_v28, %v4741_v62 }
 0x17f   :  { %v3998_v8 = vpop.eup %3997  ;;  %4023 = vrcp.f32 %v1187_v5  ;;  %v1479_v21 = vmul.f32 %v3996_v30, %v4776_v27  ;;  %v5283_v56 = vadd.f32 %v693_v43, %v4743_v63  ;;  %v5287_v2 = vadd.f32 %v695_v33, %v4741_v62 }
 0x180   :  { %v4000_v51 = vpop.eup %3999  ;;  %v3242_v31 = vpack.c.bf16 %v1439_v61, %v1438_v37  ;;  %4025 = vpow2.f32 %v1006_v16  ;;  %v1080_v48 = vmul.f32 1.442695, %v846_v50  ;;  %v847_v45 = vsub.f32 0.0, %v5265_v35 }
 0x181   :  { %v4002_v22 = vpop.eup %4001  ;;  %v3262_v1 = vpack.c.bf16 %v1479_v21, %v5262_v19  ;;  %v1188_v27 = vadd.f32 1.0, %v4000_v51  ;;  %4027 = vpow2.f32 %v1078_v36  ;;  %v811_v38 = vsub.f32 0.0, %v5275_v26  ;;  %v613_v21 = vpop.f32.mrf.mxu0 }
 0x182   :  { %v4004_v14 = vpop.eup %4003  ;;  %2665 = vst [vmem:[%s6178_s5 + $0xe8] sm:$0xff] %v3242_v31  ;;  %v1224_v28 = vadd.f32 1.0, %v4002_v22  ;;  %4029 = vpow2.f32 %v1008_v39  ;;  %v848_v54 = vsub.f32 0.0, %v5278_v13  ;;  %v5301_v4 = vmul.f32 %v3998_v8, %v5124_v60 }
 0x183   :  { %v4006_v11 = vpop.eup %4005  ;;  %2685 = vst [vmem:[%s6178_s5 + $0x188] sm:$0xff] %v3262_v1  ;;  %4031 = vrcp.f32 %v1188_v27  ;;  %v1189_v6 = vadd.f32 1.0, %v4004_v14  ;;  %v849_v43 = vsub.f32 0.0, %v5283_v56  ;;  %v850_v16 = vsub.f32 0.0, %v5287_v2 }
 0x184   :  { %v4008_v20 = vpop.eup %4007  ;;  %v1441_v36 = vmul.f32 %v4006_v11, %v5130_v10  ;;  %4033 = vrcp.f32 %v1224_v28  ;;  %v1536_v50 = vpack.c.bf16 %v1438_v37, %v5247_v7  ;;  %v5309_v60 = vadd.f32 %v697_v25, %v4743_v63 }
 0x185   :  { %v4010_v57 = vpop.eup %4009  ;;  %4035 = vrcp.f32 %v1189_v6  ;;  %v1225_v3 = vadd.f32 1.0, %v4008_v20  ;;  %v1010_v39 = vmul.f32 1.442695, %v811_v38  ;;  %v5313_v8 = vadd.f32 %v5218_v47, %v4741_v62  ;;  %v615_v38 = vpop.f32.mrf.mxu0 }
 0x186   :  { %v4012_v15 = vpop.eup %4011  ;;  %v3243_v5 = vpack.c.bf16 %v1441_v36, %v5301_v4  ;;  %v1190_v30 = vadd.f32 1.0, %v4010_v57  ;;  %4037 = vpow2.f32 %v1080_v48  ;;  %3616 = vmatprep.mubr.bf16.mxu1 %v1536_v50  ;;  %v5320_v37 = vadd.f32 %v5241_v41, %v4743_v63  ;;  %v701_v41 = vpop.f32.mrf.mxu1 }
 0x187   :  { %v4014_v61 = vpop.eup %4013  ;;  %4039 = vrcp.f32 %v1225_v3  ;;  %v1226_v10 = vadd.f32 1.0, %v4012_v15  ;;  %v1082_v31 = vmul.f32 1.442695, %v847_v45  ;;  %v1084_v22 = vmul.f32 1.442695, %v848_v54 }
 0x188   :  { %v4016_v33 = vpop.eup %4015  ;;  %2666 = vst [vmem:[%s6178_s5 + $0xf0] sm:$0xff] %v3243_v5  ;;  %4041 = vrcp.f32 %v1190_v30  ;;  %v1191_v7 = vadd.f32 1.0, %v4014_v61  ;;  %v5322_v27 = vmul.f32 1.442695, %v849_v43  ;;  %v851_v14 = vsub.f32 0.0, %v5309_v60 }
 0x189   :  { %v4018_v51 = vpop.eup %4017  ;;  %4043 = vrcp.f32 %v1226_v10  ;;  %v812_v11 = vsub.f32 0.0, %v5313_v8  ;;  %v5326_v6 = vmul.f32 1.442695, %v850_v16  ;;  %v813_v54 = vsub.f32 0.0, %v5320_v37  ;;  %v703_v10 = vpop.f32.mrf.mxu1 }
 0x18a   :  { %v4020_v1 = vpop.eup %4019  ;;  %4045 = vrcp.f32 %v1191_v7  ;;  %v1227_v47 = vadd.f32 1.0, %v4018_v51  ;;  %v5331_v20 = vadd.f32 %v5256_v55, %v4741_v62  ;;  %v1442_v43 = vmul.f32 %v4016_v33, %v5139_v42 }
 0x18b   :  { %v4022_v28 = vpop.eup %4021  ;;  %v1192_v48 = vadd.f32 1.0, %v4020_v1  ;;  %4047 = vpow2.f32 %v1010_v39  ;;  %v5337_v3 = vadd.f32 %v5280_v59, %v4743_v63  ;;  %v5339_v15 = vmul.f32 1.442695, %v851_v14 }
 0x18c   :  { %v4024_v25 = vpop.eup %4023  ;;  %4049 = vrcp.f32 %v1227_v47  ;;  %v1228_v45 = vadd.f32 1.0, %v4022_v28  ;;  %v5342_v5 = vadd.f32 %v701_v41, %v4741_v62  ;;  %v1012_v42 = vmul.f32 1.442695, %v812_v11 }
 0x18d   :  { %v4026_v36 = vpop.eup %4025  ;;  %v1443_v57 = vmul.f32 %v4024_v25, %v5150_v34  ;;  %4051 = vrcp.f32 %v1192_v48  ;;  %v5344_v34 = vpop.f32.mrf.mxu0  ;;  %v1014_v33 = vmul.f32 1.442695, %v813_v54  ;;  %v814_v7 = vsub.f32 0.0, %v5331_v20 }
 0x18e   :  { %v4028_v16 = vpop.eup %4027  ;;  %4053 = vrcp.f32 %v1228_v45  ;;  %v1193_v50 = vadd.f32 1.0, %v4026_v36  ;;  %v815_v1 = vsub.f32 0.0, %v5337_v3  ;;  %v5356_v47 = vadd.f32 %v613_v21, %v4743_v63  ;;  %v705_v21 = vpop.f32.mrf.mxu1 }
 0x18f   :  { %v4030_v55 = vpop.eup %4029  ;;  %v3244_v30 = vpack.c.bf16 %v1443_v57, %v1442_v43  ;;  %v1229_v61 = vadd.f32 1.0, %v4028_v16  ;;  %4055 = vpow2.f32 %v1082_v31  ;;  %v5353_v31 = vadd.f32 %v5298_v58, %v4741_v62  ;;  %v5371_v45 = vpop.f32.mrf.mxu0 }
 0x190   :  { %v4032_v39 = vpop.eup %4031  ;;  %4057 = vrcp.f32 %v1193_v50  ;;  %v1194_v59 = vadd.f32 1.0, %v4030_v55  ;;  %v5362_v48 = vadd.f32 %v703_v10, %v4743_v63  ;;  %v5365_v11 = vadd.f32 %v615_v38, %v4741_v62  ;;  %v707_v10 = vpop.f32.mrf.mxu1 }
 0x191   :  { %v4034_v51 = vpop.eup %4033  ;;  %2667 = vst [vmem:[%s6178_s5 + $0xf8] sm:$0xff] %v3244_v30  ;;  %4059 = vrcp.f32 %v1229_v61  ;;  %v5359_v28 = vmul.f32 %v4032_v39, %v5154_v53  ;;  %v1538_v53 = vpack.c.bf16 %v1442_v43, %v5301_v4  ;;  %v1016_v57 = vmul.f32 1.442695, %v814_v7  ;;  %v5389_v39 = vpop.f32.mrf.mxu0 }
 0x192   :  { %v4036_v14 = vpop.eup %4035  ;;  %4061 = vrcp.f32 %v1194_v59  ;;  %v5368_v25 = vmul.f32 %v4034_v51, %v4985_v9  ;;  %v852_v16 = vsub.f32 0.0, %v5342_v5  ;;  %v1018_v30 = vmul.f32 1.442695, %v815_v1 }
 0x193   :  { %v4038_v41 = vpop.eup %4037  ;;  %v1445_v58 = vmul.f32 %v4036_v14, %v5170_v40  ;;  %4063 = vpow2.f32 %v1012_v42  ;;  %v816_v40 = vsub.f32 0.0, %v5353_v31  ;;  %3617 = vmatmul.mubr.bf16.gmra.mxu1 %v1538_v53  ;;  %v817_v4 = vsub.f32 0.0, %v5356_v47 }
 0x194   :  { %v4040_v54 = vpop.eup %4039  ;;  %v1230_v36 = vadd.f32 1.0, %v4038_v41  ;;  %4065 = vpow2.f32 %v1084_v22  ;;  %v853_v43 = vsub.f32 0.0, %v5362_v48  ;;  %v5387_v42 = vadd.f32 %v705_v21, %v4741_v62 }
 0x195   :  { %v4042_v38 = vpop.eup %4041  ;;  %v3245_v50 = vpack.c.bf16 %v1445_v58, %v5359_v28  ;;  %v1481_v9 = vmul.f32 %v4040_v54, %v5027_v17  ;;  %4067 = vpow2.f32 %v1014_v33  ;;  %v818_v17 = vsub.f32 0.0, %v5365_v11 }
 0x196   :  { %v4044_v55 = vpop.eup %4043  ;;  %4069 = vrcp.f32 %v1230_v36  ;;  %v5392_v33 = vmul.f32 %v4042_v38, %v5179_v18  ;;  %v1020_v14 = vmul.f32 1.442695, %v816_v40  ;;  %v1094_v53 = vmul.f32 1.442695, %v853_v43  ;;  %v711_v36 = vpop.f32.mrf.mxu1 }
 0x197   :  { %v4046_v22 = vpop.eup %4045  ;;  %2668 = vst [vmem:[%s6178_s5 + $0x100] sm:$0xff] %v3245_v50  ;;  %v3263_v61 = vpack.c.bf16 %v1481_v9, %v5368_v25  ;;  %4071 = vpow2.f32 %v5322_v27  ;;  %v5395_v7 = vmul.f32 %v4044_v55, %v5060_v44  ;;  %v1092_v44 = vmul.f32 1.442695, %v852_v16 }
 0x198   :  { %v4048_v59 = vpop.eup %4047  ;;  %v1447_v51 = vmul.f32 %v4046_v22, %v5190_v0  ;;  %4073 = vpow2.f32 %v1016_v57  ;;  %v1022_v0 = vmul.f32 1.442695, %v817_v4  ;;  %v854_v54 = vsub.f32 0.0, %v5387_v42  ;;  %v625_v57 = vpop.f32.mrf.mxu0 }
 0x199   :  { %v4050_v1 = vpop.eup %4049  ;;  %2686 = vst [vmem:[%s6178_s5 + $0x190] sm:$0xff] %v3263_v61  ;;  %v1195_v27 = vadd.f32 1.0, %v4048_v59  ;;  %4075 = vpow2.f32 %v5326_v6  ;;  %v5412_v16 = vadd.f32 %v5344_v34, %v4743_v63  ;;  %v5418_v55 = vadd.f32 %v707_v10, %v4743_v63  ;;  %v713_v22 = vpop.f32.mrf.mxu1 }
 0x19a   :  { %v4052_v41 = vpop.eup %4051  ;;  %v3246_v58 = vpack.c.bf16 %v1447_v51, %v5392_v33  ;;  %v1483_v18 = vmul.f32 %v4050_v1, %v5072_v24  ;;  %4077 = vpow2.f32 %v1018_v30  ;;  %v1024_v24 = vmul.f32 1.442695, %v818_v17  ;;  %v627_v61 = vpop.f32.mrf.mxu0 }
 0x19b   :  { %v4054_v21 = vpop.eup %4053  ;;  %4079 = vrcp.f32 %v1195_v27  ;;  %v1096_v59 = vmul.f32 1.442695, %v854_v54 }
 0x19c   :  { %v4056_v38 = vpop.eup %4055  ;;  %2669 = vst [vmem:[%s6178_s5 + $0x108] sm:$0xff] %v3246_v58  ;;  %v3264_v6 = vpack.c.bf16 %v1483_v18, %v5395_v7  ;;  %4081 = vpow2.f32 %v5339_v15  ;;  %v5415_v9 = vmul.f32 %v4054_v21, %v5184_v12  ;;  %v5424_v15 = vmul.f32 %v4052_v41, %v5197_v52  ;;  %v715_v21 = vpop.f32.mrf.mxu1 }
 0x19d   :  { %v4058_v50 = vpop.eup %4057  ;;  %v1231_v40 = vadd.f32 1.0, %v4056_v38  ;;  %4083 = vpow2.f32 %v1020_v14  ;;  %v5429_v12 = vadd.f32 %v5371_v45, %v4741_v62  ;;  %v819_v52 = vsub.f32 0.0, %v5412_v16 }
 0x19e   :  { %v4060_v30 = vpop.eup %4059  ;;  %2687 = vst [vmem:[%s6178_s5 + $0x198] sm:$0xff] %v3264_v6  ;;  %v1449_v34 = vmul.f32 %v4058_v50, %v5225_v29  ;;  %4085 = vpow2.f32 %v1092_v44  ;;  %v5436_v45 = vadd.f32 %v711_v36, %v4741_v62  ;;  %v855_v14 = vsub.f32 0.0, %v5418_v55 }
 0x19f   :  { %v4062_v4 = vpop.eup %4061  ;;  %v1485_v43 = vmul.f32 %v4060_v30, %v5210_v46  ;;  %4087 = vrcp.f32 %v1231_v40  ;;  %v820_v41 = vsub.f32 0.0, %v5429_v12  ;;  %v5448_v44 = vadd.f32 %v5389_v39, %v4743_v63 }
 0x1a0   :  { %v4064_v17 = vpop.eup %4063  ;;  %v3247_v10 = vpack.c.bf16 %v1449_v34, %v5424_v15  ;;  %4089 = vpow2.f32 %v1022_v0  ;;  %v5450_v0 = vpop.f32.mrf.mxu0  ;;  %v5455_v36 = vadd.f32 %v713_v22, %v4743_v63  ;;  %v856_v50 = vsub.f32 0.0, %v5436_v45 }
 0x1a1   :  { %v4066_v51 = vpop.eup %4065  ;;  %v3265_v29 = vpack.c.bf16 %v1485_v43, %v5415_v9  ;;  %v1196_v1 = vadd.f32 1.0, %v4064_v17  ;;  %4091 = vpow2.f32 %v1094_v53  ;;  %v1540_v53 = vpack.c.bf16 %v5392_v33, %v5359_v28  ;;  %v717_v17 = vpop.f32.mrf.mxu1 }
 0x1a2   :  { %v4068_v27 = vpop.eup %4067  ;;  %2670 = vst [vmem:[%s6178_s5 + $0x110] sm:$0xff] %v3247_v10  ;;  %v1232_v46 = vadd.f32 1.0, %v4066_v51  ;;  %4093 = vpow2.f32 %v1024_v24  ;;  %v1026_v24 = vmul.f32 1.442695, %v819_v52  ;;  %v1098_v30 = vmul.f32 1.442695, %v855_v14  ;;  %v633_v10 = vpop.f32.mrf.mxu0 }
 0x1a3   :  { %v4070_v58 = vpop.eup %4069  ;;  %2688 = vst [vmem:[%s6178_s5 + $0x1a0] sm:$0xff] %v3265_v29  ;;  %4095 = vrcp.f32 %v1196_v1  ;;  %v1197_v18 = vadd.f32 1.0, %v4068_v27  ;;  %3620 = vmatprep.mubr.bf16.mxu1 %v1540_v53  ;;  %v5459_v34 = vadd.f32 %v625_v57, %v4741_v62  ;;  %v5461_v43 = vmul.f32 1.442695, %v820_v41 }
 0x1a4   :  { %v4072_v54 = vpop.eup %4071  ;;  %4097 = vrcp.f32 %v1232_v46  ;;  %v821_v22 = vsub.f32 0.0, %v5448_v44  ;;  %v857_v29 = vsub.f32 0.0, %v5455_v36  ;;  %v1450_v57 = vmul.f32 %v4062_v4, %v5228_v49 }
 0x1a5   :  { %v4074_v38 = vpop.eup %4073  ;;  %4099 = vrcp.f32 %v1197_v18  ;;  %v1233_v6 = vadd.f32 1.0, %v4072_v54  ;;  %v5471_v46 = vadd.f32 %v627_v61, %v4743_v63  ;;  %v822_v18 = vsub.f32 0.0, %v5459_v34 }
 0x1a6   :  { %v4076_v39 = vpop.eup %4075  ;;  %v1198_v40 = vadd.f32 1.0, %v4074_v38  ;;  %4101 = vpow2.f32 %v1096_v59  ;;  %v5466_v59 = vadd.f32 %v715_v21, %v4741_v62  ;;  %v5475_v53 = vadd.f32 %v717_v17, %v4743_v63 }
 0x1a7   :  { %v4078_v28 = vpop.eup %4077  ;;  %4103 = vrcp.f32 %v1233_v6  ;;  %v1234_v33 = vadd.f32 1.0, %v4076_v39  ;;  %v5478_v21 = vmul.f32 %v4070_v58, %v5239_v32  ;;  %v1100_v6 = vmul.f32 1.442695, %v856_v50 }
 0x1a8   :  { %v4080_v52 = vpop.eup %4079  ;;  %4105 = vrcp.f32 %v1198_v40  ;;  %v1199_v51 = vadd.f32 1.0, %v4078_v28  ;;  %v1030_v39 = vmul.f32 1.442695, %v821_v22  ;;  %v858_v32 = vsub.f32 0.0, %v5466_v59 }
 0x1a9   :  { %v4082_v1 = vpop.eup %4081  ;;  %v1451_v27 = vmul.f32 %v4080_v52, %v5275_v26  ;;  %4107 = vrcp.f32 %v1234_v33  ;;  %v635_v26 = vpop.f32.mrf.mxu0  ;;  %v823_v58 = vsub.f32 0.0, %v5471_v46  ;;  %v1102_v52 = vmul.f32 1.442695, %v857_v29 }
 0x1aa   :  { %v4084_v14 = vpop.eup %4083  ;;  %4109 = vrcp.f32 %v1199_v51  ;;  %v1235_v41 = vadd.f32 1.0, %v4082_v1  ;;  %v721_v33 = vpop.f32.mrf.mxu1  ;;  %v1032_v51 = vmul.f32 1.442695, %v822_v18 }
 0x1ab   :  { %v4086_v54 = vpop.eup %4085  ;;  %v3248_v38 = vpack.c.bf16 %v1451_v27, %v1450_v57  ;;  %v1200_v49 = vadd.f32 1.0, %v4084_v14  ;;  %4111 = vpow2.f32 %v1026_v24  ;;  %v859_v27 = vsub.f32 0.0, %v5475_v53  ;;  %v5488_v14 = vpop.f32.mrf.mxu0 }
 0x1ac   :  { %v4088_v4 = vpop.eup %4087  ;;  %4113 = vrcp.f32 %v1235_v41  ;;  %v1236_v61 = vadd.f32 1.0, %v4086_v54  ;;  %v5492_v54 = vadd.f32 %v5450_v0, %v4741_v62  ;;  %v1034_v18 = vmul.f32 1.442695, %v823_v58 }
 0x1ad   :  { %v4090_v40 = vpop.eup %4089  ;;  %2671 = vst [vmem:[%s6178_s5 + $0x118] sm:$0xff] %v3248_v38  ;;  %v1487_v28 = vmul.f32 %v4088_v4, %v5265_v35  ;;  %4115 = vrcp.f32 %v1200_v49  ;;  %v1542_v38 = vpack.c.bf16 %v1450_v57, %v5424_v15  ;;  %v5499_v49 = vadd.f32 %v721_v33, %v4741_v62  ;;  %v723_v4 = vpop.f32.mrf.mxu1 }
 0x1ae   :  { %v4092_v24 = vpop.eup %4091  ;;  %4117 = vrcp.f32 %v1236_v61  ;;  %v1201_v17 = vadd.f32 1.0, %v4090_v40  ;;  %v5502_v40 = vadd.f32 %v633_v10, %v4743_v63  ;;  %v5505_v0 = vadd.f32 %v723_v4, %v4743_v63  ;;  %v5516_v33 = vpop.f32.mrf.mxu0 }
 0x1af   :  { %v4094_v50 = vpop.eup %4093  ;;  %v3266_v22 = vpack.c.bf16 %v1487_v28, %v5478_v21  ;;  %v1237_v1 = vadd.f32 1.0, %v4092_v24  ;;  %4119 = vpow2.f32 %v1098_v30  ;;  %v1104_v30 = vmul.f32 1.442695, %v858_v32  ;;  %3621 = vmatmul.mubr.bf16.gmra.mxu1 %v1542_v38 }
 0x1b0   :  { %v4096_v35 = vpop.eup %4095  ;;  %4121 = vrcp.f32 %v1201_v17  ;;  %v1202_v41 = vadd.f32 1.0, %v4094_v50  ;;  %v5508_v15 = vadd.f32 %v635_v26, %v4741_v62  ;;  %v1106_v17 = vmul.f32 1.442695, %v859_v27 }
 0x1b1   :  { %v4098_v29 = vpop.eup %4097  ;;  %2689 = vst [vmem:[%s6178_s5 + $0x1a8] sm:$0xff] %v3266_v22  ;;  %4123 = vrcp.f32 %v1237_v1  ;;  %v1452_v28 = vmul.f32 %v4096_v35, %v5313_v8  ;;  %v824_v26 = vsub.f32 0.0, %v5492_v54  ;;  %v861_v35 = vsub.f32 0.0, %v5505_v0 }
 0x1b2   :  { %v4100_v61 = vpop.eup %4099  ;;  %4125 = vrcp.f32 %v1202_v41  ;;  %v5512_v32 = vmul.f32 %v4098_v29, %v5278_v13  ;;  %v860_v13 = vsub.f32 0.0, %v5499_v49  ;;  %v725_v41 = vpop.f32.mrf.mxu1 }
 0x1b3   :  { %v4102_v57 = vpop.eup %4101  ;;  %v1453_v58 = vmul.f32 %v4100_v61, %v5320_v37  ;;  %4127 = vpow2.f32 %v5461_v43  ;;  %v825_v43 = vsub.f32 0.0, %v5502_v40 }
 0x1b4   :  { %v4104_v10 = vpop.eup %4103  ;;  %v1238_v24 = vadd.f32 1.0, %v4102_v57  ;;  %4129 = vpow2.f32 %v1100_v6 }
 0x1b5   :  { %v4106_v50 = vpop.eup %4105  ;;  %v3249_v22 = vpack.c.bf16 %v1453_v58, %v1452_v28  ;;  %v1489_v1 = vmul.f32 %v4104_v10, %v5283_v56  ;;  %4131 = vpow2.f32 %v1030_v39  ;;  %v826_v56 = vsub.f32 0.0, %v5508_v15 }
 0x1b6   :  { %v4108_v8 = vpop.eup %4107  ;;  %v1454_v37 = vmul.f32 %v4106_v50, %v5331_v20  ;;  %4133 = vrcp.f32 %v1238_v24  ;;  %v5530_v39 = vadd.f32 %v725_v41, %v4741_v62  ;;  %v5532_v20 = vpop.f32.mrf.mxu0  ;;  %v1036_v58 = vmul.f32 1.442695, %v824_v26 }
 0x1b7   :  { %v4110_v6 = vpop.eup %4109  ;;  %2672 = vst [vmem:[%s6178_s5 + $0x120] sm:$0xff] %v3249_v22  ;;  %v3267_v27 = vpack.c.bf16 %v1489_v1, %v5512_v32  ;;  %4135 = vpow2.f32 %v1102_v52  ;;  %v5535_v29 = vmul.f32 %v4108_v8, %v5287_v2  ;;  %v1108_v22 = vmul.f32 1.442695, %v860_v13  ;;  %v727_v1 = vpop.f32.mrf.mxu1 }
 0x1b8   :  { %v4112_v38 = vpop.eup %4111  ;;  %v1455_v4 = vmul.f32 %v4110_v6, %v5337_v3  ;;  %4137 = vpow2.f32 %v1032_v51  ;;  %v1544_v61 = vpack.c.bf16 %v1454_v37, %v1452_v28  ;;  %v1038_v3 = vmul.f32 1.442695, %v825_v43  ;;  %v5542_v8 = vpop.f32.mrf.mxu0 }
 0x1b9   :  { %v4114_v57 = vpop.eup %4113  ;;  %2690 = vst [vmem:[%s6178_s5 + $0x1b0] sm:$0xff] %v3267_v27  ;;  %v1203_v52 = vadd.f32 1.0, %v4112_v38  ;;  %4139 = vpow2.f32 %v1104_v30  ;;  %v1110_v51 = vmul.f32 1.442695, %v861_v35  ;;  %v1040_v28 = vmul.f32 1.442695, %v826_v56  ;;  %v731_v38 = vpop.f32.mrf.mxu1 }
 0x1ba   :  { %v4116_v10 = vpop.eup %4115  ;;  %v3250_v24 = vpack.c.bf16 %v1455_v4, %v1454_v37  ;;  %v1491_v50 = vmul.f32 %v4114_v57, %v5309_v60  ;;  %4141 = vpow2.f32 %v1034_v18  ;;  %3624 = vmatprep.mubr.bf16.mxu1 %v1544_v61  ;;  %v862_v18 = vsub.f32 0.0, %v5530_v39  ;;  %v5568_v4 = vpop.f32.mrf.mxu0 }
 0x1bb   :  { %v4118_v2 = vpop.eup %4117  ;;  %4143 = vrcp.f32 %v1203_v52  ;;  %v1456_v60 = vmul.f32 %v4116_v10, %v5353_v31  ;;  %v1558_v43 = vpack.c.bf16 %v5395_v7, %v5368_v25  ;;  %v1560_v31 = vpack.c.bf16 %v5478_v21, %v5415_v9 }
 0x1bc   :  { %v4120_v41 = vpop.eup %4119  ;;  %2673 = vst [vmem:[%s6178_s5 + $0x128] sm:$0xff] %v3250_v24  ;;  %v3268_v30 = vpack.c.bf16 %v1491_v50, %v5535_v29  ;;  %4145 = vpow2.f32 %v1106_v17  ;;  %v5551_v13 = vmul.f32 %v4118_v2, %v5342_v5  ;;  %v1562_v5 = vpack.c.bf16 %v5535_v29, %v5512_v32 }
 0x1bd   :  { %v4122_v26 = vpop.eup %4121  ;;  %v1239_v37 = vadd.f32 1.0, %v4120_v41  ;;  %4147 = vpow2.f32 %v1036_v58  ;;  %v5566_v56 = vadd.f32 %v5488_v14, %v4743_v63  ;;  %v5574_v52 = vadd.f32 %v727_v1, %v4743_v63  ;;  %v5589_v1 = vpop.f32.mrf.mxu0 }
 0x1be   :  { %v4124_v35 = vpop.eup %4123  ;;  %2691 = vst [vmem:[%s6178_s5 + $0x1b8] sm:$0xff] %v3268_v30  ;;  %v1457_v6 = vmul.f32 %v4122_v26, %v5356_v47  ;;  %4149 = vpow2.f32 %v1108_v22  ;;  %v5579_v14 = vadd.f32 %v5516_v33, %v4741_v62  ;;  %v1112_v50 = vmul.f32 1.442695, %v862_v18 }
 0x1bf   :  { %v4126_v17 = vpop.eup %4125  ;;  %v1493_v27 = vmul.f32 %v4124_v35, %v5362_v48  ;;  %4151 = vrcp.f32 %v1239_v37  ;;  %v827_v33 = vsub.f32 0.0, %v5566_v56 }
 0x1c0   :  { %v4128_v61 = vpop.eup %4127  ;;  %v3251_v47 = vpack.c.bf16 %v1457_v6, %v1456_v60  ;;  %v5571_v57 = vmul.f32 %v4126_v17, %v5365_v11  ;;  %4153 = vpow2.f32 %v1038_v3  ;;  %v828_v37 = vsub.f32 0.0, %v5579_v14 }
 0x1c1   :  { %v4130_v58 = vpop.eup %4129  ;;  %v3269_v48 = vpack.c.bf16 %v1493_v27, %v5551_v13  ;;  %v1204_v10 = vadd.f32 1.0, %v4128_v61  ;;  %4155 = vpow2.f32 %v1110_v51  ;;  %v733_v51 = vpop.f32.mrf.mxu1  ;;  %v5601_v17 = vadd.f32 %v5532_v20, %v4743_v63 }
 0x1c2   :  { %v4132_v24 = vpop.eup %4131  ;;  %2674 = vst [vmem:[%s6178_s5 + $0x130] sm:$0xff] %v3251_v47  ;;  %v1240_v11 = vadd.f32 1.0, %v4130_v58  ;;  %4157 = vpow2.f32 %v1040_v28  ;;  %v1546_v22 = vpack.c.bf16 %v5571_v57, %v1456_v60  ;;  %v863_v28 = vsub.f32 0.0, %v5574_v52 }
 0x1c3   :  { %v4134_v2 = vpop.eup %4133  ;;  %2692 = vst [vmem:[%s6178_s5 + $0x1c0] sm:$0xff] %v3269_v48  ;;  %4159 = vrcp.f32 %v1204_v10  ;;  %v1205_v3 = vadd.f32 1.0, %v4132_v24  ;;  %v5596_v60 = vadd.f32 %v731_v38, %v4741_v62  ;;  %v1042_v61 = vmul.f32 1.442695, %v827_v33  ;;  %v735_v58 = vpop.f32.mrf.mxu1 }
 0x1c4   :  { %v4136_v41 = vpop.eup %4135  ;;  %v5592_v30 = vmul.f32 %v4134_v2, %v5387_v42  ;;  %4161 = vrcp.f32 %v1240_v11  ;;  %3625 = vmatmul.mubr.bf16.gmra.mxu1 %v1546_v22  ;;  %v5606_v47 = vadd.f32 %v733_v51, %v4743_v63  ;;  %v653_v48 = vpop.f32.mrf.mxu0  ;;  %v1114_v11 = vmul.f32 1.442695, %v863_v28 }
 0x1c5   :  { %v4138_v18 = vpop.eup %4137  ;;  %4163 = vrcp.f32 %v1205_v3  ;;  %v1241_v26 = vadd.f32 1.0, %v4136_v41  ;;  %v5612_v2 = vadd.f32 %v5542_v8, %v4741_v62  ;;  %v5615_v3 = vadd.f32 %v735_v58, %v4741_v62 }
 0x1c6   :  { %v4140_v35 = vpop.eup %4139  ;;  %v1206_v6 = vadd.f32 1.0, %v4138_v18  ;;  %4165 = vpow2.f32 %v1112_v50  ;;  %v864_v50 = vsub.f32 0.0, %v5596_v60  ;;  %v1044_v41 = vmul.f32 1.442695, %v828_v37 }
 0x1c7   :  { %v4142_v27 = vpop.eup %4141  ;;  %4167 = vrcp.f32 %v1241_v26  ;;  %v1242_v38 = vadd.f32 1.0, %v4140_v35  ;;  %v829_v18 = vsub.f32 0.0, %v5601_v17 }
 0x1c8   :  { %v4144_v10 = vpop.eup %4143  ;;  %4169 = vrcp.f32 %v1206_v6  ;;  %v1207_v24 = vadd.f32 1.0, %v4142_v27  ;;  %v737_v6 = vpop.f32.mrf.mxu1  ;;  %v1116_v58 = vmul.f32 1.442695, %v864_v50 }
 0x1c9   :  { %v4146_v20 = vpop.eup %4145  ;;  %v1459_v22 = vmul.f32 %v4144_v10, %v5412_v16  ;;  %4171 = vrcp.f32 %v1242_v38  ;;  %v865_v16 = vsub.f32 0.0, %v5606_v47  ;;  %v655_v27 = vpop.f32.mrf.mxu0  ;;  %v5622_v10 = vadd.f32 %v5568_v4, %v4743_v63 }
 0x1ca   :  { %v4148_v33 = vpop.eup %4147  ;;  %4173 = vrcp.f32 %v1207_v24  ;;  %v1243_v51 = vadd.f32 1.0, %v4146_v20  ;;  %v866_v24 = vsub.f32 0.0, %v5615_v3  ;;  %v1046_v50 = vmul.f32 1.442695, %v829_v18 }
 0x1cb   :  { %v4150_v28 = vpop.eup %4149  ;;  %v3252_v26 = vpack.c.bf16 %v1459_v22, %v5571_v57  ;;  %v1208_v35 = vadd.f32 1.0, %v4148_v33  ;;  %4175 = vpow2.f32 %v1042_v61  ;;  %v830_v61 = vsub.f32 0.0, %v5612_v2  ;;  %v657_v42 = vpop.f32.mrf.mxu0 }
 0x1cc   :  { %v4152_v8 = vpop.eup %4151  ;;  %4177 = vrcp.f32 %v1243_v51  ;;  %v1244_v38 = vadd.f32 1.0, %v4150_v28  ;;  %v5631_v33 = vadd.f32 %v737_v6, %v4743_v63 }
 0x1cd   :  { %v4154_v37 = vpop.eup %4153  ;;  %2675 = vst [vmem:[%s6178_s5 + $0x138] sm:$0xff] %v3252_v26  ;;  %v1495_v57 = vmul.f32 %v4152_v8, %v5418_v55  ;;  %4179 = vrcp.f32 %v1208_v35  ;;  %v1118_v26 = vmul.f32 1.442695, %v865_v16  ;;  %v831_v8 = vsub.f32 0.0, %v5622_v10 }
 0x1ce   :  { %v4156_v20 = vpop.eup %4155  ;;  %4181 = vrcp.f32 %v1244_v38  ;;  %v1209_v22 = vadd.f32 1.0, %v4154_v37  ;;  %v5637_v38 = vadd.f32 %v5589_v1, %v4741_v62  ;;  %v1048_v6 = vmul.f32 1.442695, %v830_v61 }
 0x1cf   :  { %v4158_v4 = vpop.eup %4157  ;;  %v3270_v51 = vpack.c.bf16 %v1495_v57, %v5592_v30  ;;  %v1245_v28 = vadd.f32 1.0, %v4156_v20  ;;  %4183 = vpow2.f32 %v1114_v11  ;;  %v1120_v37 = vmul.f32 1.442695, %v866_v24 }
 0x1d0   :  { %v4160_v55 = vpop.eup %4159  ;;  %4185 = vrcp.f32 %v1209_v22  ;;  %v1210_v35 = vadd.f32 1.0, %v4158_v4  ;;  %v5643_v11 = vadd.f32 %v653_v48, %v4743_v63  ;;  %v867_v57 = vsub.f32 0.0, %v5631_v33 }
 0x1d1   :  { %v4162_v18 = vpop.eup %4161  ;;  %2693 = vst [vmem:[%s6178_s5 + $0x1c8] sm:$0xff] %v3270_v51  ;;  %4187 = vrcp.f32 %v1245_v28  ;;  %v5647_v20 = vadd.f32 %v655_v27, %v4741_v62  ;;  %v5650_v1 = vadd.f32 %v657_v42, %v4743_v63  ;;  %v1460_v4 = vmul.f32 %v4160_v55, %v5429_v12  ;;  %v5663_v12 = vld [vmem:[%s6179_s4] ss:$0 sm:$0xff] }
 0x1d2   :  { %v4164_v16 = vpop.eup %4163  ;;  %4189 = vrcp.f32 %v1210_v35  ;;  %v5654_v51 = vmul.f32 %v4162_v18, %v5436_v45  ;;  %v1050_v28 = vmul.f32 1.442695, %v831_v8  ;;  %v832_v35 = vsub.f32 0.0, %v5637_v38 }
 0x1d3   :  { %v4166_v22 = vpop.eup %4165  ;;  %v1461_v61 = vmul.f32 %v4164_v16, %v5448_v44  ;;  %4191 = vpow2.f32 %v1044_v41  ;;  %v833_v42 = vsub.f32 0.0, %v5643_v11  ;;  %v1122_v41 = vmul.f32 1.442695, %v867_v57 }
 0x1d4   :  { %v4168_v48 = vpop.eup %4167  ;;  %v1246_v24 = vadd.f32 1.0, %v4166_v22  ;;  %4193 = vpow2.f32 %v1116_v58  ;;  %v834_v58 = vsub.f32 0.0, %v5647_v20  ;;  %v835_v8 = vsub.f32 0.0, %v5650_v1 }
 0x1d5   :  { %v4170_v62 = vpop.eup %4169  ;;  %v3253_v27 = vpack.c.bf16 %v1461_v61, %v1460_v4  ;;  %v1497_v63 = vmul.f32 %v4168_v48, %v5455_v36  ;;  %4195 = vpow2.f32 %v1046_v50 }
 0x1d6   :  { %v4172_v45 = vpop.eup %4171  ;;  %v1462_v44 = vmul.f32 %v4170_v62, %v5459_v34  ;;  %4197 = vrcp.f32 %v1246_v24 }
 0x1d7   :  { %v4174_v55 = vpop.eup %4173  ;;  %2676 = vst [vmem:[%s6178_s5 + $0x140] sm:$0xff] %v3253_v27  ;;  %v3271_v36 = vpack.c.bf16 %v1497_v63, %v5654_v51  ;;  %v5672_v50 = vmul.f32 %v4172_v45, %v5466_v59  ;;  %4199 = vpow2.f32 %v1118_v26  ;;  %v3590_v18 = vpop.f32.mrf.mxu1  ;;  %v1052_v59 = vmul.f32 1.442695, %v832_v35 }
 0x1d8   :  { %v4176_v16 = vpop.eup %4175  ;;  %v1463_v34 = vmul.f32 %v4174_v55, %v5471_v46  ;;  %4201 = vpow2.f32 %v1048_v6  ;;  %v1548_v57 = vpack.c.bf16 %v1462_v44, %v1460_v4  ;;  %v5677_v22 = vadd.f32 %v3590_v18, %v5663_v12 }
 0x1d9   :  { %v4178_v61 = vpop.eup %4177  ;;  %2694 = vst [vmem:[%s6178_s5 + $0x1d0] sm:$0xff] %v3271_v36  ;;  %v1211_v48 = vadd.f32 1.0, %v4176_v16  ;;  %4203 = vpow2.f32 %v1120_v37  ;;  %v1054_v26 = vmul.f32 1.442695, %v833_v42  ;;  %v1677_v24 = vpop.f32.mrf.mxu1  ;;  %v1056_v35 = vmul.f32 1.442695, %v834_v58 }
 0x1da   :  { %v4180_v62 = vpop.eup %4179  ;;  %v3254_v27 = vpack.c.bf16 %v1463_v34, %v1462_v44  ;;  %v1499_v63 = vmul.f32 %v4178_v61, %v5475_v53  ;;  %4205 = vpow2.f32 %v1050_v28  ;;  %3628 = vmatprep.mubr.bf16.mxu1 %v1548_v57  ;;  %v1934_v46 = vsub.f32 0.0, %v5677_v22 }
 0x1db   :  { %v4182_v6 = vpop.eup %4181  ;;  %4207 = vrcp.f32 %v1211_v48  ;;  %v5685_v4 = vadd.f32 %v5663_v12, %v1677_v24  ;;  %v3591_v45 = vpop.f32.mrf.mxu1  ;;  %v1058_v53 = vmul.f32 1.442695, %v835_v8  ;;  %v1464_v42 = vmul.f32 %v4180_v62, %v5492_v54 }
 0x1dc   :  { %v4184_v55 = vpop.eup %4183  ;;  %2677 = vst [vmem:[%s6178_s5 + $0x148] sm:$0xff] %v3254_v27  ;;  %v3272_v37 = vpack.c.bf16 %v1499_v63, %v5672_v50  ;;  %4209 = vpow2.f32 %v1122_v41  ;;  %v5693_v44 = vmul.f32 %v4182_v6, %v5499_v49  ;;  %v2000_v34 = vmul.f32 1.442695, %v1934_v46 }
 0x1dd   :  { %v4186_v28 = vpop.eup %4185  ;;  %v1247_v36 = vadd.f32 1.0, %v4184_v55  ;;  %4211 = vpow2.f32 %v1052_v59  ;;  %v1932_v41 = vsub.f32 0.0, %v5685_v4  ;;  %v1680_v58 = vpop.f32.mrf.mxu1  ;;  %v5702_v49 = vadd.f32 %v3591_v45, %v5663_v12 }
 0x1de   :  { %v4188_v18 = vpop.eup %4187  ;;  %2695 = vst [vmem:[%s6178_s5 + $0x1d8] sm:$0xff] %v3272_v37  ;;  %v1465_v16 = vmul.f32 %v4186_v28, %v5502_v40  ;;  %4213 = vpow2.f32 %v1054_v26  ;;  %v5707_v24 = vadd.f32 %v5663_v12, %v1680_v58 }
 0x1df   :  { %v4190_v8 = vpop.eup %4189  ;;  %v1501_v54 = vmul.f32 %v4188_v18, %v5505_v0  ;;  %4215 = vrcp.f32 %v1247_v36  ;;  %v1996_v63 = vmul.f32 1.442695, %v1932_v41  ;;  %v1935_v6 = vsub.f32 0.0, %v5702_v49 }
 0x1e0   :  { %v4192_v57 = vpop.eup %4191  ;;  %v3255_v61 = vpack.c.bf16 %v1465_v16, %v1464_v42  ;;  %v1466_v48 = vmul.f32 %v4190_v8, %v5508_v15  ;;  %4217 = vpow2.f32 %v1056_v35  ;;  %v1933_v28 = vsub.f32 0.0, %v5707_v24 }
 0x1e1   :  { %v4194_v59 = vpop.eup %4193  ;;  %v3273_v40 = vpack.c.bf16 %v1501_v54, %v5693_v44  ;;  %v1212_v26 = vadd.f32 1.0, %v4192_v57  ;;  %4219 = vpow2.f32 %v1058_v53  ;;  %v2002_v18 = vmul.f32 1.442695, %v1935_v6 }
 0x1e2   :  { %v4196_v62 = vpop.eup %4195  ;;  %2678 = vst [vmem:[%s6178_s5 + $0x150] sm:$0xff] %v3255_v61  ;;  %v1248_v0 = vadd.f32 1.0, %v4194_v59  ;;  %v1550_v27 = vpack.c.bf16 %v1466_v48, %v1464_v42  ;;  %4221 = vpow2.f32 %v2000_v34 }
 0x1e3   :  { %v4198_v46 = vpop.eup %4197  ;;  %2696 = vst [vmem:[%s6178_s5 + $0x1e0] sm:$0xff] %v3273_v40  ;;  %4223 = vrcp.f32 %v1212_v26  ;;  %v1213_v15 = vadd.f32 1.0, %v4196_v62  ;;  %v1998_v40 = vmul.f32 1.442695, %v1933_v28 }
 0x1e4   :  { %v4200_v45 = vpop.eup %4199  ;;  %4225 = vrcp.f32 %v1248_v0  ;;  %3629 = vmatmul.mubr.bf16.gmra.mxu1 %v1550_v27  ;;  %v5722_v61 = vmul.f32 %v4198_v46, %v5530_v39 }
 0x1e5   :  { %v4202_v55 = vpop.eup %4201  ;;  %4227 = vrcp.f32 %v1213_v15  ;;  %v1249_v37 = vadd.f32 1.0, %v4200_v45 }
 0x1e6   :  { %v4204_v35 = vpop.eup %4203  ;;  %v1214_v53 = vadd.f32 1.0, %v4202_v55  ;;  %4229 = vpow2.f32 %v1996_v63 }
 0x1e7   :  { %v4206_v42 = vpop.eup %4205  ;;  %4231 = vrcp.f32 %v1249_v37  ;;  %v1250_v36 = vadd.f32 1.0, %v4204_v35 }
 0x1e8   :  { %v4208_v16 = vpop.eup %4207  ;;  %4233 = vrcp.f32 %v1214_v53  ;;  %v1215_v34 = vadd.f32 1.0, %v4206_v42  ;;  %v3594_v41 = vpop.f32.mrf.mxu1 }
 0x1e9   :  { %v4210_v58 = vpop.eup %4209  ;;  %v1467_v8 = vmul.f32 %v4208_v16, %v5566_v56  ;;  %4235 = vrcp.f32 %v1250_v36  ;;  %v5719_v54 = vadd.f32 %v3594_v41, %v5663_v12 }
 0x1ea   :  { %v4212_v57 = vpop.eup %4211  ;;  %4237 = vrcp.f32 %v1215_v34  ;;  %v1251_v59 = vadd.f32 1.0, %v4210_v58  ;;  %v1693_v26 = vpop.f32.mrf.mxu1 }
 0x1eb   :  { %v4214_v62 = vpop.eup %4213  ;;  %v3256_v0 = vpack.c.bf16 %v1467_v8, %v1466_v48  ;;  %v1216_v27 = vadd.f32 1.0, %v4212_v57  ;;  %4239 = vpow2.f32 %v2002_v18  ;;  %v1938_v63 = vsub.f32 0.0, %v5719_v54 }
 0x1ec   :  { %v4216_v15 = vpop.eup %4215  ;;  %4241 = vrcp.f32 %v1251_v59  ;;  %v1217_v56 = vadd.f32 1.0, %v4214_v62  ;;  %v5726_v6 = vadd.f32 %v5663_v12, %v1693_v26  ;;  %v3595_v45 = vpop.f32.mrf.mxu1 }
 0x1ed   :  { %v4218_v55 = vpop.eup %4217  ;;  %2679 = vst [vmem:[%s6178_s5 + $0x158] sm:$0xff] %v3256_v0  ;;  %v1503_v39 = vmul.f32 %v4216_v15, %v5574_v52  ;;  %4243 = vrcp.f32 %v1216_v27  ;;  %v5733_v48 = vadd.f32 %v3595_v45, %v5663_v12  ;;  %v2008_v35 = vmul.f32 1.442695, %v1938_v63 }
 0x1ee   :  { %v4220_v46 = vpop.eup %4219  ;;  %4245 = vrcp.f32 %v1217_v56  ;;  %v1218_v37 = vadd.f32 1.0, %v4218_v55  ;;  %v1936_v53 = vsub.f32 0.0, %v5726_v6  ;;  %v1696_v28 = vpop.f32.mrf.mxu1 }
 0x1ef   :  { %v4222_v42 = vpop.eup %4221  ;;  %v3274_v36 = vpack.c.bf16 %v1503_v39, %v5722_v61  ;;  %v1219_v18 = vadd.f32 1.0, %v4220_v46  ;;  %4247 = vpow2.f32 %v1998_v40  ;;  %v1939_v16 = vsub.f32 0.0, %v5733_v48 }
 0x1f0   :  { %v4224_v34 = vpop.eup %4223  ;;  %4249 = vrcp.f32 %v1218_v37  ;;  %v2004_v52 = vmul.f32 1.442695, %v1936_v53  ;;  %v5739_v41 = vadd.f32 %v5663_v12, %v1696_v28  ;;  %v2126_v55 = vadd.f32 1.0, %v4222_v42 }
 0x1f1   :  { %v4226_v58 = vpop.eup %4225  ;;  %2697 = vst [vmem:[%s6178_s5 + $0x1e8] sm:$0xff] %v3274_v36  ;;  %4251 = vrcp.f32 %v1219_v18  ;;  %v2010_v8 = vmul.f32 1.442695, %v1939_v16  ;;  %v1468_v40 = vmul.f32 %v4224_v34, %v5579_v14 }
 0x1f2   :  { %v4228_v57 = vpop.eup %4227  ;;  %v1937_v59 = vsub.f32 0.0, %v5739_v41  ;;  %v5747_v62 = vmul.f32 %v4226_v58, %v5596_v60  ;;  %4253 = vpow2.f32 %v2008_v35 }
 0x1f3   :  { %v4230_v26 = vpop.eup %4229  ;;  %v1469_v0 = vmul.f32 %v4228_v57, %v5601_v17  ;;  %4255 = vpow2.f32 %v2004_v52 }
 0x1f4   :  { %v4232_v27 = vpop.eup %4231  ;;  %v2006_v63 = vmul.f32 1.442695, %v1937_v59  ;;  %4257 = vpow2.f32 %v2010_v8  ;;  %v2124_v53 = vadd.f32 1.0, %v4230_v26 }
 0x1f5   :  { %v4234_v15 = vpop.eup %4233  ;;  %v3257_v56 = vpack.c.bf16 %v1469_v0, %v1468_v40  ;;  %v1505_v45 = vmul.f32 %v4232_v27, %v5606_v47 }
 0x1f6   :  { %v4236_v39 = vpop.eup %4235  ;;  %v1470_v46 = vmul.f32 %v4234_v15, %v5612_v2  ;;  %4259 = vpow2.f32 %v2006_v63 }
 0x1f7   :  { %v4238_v37 = vpop.eup %4237  ;;  %2680 = vst [vmem:[%s6178_s5 + $0x160] sm:$0xff] %v3257_v56  ;;  %v3275_v14 = vpack.c.bf16 %v1505_v45, %v5747_v62  ;;  %v5757_v17 = vmul.f32 %v4236_v39, %v5615_v3  ;;  %4261 = vrcp.f32 %v2126_v55 }
 0x1f8   :  { %v4240_v60 = vpop.eup %4239  ;;  %v1471_v35 = vmul.f32 %v4238_v37, %v5622_v10  ;;  %v1552_v47 = vpack.c.bf16 %v1470_v46, %v1468_v40 }
 0x1f9   :  { %v4242_v28 = vpop.eup %4241  ;;  %2698 = vst [vmem:[%s6178_s5 + $0x1f0] sm:$0xff] %v3275_v14  ;;  %v2127_v2 = vadd.f32 1.0, %v4240_v60 }
 0x1fa   :  { %v4244_v42 = vpop.eup %4243  ;;  %v3258_v36 = vpack.c.bf16 %v1471_v35, %v1470_v46  ;;  %v1507_v18 = vmul.f32 %v4242_v28, %v5631_v33  ;;  %3632 = vmatprep.mubr.bf16.mxu1 %v1552_v47  ;;  %v3598_v16 = vpop.f32.mrf.mxu1 }
 0x1fb   :  { %v4246_v34 = vpop.eup %4245  ;;  %4263 = vrcp.f32 %v2127_v2  ;;  %v5765_v3 = vadd.f32 %v3598_v16, %v5663_v12  ;;  %v1472_v58 = vmul.f32 %v4244_v42, %v5637_v38 }
 0x1fc   :  { %v4248_v10 = vpop.eup %4247  ;;  %2681 = vst [vmem:[%s6178_s5 + $0x168] sm:$0xff] %v3258_v36  ;;  %v3276_v52 = vpack.c.bf16 %v1507_v18, %v5757_v17  ;;  %v1473_v8 = vmul.f32 %v4246_v34, %v5643_v11  ;;  %4265 = vrcp.f32 %v2124_v53  ;;  %v1709_v33 = vpop.f32.mrf.mxu1 }
 0x1fd   :  { %v4250_v57 = vpop.eup %4249  ;;  %v2125_v59 = vadd.f32 1.0, %v4248_v10  ;;  %v1942_v26 = vsub.f32 0.0, %v5765_v3  ;;  %v5775_v40 = vadd.f32 %v5663_v12, %v1709_v33 }
 0x1fe   :  { %v4252_v0 = vpop.eup %4251  ;;  %2699 = vst [vmem:[%s6178_s5 + $0x1f8] sm:$0xff] %v3276_v52  ;;  %v3259_v27 = vpack.c.bf16 %v1473_v8, %v1472_v58  ;;  %v1474_v63 = vmul.f32 %v4250_v57, %v5647_v20  ;;  %v3599_v38 = vpop.f32.mrf.mxu1  ;;  %v1556_v20 = vpack.c.bf16 %v5262_v19, %v5221_v23 }
 0x1ff   :  { %v1475_v11 = vmul.f32 %v4252_v0, %v5650_v1  ;;  %4267 = vrcp.f32 %v2125_v59  ;;  %v2016_v15 = vmul.f32 1.442695, %v1942_v26  ;;  %v1940_v56 = vsub.f32 0.0, %v5775_v40  ;;  %v4254_v45 = vpop.eup %4253 }
 0x200   :  { %2682 = vst [vmem:[%s6178_s5 + $0x170] sm:$0xff] %v3259_v27  ;;  %v1554_v55 = vpack.c.bf16 %v1474_v63, %v1472_v58  ;;  %v5787_v39 = vadd.f32 %v3599_v38, %v5663_v12  ;;  %v1712_v46 = vpop.f32.mrf.mxu1  ;;  %v4256_v37 = vpop.eup %4255  ;;  %v2130_v1 = vadd.f32 1.0, %v4254_v45 }
 0x201   :  { %v3260_v14 = vpack.c.bf16 %v1475_v11, %v1474_v63  ;;  %4269 = vpow2.f32 %v2016_v15  ;;  %v4258_v60 = vpop.eup %4257  ;;  %v2128_v35 = vadd.f32 1.0, %v4256_v37  ;;  %v2012_v47 = vmul.f32 1.442695, %v1940_v56 }
 0x202   :  { %3633 = vmatmul.mubr.bf16.gmra.mxu1 %v1554_v55  ;;  %v1943_v53 = vsub.f32 0.0, %v5787_v39  ;;  %v5793_v28 = vadd.f32 %v5663_v12, %v1712_v46  ;;  %4271 = vrcp.f32 %v2130_v1  ;;  %v2131_v2 = vadd.f32 1.0, %v4258_v60 }
 0x203   :  { %2683 = vst [vmem:[%s6178_s5 + $0x178] sm:$0xff] %v3260_v14  ;;  %3636 = vmatprep.mubr.bf16.mxu1 %v1556_v20  ;;  %v4260_v42 = vpop.eup %4259  ;;  %4273 = vrcp.f32 %v2128_v35  ;;  %v6181_v14 = vpack.c.bf16 %v5592_v30, %v5551_v13 }
 0x204   :  { %v2018_v23 = vmul.f32 1.442695, %v1943_v53  ;;  %v1941_v19 = vsub.f32 0.0, %v5793_v28  ;;  %4275 = vrcp.f32 %v2131_v2  ;;  %v2129_v36 = vadd.f32 1.0, %v4260_v42  ;;  %v4262_v18 = vpop.eup %4261 }
 0x205   :  { %4277 = vpow2.f32 %v2012_v47  ;;  %v2254_v58 = vmul.f32 %v4262_v18, %v5677_v22 }
 0x206   :  { %v2014_v16 = vmul.f32 1.442695, %v1941_v19  ;;  %4279 = vrcp.f32 %v2129_v36 }
 0x207   :  { %4281 = vpow2.f32 %v2018_v23 }
 0x208   :  { %v4264_v34 = vpop.eup %4263  ;;  %v3602_v10 = vpop.f32.mrf.mxu1  ;;  %4283 = vpow2.f32 %v2014_v16 }
 0x209   :  { %v4266_v52 = vpop.eup %4265  ;;  %v2255_v8 = vmul.f32 %v4264_v34, %v5702_v49  ;;  %v5802_v33 = vadd.f32 %v3602_v10, %v5663_v12  ;;  %v1570_v34 = vpack.c.bf16 %v5757_v17, %v5747_v62 }
 0x20a   :  { %3637 = vmatmul.mubr.bf16.gmra.mxu1 %v1558_v43  ;;  %v1725_v57 = vpop.f32.mrf.mxu1  ;;  %v2252_v0 = vmul.f32 %v4266_v52, %v5685_v4 }
 0x20b   :  { %3640 = vmatprep.mubr.bf16.mxu1 %v1560_v31  ;;  %v3349_v59 = vpack.c.bf16 %v2255_v8, %v2254_v58  ;;  %v1946_v26 = vsub.f32 0.0, %v5802_v33  ;;  %v5812_v22 = vadd.f32 %v5663_v12, %v1725_v57 }
 0x20c   :  { %v4268_v49 = vpop.eup %4267  ;;  %v3603_v27 = vpop.f32.mrf.mxu1 }
 0x20d   :  { %3501 = vst [vmem:[%s6180_s6 + $0x8] sm:$0xff] %v3349_v59   ;;  %v2253_v25 = vmul.f32 %v4268_v49, %v5707_v24  ;;  %v2024_v7 = vmul.f32 1.442695, %v1946_v26  ;;  %v1944_v9 = vsub.f32 0.0, %v5812_v22  ;;  %v5821_v21 = vadd.f32 %v3603_v27, %v5663_v12 }
 0x20e   :  { %v4270_v43 = vpop.eup %4269  ;;  %v1728_v31 = vpop.f32.mrf.mxu1 }
 0x20f   :  { %v3344_v63 = vpack.c.bf16 %v2253_v25, %v2252_v0  ;;  %4285 = vpow2.f32 %v2024_v7  ;;  %v2020_v38 = vmul.f32 1.442695, %v1944_v9  ;;  %v4272_v11 = vpop.eup %4271  ;;  %v1947_v4 = vsub.f32 0.0, %v5821_v21 }
 0x210   :  { %v5825_v15 = vadd.f32 %v5663_v12, %v1728_v31  ;;  %v4274_v56 = vpop.eup %4273  ;;  %v2134_v24 = vadd.f32 1.0, %v4270_v43  ;;  %v2258_v20 = vmul.f32 %v4272_v11, %v5719_v54  ;;  %v1566_v54 = vpack.c.bf16 %v5672_v50, %v5654_v51 }
 0x211   :  { %3345 = vst [vmem:[%s6180_s6] sm:$0xff] %v3344_v63   ;;  %v4276_v45 = vpop.eup %4275  ;;  %4287 = vpow2.f32 %v2020_v38  ;;  %v2026_v55 = vmul.f32 1.442695, %v1947_v4  ;;  %v2256_v32 = vmul.f32 %v4274_v56, %v5726_v6  ;;  %v1568_v6 = vpack.c.bf16 %v5722_v61, %v5693_v44 }
 0x212   :  { %3641 = vmatmul.mubr.bf16.gmra.mxu1 %v1562_v5  ;;  %v1945_v46 = vsub.f32 0.0, %v5825_v15  ;;  %v4278_v37 = vpop.eup %4277  ;;  %v2259_v1 = vmul.f32 %v4276_v45, %v5733_v48 }
 0x213   :  { %3644 = vmatprep.mubr.bf16.mxu1 %v6181_v14  ;;  %v4280_v60 = vpop.eup %4279  ;;  %v2132_v35 = vadd.f32 1.0, %v4278_v37  ;;  %4289 = vpow2.f32 %v2026_v55 }
 0x214   :  { %v2022_v47 = vmul.f32 1.442695, %v1945_v46  ;;  %v4282_v53 = vpop.eup %4281  ;;  %v3359_v29 = vpack.c.bf16 %v2259_v1, %v2258_v20  ;;  %v2257_v5 = vmul.f32 %v4280_v60, %v5739_v41  ;;  %4291 = vrcp.f32 %v2134_v24 }
 0x215   :  { %v4284_v2 = vpop.eup %4283  ;;  %4293 = vrcp.f32 %v2132_v35  ;;  %v2135_v42 = vadd.f32 1.0, %v4282_v53 }
 0x216   :  { %3503 = vst [vmem:[%s6180_s6 + $0x18] sm:$0xff] %v3359_v29   ;;  %v3354_v13 = vpack.c.bf16 %v2257_v5, %v2256_v32  ;;  %v2133_v30 = vadd.f32 1.0, %v4284_v2  ;;  %4295 = vpow2.f32 %v2022_v47 }
 0x217   :  { %4297 = vrcp.f32 %v2135_v42 }
 0x218   :  { %3502 = vst [vmem:[%s6180_s6 + $0x10] sm:$0xff] %v3354_v13   ;;  %4299 = vrcp.f32 %v2133_v30 }
 0x21a   :  { %3645 = vmatmul.mubr.bf16.gmra.mxu1 %v1566_v54  ;;  %v3606_v48 = vpop.f32.mrf.mxu1 }
 0x21b   :  { %3648 = vmatprep.mubr.bf16.mxu1 %v1568_v6  ;;  %v5852_v41 = vadd.f32 %v3606_v48, %v5663_v12 }
 0x21c   :  { %v4286_v23 = vpop.eup %4285  ;;  %v1741_v19 = vpop.f32.mrf.mxu1 }
 0x21d   :  { %v1950_v36 = vsub.f32 0.0, %v5852_v41  ;;  %v5856_v51 = vadd.f32 %v5663_v12, %v1741_v19  ;;  %v2138_v50 = vadd.f32 1.0, %v4286_v23 }
 0x21e   :  { %v3607_v44 = vpop.f32.mrf.mxu1  ;;  %v4288_v61 = vpop.eup %4287 }
 0x21f   :  { %v2032_v18 = vmul.f32 1.442695, %v1950_v36  ;;  %v1948_v16 = vsub.f32 0.0, %v5856_v51  ;;  %v5862_v10 = vadd.f32 %v3607_v44, %v5663_v12  ;;  %v2136_v8 = vadd.f32 1.0, %v4288_v61 }
 0x220   :  { %v1744_v52 = vpop.f32.mrf.mxu1  ;;  %v4290_v58 = vpop.eup %4289 }
 0x221   :  { %4301 = vpow2.f32 %v2032_v18  ;;  %v2028_v57 = vmul.f32 1.442695, %v1948_v16  ;;  %v5865_v59 = vadd.f32 %v5663_v12, %v1744_v52  ;;  %v4292_v26 = vpop.eup %4291  ;;  %v2139_v49 = vadd.f32 1.0, %v4290_v58 }
 0x222   :  { %3649 = vmatmul.mubr.bf16.gmra.mxu1 %v1570_v34  ;;  %4303 = vrcp.f32 %v2138_v50  ;;  %v1951_v0 = vsub.f32 0.0, %v5862_v10  ;;  %v4294_v27 = vpop.eup %4293  ;;  %v2262_v63 = vmul.f32 %v4292_v26, %v5765_v3 }
 0x223   :  { %4305 = vpow2.f32 %v2028_v57  ;;  %v1949_v62 = vsub.f32 0.0, %v5865_v59  ;;  %v4296_v17 = vpop.eup %4295  ;;  %v2260_v11 = vmul.f32 %v4294_v27, %v5775_v40 }
 0x224   :  { %4307 = vrcp.f32 %v2139_v49  ;;  %v2034_v25 = vmul.f32 1.442695, %v1951_v0  ;;  %v4298_v7 = vpop.eup %4297  ;;  %v2137_v9 = vadd.f32 1.0, %v4296_v17 }
 0x225   :  { %4309 = vrcp.f32 %v2136_v8  ;;  %v2030_v43 = vmul.f32 1.442695, %v1949_v62  ;;  %v4300_v31 = vpop.eup %4299  ;;  %v2263_v38 = vmul.f32 %v4298_v7, %v5787_v39 }
 0x226   :  { %4311 = vpow2.f32 %v2034_v25  ;;  %v2261_v4 = vmul.f32 %v4300_v31, %v5793_v28 }
 0x227   :  { %4313 = vrcp.f32 %v2137_v9  ;;  %v3369_v56 = vpack.c.bf16 %v2263_v38, %v2262_v63 }
 0x228   :  { %4315 = vpow2.f32 %v2030_v43  ;;  %v3610_v24 = vpop.f32.mrf.mxu1  ;;  %v3364_v45 = vpack.c.bf16 %v2261_v4, %v2260_v11 }
 0x229   :  { %v5874_v55 = vadd.f32 %v3610_v24, %v5663_v12  ;;  %3505 = vst [vmem:[%s6180_s6 + $0x28] sm:$0xff] %v3369_v56  }
 0x22a   :  { %v1757_v3 = vpop.f32.mrf.mxu1  ;;  %3504 = vst [vmem:[%s6180_s6 + $0x20] sm:$0xff] %v3364_v45  }
 0x22b   :  { %v1954_v40 = vsub.f32 0.0, %v5874_v55  ;;  %v5884_v39 = vadd.f32 %v5663_v12, %v1757_v3 }
 0x22c   :  { %v3611_v28 = vpop.f32.mrf.mxu1 }
 0x22d   :  { %v2040_v46 = vmul.f32 1.442695, %v1954_v40  ;;  %v1952_v37 = vsub.f32 0.0, %v5884_v39  ;;  %v5888_v14 = vadd.f32 %v3611_v28, %v5663_v12 }
 0x22e   :  { %v4302_v20 = vpop.eup %4301  ;;  %v1760_v1 = vpop.f32.mrf.mxu1 }
 0x22f   :  { %v4304_v60 = vpop.eup %4303  ;;  %v2142_v35 = vadd.f32 1.0, %v4302_v20  ;;  %4317 = vpow2.f32 %v2040_v46  ;;  %v2036_v47 = vmul.f32 1.442695, %v1952_v37  ;;  %v1955_v53 = vsub.f32 0.0, %v5888_v14 }
 0x230   :  { %v4306_v32 = vpop.eup %4305  ;;  %v5892_v29 = vadd.f32 %v5663_v12, %v1760_v1  ;;  %v2266_v30 = vmul.f32 %v4304_v60, %v5802_v33 }
 0x231   :  { %v4308_v5 = vpop.eup %4307  ;;  %v2140_v2 = vadd.f32 1.0, %v4306_v32  ;;  %v2042_v42 = vmul.f32 1.442695, %v1955_v53  ;;  %4319 = vpow2.f32 %v2036_v47 }
 0x232   :  { %v4310_v13 = vpop.eup %4309  ;;  %v2267_v54 = vmul.f32 %v4308_v5, %v5821_v21  ;;  %v1953_v6 = vsub.f32 0.0, %v5892_v29  ;;  %4321 = vrcp.f32 %v2142_v35 }
 0x233   :  { %v4312_v48 = vpop.eup %4311  ;;  %4323 = vpow2.f32 %v2042_v42  ;;  %v2264_v61 = vmul.f32 %v4310_v13, %v5812_v22 }
 0x234   :  { %v4314_v23 = vpop.eup %4313  ;;  %v3379_v19 = vpack.c.bf16 %v2267_v54, %v2266_v30  ;;  %v2143_v36 = vadd.f32 1.0, %v4312_v48  ;;  %v2038_v50 = vmul.f32 1.442695, %v1953_v6  ;;  %4325 = vrcp.f32 %v2140_v2 }
 0x235   :  { %v4316_v44 = vpop.eup %4315  ;;  %v2265_v18 = vmul.f32 %v4314_v23, %v5825_v15 }
 0x236   :  { %3507 = vst [vmem:[%s6180_s6 + $0x38] sm:$0xff] %v3379_v19   ;;  %4327 = vrcp.f32 %v2143_v36  ;;  %v2141_v33 = vadd.f32 1.0, %v4316_v44 }
 0x237   :  { %v3374_v21 = vpack.c.bf16 %v2265_v18, %v2264_v61  ;;  %4329 = vpow2.f32 %v2038_v50 }
 0x238   :  { %4331 = vrcp.f32 %v2141_v33 }
 0x239   :  { %3506 = vst [vmem:[%s6180_s6 + $0x30] sm:$0xff] %v3374_v21  }
 0x23c   :  { %v4318_v16 = vpop.eup %4317  ;;  %v3614_v34 = vpop.f32.mrf.mxu1 }
 0x23d   :  { %v2146_v52 = vadd.f32 1.0, %v4318_v16  ;;  %v5906_v22 = vadd.f32 %v3614_v34, %v5663_v12 }
 0x23e   :  { %v1773_v15 = vpop.f32.mrf.mxu1  ;;  %v4320_v58 = vpop.eup %4319 }
 0x23f   :  { %v1958_v8 = vsub.f32 0.0, %v5906_v22  ;;  %v5910_v57 = vadd.f32 %v5663_v12, %v1773_v15  ;;  %v4322_v26 = vpop.eup %4321  ;;  %v2144_v49 = vadd.f32 1.0, %v4320_v58  ;;  %4333 = vrcp.f32 %v2146_v52 }
 0x240   :  { %v3615_v0 = vpop.f32.mrf.mxu1  ;;  %v4324_v27 = vpop.eup %4323  ;;  %v2270_v56 = vmul.f32 %v4322_v26, %v5852_v41 }
 0x241   :  { %v2048_v62 = vmul.f32 1.442695, %v1958_v8  ;;  %v1956_v17 = vsub.f32 0.0, %v5910_v57  ;;  %v5914_v25 = vadd.f32 %v3615_v0, %v5663_v12  ;;  %v4326_v7 = vpop.eup %4325  ;;  %4335 = vrcp.f32 %v2144_v49 }
 0x242   :  { %v2147_v9 = vadd.f32 1.0, %v4324_v27  ;;  %v1776_v43 = vpop.f32.mrf.mxu1  ;;  %v2268_v46 = vmul.f32 %v4326_v7, %v5856_v51 }
 0x243   :  { %v4328_v31 = vpop.eup %4327  ;;  %4337 = vpow2.f32 %v2048_v62  ;;  %v2044_v63 = vmul.f32 1.442695, %v1956_v17  ;;  %v1959_v38 = vsub.f32 0.0, %v5914_v25  ;;  %v5918_v11 = vadd.f32 %v5663_v12, %v1776_v43 }
 0x244   :  { %v4330_v4 = vpop.eup %4329  ;;  %v2271_v24 = vmul.f32 %v4328_v31, %v5862_v10  ;;  %4339 = vrcp.f32 %v2147_v9 }
 0x245   :  { %v4332_v45 = vpop.eup %4331  ;;  %v2145_v3 = vadd.f32 1.0, %v4330_v4  ;;  %4341 = vpow2.f32 %v2044_v63  ;;  %v2050_v40 = vmul.f32 1.442695, %v1959_v38  ;;  %v1957_v28 = vsub.f32 0.0, %v5918_v11 }
 0x246   :  { %v3389_v37 = vpack.c.bf16 %v2271_v24, %v2270_v56  ;;  %v2269_v20 = vmul.f32 %v4332_v45, %v5865_v59 }
 0x247   :  { %4343 = vrcp.f32 %v2145_v3  ;;  %v2046_v1 = vmul.f32 1.442695, %v1957_v28 }
 0x248   :  { %3509 = vst [vmem:[%s6180_s6 + $0x48] sm:$0xff] %v3389_v37   ;;  %v3384_v41 = vpack.c.bf16 %v2269_v20, %v2268_v46  ;;  %4345 = vpow2.f32 %v2050_v40 }
 0x249   :  { %4347 = vpow2.f32 %v2046_v1 }
 0x24a   :  { %3508 = vst [vmem:[%s6180_s6 + $0x40] sm:$0xff] %v3384_v41  }
 0x24c   :  { %v4334_v10 = vpop.eup %4333 }
 0x24d   :  { %v2274_v59 = vmul.f32 %v4334_v10, %v5874_v55 }
 0x24e   :  { %v4336_v60 = vpop.eup %4335 }
 0x24f   :  { %v2272_v30 = vmul.f32 %v4336_v60, %v5884_v39 }
 0x250   :  { %v4338_v35 = vpop.eup %4337 }
 0x251   :  { %v4340_v51 = vpop.eup %4339  ;;  %v2150_v32 = vadd.f32 1.0, %v4338_v35 }
 0x252   :  { %v4342_v47 = vpop.eup %4341  ;;  %v2275_v53 = vmul.f32 %v4340_v51, %v5888_v14 }
 0x253   :  { %v2148_v5 = vadd.f32 1.0, %v4342_v47  ;;  %v3618_v6 = vpop.f32.mrf.mxu1  ;;  %4349 = vrcp.f32 %v2150_v32 }
 0x254   :  { %v4344_v2 = vpop.eup %4343  ;;  %v3399_v42 = vpack.c.bf16 %v2275_v53, %v2274_v59  ;;  %v5939_v55 = vadd.f32 %v3618_v6, %v5663_v12 }
 0x255   :  { %v4346_v13 = vpop.eup %4345  ;;  %v2273_v54 = vmul.f32 %v4344_v2, %v5892_v29  ;;  %4351 = vrcp.f32 %v2148_v5  ;;  %v1789_v36 = vpop.f32.mrf.mxu1 }
 0x256   :  { %v4348_v48 = vpop.eup %4347  ;;  %3511 = vst [vmem:[%s6180_s6 + $0x58] sm:$0xff] %v3399_v42   ;;  %v2151_v23 = vadd.f32 1.0, %v4346_v13  ;;  %v1962_v39 = vsub.f32 0.0, %v5939_v55  ;;  %v5943_v29 = vadd.f32 %v5663_v12, %v1789_v36 }
 0x257   :  { %v3394_v14 = vpack.c.bf16 %v2273_v54, %v2272_v30  ;;  %v2149_v19 = vadd.f32 1.0, %v4348_v48  ;;  %v3619_v50 = vpop.f32.mrf.mxu1  ;;  %v5988_v48 = vld [vmem:[%s6179_s4] ss:$0 sm:$0xff] }
 0x258   :  { %4353 = vrcp.f32 %v2151_v23  ;;  %v2056_v44 = vmul.f32 1.442695, %v1962_v39  ;;  %v1960_v61 = vsub.f32 0.0, %v5943_v29  ;;  %v1801_v18 = vadd.f32 %v3619_v50, %v5663_v12 }
 0x259   :  { %3510 = vst [vmem:[%s6180_s6 + $0x50] sm:$0xff] %v3394_v14   ;;  %4355 = vrcp.f32 %v2149_v19  ;;  %v1792_v33 = vpop.f32.mrf.mxu1 }
 0x25a   :  { %4357 = vpow2.f32 %v2056_v44  ;;  %v2052_v21 = vmul.f32 1.442695, %v1960_v61  ;;  %v1963_v16 = vsub.f32 0.0, %v1801_v18  ;;  %v1793_v34 = vadd.f32 %v5663_v12, %v1792_v33 }
 0x25c   :  { %4359 = vpow2.f32 %v2052_v21  ;;  %v2058_v52 = vmul.f32 1.442695, %v1963_v16  ;;  %v1961_v15 = vsub.f32 0.0, %v1793_v34 }
 0x25e   :  { %4361 = vpow2.f32 %v2058_v52  ;;  %v2054_v58 = vmul.f32 1.442695, %v1961_v15 }
 0x260   :  { %4363 = vpow2.f32 %v2054_v58  ;;  %v4350_v8 = vpop.eup %4349 }
 0x261   :  { %v2278_v27 = vmul.f32 %v4350_v8, %v5906_v22 }
 0x262   :  { %v4352_v26 = vpop.eup %4351 }
 0x263   :  { %v2276_v17 = vmul.f32 %v4352_v26, %v5910_v57 }
 0x265   :  { %v4354_v49 = vpop.eup %4353 }
 0x266   :  { %v4356_v0 = vpop.eup %4355  ;;  %v2279_v62 = vmul.f32 %v4354_v49, %v5914_v25 }
 0x267   :  { %v2277_v7 = vmul.f32 %v4356_v0, %v5918_v11  ;;  %v4358_v43 = vpop.eup %4357 }
 0x268   :  { %v3409_v9 = vpack.c.bf16 %v2279_v62, %v2278_v27  ;;  %v2154_v63 = vadd.f32 1.0, %v4358_v43 }
 0x269   :  { %v3404_v31 = vpack.c.bf16 %v2277_v7, %v2276_v17  ;;  %v4360_v38 = vpop.eup %4359 }
 0x26a   :  { %3513 = vst [vmem:[%s6180_s6 + $0x68] sm:$0xff] %v3409_v9   ;;  %v2152_v22 = vadd.f32 1.0, %v4360_v38  ;;  %4365 = vrcp.f32 %v2154_v63 }
 0x26b   :  { %3512 = vst [vmem:[%s6180_s6 + $0x60] sm:$0xff] %v3404_v31   ;;  %v4362_v4 = vpop.eup %4361 }
 0x26c   :  { %v2155_v25 = vadd.f32 1.0, %v4362_v4  ;;  %4367 = vrcp.f32 %v2152_v22 }
 0x26d   :  { %v4364_v57 = vpop.eup %4363 }
 0x26e   :  { %4369 = vrcp.f32 %v2155_v25  ;;  %v2153_v11 = vadd.f32 1.0, %v4364_v57 }
 0x26f   :  { %v3622_v56 = vpop.f32.mrf.mxu1 }
 0x270   :  { %4371 = vrcp.f32 %v2153_v11  ;;  %v5962_v24 = vadd.f32 %v3622_v56, %v5663_v12 }
 0x271   :  { %v1805_v45 = vpop.f32.mrf.mxu1 }
 0x272   :  { %v1966_v3 = vsub.f32 0.0, %v5962_v24  ;;  %v5966_v40 = vadd.f32 %v5663_v12, %v1805_v45 }
 0x273   :  { %v3623_v28 = vpop.f32.mrf.mxu1 }
 0x274   :  { %v2064_v46 = vmul.f32 1.442695, %v1966_v3  ;;  %v1964_v37 = vsub.f32 0.0, %v5966_v40  ;;  %v5970_v20 = vadd.f32 %v3623_v28, %v5663_v12 }
 0x275   :  { %v1808_v1 = vpop.f32.mrf.mxu1 }
 0x276   :  { %4373 = vpow2.f32 %v2064_v46  ;;  %v2060_v41 = vmul.f32 1.442695, %v1964_v37  ;;  %v1967_v10 = vsub.f32 0.0, %v5970_v20  ;;  %v5974_v60 = vadd.f32 %v5663_v12, %v1808_v1 }
 0x277   :  { %v4366_v35 = vpop.eup %4365 }
 0x278   :  { %4375 = vpow2.f32 %v2060_v41  ;;  %v2066_v51 = vmul.f32 1.442695, %v1967_v10  ;;  %v1965_v47 = vsub.f32 0.0, %v5974_v60  ;;  %v2282_v5 = vmul.f32 %v4366_v35, %v5939_v55 }
 0x279   :  { %v4368_v59 = vpop.eup %4367 }
 0x27a   :  { %4377 = vpow2.f32 %v2066_v51  ;;  %v2062_v32 = vmul.f32 1.442695, %v1965_v47  ;;  %v2280_v13 = vmul.f32 %v4368_v59, %v5943_v29 }
 0x27b   :  { %v4370_v53 = vpop.eup %4369 }
 0x27c   :  { %v2283_v2 = vmul.f32 %v4370_v53, %v1801_v18  ;;  %4379 = vpow2.f32 %v2062_v32 }
 0x27d   :  { %v4372_v42 = vpop.eup %4371 }
 0x27e   :  { %v3419_v30 = vpack.c.bf16 %v2283_v2, %v2282_v5  ;;  %v2281_v54 = vmul.f32 %v4372_v42, %v1793_v34 }
 0x280   :  { %3515 = vst [vmem:[%s6180_s6 + $0x78] sm:$0xff] %v3419_v30   ;;  %v3414_v12 = vpack.c.bf16 %v2281_v54, %v2280_v13 }
 0x282   :  { %3514 = vst [vmem:[%s6180_s6 + $0x70] sm:$0xff] %v3414_v12  }
 0x283   :  { %v4374_v55 = vpop.eup %4373 }
 0x284   :  { %v3626_v6 = vpop.f32.mrf.mxu1  ;;  %v2158_v19 = vadd.f32 1.0, %v4374_v55 }
 0x285   :  { %v5991_v23 = vadd.f32 %v5988_v48, %v3626_v6  ;;  %v4376_v29 = vpop.eup %4375 }
 0x286   :  { %v1821_v14 = vpop.f32.mrf.mxu1  ;;  %v2156_v44 = vadd.f32 1.0, %v4376_v29  ;;  %4381 = vrcp.f32 %v2158_v19 }
 0x287   :  { %v1970_v36 = vsub.f32 0.0, %v5991_v23  ;;  %v5995_v39 = vadd.f32 %v5988_v48, %v1821_v14  ;;  %v4378_v33 = vpop.eup %4377 }
 0x288   :  { %v3627_v50 = vpop.f32.mrf.mxu1  ;;  %4383 = vrcp.f32 %v2156_v44  ;;  %v2159_v34 = vadd.f32 1.0, %v4378_v33 }
 0x289   :  { %v2072_v61 = vmul.f32 1.442695, %v1970_v36  ;;  %v1968_v18 = vsub.f32 0.0, %v5995_v39  ;;  %v5999_v21 = vadd.f32 %v5988_v48, %v3627_v50  ;;  %v4380_v58 = vpop.eup %4379 }
 0x28a   :  { %v1824_v16 = vpop.f32.mrf.mxu1  ;;  %v2157_v26 = vadd.f32 1.0, %v4380_v58 }
 0x28b   :  { %v2068_v52 = vmul.f32 1.442695, %v1968_v18  ;;  %v1825_v15 = vadd.f32 %v5988_v48, %v1824_v16  ;;  %4385 = vpow2.f32 %v2072_v61  ;;  %v1971_v8 = vsub.f32 0.0, %v5999_v21 }
 0x28c   :  { %4387 = vrcp.f32 %v2159_v34 }
 0x28d   :  { %v1969_v49 = vsub.f32 0.0, %v1825_v15  ;;  %4389 = vpow2.f32 %v2068_v52  ;;  %v2074_v0 = vmul.f32 1.442695, %v1971_v8 }
 0x28e   :  { %4391 = vrcp.f32 %v2157_v26 }
 0x28f   :  { %v2070_v27 = vmul.f32 1.442695, %v1969_v49  ;;  %4393 = vpow2.f32 %v2074_v0 }
 0x291   :  { %4395 = vpow2.f32 %v2070_v27 }
 0x293   :  { %v4382_v62 = vpop.eup %4381 }
 0x294   :  { %v2286_v63 = vmul.f32 %v4382_v62, %v5962_v24 }
 0x295   :  { %v4384_v17 = vpop.eup %4383 }
 0x296   :  { %v2284_v57 = vmul.f32 %v4384_v17, %v5966_v40 }
 0x298   :  { %v4386_v7 = vpop.eup %4385 }
 0x299   :  { %v4388_v9 = vpop.eup %4387  ;;  %v2162_v43 = vadd.f32 1.0, %v4386_v7 }
 0x29a   :  { %v4390_v31 = vpop.eup %4389  ;;  %v2287_v38 = vmul.f32 %v4388_v9, %v5970_v20 }
 0x29b   :  { %v4392_v22 = vpop.eup %4391  ;;  %v2160_v4 = vadd.f32 1.0, %v4390_v31  ;;  %4397 = vrcp.f32 %v2162_v43 }
 0x29c   :  { %v4394_v25 = vpop.eup %4393  ;;  %v3429_v11 = vpack.c.bf16 %v2287_v38, %v2286_v63  ;;  %v2285_v56 = vmul.f32 %v4392_v22, %v5974_v60 }
 0x29d   :  { %v2163_v3 = vadd.f32 1.0, %v4394_v25  ;;  %4399 = vrcp.f32 %v2160_v4 }
 0x29e   :  { %v4396_v45 = vpop.eup %4395  ;;  %3517 = vst [vmem:[%s6180_s6 + $0x88] sm:$0xff] %v3429_v11   ;;  %v3424_v28 = vpack.c.bf16 %v2285_v56, %v2284_v57 }
 0x29f   :  { %v2161_v24 = vadd.f32 1.0, %v4396_v45  ;;  %4401 = vrcp.f32 %v2163_v3 }
 0x2a0   :  { %3516 = vst [vmem:[%s6180_s6 + $0x80] sm:$0xff] %v3424_v28  }
 0x2a1   :  { %4403 = vrcp.f32 %v2161_v24 }
 0x2a4   :  { %v3630_v40 = vpop.f32.mrf.mxu1 }
 0x2a5   :  { %v6014_v46 = vadd.f32 %v5988_v48, %v3630_v40 }
 0x2a6   :  { %v1837_v37 = vpop.f32.mrf.mxu1 }
 0x2a7   :  { %v1974_v20 = vsub.f32 0.0, %v6014_v46  ;;  %v6018_v1 = vadd.f32 %v5988_v48, %v1837_v37 }
 0x2a8   :  { %v3631_v41 = vpop.f32.mrf.mxu1  ;;  %v4398_v47 = vpop.eup %4397 }
 0x2a9   :  { %v2080_v10 = vmul.f32 1.442695, %v1974_v20  ;;  %v1972_v60 = vsub.f32 0.0, %v6018_v1  ;;  %v1849_v35 = vadd.f32 %v5988_v48, %v3631_v41  ;;  %v2290_v54 = vmul.f32 %v4398_v47, %v5991_v23 }
 0x2aa   :  { %v1840_v51 = vpop.f32.mrf.mxu1  ;;  %v4400_v5 = vpop.eup %4399 }
 0x2ab   :  { %4405 = vpow2.f32 %v2080_v10  ;;  %v2076_v59 = vmul.f32 1.442695, %v1972_v60  ;;  %v1975_v53 = vsub.f32 0.0, %v1849_v35  ;;  %v6023_v32 = vadd.f32 %v5988_v48, %v1840_v51 }
 0x2ac   :  { %v4402_v2 = vpop.eup %4401  ;;  %v2288_v6 = vmul.f32 %v4400_v5, %v5995_v39 }
 0x2ad   :  { %4407 = vpow2.f32 %v2076_v59  ;;  %v2082_v42 = vmul.f32 1.442695, %v1975_v53  ;;  %v1973_v13 = vsub.f32 0.0, %v6023_v32  ;;  %v2291_v12 = vmul.f32 %v4402_v2, %v5999_v21 }
 0x2ae   :  { %v4404_v30 = vpop.eup %4403 }
 0x2af   :  { %v2289_v55 = vmul.f32 %v4404_v30, %v1825_v15  ;;  %4409 = vpow2.f32 %v2082_v42  ;;  %v2078_v14 = vmul.f32 1.442695, %v1973_v13  ;;  %v3439_v19 = vpack.c.bf16 %v2291_v12, %v2290_v54 }
 0x2b1   :  { %v3434_v36 = vpack.c.bf16 %v2289_v55, %v2288_v6  ;;  %4411 = vpow2.f32 %v2078_v14  ;;  %3519 = vst [vmem:[%s6180_s6 + $0x98] sm:$0xff] %v3439_v19  }
 0x2b3   :  { %3518 = vst [vmem:[%s6180_s6 + $0x90] sm:$0xff] %v3434_v36  }
 0x2b8   :  { %v4406_v29 = vpop.eup %4405 }
 0x2b9   :  { %v2166_v23 = vadd.f32 1.0, %v4406_v29 }
 0x2ba   :  { %v4408_v50 = vpop.eup %4407 }
 0x2bb   :  { %v2164_v44 = vadd.f32 1.0, %v4408_v50  ;;  %4413 = vrcp.f32 %v2166_v23 }
 0x2bc   :  { %v4410_v61 = vpop.eup %4409 }
 0x2bd   :  { %v2167_v39 = vadd.f32 1.0, %v4410_v61  ;;  %4415 = vrcp.f32 %v2164_v44 }
 0x2be   :  { %v4412_v18 = vpop.eup %4411 }
 0x2bf   :  { %4417 = vrcp.f32 %v2167_v39  ;;  %v2165_v33 = vadd.f32 1.0, %v4412_v18 }
 0x2c1   :  { %4419 = vrcp.f32 %v2165_v33 }
 0x2c2   :  { %v3634_v21 = vpop.f32.mrf.mxu1 }
 0x2c3   :  { %v6036_v16 = vadd.f32 %v5988_v48, %v3634_v21 }
 0x2c4   :  { %v1853_v34 = vpop.f32.mrf.mxu1 }
 0x2c5   :  { %v1978_v52 = vsub.f32 0.0, %v6036_v16  ;;  %v6040_v15 = vadd.f32 %v5988_v48, %v1853_v34 }
 0x2c6   :  { %v3635_v58 = vpop.f32.mrf.mxu1 }
 0x2c7   :  { %v2088_v8 = vmul.f32 1.442695, %v1978_v52  ;;  %v1976_v26 = vsub.f32 0.0, %v6040_v15  ;;  %v6044_v49 = vadd.f32 %v5988_v48, %v3635_v58 }
 0x2c8   :  { %v1856_v0 = vpop.f32.mrf.mxu1  ;;  %v4414_v27 = vpop.eup %4413 }
 0x2c9   :  { %4421 = vpow2.f32 %v2088_v8  ;;  %v2084_v62 = vmul.f32 1.442695, %v1976_v26  ;;  %v1979_v17 = vsub.f32 0.0, %v6044_v49  ;;  %v6048_v7 = vadd.f32 %v5988_v48, %v1856_v0 }
 0x2ca   :  { %v3638_v9 = vpop.f32.mrf.mxu1  ;;  %v4416_v43 = vpop.eup %4415  ;;  %v2294_v22 = vmul.f32 %v4414_v27, %v6014_v46 }
 0x2cb   :  { %4423 = vpow2.f32 %v2084_v62  ;;  %v2090_v31 = vmul.f32 1.442695, %v1979_v17  ;;  %v6051_v63 = vadd.f32 %v5988_v48, %v3638_v9  ;;  %v1977_v4 = vsub.f32 0.0, %v6048_v7 }
 0x2cc   :  { %v4418_v38 = vpop.eup %4417  ;;  %v1869_v25 = vpop.f32.mrf.mxu1  ;;  %v2292_v3 = vmul.f32 %v4416_v43, %v6018_v1 }
 0x2cd   :  { %v2295_v57 = vmul.f32 %v4418_v38, %v1849_v35  ;;  %4425 = vpow2.f32 %v2090_v31  ;;  %v1982_v11 = vsub.f32 0.0, %v6051_v63  ;;  %v6057_v56 = vadd.f32 %v5988_v48, %v1869_v25 }
 0x2ce   :  { %v4420_v45 = vpop.eup %4419  ;;  %v2086_v28 = vmul.f32 1.442695, %v1977_v4  ;;  %v3639_v24 = vpop.f32.mrf.mxu1 }
 0x2cf   :  { %v3449_v40 = vpack.c.bf16 %v2295_v57, %v2294_v22  ;;  %v2293_v37 = vmul.f32 %v4420_v45, %v6023_v32  ;;  %v2096_v20 = vmul.f32 1.442695, %v1982_v11  ;;  %v1980_v46 = vsub.f32 0.0, %v6057_v56 }
 0x2d0   :  { %4427 = vpow2.f32 %v2086_v28  ;;  %v6063_v41 = vadd.f32 %v5988_v48, %v3639_v24  ;;  %v1872_v10 = vpop.f32.mrf.mxu1 }
 0x2d1   :  { %3521 = vst [vmem:[%s6180_s6 + $0xa8] sm:$0xff] %v3449_v40   ;;  %v3444_v60 = vpack.c.bf16 %v2293_v37, %v2292_v3  ;;  %4429 = vpow2.f32 %v2096_v20  ;;  %v2092_v1 = vmul.f32 1.442695, %v1980_v46  ;;  %v6069_v35 = vadd.f32 %v5988_v48, %v1872_v10 }
 0x2d2   :  { %v1983_v51 = vsub.f32 0.0, %v6063_v41  ;;  %v3642_v47 = vpop.f32.mrf.mxu1 }
 0x2d3   :  { %3520 = vst [vmem:[%s6180_s6 + $0xa0] sm:$0xff] %v3444_v60   ;;  %4431 = vpow2.f32 %v2092_v1  ;;  %v1981_v59 = vsub.f32 0.0, %v6069_v35  ;;  %v6077_v53 = vadd.f32 %v5988_v48, %v3642_v47 }
 0x2d4   :  { %v2098_v32 = vmul.f32 1.442695, %v1983_v51  ;;  %v1885_v5 = vpop.f32.mrf.mxu1 }
 0x2d5   :  { %v2094_v2 = vmul.f32 1.442695, %v1981_v59  ;;  %v1986_v42 = vsub.f32 0.0, %v6077_v53  ;;  %v6081_v13 = vadd.f32 %v5988_v48, %v1885_v5 }
 0x2d6   :  { %v4422_v30 = vpop.eup %4421  ;;  %4433 = vpow2.f32 %v2098_v32  ;;  %v3643_v54 = vpop.f32.mrf.mxu1 }
 0x2d7   :  { %v2170_v12 = vadd.f32 1.0, %v4422_v30  ;;  %4435 = vpow2.f32 %v2094_v2  ;;  %v2104_v6 = vmul.f32 1.442695, %v1986_v42  ;;  %v1984_v55 = vsub.f32 0.0, %v6081_v13 }
 0x2d8   :  { %v4424_v14 = vpop.eup %4423  ;;  %v6085_v19 = vadd.f32 %v5988_v48, %v3643_v54  ;;  %v1888_v36 = vpop.f32.mrf.mxu1 }
 0x2d9   :  { %4437 = vrcp.f32 %v2170_v12  ;;  %v2168_v29 = vadd.f32 1.0, %v4424_v14  ;;  %v2100_v23 = vmul.f32 1.442695, %v1984_v55  ;;  %v6088_v50 = vadd.f32 %v5988_v48, %v1888_v36 }
 0x2da   :  { %v4426_v44 = vpop.eup %4425  ;;  %4439 = vpow2.f32 %v2104_v6  ;;  %v1987_v61 = vsub.f32 0.0, %v6085_v19  ;;  %v3646_v39 = vpop.f32.mrf.mxu1 }
 0x2db   :  { %4441 = vrcp.f32 %v2168_v29  ;;  %v2171_v18 = vadd.f32 1.0, %v4426_v44  ;;  %v1985_v33 = vsub.f32 0.0, %v6088_v50  ;;  %v6093_v21 = vadd.f32 %v5988_v48, %v3646_v39 }
 0x2dc   :  { %4443 = vpow2.f32 %v2100_v23  ;;  %v2106_v34 = vmul.f32 1.442695, %v1987_v61  ;;  %v1901_v52 = vpop.f32.mrf.mxu1 }
 0x2dd   :  { %v4428_v58 = vpop.eup %4427  ;;  %4445 = vrcp.f32 %v2171_v18  ;;  %v2102_v8 = vmul.f32 1.442695, %v1985_v33  ;;  %v1990_v26 = vsub.f32 0.0, %v6093_v21  ;;  %v6097_v0 = vadd.f32 %v5988_v48, %v1901_v52 }
 0x2de   :  { %v4430_v27 = vpop.eup %4429  ;;  %v2169_v62 = vadd.f32 1.0, %v4428_v58  ;;  %4447 = vpow2.f32 %v2106_v34  ;;  %v3647_v17 = vpop.f32.mrf.mxu1 }
 0x2df   :  { %v2174_v9 = vadd.f32 1.0, %v4430_v27  ;;  %4449 = vpow2.f32 %v2102_v8  ;;  %v2112_v43 = vmul.f32 1.442695, %v1990_v26  ;;  %v1988_v31 = vsub.f32 0.0, %v6097_v0 }
 0x2e0   :  { %v4432_v38 = vpop.eup %4431  ;;  %4451 = vrcp.f32 %v2169_v62  ;;  %v6101_v22 = vadd.f32 %v5988_v48, %v3647_v17  ;;  %v1904_v4 = vpop.f32.mrf.mxu1 }
 0x2e1   :  { %4453 = vrcp.f32 %v2174_v9  ;;  %v2172_v25 = vadd.f32 1.0, %v4432_v38  ;;  %v2108_v57 = vmul.f32 1.442695, %v1988_v31  ;;  %v6104_v11 = vadd.f32 %v5988_v48, %v1904_v4 }
 0x2e2   :  { %4455 = vpow2.f32 %v2112_v43  ;;  %v1991_v45 = vsub.f32 0.0, %v6101_v22  ;;  %v3650_v3 = vpop.f32.mrf.mxu1 }
 0x2e3   :  { %v4434_v28 = vpop.eup %4433  ;;  %4457 = vrcp.f32 %v2172_v25  ;;  %v1989_v24 = vsub.f32 0.0, %v6104_v11  ;;  %v6109_v40 = vadd.f32 %v5988_v48, %v3650_v3 }
 0x2e4   :  { %v4436_v37 = vpop.eup %4435  ;;  %v2175_v20 = vadd.f32 1.0, %v4434_v28  ;;  %4459 = vpow2.f32 %v2108_v57  ;;  %v2114_v46 = vmul.f32 1.442695, %v1991_v45  ;;  %v1917_v10 = vpop.f32.mrf.mxu1 }
 0x2e5   :  { %v2173_v60 = vadd.f32 1.0, %v4436_v37  ;;  %v2110_v1 = vmul.f32 1.442695, %v1989_v24  ;;  %v1994_v51 = vsub.f32 0.0, %v6109_v40  ;;  %v6113_v47 = vadd.f32 %v5988_v48, %v1917_v10 }
 0x2e6   :  { %v4438_v59 = vpop.eup %4437  ;;  %4461 = vrcp.f32 %v2175_v20  ;;  %v3651_v32 = vpop.f32.mrf.mxu1 }
 0x2e7   :  { %v4440_v5 = vpop.eup %4439  ;;  %4463 = vrcp.f32 %v2173_v60  ;;  %v2120_v2 = vmul.f32 1.442695, %v1994_v51  ;;  %v1992_v42 = vsub.f32 0.0, %v6113_v47  ;;  %v6117_v12 = vadd.f32 %v5988_v48, %v3651_v32 }
 0x2e8   :  { %v4442_v30 = vpop.eup %4441  ;;  %v2178_v54 = vadd.f32 1.0, %v4440_v5  ;;  %4465 = vpow2.f32 %v2114_v46  ;;  %v1920_v6 = vpop.f32.mrf.mxu1  ;;  %v2298_v39 = vmul.f32 %v4438_v59, %v6036_v16 }
 0x2e9   :  { %v4444_v55 = vpop.eup %4443  ;;  %4467 = vpow2.f32 %v2110_v1  ;;  %v2116_v14 = vmul.f32 1.442695, %v1992_v42  ;;  %v6120_v36 = vadd.f32 %v5988_v48, %v1920_v6  ;;  %v1995_v44 = vsub.f32 0.0, %v6117_v12 }
 0x2ea   :  { %v4446_v29 = vpop.eup %4445  ;;  %4469 = vrcp.f32 %v2178_v54  ;;  %v2176_v23 = vadd.f32 1.0, %v4444_v55  ;;  %v2296_v17 = vmul.f32 %v4442_v30, %v6040_v15 }
 0x2eb   :  { %v4448_v61 = vpop.eup %4447  ;;  %v2299_v18 = vmul.f32 %v4446_v29, %v6044_v49  ;;  %4471 = vpow2.f32 %v2120_v2  ;;  %v1993_v33 = vsub.f32 0.0, %v6120_v36  ;;  %v2122_v58 = vmul.f32 1.442695, %v1995_v44 }
 0x2ec   :  { %v4450_v34 = vpop.eup %4449  ;;  %4473 = vrcp.f32 %v2176_v23  ;;  %v2179_v52 = vadd.f32 1.0, %v4448_v61 }
 0x2ed   :  { %v4452_v8 = vpop.eup %4451  ;;  %v3459_v48 = vpack.c.bf16 %v2299_v18, %v2298_v39  ;;  %v2177_v26 = vadd.f32 1.0, %v4450_v34  ;;  %4475 = vpow2.f32 %v2116_v14  ;;  %v2118_v27 = vmul.f32 1.442695, %v1993_v33 }
 0x2ee   :  { %v4454_v62 = vpop.eup %4453  ;;  %v2297_v9 = vmul.f32 %v4452_v8, %v6048_v7  ;;  %4477 = vrcp.f32 %v2179_v52 }
 0x2ef   :  { %v4456_v16 = vpop.eup %4455  ;;  %3523 = vst [vmem:[%s6180_s6 + $0xb8] sm:$0xff] %v3459_v48   ;;  %4479 = vrcp.f32 %v2177_v26  ;;  %v2302_v25 = vmul.f32 %v4454_v62, %v6051_v63 }
 0x2f0   :  { %v4458_v49 = vpop.eup %4457  ;;  %v3454_v43 = vpack.c.bf16 %v2297_v9, %v2296_v17  ;;  %4481 = vpow2.f32 %v2122_v58  ;;  %v2182_v38 = vadd.f32 1.0, %v4456_v16 }
 0x2f1   :  { %v4460_v31 = vpop.eup %4459  ;;  %4483 = vpow2.f32 %v2118_v27  ;;  %v2300_v3 = vmul.f32 %v4458_v49, %v6057_v56 }
 0x2f2   :  { %3522 = vst [vmem:[%s6180_s6 + $0xb0] sm:$0xff] %v3454_v43   ;;  %v2180_v4 = vadd.f32 1.0, %v4460_v31  ;;  %4485 = vrcp.f32 %v2182_v38 }
 0x2f3   :  { %v4462_v15 = vpop.eup %4461 }
 0x2f4   :  { %v4464_v7 = vpop.eup %4463  ;;  %v2303_v57 = vmul.f32 %v4462_v15, %v6063_v41  ;;  %4487 = vrcp.f32 %v2180_v4 }
 0x2f5   :  { %v4466_v45 = vpop.eup %4465  ;;  %v2301_v28 = vmul.f32 %v4464_v7, %v6069_v35 }
 0x2f6   :  { %v4468_v24 = vpop.eup %4467  ;;  %v3469_v37 = vpack.c.bf16 %v2303_v57, %v2302_v25  ;;  %v2183_v20 = vadd.f32 1.0, %v4466_v45 }
 0x2f7   :  { %v4470_v46 = vpop.eup %4469  ;;  %v3464_v10 = vpack.c.bf16 %v2301_v28, %v2300_v3  ;;  %v2181_v60 = vadd.f32 1.0, %v4468_v24 }
 0x2f8   :  { %v4472_v1 = vpop.eup %4471  ;;  %3525 = vst [vmem:[%s6180_s6 + $0xc8] sm:$0xff] %v3469_v37   ;;  %4489 = vrcp.f32 %v2183_v20  ;;  %v2306_v32 = vmul.f32 %v4470_v46, %v6077_v53 }
 0x2f9   :  { %v4474_v63 = vpop.eup %4473  ;;  %3524 = vst [vmem:[%s6180_s6 + $0xc0] sm:$0xff] %v3464_v10   ;;  %4491 = vrcp.f32 %v2181_v60  ;;  %v2186_v41 = vadd.f32 1.0, %v4472_v1 }
 0x2fa   :  { %v4476_v56 = vpop.eup %4475  ;;  %v2304_v42 = vmul.f32 %v4474_v63, %v6081_v13 }
 0x2fb   :  { %v4478_v35 = vpop.eup %4477  ;;  %v2184_v51 = vadd.f32 1.0, %v4476_v56  ;;  %4493 = vrcp.f32 %v2186_v41 }
 0x2fc   :  { %v4480_v59 = vpop.eup %4479  ;;  %v2307_v5 = vmul.f32 %v4478_v35, %v6085_v19 }
 0x2fd   :  { %v4482_v2 = vpop.eup %4481  ;;  %v2305_v30 = vmul.f32 %v4480_v59, %v6088_v50  ;;  %4495 = vrcp.f32 %v2184_v51 }
 0x2fe   :  { %v4484_v54 = vpop.eup %4483  ;;  %v3479_v6 = vpack.c.bf16 %v2307_v5, %v2306_v32  ;;  %v2187_v55 = vadd.f32 1.0, %v4482_v2 }
 0x2ff   :  { %v3474_v14 = vpack.c.bf16 %v2305_v30, %v2304_v42  ;;  %v2185_v29 = vadd.f32 1.0, %v4484_v54  ;;  %v4486_v53 = vpop.eup %4485 }
 0x300   :  { %3527 = vst [vmem:[%s6180_s6 + $0xd8] sm:$0xff] %v3479_v6   ;;  %4497 = vrcp.f32 %v2187_v55  ;;  %v2310_v23 = vmul.f32 %v4486_v53, %v6093_v21 }
 0x301   :  { %3526 = vst [vmem:[%s6180_s6 + $0xd0] sm:$0xff] %v3474_v14   ;;  %4499 = vrcp.f32 %v2185_v29  ;;  %v4488_v13 = vpop.eup %4487 }
 0x302   :  { %v2308_v61 = vmul.f32 %v4488_v13, %v6097_v0 }
 0x305   :  { %v4490_v19 = vpop.eup %4489 }
 0x306   :  { %v4492_v50 = vpop.eup %4491  ;;  %v2311_v44 = vmul.f32 %v4490_v19, %v6101_v22 }
 0x307   :  { %v2309_v39 = vmul.f32 %v4492_v50, %v6104_v11 }
 0x308   :  { %v3489_v18 = vpack.c.bf16 %v2311_v44, %v2310_v23  ;;  %v4494_v34 = vpop.eup %4493 }
 0x309   :  { %v3484_v33 = vpack.c.bf16 %v2309_v39, %v2308_v61  ;;  %v2314_v22 = vmul.f32 %v4494_v34, %v6109_v40 }
 0x30a   :  { %3529 = vst [vmem:[%s6180_s6 + $0xe8] sm:$0xff] %v3489_v18   ;;  %v4496_v52 = vpop.eup %4495 }
 0x30b   :  { %3528 = vst [vmem:[%s6180_s6 + $0xe0] sm:$0xff] %v3484_v33   ;;  %v2312_v11 = vmul.f32 %v4496_v52, %v6113_v47 }
 0x30d   :  { %v4498_v58 = vpop.eup %4497 }
 0x30e   :  { %v4500_v21 = vpop.eup %4499  ;;  %v2315_v0 = vmul.f32 %v4498_v58, %v6117_v12 }
 0x30f   :  { %v2313_v8 = vmul.f32 %v4500_v21, %v6120_v36 }
 0x310   :  { %v3499_v48 = vpack.c.bf16 %v2315_v0, %v2314_v22 }
 0x311   :  { %v3494_v26 = vpack.c.bf16 %v2313_v8, %v2312_v11 }
 0x312   :  { %3531 = vst [vmem:[%s6180_s6 + $0xf8] sm:$0xff] %v3499_v48  }
 0x313   :  { %3530 = vst [vmem:[%s6180_s6 + $0xf0] sm:$0xff] %v3494_v26  }

// kernel: _lambda_.3
= control target key start
LH: loop header
LB: loop body
LE: loop exit
PB: predicated region body
PF: predicated region fallthrough
CT: control target
= control target key end

     0   :  { %s5812_s24 = smov 0   ;;  %s5814_s25 = smov 0   ;;  %s7414_s0 = inlined_call_operand.vmem [shape: bf16[2,16,16,128], index: 0, kind: input, shape index: {}]   ;;  %s7415_s1 = inlined_call_operand.vmem [shape: bf16[2,16,16,256], index: 1, kind: input, shape index: {}]   ;;  %s7416_s2 = inlined_call_operand.vmem [shape: bf16[9,128,128], index: 2, kind: input, shape index: {}]   ;;  %s7417_s3 = inlined_call_operand.vmem [shape: f32[1,128], index: 3, kind: input, shape index: {}]   ;;  %s7418_s4 = inlined_call_operand.vmem [shape: bf16[128,128], index: 4, kind: input, shape index: {}]   ;;  %s7419_s5 = inlined_call_operand.vmem [shape: bf16[128,128], index: 5, kind: input, shape index: {}]   ;;  %s7420_s6 = inlined_call_operand.vmem [shape: f32[1,128], index: 6, kind: input, shape index: {}]   ;;  %s7421_s7 = inlined_call_operand.vmem [shape: bf16[2,16,16,128], index: 7, kind: output, shape index: {}]  }
   0x1   :  { %s5816_s26 = smov 0   ;;  %s5818_s27 = smov 0  }
   0x2   :  { %s5820_s28 = smov 0  }
   0x3 LB: > { %7439 = sst [smem:[#allocation3_spill]] %s5764_s27  ;;  %s26_s29 = sadd.s32 1, %s5760_s26  ;;  %s5768_s28 = sphi %s5820_s28, %s17_s28   ;;  %s5764_s27 = sphi %s5818_s27, %s7530_s27   ;;  %s5760_s26 = sphi %s5816_s26, %s7532_s26   ;;  %s5756_s25 = sphi %s5814_s25, %s7528_s25   ;;  %s5752_s24 = sphi %s5812_s24, %s7531_s24  }
   0x4   : > { %s29_s30 = sadd.s32 1, %s5764_s27  ;;  %p27_p0 = scmp.ge.s32.totalorder %s26_s29, 2 }
   0x5   : > { %p4471_p1 = scmp.ge.s32.totalorder %s5768_s28, 1  ;;  %p269_p2 = scmp.lt.s32.totalorder %s5768_s28, 5 }
   0x6   : > { %s7534_s29 = smov (%p27_p0, %s26_s29), 0  ;;  %s7536_s30 = smov (!%p27_p0, %s29_s30), %s5764_s27 }
   0x7   : > { %7440 = sst [smem:[#allocation4_spill]] %s7534_s29  ;;  %p270_p3 = pnand %p4471_p1, %p269_p2 }
   0x8   : > { %p31_p4 = scmp.ge.s32.totalorder %s7536_s30, 2 }
   0x9   : > { %273 = sbr.rel (%p270_p3) target bundleno = 800 (0x320), region = 48 }
   0xa   : > { %s7538_s30 = smov (%p31_p4, %s7536_s30), 0 }
   0xb   : > { %7441 = sst [smem:[#allocation5_spill]] %s7538_s30 }
   0xe   : > { %p316_p5 = scmp.lt.s32.totalorder %s5756_s25, 1  ;;  %s5845_s8 = sshll.u32 %s5752_s24, 3  ;;  %vm364_vm0 = vsmask.f32 256  ;;  %vm528_vm1 = vcmask 1043456   ;;  %vm535_vm3 = vcmask 1040384  }
   0xf   : > { %p324_p6 = scmp.lt.s32.totalorder %s5845_s8, 15  ;;  %s4838_s9 = sshll.u32 %s5752_s24, 6  ;;  %vm529_vm2 = vsmask.f32 7938  ;;  %v531_v8 = vld [vmem:[#allocation2 + $0xc] sm:$0xf]  ;;  %vm5886_vm4 = vmand %vm535_vm3, %vm364_vm0 }
  0x10   : > { %s7540_s25 = smov (!%p316_p5, %s5756_s25), 1  ;;  %v537_v9 = vld [vmem:[#allocation2 + $0x14] sm:$0x1]  ;;  %v540_v11 = vld [vmem:[#allocation2 + $0x18] sm:$0xf]  ;;  %vm5897_vm5 = vmand %vm528_vm1, %vm529_vm2  ;;  %p4485_p7 = scmp.le.s32.totalorder %s5752_s24, 0 }
  0x11   : > { %s325_s10 = scalar_select %p324_p6, %s5845_s8, 15  ;;  %v544_v19 = vld [vmem:[#allocation2 + $0x20] sm:$0x1]  ;;  %v547_v25 = vld [vmem:[#allocation2 + $0x24] sm:$0xf]  ;;  %vm6042_vm8 = vmand %vm535_vm3, %vm529_vm2 }
  0x12   : > { %s4836_s11 = sshll.u32 %s7540_s25, 7  ;;  %s4476_s12 = sshll.u32 %s7540_s25, 6  ;;  %v551_v43 = vld [vmem:[#allocation2 + $0x2c] sm:$0x1]  ;;  %v554_v44 = vld [vmem:[#allocation2 + $0x30] sm:$0xf] }
  0x13   : > { %s5853_s15 = scalar_lea.vmem %s7414_s0, %s4836_s11  ;;  %s4475_s16 = sshll.u32 %s325_s10, 2  ;;  %vm365_vm6 = vsmask.f32 4368  ;;  %v558_v52 = vld [vmem:[#allocation2 + $0x38] sm:$0x1] }
  0x14   : > { %s328_s17 = sadd.s32 %s4476_s12, %s4475_s16  ;;  %s4479_s18 = sshll.u32 %s325_s10, 1  ;;  %v561_v60 = vld [vmem:[#allocation2 + $0x3c] sm:$0xf]  ;;  %vm5998_vm7 = vmor %vm364_vm0, %vm365_vm6 }
  0x15   : > { %s4477_s19 = sshll.u32 %s328_s17, 2  ;;  %s4480_s20 = sshll.u32 %s7540_s25, 5 }
  0x16   : > { %s5858_s23 = scalar_lea.vmem %s7415_s1, %s4477_s19  ;;  %s339_s30 = sadd.s32 %s4480_s20, %s4479_s18 }
  0x17   : > { %s4481_s29 = sshll.u32 %s339_s30, 2  ;;  %s5861_s27 = scalar_lea.vmem %s5853_s15, %s4838_s9 }
  0x18   : > { %s5866_s11 = scalar_lea.vmem %s7421_s7, %s4481_s29  ;;  %v348_v0 = vld [vmem:[%s5861_s27] sm:$0xf]  ;;  %v5870_v1 = vld [vmem:[%s5861_s27 + $0x4] sm:$0xf]  ;;  %v350_v2 = vld [vmem:[%s5861_s27 + $0x8] sm:$0xf] }
  0x19   : > { %v368_v3 = vshrl.u32 %v348_v0, 16  ;;  %v371_v4 = vshll.u32 %v348_v0, 16  ;;  %v376_v5 = vshrl.u32 %v5870_v1, 16  ;;  %v385_v6 = vshrl.u32 %v350_v2, 16  ;;  %v5875_v7 = vld [vmem:[%s5861_s27 + $0xc] sm:$0xf] }
  0x1a   : > { %v388_v10 = vshll.u32 %v350_v2, 16  ;;  %v393_v12 = vshrl.u32 %v5875_v7, 16  ;;  %v352_v13 = vld [vmem:[%s5861_s27 + $0x10] sm:$0xf]  ;;  %v5880_v14 = vld [vmem:[%s5861_s27 + $0x14] sm:$0xf] }
  0x1b   : > { %v5882_v15 = vrot.slane %v368_v3, 7  ;;  %v5890_v17 = vrot.slane %v376_v5, 7  ;;  %v5892_v18 = vrot.slane %v385_v6, 7  ;;  %v402_v20 = vshrl.u32 %v352_v13, 16  ;;  %v354_v21 = vld [vmem:[%s5861_s27 + $0x18] sm:$0xf] }
  0x1c   : > { %v5901_v23 = vrot.slane %v393_v12, 7  ;;  %v405_v24 = vshll.u32 %v352_v13, 16  ;;  %v410_v26 = vshrl.u32 %v5880_v14, 16  ;;  %v419_v27 = vshrl.u32 %v354_v21, 16  ;;  %v5910_v32 = vld [vmem:[%s5861_s27 + $0x1c] sm:$0xf] }
  0x1d   : > { %v373_v28 = vor.u32 %v371_v4, %v5882_v15  ;;  %v383_v29 = vrot.slane %v5890_v17, 4  ;;  %v390_v30 = vor.u32 %v388_v10, %v5892_v18  ;;  %v5907_v31 = vrot.slane %v402_v20, 7  ;;  %v356_v33 = vld [vmem:[%s5861_s27 + $0x20] sm:$0xf]  ;;  %v5919_v38 = vld [vmem:[%s5861_s27 + $0x24] sm:$0xf] }
  0x1e   : > { %v400_v34 = vrot.slane %v5901_v23, 4  ;;  %v5914_v35 = vrot.slane %v410_v26, 7  ;;  %v5916_v36 = vrot.slane %v419_v27, 7  ;;  %v422_v37 = vshll.u32 %v354_v21, 16  ;;  %v358_v45 = vld [vmem:[%s5861_s27 + $0x28] sm:$0xf] }
  0x1f   : > { %v532_v39 = vsel %vm5897_vm5, %v373_v28, %v531_v8  ;;  %v538_v40 = vsel %vm5886_vm4, %v383_v29, %v537_v9  ;;  %v541_v41 = vsel %vm5897_vm5, %v390_v30, %v540_v11  ;;  %v407_v42 = vor.u32 %v405_v24, %v5907_v31  ;;  %v5935_v50 = vld [vmem:[%s5861_s27 + $0x2c] sm:$0xf]  ;;  %v360_v56 = vld [vmem:[%s5861_s27 + $0x30] sm:$0xf]  ;;  %v5948_v62 = vld [vmem:[%s5861_s27 + $0x34] sm:$0xf] }
  0x20   : > { %533 = vst [vmem:[#allocation2 + $0xc] sm:$0xf] %v532_v39  ;;  %539 = vst [vmem:[#allocation2 + $0x14] sm:$0x1] %v538_v40  ;;  %v545_v46 = vsel %vm5886_vm4, %v400_v34, %v544_v19  ;;  %v417_v47 = vrot.slane %v5914_v35, 4  ;;  %v424_v48 = vor.u32 %v422_v37, %v5916_v36  ;;  %v427_v49 = vshrl.u32 %v5910_v32, 16 }
  0x21   : > { %542 = vst [vmem:[#allocation2 + $0x18] sm:$0xf] %v541_v41  ;;  %546 = vst [vmem:[#allocation2 + $0x20] sm:$0x1] %v545_v46  ;;  %v548_v51 = vsel %vm5897_vm5, %v407_v42, %v547_v25  ;;  %v436_v53 = vshrl.u32 %v356_v33, 16  ;;  %v439_v54 = vshll.u32 %v356_v33, 16 }
  0x22   : > { %v444_v55 = vshrl.u32 %v5919_v38, 16  ;;  %549 = vst [vmem:[#allocation2 + $0x24] sm:$0xf] %v548_v51  ;;  %v552_v57 = vsel %vm5886_vm4, %v417_v47, %v551_v43  ;;  %v555_v58 = vsel %vm5897_vm5, %v424_v48, %v554_v44  ;;  %v5945_v59 = vrot.slane %v427_v49, 7  ;;  %v362_v4 = vld [vmem:[%s5861_s27 + $0x38] sm:$0xf] }
  0x23   : > { %v453_v61 = vshrl.u32 %v358_v45, 16  ;;  %553 = vst [vmem:[#allocation2 + $0x2c] sm:$0x1] %v552_v57  ;;  %556 = vst [vmem:[#allocation2 + $0x30] sm:$0xf] %v555_v58  ;;  %v5950_v63 = vrot.slane %v436_v53, 7 }
  0x24   : > { %v5952_v0 = vrot.slane %v444_v55, 7  ;;  %v456_v2 = vshll.u32 %v358_v45, 16  ;;  %v461_v3 = vshrl.u32 %v5935_v50, 16  ;;  %v434_v5 = vrot.slane %v5945_v59, 4  ;;  %v565_v6 = vld [vmem:[#allocation2 + $0x44] sm:$0x1] }
  0x25   : > { %v5957_v8 = vrot.slane %v453_v61, 7  ;;  %v470_v9 = vshrl.u32 %v360_v56, 16  ;;  %v473_v10 = vshll.u32 %v360_v56, 16  ;;  %v441_v11 = vor.u32 %v439_v54, %v5950_v63  ;;  %v568_v13 = vld [vmem:[#allocation2 + $0x48] sm:$0xf]  ;;  %s4486_s29 = sadd.s32 (!%p4485_p7), 4294967295, %s5845_s8 }
  0x26   : > { %v451_v12 = vrot.slane %v5952_v0, 4  ;;  %v5961_v19 = vrot.slane %v461_v3, 7  ;;  %v478_v20 = vshrl.u32 %v5948_v62, 16  ;;  %v559_v21 = vsel %vm5886_vm4, %v434_v5, %v558_v52  ;;  %v572_v25 = vld [vmem:[#allocation2 + $0x50] sm:$0x1]  ;;  %s4839_s30 = sshll.u32 (!%p4485_p7), %s4486_s29, 3 }
  0x27   : > { %v458_v24 = vor.u32 %v456_v2, %v5957_v8  ;;  %v5967_v26 = vrot.slane %v470_v9, 7  ;;  %v487_v27 = vshrl.u32 %v362_v4, 16  ;;  %v5970_v28 = vld [vmem:[%s5861_s27 + $0x3c] sm:$0xf]  ;;  %560 = vst [vmem:[#allocation2 + $0x38] sm:$0x1] %v559_v21  ;;  %v562_v29 = vsel %vm5897_vm5, %v441_v11, %v561_v60  ;;  %s657_s9 = scalar_lea.vmem (!%p4485_p7), %s5853_s15, %s4839_s30 }
  0x28   : > { %v566_v30 = vsel %vm5886_vm4, %v451_v12, %v565_v6  ;;  %v468_v33 = vrot.slane %v5961_v19, 4  ;;  %v575_v34 = vld [vmem:[#allocation2 + $0x54] sm:$0xf]  ;;  %v5977_v37 = vrot.slane %v478_v20, 7  ;;  %563 = vst [vmem:[#allocation2 + $0x3c] sm:$0xf] %v562_v29 }
  0x29   : > { %567 = vst [vmem:[#allocation2 + $0x44] sm:$0x1] %v566_v30  ;;  %v569_v39 = vsel %vm5897_vm5, %v458_v24, %v568_v13  ;;  %v475_v40 = vor.u32 %v473_v10, %v5967_v26  ;;  %v579_v41 = vld [vmem:[#allocation2 + $0x5c] sm:$0x1]  ;;  %v5982_v42 = vrot.slane %v487_v27, 7  ;;  %v490_v43 = vshll.u32 %v362_v4, 16 }
  0x2a   : > { %570 = vst [vmem:[#allocation2 + $0x48] sm:$0xf] %v569_v39  ;;  %v573_v44 = vsel %vm5886_vm4, %v468_v33, %v572_v25  ;;  %v485_v45 = vrot.slane %v5977_v37, 4  ;;  %v582_v46 = vld [vmem:[#allocation2 + $0x60] sm:$0xf]  ;;  %v495_v47 = vshrl.u32 %v5970_v28, 16 }
  0x2b   : > { %v374_v48 = vrot.slane %v5882_v15, 4  ;;  %574 = vst [vmem:[#allocation2 + $0x50] sm:$0x1] %v573_v44  ;;  %v576_v49 = vsel %vm5897_vm5, %v475_v40, %v575_v34  ;;  %v492_v51 = vor.u32 %v490_v43, %v5982_v42  ;;  %v379_v52 = vshll.u32 %v5870_v1, 16  ;;  %v592_v9 = vld [vmem:[#allocation2 + $0xc] sm:$0x1] }
  0x2c   : > { %v391_v53 = vrot.slane %v5892_v18, 4  ;;  %577 = vst [vmem:[#allocation2 + $0x54] sm:$0xf] %v576_v49  ;;  %v580_v54 = vsel %vm5886_vm4, %v485_v45, %v579_v41  ;;  %v497_v55 = vrot.slane %v495_v47, 7  ;;  %v396_v15 = vshll.u32 %v5875_v7, 16 }
  0x2d   : > { %v408_v57 = vrot.slane %v5907_v31, 4  ;;  %581 = vst [vmem:[#allocation2 + $0x5c] sm:$0x1] %v580_v54  ;;  %v583_v1 = vsel %vm5897_vm5, %v492_v51, %v582_v46  ;;  %v586_v18 = vld [vmem:[#allocation2 + $0x68] sm:$0x1]  ;;  %v381_v58 = vor.u32 %v379_v52, %v5890_v17  ;;  %v413_v60 = vshll.u32 %v5880_v14, 16 }
  0x2e   : > { %v425_v61 = vrot.slane %v5916_v36, 4  ;;  %584 = vst [vmem:[#allocation2 + $0x60] sm:$0xf] %v583_v1  ;;  %v502_v2 = vrot.slane %v497_v55, 4  ;;  %v398_v3 = vor.u32 %v396_v15, %v5901_v23  ;;  %v430_v4 = vshll.u32 %v5910_v32, 16 }
  0x2f   : > { %v442_v7 = vrot.slane %v5950_v63, 4  ;;  %v382_v31 = vsel %vm5998_vm7, %v374_v48, %v381_v58  ;;  %v415_v5 = vor.u32 %v413_v60, %v5914_v35  ;;  %v447_v6 = vshll.u32 %v5919_v38, 16  ;;  %v589_v14 = vld [vmem:[#allocation2] sm:$0x1]  ;;  %v595_v10 = vld [vmem:[#allocation2 + $0x18] sm:$0x1] }
  0x30   : > { %v459_v17 = vrot.slane %v5957_v8, 4  ;;  %v587_v36 = vsel %vm5886_vm4, %v502_v2, %v586_v18  ;;  %534 = vst [vmem:[#allocation2 + $0x10] sm:$0xf] %v382_v31  ;;  %v399_v23 = vsel %vm5998_vm7, %v391_v53, %v398_v3  ;;  %v432_v32 = vor.u32 %v430_v4, %v5945_v59  ;;  %v598_v12 = vld [vmem:[#allocation2 + $0x24] sm:$0x1] }
  0x31   : > { %v464_v63 = vshll.u32 %v5935_v50, 16  ;;  %588 = vst [vmem:[#allocation2 + $0x68] sm:$0x1] %v587_v36  ;;  %543 = vst [vmem:[#allocation2 + $0x1c] sm:$0xf] %v399_v23  ;;  %v416_v35 = vsel %vm5998_vm7, %v408_v57, %v415_v5  ;;  %v449_v38 = vor.u32 %v447_v6, %v5952_v0  ;;  %v476_v8 = vrot.slane %v5967_v26, 4 }
  0x32   : > { %v481_v11 = vshll.u32 %v5948_v62, 16  ;;  %v601_v13 = vld [vmem:[#allocation2 + $0x30] sm:$0x1]  ;;  %v616_v20 = vld [vmem:[#allocation2 + $0x6c] sm:$0x1]  ;;  %v433_v50 = vsel %vm5998_vm7, %v425_v61, %v432_v32  ;;  %v493_v21 = vrot.slane %v5982_v42, 4 }
  0x33   : > { %550 = vst [vmem:[#allocation2 + $0x28] sm:$0xf] %v416_v35  ;;  %v466_v59 = vor.u32 %v464_v63, %v5961_v19  ;;  %v498_v24 = vshll.u32 %v5970_v28, 16  ;;  %v604_v25 = vld [vmem:[#allocation2 + $0x3c] sm:$0x1]  ;;  %v450_v62 = vsel %vm5998_vm7, %v442_v7, %v449_v38  ;;  %v590_v34 = vsel %vm5886_vm4, 0, %v589_v14 }
  0x34   : > { %v607_v27 = vld [vmem:[#allocation2 + $0x48] sm:$0x1]  ;;  %v623_v29 = vld [vmem:[#allocation2 + $0x14] sm:$0x1]  ;;  %v626_v26 = vld [vmem:[#allocation2 + $0x20] sm:$0x1]  ;;  %v483_v33 = vor.u32 %v481_v11, %v5977_v37 }
  0x35   : > { %v620_v0 = vld [vmem:[#allocation2 + $0x8] sm:$0x1]  ;;  %v629_v30 = vld [vmem:[#allocation2 + $0x2c] sm:$0x1]  ;;  %557 = vst [vmem:[#allocation2 + $0x34] sm:$0xf] %v433_v50  ;;  %v467_v42 = vsel %vm5998_vm7, %v459_v17, %v466_v59  ;;  %v500_v37 = vor.u32 %v498_v24, %v497_v55 }
  0x36   : > { %v593_v19 = vsel %vm5886_vm4, 0, %v592_v9  ;;  %v610_v39 = vld [vmem:[#allocation2 + $0x54] sm:$0x1]  ;;  %v632_v28 = vld [vmem:[#allocation2 + $0x38] sm:$0x1]  ;;  %v596_v43 = vsel %vm5886_vm4, 0, %v595_v10  ;;  %v484_v47 = vsel %vm5998_vm7, %v476_v8, %v483_v33 }
  0x37   : > { %v635_v40 = vld [vmem:[#allocation2 + $0x44] sm:$0x1]  ;;  %564 = vst [vmem:[#allocation2 + $0x40] sm:$0xf] %v450_v62  ;;  %591 = vst [vmem:[#allocation2] sm:$0x1] %v590_v34  ;;  %v501_v53 = vsel %vm5998_vm7, %v493_v21, %v500_v37 }
  0x38   : > { %594 = vst [vmem:[#allocation2 + $0xc] sm:$0x1] %v593_v19  ;;  %v599_v44 = vsel %vm5886_vm4, 0, %v598_v12  ;;  %v638_v45 = vld [vmem:[#allocation2 + $0x50] sm:$0x1]  ;;  %v602_v48 = vsel %vm5886_vm4, 0, %v601_v13 }
  0x39   : > { %v641_v46 = vld [vmem:[#allocation2 + $0x5c] sm:$0x1]  ;;  %571 = vst [vmem:[#allocation2 + $0x4c] sm:$0xf] %v467_v42  ;;  %597 = vst [vmem:[#allocation2 + $0x18] sm:$0x1] %v596_v43 }
  0x3a   : > { %600 = vst [vmem:[#allocation2 + $0x24] sm:$0x1] %v599_v44  ;;  %v605_v49 = vsel %vm5886_vm4, 0, %v604_v25  ;;  %v608_v51 = vsel %vm5886_vm4, 0, %v607_v27  ;;  %v613_v52 = vld [vmem:[#allocation2 + $0x60] sm:$0x1] }
  0x3b   : > { %578 = vst [vmem:[#allocation2 + $0x58] sm:$0xf] %v484_v47  ;;  %603 = vst [vmem:[#allocation2 + $0x30] sm:$0x1] %v602_v48  ;;  %v611_v54 = vsel %vm5886_vm4, 0, %v610_v39  ;;  %v614_v55 = vsel %vm5886_vm4, 0, %v613_v52 }
  0x3c   : > { %606 = vst [vmem:[#allocation2 + $0x3c] sm:$0x1] %v605_v49  ;;  %609 = vst [vmem:[#allocation2 + $0x48] sm:$0x1] %v608_v51  ;;  %v617_v15 = vsel %vm5886_vm4, 0, %v616_v20  ;;  %v621_v1 = vsel %vm6042_vm8, 0, %v620_v0 }
  0x3d   : > { %v647_v57 = vld [vmem:[#allocation2 + $0x74] sm:$0x1]  ;;  %585 = vst [vmem:[#allocation2 + $0x64] sm:$0xf] %v501_v53  ;;  %612 = vst [vmem:[#allocation2 + $0x54] sm:$0x1] %v611_v54 }
  0x3e   : > { %615 = vst [vmem:[#allocation2 + $0x60] sm:$0x1] %v614_v55  ;;  %618 = vst [vmem:[#allocation2 + $0x6c] sm:$0x1] %v617_v15  ;;  %v624_v18 = vsel %vm6042_vm8, 0, %v623_v29  ;;  %v627_v58 = vsel %vm6042_vm8, 0, %v626_v26 }
  0x3f   : > { %v630_v60 = vsel %vm6042_vm8, 0, %v629_v30  ;;  %622 = vst [vmem:[#allocation2 + $0x8] sm:$0x1] %v621_v1  ;;  %625 = vst [vmem:[#allocation2 + $0x14] sm:$0x1] %v624_v18  ;;  %v633_v61 = vsel %vm6042_vm8, 0, %v632_v28 }
  0x40   : > { %628 = vst [vmem:[#allocation2 + $0x20] sm:$0x1] %v627_v58  ;;  %631 = vst [vmem:[#allocation2 + $0x2c] sm:$0x1] %v630_v60  ;;  %v636_v2 = vsel %vm6042_vm8, 0, %v635_v40  ;;  %v639_v3 = vsel %vm6042_vm8, 0, %v638_v45 }
  0x41   : > { %v642_v4 = vsel %vm6042_vm8, 0, %v641_v46  ;;  %v644_v7 = vld [vmem:[#allocation2 + $0x68] sm:$0x1]  ;;  %634 = vst [vmem:[#allocation2 + $0x38] sm:$0x1] %v633_v61  ;;  %v648_v5 = vsel %vm6042_vm8, 0, %v647_v57 }
  0x42   : > { %637 = vst [vmem:[#allocation2 + $0x44] sm:$0x1] %v636_v2  ;;  %640 = vst [vmem:[#allocation2 + $0x50] sm:$0x1] %v639_v3  ;;  %v645_v31 = vsel %vm6042_vm8, 0, %v644_v7  ;;  %653 = sbr.rel (%p4485_p7) target bundleno = 81 (0x51), region = 52 }
  0x43   : > { %643 = vst [vmem:[#allocation2 + $0x5c] sm:$0x1] %v642_v4  ;;  %646 = vst [vmem:[#allocation2 + $0x68] sm:$0x1] %v645_v31 }
  0x44   : > { %649 = vst [vmem:[#allocation2 + $0x74] sm:$0x1] %v648_v5 }
  0x47   : > { %v658_v6 = vld [vmem:[%s657_s9] sm:$0xf]  ;;  %v659_v17 = vld [vmem:[%s657_s9 + $0x4] sm:$0xf]  ;;  %v684_v35 = vld [vmem:[#allocation2 + $0x8] sm:$0x1] }
  0x48   : > { %v661_v14 = vshrl.u32 %v658_v6, 16  ;;  %v664_v36 = vshll.u32 %v658_v6, 16  ;;  %v669_v23 = vshrl.u32 %v659_v17, 16  ;;  %v672_v32 = vshll.u32 %v659_v17, 16  ;;  %v680_v10 = vld [vmem:[#allocation2] sm:$0xf] }
  0x4a   : > { %v663_v63 = vrot.slane %v661_v14, 7  ;;  %v671_v9 = vrot.slane %v669_v23, 7 }
  0x4c   : > { %v666_v38 = vor.u32 %v664_v36, %v663_v63  ;;  %v667_v8 = vrot.slane %v663_v63, 4  ;;  %v674_v11 = vor.u32 %v672_v32, %v671_v9  ;;  %v676_v12 = vrot.slane %v671_v9, 4 }
  0x4e   : > { %v681_v13 = vsel %vm5897_vm5, %v666_v38, %v680_v10  ;;  %v675_v20 = vsel %vm5998_vm7, %v667_v8, %v674_v11  ;;  %v685_v50 = vsel %vm5886_vm4, %v676_v12, %v684_v35 }
  0x4f   : > { %682 = vst [vmem:[#allocation2] sm:$0xf] %v681_v13  ;;  %683 = vst [vmem:[#allocation2 + $0x4] sm:$0xf] %v675_v20 }
  0x50   : > { %686 = vst [vmem:[#allocation2 + $0x8] sm:$0x1] %v685_v50 }
  0x51 PF: > { %p4489_p8 = scmp.ne.s32.totalorder %s5752_s24, 0 }
  0x53   : > { %690 = sbr.rel (%p4489_p8) target bundleno = 91 (0x5b), region = 56 }
  0x58   : > { %v5770_v59 = vmov 0  }
  0x59   : > { %691 = vst [vmem:[#allocation2] sm:$0xf] %v5770_v59  ;;  %692 = vst [vmem:[#allocation2 + $0x4] sm:$0xf] %v5770_v59 }
  0x5a   : > { %693 = vst [vmem:[#allocation2 + $0x8] sm:$0x1] %v5770_v59 }
  0x5b PF: > { %p4490_p9 = scmp.ge.s32.totalorder %s5752_s24, 1 }
  0x5d   : > { %697 = sbr.rel (%p4490_p9) target bundleno = 108 (0x6c), region = 60 }
  0x62   : > { %v4493_v21 = vld [vmem:[%s5861_s27 + $0x40] sm:$0xf]  ;;  %v4494_v24 = vld [vmem:[%s5861_s27 + $0x44] sm:$0xf]  ;;  %v725_v62 = vld [vmem:[#allocation2 + $0x6c] sm:$0xf] }
  0x63   : > { %v705_v25 = vshrl.u32 %v4493_v21, 16  ;;  %v708_v27 = vshll.u32 %v4493_v21, 16  ;;  %v713_v0 = vshrl.u32 %v4494_v24, 16  ;;  %v716_v29 = vshll.u32 %v4494_v24, 16  ;;  %v729_v33 = vld [vmem:[#allocation2 + $0x74] sm:$0x1] }
  0x65   : > { %v707_v26 = vrot.slane %v705_v25, 7  ;;  %v715_v30 = vrot.slane %v713_v0, 7 }
  0x67   : > { %v710_v34 = vor.u32 %v708_v27, %v707_v26  ;;  %v711_v19 = vrot.slane %v707_v26, 4  ;;  %v718_v39 = vor.u32 %v716_v29, %v715_v30  ;;  %v720_v28 = vrot.slane %v715_v30, 4 }
  0x69   : > { %v726_v40 = vsel %vm5897_vm5, %v710_v34, %v725_v62  ;;  %v719_v41 = vsel %vm5998_vm7, %v711_v19, %v718_v39  ;;  %v730_v42 = vsel %vm5886_vm4, %v720_v28, %v729_v33 }
  0x6a   : > { %727 = vst [vmem:[#allocation2 + $0x6c] sm:$0xf] %v726_v40  ;;  %728 = vst [vmem:[#allocation2 + $0x70] sm:$0xf] %v719_v41 }
  0x6b   : > { %731 = vst [vmem:[#allocation2 + $0x74] sm:$0x1] %v730_v42 }
  0x6c PF: > { %p4495_p10 = scmp.ne.s32.totalorder %s5752_s24, 1 }
  0x6e   : > { %735 = sbr.rel (%p4495_p10) target bundleno = 118 (0x76), region = 64 }
  0x73   : > { %v5771_v37 = vmov 0  }
  0x74   : > { %737 = vst [vmem:[#allocation2 + $0x6c] sm:$0xf] %v5771_v37  ;;  %738 = vst [vmem:[#allocation2 + $0x70] sm:$0xf] %v5771_v37 }
  0x75   : > { %739 = vst [vmem:[#allocation2 + $0x74] sm:$0x1] %v5771_v37 }
  0x76 PF: > { %v5490_v22 = vld [vmem:[%s7416_s2 + $0x78] sm:$0xff]   ;;  %v5492_v56 = vld [vmem:[%s7416_s2 + $0x70] sm:$0xff]   ;;  %v5494_v44 = vld [vmem:[%s7416_s2 + $0x68] sm:$0xff]   ;;  %vm780_vm9 = vsmask.f32 3328  ;;  %vm1386_vm12 = vcmask 1042432  }
  0x77   : > { %v5491_v16 = vld [vmem:[%s7416_s2 + $0x38] sm:$0xff]   ;;  %5080 = vmatprep.subr.bf16.mxu0 %v5490_v22  ;;  %v5493_v43 = vld [vmem:[%s7416_s2 + $0x30] sm:$0xff]   ;;  %v5495_v45 = vld [vmem:[%s7416_s2 + $0x28] sm:$0xff]   ;;  %vm781_vm10 = vsmask.f32 7440  ;;  %vm1387_vm13 = vcmask 1046532  }
  0x78   : > { %5112 = vmatprep.subr.bf16.mxu1 %v5491_v16  ;;  %5081 = vmatpush3.bf16.msra.mxu0 %v5490_v22  ;;  %v5496_v46 = vld [vmem:[%s7416_s2 + $0x60] sm:$0xff]   ;;  %v5498_v48 = vld [vmem:[%s7416_s2 + $0x58] sm:$0xff]   ;;  %v5500_v51 = vld [vmem:[%s7416_s2 + $0x50] sm:$0xff]  }
  0x79   : > { %5113 = vmatpush3.bf16.msra.mxu1 %v5491_v16  ;;  %5082 = vmatprep.subr.bf16.mxu0 %v5492_v56  ;;  %v5497_v47 = vld [vmem:[%s7416_s2 + $0x20] sm:$0xff]   ;;  %v5499_v49 = vld [vmem:[%s7416_s2 + $0x18] sm:$0xff]   ;;  %v5501_v52 = vld [vmem:[%s7416_s2 + $0x10] sm:$0xff]  }
  0x7a   : > { %5114 = vmatprep.subr.bf16.mxu1 %v5493_v43  ;;  %v740_v53 = vld [vmem:[#allocation2] sm:$0xf]  ;;  %v6144_v54 = vld [vmem:[#allocation2 + $0x4] sm:$0xf]  ;;  %v6146_v55 = vld [vmem:[#allocation2 + $0x8] sm:$0x1] }
  0x7b   : > { %v784_v15 = vshrl.u32 %v740_v53, 16  ;;  %v787_v57 = vshll.u32 %v740_v53, 16  ;;  %v793_v1 = vshll.u32 %v6144_v54, 16  ;;  %v797_v18 = vshrl.u32 %v6144_v54, 16  ;;  %v6151_v60 = vld [vmem:[#allocation2 + $0xc] sm:$0xf]  ;;  %vm6173_vm11 = vmor %vm780_vm9, %vm781_vm10 }
  0x7c   : > { %5083 = vmatpush3.bf16.msra.mxu0 %v5492_v56  ;;  %v803_v58 = vshll.u32 %v6146_v55, 16  ;;  %v4528_v3 = vcombine.low %v740_v53, %v6144_v54  ;;  %v6154_v4 = vld [vmem:[#allocation2 + $0x10] sm:$0xf]  ;;  %v6156_v7 = vld [vmem:[#allocation2 + $0x14] sm:$0x1]  ;;  %v5502_v31 = vld [vmem:[%s7416_s2 + $0x48] sm:$0xff]  }
  0x7d   : > { %5115 = vmatpush3.bf16.msra.mxu1 %v5493_v43  ;;  %5084 = vmatprep.subr.bf16.mxu0 %v5494_v44  ;;  %v786_v61 = vrot.slane %v784_v15, 4  ;;  %v789_v2 = vrot.slane %v787_v57, 5  ;;  %v795_v5 = vrot.slane %v793_v1, 5  ;;  %v799_v6 = vrot.slane %v797_v18, 4  ;;  %v5503_v14 = vld [vmem:[%s7416_s2 + $0x8] sm:$0xff]   ;;  %v5504_v9 = vld [vmem:[%s7416_s2 + $0x40] sm:$0xff]   ;;  %vm6330_vm14 = vmor %vm1386_vm12, %vm1387_vm13 }
  0x7e   : > { %5116 = vmatprep.subr.bf16.mxu1 %v5495_v45  ;;  %v808_v17 = vshrl.u32 %v6151_v60, 16  ;;  %5128 = vmatprep.mubr.bf16.mxu1 %v4528_v3  ;;  %v811_v23 = vshll.u32 %v6151_v60, 16  ;;  %v817_v32 = vshll.u32 %v6154_v4, 16  ;;  %v821_v63 = vshrl.u32 %v6154_v4, 16  ;;  %v5505_v24 = vld [vmem:[%s7416_s2] sm:$0xff]   ;;  %v5508_v33 = vld [vmem:[%s7416_s2 + $0xb8] sm:$0xff]  }
  0x7f   : > { %v790_v36 = vor.u32 %v789_v2, %v786_v61  ;;  %v800_v35 = vor.u32 %v799_v6, %v795_v5  ;;  %v805_v38 = vrot.slane %v803_v58, 5  ;;  %v827_v11 = vshll.u32 %v6156_v7, 16  ;;  %v6192_v34 = vld [vmem:[#allocation2 + $0x18] sm:$0xf]  ;;  %v6194_v19 = vld [vmem:[#allocation2 + $0x1c] sm:$0xf] }
  0x80   : > { %5085 = vmatpush3.bf16.msra.mxu0 %v5494_v44  ;;  %v810_v8 = vrot.slane %v808_v17, 4  ;;  %v813_v13 = vrot.slane %v811_v23, 5  ;;  %v819_v20 = vrot.slane %v817_v32, 5  ;;  %v823_v50 = vrot.slane %v821_v63, 4  ;;  %v5509_v42 = vld [vmem:[%s7416_s2 + $0xf8] sm:$0xff]   ;;  %v5510_v15 = vld [vmem:[%s7416_s2 + $0xb0] sm:$0xff]  }
  0x81   : > { %5117 = vmatpush3.bf16.msra.mxu1 %v5495_v45  ;;  %5086 = vmatprep.subr.bf16.mxu0 %v5496_v46  ;;  %v791_v12 = vrot.slane %v790_v36, 4  ;;  %v801_v59 = vrot.slane %v800_v35, 4  ;;  %v1394_v21 = vrot.slane %v6146_v55, 5  ;;  %v829_v29 = vrot.slane %v827_v11, 5  ;;  %v6200_v37 = vld [vmem:[#allocation2 + $0x20] sm:$0x1] }
  0x82   : > { %5118 = vmatprep.subr.bf16.mxu1 %v5497_v47  ;;  %v814_v27 = vor.u32 %v813_v13, %v810_v8  ;;  %v824_v0 = vor.u32 %v823_v50, %v819_v20  ;;  %v1401_v30 = vrot.slane %v6156_v7, 5  ;;  %v4529_v62 = vcombine.low %v6151_v60, %v6154_v4  ;;  %v6207_v45 = vld [vmem:[#allocation2 + $0x24] sm:$0xf]  ;;  %v5511_v17 = vld [vmem:[%s7416_s2 + $0xf0] sm:$0xff]  }
  0x83   : > { %v796_v25 = vsel %vm6173_vm11, %v791_v12, %v795_v5  ;;  %v806_v26 = vsel %vm6173_vm11, %v801_v59, %v805_v38  ;;  %v1391_v39 = vrot.slane %v6144_v54, 5  ;;  %v832_v22 = vshrl.u32 %v6192_v34, 16  ;;  %v6233_v12 = vld [vmem:[#allocation2 + $0x30] sm:$0xf]  ;;  %v5514_v59 = vld [vmem:[%s7416_s2 + $0xa8] sm:$0xff]  }
  0x84   : > { %5087 = vmatpush3.bf16.msra.mxu0 %v5496_v46  ;;  %v4512_v28 = vcombine.low %v796_v25, %v806_v26  ;;  %v815_v40 = vrot.slane %v814_v27, 4  ;;  %v825_v41 = vrot.slane %v824_v0, 4  ;;  %v835_v16 = vshll.u32 %v6192_v34, 16  ;;  %v6244_v25 = vld [vmem:[#allocation2 + $0x38] sm:$0x1]  ;;  %v5515_v26 = vld [vmem:[%s7416_s2 + $0xe8] sm:$0xff]  }
  0x85   : > { %5119 = vmatpush3.bf16.msra.mxu1 %v5497_v47  ;;  %5088 = vmatprep.subr.bf16.mxu0 %v5498_v48  ;;  %v841_v56 = vshll.u32 %v6194_v19, 16  ;;  %v845_v43 = vshrl.u32 %v6194_v19, 16  ;;  %v851_v44 = vshll.u32 %v6200_v37, 16  ;;  %v856_v60 = vshrl.u32 %v6207_v45, 16  ;;  %v5535_v7 = vld [vmem:[%s7416_s2 + $0x170] sm:$0xff]  }
  0x86   : > { %5120 = vmatprep.subr.bf16.mxu1 %v5499_v49  ;;  %5096 = vmatprep.mubr.bf16.mxu0 %v4512_v28  ;;  %v820_v46 = vsel %vm6173_vm11, %v815_v40, %v819_v20  ;;  %v830_v47 = vsel %vm6173_vm11, %v825_v41, %v829_v29  ;;  %v837_v57 = vrot.slane %v835_v16, 5  ;;  %v859_v61 = vshll.u32 %v6207_v45, 16 }
  0x87   : > { %v4513_v53 = vcombine.low %v820_v46, %v830_v47  ;;  %v843_v1 = vrot.slane %v841_v56, 5  ;;  %v847_v18 = vrot.slane %v845_v43, 4  ;;  %v853_v58 = vrot.slane %v851_v44, 5  ;;  %v5516_v56 = vld [vmem:[%s7416_s2 + $0xa0] sm:$0xff]  }
  0x88   : > { %5089 = vmatpush3.bf16.msra.mxu0 %v5498_v48  ;;  %v834_v48 = vrot.slane %v832_v22, 4  ;;  %v858_v36 = vrot.slane %v856_v60, 4  ;;  %v861_v23 = vrot.slane %v859_v61, 5  ;;  %v880_v27 = vshrl.u32 %v6233_v12, 16  ;;  %v6256_v22 = vld [vmem:[#allocation2 + $0x40] sm:$0xf] }
  0x89   : > { %5121 = vmatpush3.bf16.msra.mxu1 %v5499_v49  ;;  %5090 = vmatprep.subr.bf16.mxu0 %v5500_v51  ;;  %v6213_v49 = vld [vmem:[#allocation2 + $0x28] sm:$0xf]  ;;  %v6265_v46 = vld [vmem:[#allocation2 + $0x44] sm:$0x1]  ;;  %v913_v60 = vshll.u32 %v6256_v22, 16 }
  0x8a   : > { %5122 = vmatprep.subr.bf16.mxu1 %v5501_v52  ;;  %v865_v2 = vshll.u32 %v6213_v49, 16  ;;  %v838_v3 = vor.u32 %v837_v57, %v834_v48  ;;  %v869_v5 = vshrl.u32 %v6213_v49, 16  ;;  %v862_v8 = vor.u32 %v861_v23, %v858_v36  ;;  %v5517_v48 = vld [vmem:[%s7416_s2 + $0xe0] sm:$0xff]  }
  0x8b   : > { %v4531_v11 = vcombine.low %v6207_v45, %v6213_v49  ;;  %v882_v40 = vrot.slane %v880_v27, 4  ;;  %v6293_v27 = vld [vmem:[#allocation2 + $0x54] sm:$0xf] }
  0x8c   : > { %5091 = vmatpush3.bf16.msra.mxu0 %v5500_v51  ;;  %v6215_v51 = vld [vmem:[#allocation2 + $0x2c] sm:$0x1]  ;;  %v867_v32 = vrot.slane %v865_v2, 5  ;;  %v839_v63 = vrot.slane %v838_v3, 4  ;;  %v871_v35 = vrot.slane %v869_v5, 4  ;;  %v863_v29 = vrot.slane %v862_v8, 4 }
  0x8d   : > { %5123 = vmatpush3.bf16.msra.mxu1 %v5501_v52  ;;  %5092 = vmatprep.subr.bf16.mxu0 %v5502_v31  ;;  %v1398_v52 = vrot.slane %v6154_v4, 5  ;;  %v875_v6 = vshll.u32 %v6215_v51, 16  ;;  %v917_v3 = vshrl.u32 %v6256_v22, 16  ;;  %v752_v8 = vld [vmem:[#allocation2 + $0x48] sm:$0xf] }
  0x8e   : > { %5124 = vmatprep.subr.bf16.mxu1 %v5503_v14  ;;  %v844_v13 = vsel %vm6173_vm11, %v839_v63, %v843_v1  ;;  %v872_v50 = vor.u32 %v871_v35, %v867_v32  ;;  %v868_v16 = vsel %vm6173_vm11, %v863_v29, %v867_v32  ;;  %v5521_v63 = vld [vmem:[%s7416_s2 + $0xd8] sm:$0xff]   ;;  %v5537_v4 = vld [vmem:[#allocation2 + $0x24] sm:$0xff]  }
  0x8f   : > { %v877_v38 = vrot.slane %v875_v6, 5  ;;  %v919_v23 = vrot.slane %v917_v3, 4 }
  0x90   : > { %5093 = vmatpush3.bf16.msra.mxu0 %v5502_v31  ;;  %v848_v31 = vor.u32 %v847_v18, %v843_v1  ;;  %v873_v28 = vrot.slane %v872_v50, 4  ;;  %v928_v50 = vshrl.u32 %v752_v8, 16 }
  0x91   : > { %5125 = vmatpush3.bf16.msra.mxu1 %v5503_v14  ;;  %5094 = vmatprep.subr.bf16.mxu0 %v5504_v9  ;;  %v4530_v14 = vcombine.low %v6192_v34, %v6194_v19  ;;  %v6252_v34 = vld [vmem:[#allocation2 + $0x3c] sm:$0xf] }
  0x92   : > { %5126 = vmatprep.subr.bf16.mxu1 %v5505_v24  ;;  %v878_v47 = vsel %vm6173_vm11, %v873_v28, %v877_v38  ;;  %v904_v57 = vshrl.u32 %v6252_v34, 16  ;;  %v4533_v38 = vcombine.low %v6252_v34, %v6256_v22 }
  0x93   : > { %v4515_v1 = vcombine.low %v868_v16, %v878_v47 }
  0x94   : > { %5095 = vmatpush3.bf16.msra.mxu0 %v5504_v9  ;;  %v849_v9 = vrot.slane %v848_v31, 4  ;;  %v906_v2 = vrot.slane %v904_v57, 4  ;;  %v923_v31 = vshll.u32 %v6265_v46, 16  ;;  %v952_v57 = vshrl.u32 %v6293_v27, 16 }
  0x95   : > { %5127 = vmatpush3.bf16.msra.mxu1 %v5505_v24  ;;  %5144 = vmatprep.subr.bf16.mxu0 %v5508_v33  ;;  %v6242_v24 = vld [vmem:[#allocation2 + $0x34] sm:$0xf] }
  0x96   : > { %5176 = vmatprep.subr.bf16.mxu1 %v5509_v42  ;;  %v854_v20 = vsel %vm6173_vm11, %v849_v9, %v853_v58  ;;  %v893_v41 = vshrl.u32 %v6242_v24, 16  ;;  %v4532_v45 = vcombine.low %v6233_v12, %v6242_v24  ;;  %v907_v58 = vshll.u32 %v6252_v34, 16  ;;  %v6300_v34 = vld [vmem:[#allocation2 + $0x58] sm:$0xf] }
  0x97   : > { %5097 = vmatmul.mubr.bf16.vlgmr.msra.gmra.mxu0 %v4513_v53  ;;  %v4514_v0 = vcombine.low %v844_v13, %v854_v20  ;;  %v925_v32 = vrot.slane %v923_v31, 5  ;;  %v6291_v20 = vld [vmem:[#allocation2 + $0x50] sm:$0x1]  ;;  %v954_v3 = vrot.slane %v952_v57, 4  ;;  %v965_v31 = vshrl.u32 %v6300_v34, 16 }
  0x98   : > { %5129 = vmatmul.mubr.bf16.vlgmr.msra.gmra.mxu1 %v4529_v62  ;;  %5145 = vmatpush3.bf16.msra.mxu0 %v5508_v33  ;;  %v883_v62 = vshll.u32 %v6233_v12, 16  ;;  %v889_v33 = vshll.u32 %v6242_v24, 16  ;;  %v895_v53 = vrot.slane %v893_v41, 4  ;;  %v909_v6 = vrot.slane %v907_v58, 5  ;;  %v1365_v57 = vld [vmem:[#allocation2 + $0x24] sm:$0xe] }
  0x99   : > { %5177 = vmatpush3.bf16.msra.mxu1 %v5509_v42  ;;  %5146 = vmatprep.subr.bf16.mxu0 %v5510_v15  ;;  %v899_v42 = vshll.u32 %v6244_v25, 16  ;;  %v930_v41 = vrot.slane %v928_v50, 4  ;;  %v947_v16 = vshll.u32 %v6291_v20, 16  ;;  %v955_v58 = vshll.u32 %v6293_v27, 16  ;;  %v5528_v50 = vld [vmem:[%s7416_s2 + $0x80] sm:$0xff]  }
  0x9a   : > { %5178 = vmatprep.subr.bf16.mxu1 %v5511_v17  ;;  %5132 = vmatprep.mubr.bf16.mxu1 %v4530_v14  ;;  %v885_v43 = vrot.slane %v883_v62, 5  ;;  %v891_v44 = vrot.slane %v889_v33, 5  ;;  %v5520_v14 = vld [vmem:[%s7416_s2 + $0x98] sm:$0xff]   ;;  %v910_v35 = vor.u32 %v909_v6, %v906_v2 }
  0x9b   : > { %5100 = vmatprep.mubr.bf16.mxu0 %v4514_v0 }
  0x9c   : > { %5147 = vmatpush3.bf16.msra.mxu0 %v5510_v15  ;;  %v901_v15 = vrot.slane %v899_v42, 5  ;;  %v886_v18 = vor.u32 %v885_v43, %v882_v40  ;;  %v896_v61 = vor.u32 %v895_v53, %v891_v44  ;;  %v911_v29 = vrot.slane %v910_v35, 4  ;;  %v5523_v40 = vld [vmem:[%s7416_s2 + $0xd0] sm:$0xff]   ;;  %v6306_v43 = vld [vmem:[#allocation2 + $0x5c] sm:$0x1] }
  0x9d   : > { %5179 = vmatpush3.bf16.msra.mxu1 %v5511_v17  ;;  %5148 = vmatprep.subr.bf16.mxu0 %v5514_v59  ;;  %v915_v17 = vrot.slane %v913_v60, 5  ;;  %v961_v60 = vshll.u32 %v6300_v34, 16 }
  0x9e   : > { %5180 = vmatprep.subr.bf16.mxu1 %v5515_v26  ;;  %v887_v5 = vrot.slane %v886_v18, 4  ;;  %v897_v36 = vrot.slane %v896_v61, 4  ;;  %v5526_v61 = vld [vmem:[%s7416_s2 + $0x88] sm:$0xff]  }
  0x9f   : > { %5101 = vmatmul.mubr.bf16.gmra.mxu0 %v4515_v1  ;;  %v920_v13 = vor.u32 %v919_v23, %v915_v17  ;;  %v5527_v23 = vld [vmem:[%s7416_s2 + $0xc8] sm:$0xff]  }
  0xa0   : > { %5133 = vmatmul.mubr.bf16.gmra.mxu1 %v4531_v11  ;;  %5149 = vmatpush3.bf16.msra.mxu0 %v5514_v59  ;;  %v892_v9 = vsel %vm6173_vm11, %v887_v5, %v891_v44  ;;  %v6287_v11 = vld [vmem:[#allocation2 + $0x4c] sm:$0xf]  ;;  %v902_v12 = vsel %vm6173_vm11, %v897_v36, %v901_v15  ;;  %v931_v59 = vshll.u32 %v752_v8, 16  ;;  %v916_v44 = vsel %vm6173_vm11, %v911_v29, %v915_v17 }
  0xa1   : > { %5181 = vmatpush3.bf16.msra.mxu1 %v5515_v26  ;;  %5150 = vmatprep.subr.bf16.mxu0 %v5516_v56  ;;  %v4516_v0 = vcombine.low %v892_v9, %v902_v12  ;;  %v5522_v26 = vld [vmem:[%s7416_s2 + $0x90] sm:$0xff]   ;;  %v937_v62 = vshll.u32 %v6287_v11, 16  ;;  %v941_v33 = vshrl.u32 %v6287_v11, 16  ;;  %v921_v28 = vrot.slane %v920_v13, 4  ;;  %v1362_v9 = vld [vmem:[#allocation2] sm:$0xe] }
  0xa2   : > { %5182 = vmatprep.subr.bf16.mxu1 %v5517_v48  ;;  %5136 = vmatprep.mubr.bf16.mxu1 %v4532_v45  ;;  %v933_v42 = vrot.slane %v931_v59, 5  ;;  %v949_v15 = vrot.slane %v947_v16, 5  ;;  %v971_v5 = vshll.u32 %v6306_v43, 16  ;;  %v957_v17 = vrot.slane %v955_v58, 5  ;;  %v5529_v59 = vld [vmem:[%s7416_s2 + $0xc0] sm:$0xff]  }
  0xa3   : > { %5104 = vmatprep.mubr.bf16.mxu0 %v4516_v0  ;;  %v939_v45 = vrot.slane %v937_v62, 5  ;;  %v943_v47 = vrot.slane %v941_v33, 4  ;;  %v963_v36 = vrot.slane %v961_v60, 5  ;;  %v1363_v62 = vld [vmem:[#allocation2 + $0xc] sm:$0xe] }
  0xa4   : > { %5151 = vmatpush3.bf16.msra.mxu0 %v5516_v56  ;;  %v4534_v56 = vcombine.low %v752_v8, %v6287_v11  ;;  %v934_v53 = vor.u32 %v933_v42, %v930_v41  ;;  %v958_v12 = vor.u32 %v957_v17, %v954_v3  ;;  %v973_v13 = vrot.slane %v971_v5, 5  ;;  %v5531_v42 = vld [vmem:[#allocation2 + $0xc] sm:$0xff]  }
  0xa5   : > { %5183 = vmatpush3.bf16.msra.mxu1 %v5517_v48  ;;  %5152 = vmatprep.subr.bf16.mxu0 %v5520_v14  ;;  %v926_v48 = vsel %vm6173_vm11, %v921_v28, %v925_v32  ;;  %v944_v18 = vor.u32 %v943_v47, %v939_v45  ;;  %v967_v32 = vrot.slane %v965_v31, 4  ;;  %v4545_v55 = vrot.slane %v1363_v62, 9  ;;  %v1364_v47 = vld [vmem:[#allocation2 + $0x18] sm:$0xe]  ;;  %v1366_v31 = vld [vmem:[#allocation2 + $0x30] sm:$0xe] }
  0xa6   : > { %5184 = vmatprep.subr.bf16.mxu1 %v5521_v63  ;;  %v4517_v1 = vcombine.low %v916_v44, %v926_v48  ;;  %v935_v2 = vrot.slane %v934_v53, 4  ;;  %v959_v33 = vrot.slane %v958_v12, 4  ;;  %v1405_v44 = vrot.slane %v6194_v19, 5  ;;  %v5533_v48 = vld [vmem:[%s7416_s2 + $0x178] sm:$0xff]   ;;  %v5534_v5 = vld [vmem:[%s7416_s2 + $0x130] sm:$0xff]  }
  0xa7   : > { %v945_v6 = vrot.slane %v944_v18, 4  ;;  %v968_v29 = vor.u32 %v967_v32, %v963_v36  ;;  %v4546_v53 = vrot.slane %v1364_v47, 9  ;;  %v1399_v19 = vsel %vm6330_vm14, %v4545_v55, %v1398_v52  ;;  %v5549_v47 = vld [vmem:[#allocation2 + $0x54] sm:$0xff]  }
  0xa8   : > { %5137 = vmatmul.mubr.bf16.gmra.mxu1 %v4533_v38  ;;  %5153 = vmatpush3.bf16.msra.mxu0 %v5520_v14  ;;  %v940_v14 = vsel %vm6173_vm11, %v935_v2, %v939_v45  ;;  %v1393_v38 = vrot.slane %v1391_v39, 4  ;;  %v964_v16 = vsel %vm6173_vm11, %v959_v33, %v963_v36  ;;  %v5530_v45 = vld [vmem:[%s7416_s2 + $0x138] sm:$0xff]   ;;  %v1412_v18 = vrot.slane %v6213_v49, 5  ;;  %v5539_v36 = vld [vmem:[%s7416_s2 + $0x168] sm:$0xff]  }
  0xa9   : > { %5185 = vmatpush3.bf16.msra.mxu1 %v5521_v63  ;;  %5105 = vmatmul.mubr.bf16.gmra.mxu0 %v4517_v1  ;;  %v4535_v63 = vcombine.low %v6293_v27, %v6300_v34  ;;  %v950_v8 = vsel %vm6173_vm11, %v945_v6, %v949_v15  ;;  %v4544_v27 = vrot.slane %v1362_v9, 9  ;;  %v1407_v15 = vrot.slane %v1405_v44, 4  ;;  %v5532_v1 = vld [vmem:[#allocation2 + $0x18] sm:$0xff]  }
  0xaa   : > { %5154 = vmatprep.subr.bf16.mxu0 %v5522_v26  ;;  %5186 = vmatprep.subr.bf16.mxu1 %v5523_v40  ;;  %v4518_v0 = vcombine.low %v940_v14, %v950_v8  ;;  %v1395_v41 = vsel %vm6330_vm14, %v1393_v38, %v1394_v21  ;;  %v1406_v58 = vsel %vm6330_vm14, %v4546_v53, %v1405_v44  ;;  %v1414_v2 = vrot.slane %v1412_v18, 4  ;;  %v5545_v33 = vld [vmem:[%s7416_s2 + $0x158] sm:$0xff]   ;;  %v5546_v53 = vld [vmem:[%s7416_s2 + $0x110] sm:$0xff]  }
  0xab   : > { %5140 = vmatprep.mubr.bf16.mxu1 %v4534_v56  ;;  %v1392_v28 = vsel %vm6330_vm14, %v4544_v27, %v1391_v39  ;;  %v1408_v56 = vrot.slane %v6200_v37, 5  ;;  %v1415_v3 = vrot.slane %v6215_v51, 5  ;;  %v1422_v17 = vrot.slane %v6244_v25, 5  ;;  %v5536_v51 = vld [vmem:[%s7416_s2 + $0x128] sm:$0xff]  }
  0xac   : > { %5155 = vmatpush3.bf16.msra.mxu0 %v5522_v26  ;;  %v1400_v26 = vrot.slane %v1398_v52, 4  ;;  %5108 = vmatprep.mubr.bf16.mxu0 %v4518_v0  ;;  %v4568_v39 = vcombine.low %v1392_v28, %v1395_v41  ;;  %v4547_v52 = vrot.slane %v1365_v57, 9  ;;  %v1426_v14 = vrot.slane %v6256_v22, 5  ;;  %v5541_v22 = vld [vmem:[%s7416_s2 + $0x160] sm:$0xff]   ;;  %v1368_v0 = vld [vmem:[#allocation2 + $0x48] sm:$0xe] }
  0xad   : > { %5187 = vmatpush3.bf16.msra.mxu1 %v5523_v40  ;;  %5156 = vmatprep.subr.bf16.mxu0 %v5526_v61  ;;  %v969_v40 = vrot.slane %v968_v29, 4  ;;  %v1409_v60 = vsel %vm6330_vm14, %v1407_v15, %v1408_v56  ;;  %v1416_v25 = vsel %vm6330_vm14, %v1414_v2, %v1415_v3  ;;  %v1433_v9 = vrot.slane %v6287_v11, 5  ;;  %v5540_v11 = vld [vmem:[%s7416_s2 + $0x120] sm:$0xff]   ;;  %v1369_v41 = vld [vmem:[#allocation2 + $0x54] sm:$0xe] }
  0xae   : > { %5188 = vmatprep.subr.bf16.mxu1 %v5527_v23  ;;  %v1402_v37 = vsel %vm6330_vm14, %v1400_v26, %v1401_v30  ;;  %v4570_v49 = vcombine.low %v1406_v58, %v1409_v60  ;;  %v1413_v32 = vsel %vm6330_vm14, %v4547_v52, %v1412_v18  ;;  %v1429_v12 = vrot.slane %v6265_v46, 5  ;;  %v1897_v56 = vld [vmem:[#allocation2 + $0xc] sm:$0xf]  ;;  %v1898_v15 = vld [vmem:[#allocation2 + $0x10] sm:$0xf] }
  0xaf   : > { %v974_v54 = vsel %vm6173_vm11, %v969_v40, %v973_v13  ;;  %v4569_v30 = vcombine.low %v1399_v19, %v1402_v37  ;;  %v1428_v27 = vrot.slane %v1426_v14, 4  ;;  %v1440_v29 = vrot.slane %v6300_v34, 5  ;;  %v5542_v34 = vld [vmem:[%s7416_s2 + $0x118] sm:$0xff]   ;;  %v6442_v57 = vld [vmem:[#allocation2 + $0x14] sm:$0x1]  ;;  %v5551_v18 = vld [vmem:[%s7416_s2 + $0x148] sm:$0xff]  }
  0xb0   : > { %5141 = vmatmul.mubr.bf16.gmra.mxu1 %v4535_v63  ;;  %5157 = vmatpush3.bf16.msra.mxu0 %v5526_v61  ;;  %v4519_v21 = vcombine.low %v964_v16, %v974_v54  ;;  %v1419_v61 = vrot.slane %v6242_v24, 5  ;;  %v4548_v24 = vrot.slane %v1366_v31, 9  ;;  %v5538_v63 = vld [vmem:[#allocation2 + $0x30] sm:$0xff]   ;;  %v1435_v46 = vrot.slane %v1433_v9, 4  ;;  %v6450_v2 = vld [vmem:[#allocation2 + $0x20] sm:$0x1] }
  0xb1   : > { %5189 = vmatpush3.bf16.msra.mxu1 %v5527_v23  ;;  %5158 = vmatprep.subr.bf16.mxu0 %v5528_v50  ;;  %v1367_v23 = vld [vmem:[#allocation2 + $0x3c] sm:$0xe]  ;;  %v1436_v28 = vrot.slane %v6291_v20, 5  ;;  %v4550_v26 = vrot.slane %v1368_v0, 9  ;;  %v4551_v40 = vrot.slane %v1369_v41, 9  ;;  %v1443_v16 = vrot.slane %v6306_v43, 5 }
  0xb2   : > { %5190 = vmatprep.subr.bf16.mxu1 %v5529_v59  ;;  %5192 = vmatprep.mubr.bf16.mxu1 %v5531_v42  ;;  %v1421_v6 = vrot.slane %v1419_v61, 4  ;;  %v1420_v38 = vsel %vm6330_vm14, %v4548_v24, %v1419_v61  ;;  %v4549_v13 = vrot.slane %v1367_v23, 9  ;;  %v1442_v42 = vrot.slane %v1440_v29, 4  ;;  %v5547_v43 = vld [vmem:[%s7416_s2 + $0x150] sm:$0xff]   ;;  %v1900_v61 = vld [vmem:[#allocation2 + $0x18] sm:$0xf] }
  0xb3   : > { %5109 = vmatmul.mubr.bf16.gmra.mxu0 %v4519_v21  ;;  %v1430_v54 = vsel %vm6330_vm14, %v1428_v27, %v1429_v12  ;;  %v1434_v55 = vsel %vm6330_vm14, %v4550_v26, %v1433_v9  ;;  %v1437_v44 = vsel %vm6330_vm14, %v1435_v46, %v1436_v28  ;;  %v6433_v21 = vsel %vm6330_vm14, %v4551_v40, %v1440_v29 }
  0xb4   : > { %5159 = vmatpush3.bf16.msra.mxu0 %v5528_v50  ;;  %5160 = vmatprep.mubr.bf16.mxu0 %v4568_v39  ;;  %v1423_v8 = vsel %vm6330_vm14, %v1421_v6, %v1422_v17  ;;  %v5543_v50 = vld [vmem:[#allocation2 + $0x3c] sm:$0xff]   ;;  %v1427_v20 = vsel %vm6330_vm14, %v4549_v13, %v1426_v14  ;;  %v5544_v39 = vld [vmem:[#allocation2 + $0x48] sm:$0xff]   ;;  %v1922_v19 = vshrl.u32 %v1897_v56, 16  ;;  %v1925_v37 = vshll.u32 %v1897_v56, 16 }
  0xb5   : > { %5191 = vmatpush3.bf16.msra.mxu1 %v5529_v59  ;;  %5208 = vmatprep.subr.bf16.mxu0 %v5530_v45  ;;  %v4571_v59 = vcombine.low %v1413_v32, %v1416_v25  ;;  %v4572_v62 = vcombine.low %v1420_v38, %v1423_v8  ;;  %v1931_v58 = vshll.u32 %v1898_v15, 16  ;;  %v1935_v60 = vshrl.u32 %v1898_v15, 16  ;;  %v5548_v6 = vld [vmem:[%s7416_s2 + $0x108] sm:$0xff]   ;;  %v5550_v17 = vld [vmem:[#allocation2 + $0x60] sm:$0xff]  }
  0xb6   : > { %5240 = vmatprep.subr.bf16.mxu1 %v5533_v48  ;;  %v1927_v52 = vrot.slane %v1925_v37, 5  ;;  %v1946_v24 = vshrl.u32 %v1900_v61, 16  ;;  %v1949_v23 = vshll.u32 %v1900_v61, 16  ;;  %v5553_v32 = vld [vmem:[%s7416_s2 + $0x140] sm:$0xff]   ;;  %v1965_v9 = vshll.u32 %v6450_v2, 16  ;;  %v5554_v37 = vld [vmem:[%s7416_s2 + $0x1b8] sm:$0xff]  }
  0xb7   : > { %v1933_v3 = vrot.slane %v1931_v58, 5  ;;  %v1937_v31 = vrot.slane %v1935_v60, 4  ;;  %v2357_v38 = vrot.slane %v1898_v15, 5  ;;  %v2360_v41 = vrot.slane %v6442_v57, 5  ;;  %v6479_v15 = vld [vmem:[#allocation2 + $0x2c] sm:$0x1] }
  0xb8   : > { %5193 = vmatmul.mubr.bf16.vlgmr.msra.gmra.mxu1 %v5532_v1  ;;  %v4574_v1 = vcombine.low %v1434_v55, %v1437_v44  ;;  %v1951_v12 = vrot.slane %v1949_v23, 5  ;;  %v1967_v27 = vrot.slane %v1965_v9, 5  ;;  %v1903_v55 = vld [vmem:[#allocation2 + $0x24] sm:$0xf]  ;;  %v1906_v58 = vld [vmem:[#allocation2 + $0x30] sm:$0xf] }
  0xb9   : > { %5241 = vmatpush3.bf16.msra.mxu1 %v5533_v48  ;;  %5196 = vmatprep.mubr.bf16.mxu1 %v5537_v4  ;;  %v4573_v48 = vcombine.low %v1427_v20, %v1430_v54  ;;  %v1941_v4 = vshll.u32 %v6442_v57, 16  ;;  %v1938_v25 = vor.u32 %v1937_v31, %v1933_v3  ;;  %v2359_v29 = vrot.slane %v2357_v38, 4  ;;  %v6491_v60 = vld [vmem:[#allocation2 + $0x34] sm:$0xf] }
  0xba   : > { %5242 = vmatprep.subr.bf16.mxu1 %v5535_v7 }
  0xbb   : > { %5161 = vmatmul.mubr.bf16.vlgmr.msra.gmra.mxu0 %v4569_v30  ;;  %v1924_v30 = vrot.slane %v1922_v19, 4 }
  0xbc   : > { %5209 = vmatpush3.bf16.msra.mxu0 %v5530_v45  ;;  %5164 = vmatprep.mubr.bf16.mxu0 %v4570_v49  ;;  %v6437_v45 = vsel %vm6330_vm14, %v1442_v42, %v1443_v16  ;;  %v1901_v49 = vld [vmem:[#allocation2 + $0x1c] sm:$0xf] }
  0xbd   : > { %5210 = vmatprep.subr.bf16.mxu0 %v5534_v5  ;;  %5243 = vmatpush3.bf16.msra.mxu1 %v5535_v7  ;;  %v4575_v7 = vcombine.low %v6433_v21, %v6437_v45  ;;  %v1955_v14 = vshll.u32 %v1901_v49, 16  ;;  %v2364_v16 = vrot.slane %v1901_v49, 5 }
  0xbe   : > { %5244 = vmatprep.subr.bf16.mxu1 %v5539_v36 }
  0xbf   : > { %v1957_v13 = vrot.slane %v1955_v14, 5  ;;  %v2366_v56 = vrot.slane %v2364_v16, 4  ;;  %v2003_v14 = vshll.u32 %v6491_v60, 16 }
  0xc0   : > { %5211 = vmatpush3.bf16.msra.mxu0 %v5534_v5  ;;  %5197 = vmatmul.mubr.bf16.gmra.mxu1 %v5538_v63  ;;  %v1943_v5 = vrot.slane %v1941_v4, 5  ;;  %v1948_v63 = vrot.slane %v1946_v24, 4  ;;  %v1994_v24 = vshrl.u32 %v1906_v58, 16 }
  0xc1   : > { %5212 = vmatprep.subr.bf16.mxu0 %v5536_v51  ;;  %5245 = vmatpush3.bf16.msra.mxu1 %v5539_v36  ;;  %v1928_v36 = vor.u32 %v1927_v52, %v1924_v30  ;;  %v5557_v52 = vld [vmem:[%s7416_s2 + $0x1f0] sm:$0xff]  }
  0xc2   : > { %5246 = vmatprep.subr.bf16.mxu1 %v5541_v22  ;;  %5200 = vmatprep.mubr.bf16.mxu1 %v5543_v50  ;;  %v1952_v46 = vor.u32 %v1951_v12, %v1948_v63  ;;  %v1996_v9 = vrot.slane %v1994_v24, 4  ;;  %v2005_v12 = vrot.slane %v2003_v14, 5 }
  0xc3   : > { %5165 = vmatmul.mubr.bf16.gmra.mxu0 %v4571_v59  ;;  %v1929_v8 = vrot.slane %v1928_v36, 4  ;;  %v2324_v59 = vld [vmem:[#allocation2 + $0x18] sm:$0xe] }
  0xc4   : > { %5213 = vmatpush3.bf16.msra.mxu0 %v5536_v51  ;;  %5168 = vmatprep.mubr.bf16.mxu0 %v4572_v62  ;;  %v1959_v51 = vshrl.u32 %v1901_v49, 16  ;;  %v5552_v62 = vld [vmem:[%s7416_s2 + $0x100] sm:$0xff]   ;;  %v4649_v42 = vrot.slane %v2324_v59, 9  ;;  %v1953_v54 = vrot.slane %v1952_v46, 4  ;;  %v2374_v46 = vrot.slane %v6479_v15, 5 }
  0xc5   : > { %5214 = vmatprep.subr.bf16.mxu0 %v5540_v11  ;;  %5247 = vmatpush3.bf16.msra.mxu1 %v5541_v22  ;;  %v2323_v22 = vld [vmem:[#allocation2 + $0xc] sm:$0xe] }
  0xc6   : > { %5248 = vmatprep.subr.bf16.mxu1 %v5545_v33  ;;  %v1961_v50 = vrot.slane %v1959_v51, 4  ;;  %v4648_v0 = vrot.slane %v2323_v22, 9  ;;  %v1958_v57 = vsel %vm6173_vm11, %v1953_v54, %v1957_v13  ;;  %v2007_v51 = vshrl.u32 %v6491_v60, 16  ;;  %v5558_v54 = vld [vmem:[%s7416_s2 + $0x1a8] sm:$0xff]  }
  0xc8   : > { %5215 = vmatpush3.bf16.msra.mxu0 %v5540_v11  ;;  %5201 = vmatmul.mubr.bf16.gmra.mxu1 %v5544_v39  ;;  %v1939_v11 = vrot.slane %v1938_v25, 4  ;;  %v1962_v28 = vor.u32 %v1961_v50, %v1957_v13  ;;  %v2358_v40 = vsel %vm6330_vm14, %v4648_v0, %v2357_v38  ;;  %v5556_v25 = vld [vmem:[%s7416_s2 + $0x1b0] sm:$0xff]   ;;  %v2009_v13 = vrot.slane %v2007_v51, 4 }
  0xc9   : > { %5216 = vmatprep.subr.bf16.mxu0 %v5542_v34  ;;  %5249 = vmatpush3.bf16.msra.mxu1 %v5545_v33  ;;  %v1934_v33 = vsel %vm6173_vm11, %v1929_v8, %v1933_v3  ;;  %v1989_v3 = vshll.u32 %v6479_v15, 16  ;;  %v1912_v15 = vld [vmem:[#allocation2 + $0x48] sm:$0xf] }
  0xca   : > { %5250 = vmatprep.subr.bf16.mxu1 %v5547_v43  ;;  %5204 = vmatprep.mubr.bf16.mxu1 %v5549_v47  ;;  %v1944_v26 = vsel %vm6173_vm11, %v1939_v11, %v1943_v5  ;;  %v1963_v39 = vrot.slane %v1962_v28, 4  ;;  %v2365_v47 = vsel %vm6330_vm14, %v4649_v42, %v2364_v16  ;;  %v1909_v16 = vld [vmem:[#allocation2 + $0x3c] sm:$0xf]  ;;  %v2045_v24 = vshll.u32 %v1912_v15, 16 }
  0xcb   : > { %5169 = vmatmul.mubr.bf16.gmra.mxu0 %v4573_v48  ;;  %v4632_v20 = vcombine.low %v1934_v33, %v1944_v26  ;;  %v2367_v48 = vrot.slane %v6450_v2, 5  ;;  %v1991_v23 = vrot.slane %v1989_v3, 5  ;;  %v2010_v33 = vor.u32 %v2009_v13, %v2005_v12 }
  0xcc   : > { %5217 = vmatpush3.bf16.msra.mxu0 %v5542_v34  ;;  %5172 = vmatprep.mubr.bf16.mxu0 %v4574_v1  ;;  %v5555_v34 = vld [vmem:[%s7416_s2 + $0x1f8] sm:$0xff]   ;;  %v1968_v19 = vsel %vm6173_vm11, %v1963_v39, %v1967_v27  ;;  %v1970_v1 = vshrl.u32 %v1903_v55, 16  ;;  %v2378_v39 = vrot.slane %v6491_v60, 5  ;;  %v6540_v60 = vld [vmem:[#allocation2 + $0x50] sm:$0x1] }
  0xcd   : > { %5218 = vmatprep.subr.bf16.mxu0 %v5546_v53  ;;  %5251 = vmatpush3.bf16.msra.mxu1 %v5547_v43  ;;  %v2361_v43 = vsel %vm6330_vm14, %v2359_v29, %v2360_v41  ;;  %v4633_v4 = vcombine.low %v1958_v57, %v1968_v19  ;;  %v2368_v21 = vsel %vm6330_vm14, %v2366_v56, %v2367_v48  ;;  %v5559_v29 = vld [vmem:[%s7416_s2 + $0x1e8] sm:$0xff]   ;;  %v6529_v56 = vld [vmem:[#allocation2 + $0x44] sm:$0x1]  ;;  %v2018_v48 = vshrl.u32 %v1909_v16, 16 }
  0xce   : > { %5252 = vmatprep.subr.bf16.mxu1 %v5551_v18  ;;  %v4672_v44 = vcombine.low %v2358_v40, %v2361_v43  ;;  %v4673_v30 = vcombine.low %v2365_v47, %v2368_v21  ;;  %v1972_v49 = vrot.slane %v1970_v1, 4  ;;  %v2380_v1 = vrot.slane %v2378_v39, 4 }
  0xcf   : > { %v2020_v21 = vrot.slane %v2018_v48, 4 }
  0xd0   : > { %5219 = vmatpush3.bf16.msra.mxu0 %v5546_v53  ;;  %5205 = vmatmul.mubr.bf16.gmra.mxu1 %v5550_v17  ;;  %v6477_v53 = vld [vmem:[#allocation2 + $0x28] sm:$0xf]  ;;  %v2325_v17 = vld [vmem:[#allocation2 + $0x24] sm:$0xe] }
  0xd1   : > { %5220 = vmatprep.subr.bf16.mxu0 %v5548_v6  ;;  %5253 = vmatpush3.bf16.msra.mxu1 %v5551_v18  ;;  %v1973_v18 = vshll.u32 %v1903_v55, 16  ;;  %v1979_v45 = vshll.u32 %v6477_v53, 16  ;;  %v1983_v61 = vshrl.u32 %v6477_v53, 16  ;;  %v4650_v50 = vrot.slane %v2325_v17, 9  ;;  %v1910_v55 = vld [vmem:[#allocation2 + $0x40] sm:$0xf] }
  0xd2   : > { %5254 = vmatprep.subr.bf16.mxu1 %v5553_v32  ;;  %5256 = vmatprep.mubr.bf16.mxu1 %v4672_v44  ;;  %v2371_v0 = vrot.slane %v6477_v53, 5  ;;  %v2021_v53 = vshll.u32 %v1909_v16, 16  ;;  %v5563_v17 = vld [vmem:[%s7416_s2 + $0x1d8] sm:$0xff]   ;;  %v1915_v16 = vld [vmem:[#allocation2 + $0x54] sm:$0xf] }
  0xd3   : > { %5173 = vmatmul.mubr.bf16.gmra.mxu0 %v4575_v7  ;;  %v6497_v7 = vld [vmem:[#allocation2 + $0x38] sm:$0x1]  ;;  %v1975_v2 = vrot.slane %v1973_v18, 5  ;;  %v1981_v31 = vrot.slane %v1979_v45, 5  ;;  %v1985_v5 = vrot.slane %v1983_v61, 4  ;;  %v5561_v18 = vld [vmem:[%s7416_s2 + $0x1e0] sm:$0xff]  }
  0xd4   : > { %5221 = vmatpush3.bf16.msra.mxu0 %v5548_v6  ;;  %5224 = vmatprep.mubr.bf16.mxu0 %v4632_v20  ;;  %v1997_v6 = vshll.u32 %v1906_v58, 16  ;;  %v2013_v38 = vshll.u32 %v6497_v7, 16  ;;  %v2372_v40 = vsel %vm6330_vm14, %v4650_v50, %v2371_v0  ;;  %v2373_v42 = vrot.slane %v2371_v0, 4  ;;  %v6538_v58 = vld [vmem:[#allocation2 + $0x4c] sm:$0xf] }
  0xd5   : > { %5222 = vmatprep.subr.bf16.mxu0 %v5552_v62  ;;  %5255 = vmatpush3.bf16.msra.mxu1 %v5553_v32  ;;  %v1976_v36 = vor.u32 %v1975_v2, %v1972_v49  ;;  %v2326_v32 = vld [vmem:[#allocation2 + $0x30] sm:$0xe]  ;;  %v1986_v63 = vor.u32 %v1985_v5, %v1981_v31  ;;  %v2011_v20 = vrot.slane %v2010_v33, 4  ;;  %v2381_v43 = vrot.slane %v6497_v7, 5 }
  0xd6   : > { %5304 = vmatprep.subr.bf16.mxu1 %v5555_v34  ;;  %v1999_v22 = vrot.slane %v1997_v6, 5  ;;  %v2015_v27 = vrot.slane %v2013_v38, 5  ;;  %v4651_v28 = vrot.slane %v2326_v32, 9  ;;  %v2375_v47 = vsel %vm6330_vm14, %v2373_v42, %v2374_v46  ;;  %v2327_v6 = vld [vmem:[#allocation2 + $0x3c] sm:$0xe] }
  0xd7   : > { %v1977_v8 = vrot.slane %v1976_v36, 4  ;;  %v1987_v59 = vrot.slane %v1986_v63, 4  ;;  %v4674_v19 = vcombine.low %v2372_v40, %v2375_v47  ;;  %v2023_v45 = vrot.slane %v2021_v53, 5  ;;  %v2328_v32 = vld [vmem:[#allocation2 + $0x48] sm:$0xe]  ;;  %v5564_v53 = vld [vmem:[%s7416_s2 + $0x190] sm:$0xff]  }
  0xd8   : > { %5223 = vmatpush3.bf16.msra.mxu0 %v5552_v62  ;;  %5257 = vmatmul.mubr.bf16.vlgmr.msra.gmra.mxu1 %v4673_v30  ;;  %v2000_v11 = vor.u32 %v1999_v22, %v1996_v9  ;;  %v2016_v57 = vsel %vm6173_vm11, %v2011_v20, %v2015_v27  ;;  %v2027_v61 = vshll.u32 %v1910_v55, 16  ;;  %v2382_v7 = vsel %vm6330_vm14, %v2380_v1, %v2381_v43  ;;  %v5560_v30 = vld [vmem:[%s7416_s2 + $0x1a0] sm:$0xff]   ;;  %v6573_v43 = vld [vmem:[#allocation2 + $0x5c] sm:$0x1] }
  0xd9   : > { %5272 = vmatprep.subr.bf16.mxu0 %v5554_v37  ;;  %5305 = vmatpush3.bf16.msra.mxu1 %v5555_v34  ;;  %v1982_v62 = vsel %vm6173_vm11, %v1977_v8, %v1981_v31  ;;  %v1992_v41 = vsel %vm6173_vm11, %v1987_v59, %v1991_v23  ;;  %v2037_v49 = vshll.u32 %v6529_v56, 16  ;;  %v2042_v2 = vshrl.u32 %v1912_v15, 16  ;;  %v1918_v15 = vld [vmem:[#allocation2 + $0x60] sm:$0xf] }
  0xda   : > { %5306 = vmatprep.subr.bf16.mxu1 %v5557_v52  ;;  %v2001_v26 = vrot.slane %v2000_v11, 4  ;;  %v4634_v34 = vcombine.low %v1982_v62, %v1992_v41  ;;  %5260 = vmatprep.mubr.bf16.mxu1 %v4674_v19  ;;  %v2024_v31 = vor.u32 %v2023_v45, %v2020_v21  ;;  %v2029_v5 = vrot.slane %v2027_v61, 5 }
  0xdb   : > { %5225 = vmatmul.mubr.bf16.vlgmr.msra.gmra.mxu0 %v4633_v4  ;;  %v2039_v23 = vrot.slane %v2037_v49, 5  ;;  %v2044_v14 = vrot.slane %v2042_v2, 4  ;;  %v2051_v51 = vshll.u32 %v6538_v58, 16  ;;  %v2047_v63 = vrot.slane %v2045_v24, 5  ;;  %v2329_v2 = vld [vmem:[#allocation2 + $0x54] sm:$0xe] }
  0xdc   : > { %5273 = vmatpush3.bf16.msra.mxu0 %v5554_v37  ;;  %v2006_v44 = vsel %vm6173_vm11, %v2001_v26, %v2005_v12  ;;  %5228 = vmatprep.mubr.bf16.mxu0 %v4634_v34  ;;  %v2379_v37 = vsel %vm6330_vm14, %v4651_v28, %v2378_v39  ;;  %v2055_v9 = vshrl.u32 %v6538_v58, 16  ;;  %v2061_v22 = vshll.u32 %v6540_v60, 16  ;;  %v5562_v12 = vld [vmem:[%s7416_s2 + $0x198] sm:$0xff]   ;;  %v5565_v28 = vld [vmem:[%s7416_s2 + $0x1d0] sm:$0xff]  }
  0xdd   : > { %5274 = vmatprep.subr.bf16.mxu0 %v5556_v25  ;;  %5307 = vmatpush3.bf16.msra.mxu1 %v5557_v52  ;;  %v4635_v4 = vcombine.low %v2006_v44, %v2016_v57  ;;  %v2031_v52 = vshrl.u32 %v1910_v55, 16  ;;  %v4675_v3 = vcombine.low %v2379_v37, %v2382_v7  ;;  %v2053_v8 = vrot.slane %v2051_v51, 5  ;;  %v6571_v39 = vld [vmem:[#allocation2 + $0x58] sm:$0xf]  ;;  %v6580_v57 = vld [vmem:[#allocation2 + $0x64] sm:$0xf] }
  0xde   : > { %5308 = vmatprep.subr.bf16.mxu1 %v5559_v29  ;;  %v4652_v13 = vrot.slane %v2327_v6, 9  ;;  %v2385_v50 = vrot.slane %v1910_v55, 5  ;;  %v2048_v11 = vor.u32 %v2047_v63, %v2044_v14  ;;  %v2057_v27 = vrot.slane %v2055_v9, 4  ;;  %v5566_v6 = vld [vmem:[%s7416_s2 + $0x188] sm:$0xff]   ;;  %v2330_v51 = vld [vmem:[#allocation2 + $0x60] sm:$0xe] }
  0xdf   : > { %v2033_v36 = vrot.slane %v2031_v52, 4  ;;  %v2063_v0 = vrot.slane %v2061_v22, 5  ;;  %v2388_v46 = vrot.slane %v6529_v56, 5  ;;  %v4653_v40 = vrot.slane %v2328_v32, 9  ;;  %v5569_v32 = vld [vmem:[%s7416_s2 + $0x1c0] sm:$0xff]  }
  0xe0   : > { %5275 = vmatpush3.bf16.msra.mxu0 %v5556_v25  ;;  %5261 = vmatmul.mubr.bf16.gmra.mxu1 %v4675_v3  ;;  %v2025_v25 = vrot.slane %v2024_v31, 4  ;;  %v2386_v62 = vsel %vm6330_vm14, %v4652_v13, %v2385_v50  ;;  %v2387_v33 = vrot.slane %v2385_v50, 4  ;;  %v2049_v41 = vrot.slane %v2048_v11, 4 }
  0xe1   : > { %5276 = vmatprep.subr.bf16.mxu0 %v5558_v54  ;;  %5309 = vmatpush3.bf16.msra.mxu1 %v5559_v29  ;;  %v2034_v38 = vor.u32 %v2033_v36, %v2029_v5  ;;  %v2058_v26 = vor.u32 %v2057_v27, %v2053_v8  ;;  %v2392_v42 = vrot.slane %v6538_v58, 5  ;;  %v2066_v55 = vshrl.u32 %v1915_v16, 16  ;;  %v6584_v58 = vld [vmem:[#allocation2 + $0x68] sm:$0x1] }
  0xe2   : > { %5310 = vmatprep.subr.bf16.mxu1 %v5561_v18  ;;  %v2030_v59 = vsel %vm6173_vm11, %v2025_v25, %v2029_v5  ;;  %v2389_v20 = vsel %vm6330_vm14, %v2387_v33, %v2388_v46  ;;  %v2054_v47 = vsel %vm6173_vm11, %v2049_v41, %v2053_v8  ;;  %v2075_v21 = vshll.u32 %v6571_v39, 16 }
  0xe3   : > { %5229 = vmatmul.mubr.bf16.gmra.mxu0 %v4635_v4  ;;  %v2035_v29 = vrot.slane %v2034_v38, 4  ;;  %v2059_v56 = vrot.slane %v2058_v26, 4  ;;  %v4676_v48 = vcombine.low %v2386_v62, %v2389_v20  ;;  %v2393_v19 = vsel %vm6330_vm14, %v4653_v40, %v2392_v42  ;;  %v5568_v38 = vld [vmem:[%s7416_s2 + $0x180] sm:$0xff]  }
  0xe4   : > { %5277 = vmatpush3.bf16.msra.mxu0 %v5558_v54  ;;  %v2395_v54 = vrot.slane %v6540_v60, 5  ;;  %v2394_v37 = vrot.slane %v2392_v42, 4  ;;  %v2068_v1 = vrot.slane %v2066_v55, 4  ;;  %v5567_v60 = vld [vmem:[%s7416_s2 + $0x1c8] sm:$0xff]   ;;  %v2079_v45 = vshrl.u32 %v6571_v39, 16  ;;  %v6620_v42 = vld [vmem:[%s7416_s2 + $0x238] sm:$0xff]  }
  0xe5   : > { %5278 = vmatprep.subr.bf16.mxu0 %v5560_v30  ;;  %5311 = vmatpush3.bf16.msra.mxu1 %v5561_v18  ;;  %v2040_v34 = vsel %vm6173_vm11, %v2035_v29, %v2039_v23  ;;  %v2069_v18 = vshll.u32 %v1915_v16, 16  ;;  %v2064_v4 = vsel %vm6173_vm11, %v2059_v56, %v2063_v0  ;;  %v2085_v61 = vshll.u32 %v6573_v43, 16 }
  0xe6   : > { %5312 = vmatprep.subr.bf16.mxu1 %v5563_v17  ;;  %v4636_v44 = vcombine.low %v2030_v59, %v2040_v34  ;;  %5264 = vmatprep.mubr.bf16.mxu1 %v4676_v48  ;;  %v4637_v7 = vcombine.low %v2054_v47, %v2064_v4  ;;  %v2090_v49 = vshrl.u32 %v1918_v15, 16  ;;  %v2077_v31 = vrot.slane %v2075_v21, 5  ;;  %v5570_v47 = vld [vmem:[#allocation2 + $0x18] sm:$0xff]  }
  0xe7   : > { %v2071_v52 = vrot.slane %v2069_v18, 5  ;;  %v2081_v5 = vrot.slane %v2079_v45, 4  ;;  %v2087_v24 = vrot.slane %v2085_v61, 5  ;;  %v2093_v23 = vshll.u32 %v1918_v15, 16  ;;  %v2864_v48 = vld [vmem:[#allocation2 + $0x18] sm:$0xf] }
  0xe8   : > { %5279 = vmatpush3.bf16.msra.mxu0 %v5560_v30  ;;  %5232 = vmatprep.mubr.bf16.mxu0 %v4636_v44  ;;  %v2396_v30 = vsel %vm6330_vm14, %v2394_v37, %v2395_v54  ;;  %v2092_v36 = vrot.slane %v2090_v49, 4  ;;  %v2099_v14 = vshll.u32 %v6580_v57, 16  ;;  %v2103_v63 = vshrl.u32 %v6580_v57, 16  ;;  %v6631_v15 = vld [vmem:[#allocation2 + $0x20] sm:$0x1] }
  0xe9   : > { %5280 = vmatprep.subr.bf16.mxu0 %v5562_v12  ;;  %5313 = vmatpush3.bf16.msra.mxu1 %v5563_v17  ;;  %v4677_v3 = vcombine.low %v2393_v19, %v2396_v30  ;;  %v2072_v17 = vor.u32 %v2071_v52, %v2068_v1  ;;  %v2082_v25 = vor.u32 %v2081_v5, %v2077_v31  ;;  %v2109_v9 = vshll.u32 %v6584_v58, 16  ;;  %v2867_v18 = vld [vmem:[#allocation2 + $0x24] sm:$0xf]  ;;  %v6641_v61 = vld [vmem:[#allocation2 + $0x2c] sm:$0x1] }
  0xea   : > { %5314 = vmatprep.subr.bf16.mxu1 %v5565_v28  ;;  %v4654_v22 = vrot.slane %v2329_v2, 9  ;;  %v2101_v13 = vrot.slane %v2099_v14, 5  ;;  %v2399_v50 = vrot.slane %v6571_v39, 5  ;;  %v2105_v11 = vrot.slane %v2103_v63, 4 }
  0xeb   : > { %5233 = vmatmul.mubr.bf16.gmra.mxu0 %v4637_v7  ;;  %5265 = vmatmul.mubr.bf16.gmra.mxu1 %v4677_v3  ;;  %v2073_v8 = vrot.slane %v2072_v17, 4  ;;  %v2083_v59 = vrot.slane %v2082_v25, 4  ;;  %v2111_v27 = vrot.slane %v2109_v9, 5  ;;  %v2402_v0 = vrot.slane %v6573_v43, 5 }
  0xec   : > { %5281 = vmatpush3.bf16.msra.mxu0 %v5562_v12  ;;  %v2095_v12 = vrot.slane %v2093_v23, 5  ;;  %v2400_v33 = vsel %vm6330_vm14, %v4654_v22, %v2399_v50  ;;  %v2401_v46 = vrot.slane %v2399_v50, 4  ;;  %v2106_v41 = vor.u32 %v2105_v11, %v2101_v13  ;;  %v5571_v23 = vld [vmem:[#allocation2 + $0x24] sm:$0xff]   ;;  %v6653_v11 = vld [vmem:[#allocation2 + $0x34] sm:$0xf] }
  0xed   : > { %5282 = vmatprep.subr.bf16.mxu0 %v5564_v53  ;;  %5315 = vmatpush3.bf16.msra.mxu1 %v5565_v28  ;;  %v2078_v29 = vsel %vm6173_vm11, %v2073_v8, %v2077_v31  ;;  %v2088_v28 = vsel %vm6173_vm11, %v2083_v59, %v2087_v24  ;;  %v4655_v26 = vrot.slane %v2330_v51, 9  ;;  %v2406_v40 = vrot.slane %v6580_v57, 5 }
  0xee   : > { %5316 = vmatprep.subr.bf16.mxu1 %v5567_v60  ;;  %v2096_v62 = vor.u32 %v2095_v12, %v2092_v36  ;;  %v4638_v16 = vcombine.low %v2078_v29, %v2088_v28  ;;  %v2403_v20 = vsel %vm6330_vm14, %v2401_v46, %v2402_v0  ;;  %v2409_v54 = vrot.slane %v6584_v58, 5  ;;  %v6637_v58 = vld [vmem:[#allocation2 + $0x28] sm:$0xf]  ;;  %v5573_v12 = vld [vmem:[%s7416_s2 + $0x230] sm:$0xff]  }
  0xef   : > { %v2107_v39 = vrot.slane %v2106_v41, 4  ;;  %v4678_v43 = vcombine.low %v2400_v33, %v2403_v20  ;;  %v2407_v55 = vsel %vm6330_vm14, %v4655_v26, %v2406_v40  ;;  %v2408_v44 = vrot.slane %v2406_v40, 4  ;;  %v5574_v46 = vld [vmem:[#allocation2 + $0x30] sm:$0xff]   ;;  %v2873_v26 = vld [vmem:[#allocation2 + $0x3c] sm:$0xf] }
  0xf0   : > { %5283 = vmatpush3.bf16.msra.mxu0 %v5564_v53  ;;  %v2097_v34 = vrot.slane %v2096_v62, 4  ;;  %5236 = vmatprep.mubr.bf16.mxu0 %v4638_v16  ;;  %v6629_v53 = vld [vmem:[#allocation2 + $0x1c] sm:$0xf]  ;;  %v2889_v37 = vshrl.u32 %v2864_v48, 16  ;;  %v2892_v1 = vshll.u32 %v2864_v48, 16  ;;  %v2908_v52 = vshll.u32 %v6631_v15, 16 }
  0xf1   : > { %5284 = vmatprep.subr.bf16.mxu0 %v5566_v6  ;;  %5317 = vmatpush3.bf16.msra.mxu1 %v5567_v60  ;;  %v2112_v57 = vsel %vm6173_vm11, %v2107_v39, %v2111_v27  ;;  %v2410_v19 = vsel %vm6330_vm14, %v2408_v44, %v2409_v54  ;;  %v2898_v21 = vshll.u32 %v6629_v53, 16  ;;  %v2902_v45 = vshrl.u32 %v6629_v53, 16  ;;  %v6655_v27 = vld [vmem:[#allocation2 + $0x38] sm:$0x1]  ;;  %v6661_v54 = vld [vmem:[#allocation2 + $0x40] sm:$0xf] }
  0xf2   : > { %5318 = vmatprep.subr.bf16.mxu1 %v5569_v32  ;;  %v2102_v56 = vsel %vm6173_vm11, %v2097_v34, %v2101_v13  ;;  %5268 = vmatprep.mubr.bf16.mxu1 %v4678_v43  ;;  %v4679_v4 = vcombine.low %v2407_v55, %v2410_v19  ;;  %v2891_v7 = vrot.slane %v2889_v37, 4  ;;  %v2894_v30 = vrot.slane %v2892_v1, 5  ;;  %v2870_v13 = vld [vmem:[#allocation2 + $0x30] sm:$0xf]  ;;  %v5576_v43 = vld [vmem:[%s7416_s2 + $0x228] sm:$0xff]  }
  0xf3   : > { %v4639_v60 = vcombine.low %v2102_v56, %v2112_v57  ;;  %v2913_v49 = vshrl.u32 %v2867_v18, 16  ;;  %v2900_v2 = vrot.slane %v2898_v21, 5  ;;  %v2904_v3 = vrot.slane %v2902_v45, 4  ;;  %v6669_v56 = vld [vmem:[#allocation2 + $0x44] sm:$0x1] }
  0xf4   : > { %5285 = vmatpush3.bf16.msra.mxu0 %v5566_v6  ;;  %5269 = vmatmul.mubr.bf16.gmra.mxu1 %v4679_v4  ;;  %v2916_v31 = vshll.u32 %v2867_v18, 16  ;;  %v2922_v5 = vshll.u32 %v6637_v58, 16  ;;  %v2895_v24 = vor.u32 %v2894_v30, %v2891_v7  ;;  %v2910_v6 = vrot.slane %v2908_v52, 5 }
  0xf5   : > { %5286 = vmatprep.subr.bf16.mxu0 %v5568_v38  ;;  %5319 = vmatpush3.bf16.msra.mxu1 %v5569_v32  ;;  %v2915_v17 = vrot.slane %v2913_v49, 4  ;;  %v2926_v36 = vshrl.u32 %v6637_v58, 16  ;;  %v2905_v14 = vor.u32 %v2904_v3, %v2900_v2  ;;  %v2932_v25 = vshll.u32 %v6641_v61, 16 }
  0xf6   : > { %5237 = vmatmul.mubr.bf16.gmra.mxu0 %v4639_v60  ;;  %v2918_v51 = vrot.slane %v2916_v31, 5  ;;  %v2924_v32 = vrot.slane %v2922_v5, 5  ;;  %v2896_v63 = vrot.slane %v2895_v24, 4  ;;  %v2937_v0 = vshrl.u32 %v2870_v13, 16  ;;  %v5577_v24 = vld [vmem:[%s7416_s2 + $0x220] sm:$0xff]  }
  0xf7   : > { %5288 = vmatprep.mubr.bf16.mxu0 %v5570_v47  ;;  %v2928_v9 = vrot.slane %v2926_v36, 4  ;;  %v2906_v22 = vrot.slane %v2905_v14, 4  ;;  %v2934_v8 = vrot.slane %v2932_v25, 5  ;;  %v2940_v29 = vshll.u32 %v2870_v13, 16  ;;  %v5578_v36 = vld [vmem:[#allocation2 + $0x48] sm:$0xff]  }
  0xf8   : > { %5287 = vmatpush3.bf16.msra.mxu0 %v5568_v38  ;;  %v2919_v38 = vor.u32 %v2918_v51, %v2915_v17  ;;  %v2901_v50 = vsel %vm6173_vm11, %v2896_v63, %v2900_v2  ;;  %v2946_v28 = vshll.u32 %v6653_v11, 16  ;;  %v2950_v41 = vshrl.u32 %v6653_v11, 16  ;;  %v6684_v14 = vld [vmem:[#allocation2 + $0x4c] sm:$0xf]  ;;  %v6686_v63 = vld [vmem:[#allocation2 + $0x50] sm:$0x1] }
  0xf9   : > { %5336 = vmatprep.subr.bf16.mxu0 %v6620_v42  ;;  %v2929_v59 = vor.u32 %v2928_v9, %v2924_v32  ;;  %v2911_v62 = vsel %vm6173_vm11, %v2906_v22, %v2910_v6  ;;  %v2939_v34 = vrot.slane %v2937_v0, 4  ;;  %v2942_v20 = vrot.slane %v2940_v29, 5  ;;  %v2879_v22 = vld [vmem:[#allocation2 + $0x54] sm:$0xf]  ;;  %v5580_v29 = vld [vmem:[%s7416_s2 + $0x218] sm:$0xff]  }
  0xfa   : > { %v2920_v33 = vrot.slane %v2919_v38, 4  ;;  %v4736_v40 = vcombine.low %v2901_v50, %v2911_v62  ;;  %v2948_v55 = vrot.slane %v2946_v28, 5  ;;  %v2952_v44 = vrot.slane %v2950_v41, 4  ;;  %v6691_v50 = vld [vmem:[#allocation2 + $0x58] sm:$0xf] }
  0xfb   : > { %v2930_v16 = vrot.slane %v2929_v59, 4  ;;  %v2956_v47 = vshll.u32 %v6655_v27, 16  ;;  %v2943_v57 = vor.u32 %v2942_v20, %v2939_v34  ;;  %v2961_v19 = vshrl.u32 %v2873_v26, 16  ;;  %v5579_v34 = vld [vmem:[#allocation2 + $0x54] sm:$0xff]  }
  0xfc   : > { %v2925_v39 = vsel %vm6173_vm11, %v2920_v33, %v2924_v32  ;;  %5320 = vmatprep.mubr.bf16.mxu1 %v4736_v40  ;;  %v2964_v37 = vshll.u32 %v2873_v26, 16  ;;  %v2953_v18 = vor.u32 %v2952_v44, %v2948_v55  ;;  %v2970_v4 = vshll.u32 %v6661_v54, 16  ;;  %v6698_v33 = vld [vmem:[#allocation2 + $0x5c] sm:$0x1] }
  0xfd   : > { %v2935_v48 = vsel %vm6173_vm11, %v2930_v16, %v2934_v8  ;;  %v2958_v60 = vrot.slane %v2956_v47, 5  ;;  %v2944_v21 = vrot.slane %v2943_v57, 4  ;;  %v2963_v45 = vrot.slane %v2961_v19, 4  ;;  %v5581_v57 = vld [vmem:[%s7416_s2 + $0x210] sm:$0xff]   ;;  %v5582_v19 = vld [vmem:[#allocation2 + $0x60] sm:$0xff]  }
  0xfe   : > { %5289 = vmatmul.mubr.bf16.vlgmr.msra.gmra.mxu0 %v5571_v23  ;;  %v4737_v1 = vcombine.low %v2925_v39, %v2935_v48  ;;  %v2966_v7 = vrot.slane %v2964_v37, 5  ;;  %v2974_v30 = vshrl.u32 %v6661_v54, 16  ;;  %v2954_v52 = vrot.slane %v2953_v18, 4  ;;  %v2876_v23 = vld [vmem:[#allocation2 + $0x48] sm:$0xf] }
  0xff   : > { %5337 = vmatpush3.bf16.msra.mxu0 %v6620_v42  ;;  %5292 = vmatprep.mubr.bf16.mxu0 %v5574_v46  ;;  %v5575_v42 = vld [vmem:[#allocation2 + $0x3c] sm:$0xff]   ;;  %v2972_v49 = vrot.slane %v2970_v4, 5  ;;  %v2980_v2 = vshll.u32 %v6669_v56, 16  ;;  %v2949_v3 = vsel %vm6173_vm11, %v2944_v21, %v2948_v55  ;;  %v2985_v9 = vshrl.u32 %v2876_v23, 16 }
 0x100   : > { %5338 = vmatprep.subr.bf16.mxu0 %v5573_v12  ;;  %5321 = vmatmul.mubr.bf16.vlgmr.msra.gmra.mxu1 %v4737_v1  ;;  %v2967_v31 = vor.u32 %v2966_v7, %v2963_v45  ;;  %v2976_v5 = vrot.slane %v2974_v30, 4  ;;  %v2959_v6 = vsel %vm6173_vm11, %v2954_v52, %v2958_v60  ;;  %v2988_v38 = vshll.u32 %v2876_v23, 16 }
 0x101   : > { %v2982_v17 = vrot.slane %v2980_v2, 5  ;;  %v4738_v51 = vcombine.low %v2949_v3, %v2959_v6  ;;  %v2994_v8 = vshll.u32 %v6684_v14, 16  ;;  %v3004_v13 = vshll.u32 %v6686_v63, 16 }
 0x102   : > { %v2968_v32 = vrot.slane %v2967_v31, 4  ;;  %v2977_v25 = vor.u32 %v2976_v5, %v2972_v49  ;;  %v2987_v62 = vrot.slane %v2985_v9, 4  ;;  %v3009_v46 = vshrl.u32 %v2879_v22, 16  ;;  %v2882_v31 = vld [vmem:[#allocation2 + $0x60] sm:$0xf] }
 0x103   : > { %5339 = vmatpush3.bf16.msra.mxu0 %v5573_v12  ;;  %v2998_v12 = vshrl.u32 %v6684_v14, 16  ;;  %5324 = vmatprep.mubr.bf16.mxu1 %v4738_v51  ;;  %v2990_v28 = vrot.slane %v2988_v38, 5  ;;  %v2996_v41 = vrot.slane %v2994_v8, 5  ;;  %v3006_v40 = vrot.slane %v3004_v13, 5  ;;  %v6716_v5 = vld [vmem:[#allocation2 + $0x64] sm:$0xf] }
 0x104   : > { %5340 = vmatprep.subr.bf16.mxu0 %v5576_v43  ;;  %v2973_v59 = vsel %vm6173_vm11, %v2968_v32, %v2972_v49  ;;  %v2978_v0 = vrot.slane %v2977_v25, 4  ;;  %v3011_v20 = vrot.slane %v3009_v46, 4  ;;  %v3012_v39 = vshll.u32 %v2879_v22, 16  ;;  %v2885_v51 = vld [vmem:[#allocation2 + $0x6c] sm:$0xf] }
 0x105   : > { %v3000_v26 = vrot.slane %v2998_v12, 4  ;;  %v2991_v44 = vor.u32 %v2990_v28, %v2987_v62  ;;  %v3022_v48 = vshrl.u32 %v6691_v50, 16  ;;  %v3028_v18 = vshll.u32 %v6698_v33, 16  ;;  %v6726_v38 = vld [vmem:[#allocation2 + $0x70] sm:$0xf] }
 0x106   : > { %5293 = vmatmul.mubr.bf16.gmra.mxu0 %v5575_v42  ;;  %v2983_v16 = vsel %vm6173_vm11, %v2978_v0, %v2982_v17  ;;  %v3014_v37 = vrot.slane %v3012_v39, 5  ;;  %v3324_v60 = vrot.slane %v6629_v53, 5  ;;  %v3327_v7 = vrot.slane %v6631_v15, 5  ;;  %v5584_v17 = vld [vmem:[%s7416_s2 + $0x208] sm:$0xff]  }
 0x107   : > { %5341 = vmatpush3.bf16.msra.mxu0 %v5576_v43  ;;  %5296 = vmatprep.mubr.bf16.mxu0 %v5578_v36  ;;  %v3018_v43 = vshll.u32 %v6691_v50, 16  ;;  %v4739_v55 = vcombine.low %v2973_v59, %v2983_v16  ;;  %v3001_v47 = vor.u32 %v3000_v26, %v2996_v41  ;;  %v2992_v4 = vrot.slane %v2991_v44, 4  ;;  %v6730_v59 = vld [vmem:[#allocation2 + $0x74] sm:$0x1]  ;;  %v5583_v62 = vld [vmem:[#allocation2 + $0x6c] sm:$0xff]  }
 0x108   : > { %5342 = vmatprep.subr.bf16.mxu0 %v5577_v24  ;;  %v3024_v45 = vrot.slane %v3022_v48, 4  ;;  %v3015_v30 = vor.u32 %v3014_v37, %v3011_v20  ;;  %v3030_v42 = vrot.slane %v3028_v18, 5  ;;  %v3326_v52 = vrot.slane %v3324_v60, 4  ;;  %v3290_v20 = vld [vmem:[#allocation2 + $0x18] sm:$0xe] }
 0x109   : > { %v3020_v1 = vrot.slane %v3018_v43, 5  ;;  %5325 = vmatmul.mubr.bf16.gmra.mxu1 %v4739_v55  ;;  %v3002_v21 = vrot.slane %v3001_v47, 4  ;;  %v2997_v49 = vsel %vm6173_vm11, %v2992_v4, %v2996_v41  ;;  %v3033_v36 = vshrl.u32 %v2882_v31, 16  ;;  %v5585_v47 = vld [vmem:[%s7416_s2 + $0x200] sm:$0xff]  }
 0x10a   : > { %v3016_v15 = vrot.slane %v3015_v30, 4  ;;  %v3036_v23 = vshll.u32 %v2882_v31, 16  ;;  %v3042_v25 = vshll.u32 %v6716_v5, 16  ;;  %v3046_v9 = vshrl.u32 %v6716_v5, 16  ;;  %v3291_v48 = vld [vmem:[#allocation2 + $0x24] sm:$0xe] }
 0x10b   : > { %5343 = vmatpush3.bf16.msra.mxu0 %v5577_v24  ;;  %v3007_v2 = vsel %vm6173_vm11, %v3002_v21, %v3006_v40  ;;  %v3025_v3 = vor.u32 %v3024_v45, %v3020_v1  ;;  %v6718_v24 = vld [vmem:[#allocation2 + $0x68] sm:$0x1]  ;;  %v3035_v12 = vrot.slane %v3033_v36, 4  ;;  %v3057_v0 = vshrl.u32 %v2885_v51, 16  ;;  %v3292_v30 = vld [vmem:[#allocation2 + $0x30] sm:$0xe] }
 0x10c   : > { %5344 = vmatprep.subr.bf16.mxu0 %v5580_v29  ;;  %v4740_v6 = vcombine.low %v2997_v49, %v3007_v2  ;;  %v3052_v22 = vshll.u32 %v6718_v24, 16  ;;  %v3021_v8 = vsel %vm6173_vm11, %v3016_v15, %v3020_v1  ;;  %v3038_v13 = vrot.slane %v3036_v23, 5  ;;  %v3293_v15 = vld [vmem:[#allocation2 + $0x3c] sm:$0xe] }
 0x10d   : > { %v3026_v32 = vrot.slane %v3025_v3, 4  ;;  %v3044_v46 = vrot.slane %v3042_v25, 5  ;;  %v3048_v28 = vrot.slane %v3046_v9, 4  ;;  %v3059_v16 = vrot.slane %v3057_v0, 4 }
 0x10e   : > { %5297 = vmatmul.mubr.bf16.gmra.mxu0 %v5579_v34  ;;  %5328 = vmatprep.mubr.bf16.mxu1 %v4740_v6  ;;  %v3054_v41 = vrot.slane %v3052_v22, 5  ;;  %v3039_v40 = vor.u32 %v3038_v13, %v3035_v12  ;;  %v3060_v34 = vshll.u32 %v2885_v51, 16  ;;  %v3066_v43 = vshll.u32 %v6726_v38, 16 }
 0x10f   : > { %5345 = vmatpush3.bf16.msra.mxu0 %v5580_v29  ;;  %5300 = vmatprep.mubr.bf16.mxu0 %v5582_v19  ;;  %v3031_v29 = vsel %vm6173_vm11, %v3026_v32, %v3030_v42  ;;  %v3049_v39 = vor.u32 %v3048_v28, %v3044_v46  ;;  %v3070_v55 = vshrl.u32 %v6726_v38, 16  ;;  %v3076_v44 = vshll.u32 %v6730_v59, 16  ;;  %v3294_v32 = vld [vmem:[#allocation2 + $0x48] sm:$0xe] }
 0x110   : > { %5346 = vmatprep.subr.bf16.mxu0 %v5581_v57  ;;  %v4741_v26 = vcombine.low %v3021_v8, %v3031_v29  ;;  %v3040_v19 = vrot.slane %v3039_v40, 4  ;;  %v4752_v37 = vrot.slane %v3290_v20, 9  ;;  %v3328_v1 = vsel %vm6330_vm14, %v3326_v52, %v3327_v7  ;;  %v3295_v40 = vld [vmem:[#allocation2 + $0x54] sm:$0xe] }
 0x111   : > { %v3050_v18 = vrot.slane %v3049_v39, 4  ;;  %v3068_v4 = vrot.slane %v3066_v43, 5  ;;  %v3072_v21 = vrot.slane %v3070_v55, 4  ;;  %v3078_v45 = vrot.slane %v3076_v44, 5 }
 0x112   : > { %5329 = vmatmul.mubr.bf16.gmra.mxu1 %v4741_v26  ;;  %v3045_v42 = vsel %vm6173_vm11, %v3040_v19, %v3044_v46  ;;  %v3325_v2 = vsel %vm6330_vm14, %v4752_v37, %v3324_v60  ;;  %v4753_v3 = vrot.slane %v3291_v48, 9  ;;  %v3331_v6 = vrot.slane %v6637_v58, 5 }
 0x113   : > { %5347 = vmatpush3.bf16.msra.mxu0 %v5581_v57  ;;  %v3062_v57 = vrot.slane %v3060_v34, 5  ;;  %v3055_v7 = vsel %vm6173_vm11, %v3050_v18, %v3054_v41  ;;  %v3073_v52 = vor.u32 %v3072_v21, %v3068_v4  ;;  %v4776_v31 = vcombine.low %v3325_v2, %v3328_v1  ;;  %v3297_v18 = vld [vmem:[#allocation2 + $0x6c] sm:$0xe] }
 0x114   : > { %5348 = vmatprep.subr.bf16.mxu0 %v5584_v17  ;;  %v4742_v36 = vcombine.low %v3045_v42, %v3055_v7  ;;  %v4754_v51 = vrot.slane %v3292_v30, 9  ;;  %v3332_v60 = vsel %vm6330_vm14, %v4753_v3, %v3331_v6  ;;  %v3333_v25 = vrot.slane %v3331_v6, 4 }
 0x115   : > { %v3063_v49 = vor.u32 %v3062_v57, %v3059_v16  ;;  %v3074_v53 = vrot.slane %v3073_v52, 4  ;;  %v3338_v9 = vrot.slane %v6653_v11, 5  ;;  %v3341_v58 = vrot.slane %v6655_v27, 5 }
 0x116   : > { %5301 = vmatmul.mubr.bf16.gmra.mxu0 %v5583_v62  ;;  %5332 = vmatprep.mubr.bf16.mxu1 %v4742_v36  ;;  %v4755_v8 = vrot.slane %v3293_v15, 9  ;;  %v3348_v27 = vrot.slane %v6669_v56, 5  ;;  %v4756_v41 = vrot.slane %v3294_v32, 9  ;;  %v3355_v26 = vrot.slane %v6686_v63, 5 }
 0x117   : > { %5349 = vmatpush3.bf16.msra.mxu0 %v5584_v17  ;;  %v3064_v23 = vrot.slane %v3063_v49, 4  ;;  %v3334_v17 = vrot.slane %v6641_v61, 5  ;;  %5352 = vmatprep.mubr.bf16.mxu0 %v4776_v31  ;;  %v3345_v61 = vrot.slane %v6661_v54, 5  ;;  %v3079_v12 = vsel %vm6173_vm11, %v3074_v53, %v3078_v45 }
 0x118   : > { %5350 = vmatprep.subr.bf16.mxu0 %v5585_v47  ;;  %v3339_v0 = vsel %vm6330_vm14, %v4754_v51, %v3338_v9  ;;  %v3340_v11 = vrot.slane %v3338_v9, 4  ;;  %v3352_v54 = vrot.slane %v6684_v14, 5  ;;  %v3359_v16 = vrot.slane %v6691_v50, 5  ;;  %v3296_v14 = vld [vmem:[#allocation2 + $0x60] sm:$0xe] }
 0x119   : > { %v3069_v22 = vsel %vm6173_vm11, %v3064_v23, %v3068_v4  ;;  %v3335_v13 = vsel %vm6330_vm14, %v3333_v25, %v3334_v17  ;;  %v3347_v46 = vrot.slane %v3345_v61, 4  ;;  %v3346_v34 = vsel %vm6330_vm14, %v4755_v8, %v3345_v61 }
 0x11a   : > { %v4743_v29 = vcombine.low %v3069_v22, %v3079_v12  ;;  %v4777_v62 = vcombine.low %v3332_v60, %v3335_v13  ;;  %v3342_v28 = vsel %vm6330_vm14, %v3340_v11, %v3341_v58  ;;  %v3354_v39 = vrot.slane %v3352_v54, 4 }
 0x11b   : > { %5351 = vmatpush3.bf16.msra.mxu0 %v5585_v47  ;;  %v4778_v10 = vcombine.low %v3339_v0, %v3342_v28  ;;  %v3349_v20 = vsel %vm6330_vm14, %v3347_v46, %v3348_v27  ;;  %v3353_v56 = vsel %vm6330_vm14, %v4756_v41, %v3352_v54  ;;  %v4757_v55 = vrot.slane %v3295_v40, 9  ;;  %v5587_v41 = vld [vmem:[%s7419_s5 + $0x30] sm:$0xff]  }
 0x11c   : > { %5333 = vmatmul.mubr.bf16.gmra.mxu1 %v4743_v29  ;;  %v3356_v43 = vsel %vm6330_vm14, %v3354_v39, %v3355_v26  ;;  %v3366_v63 = vrot.slane %v6716_v5, 5  ;;  %v4779_v44 = vcombine.low %v3346_v34, %v3349_v20  ;;  %v3361_v50 = vrot.slane %v3359_v16, 4  ;;  %v5586_v29 = vld [vmem:[%s7419_s5 + $0x38] sm:$0xff]   ;;  %v5588_v20 = vld [vmem:[%s7419_s5 + $0x28] sm:$0xff]  }
 0x11d   : > { %v3362_v47 = vrot.slane %v6698_v33, 5  ;;  %v4780_v48 = vcombine.low %v3353_v56, %v3356_v43  ;;  %v4758_v19 = vrot.slane %v3296_v14, 9  ;;  %v3369_v57 = vrot.slane %v6718_v24, 5  ;;  %5368 = vmatprep.subr.bf16.mxu1 %v5586_v29 }
 0x11e   : > { %5353 = vmatmul.mubr.bf16.vlgmr.msra.gmra.mxu0 %v4777_v62  ;;  %v3368_v37 = vrot.slane %v3366_v63, 4  ;;  %v3373_v1 = vrot.slane %v6726_v38, 5  ;;  %v3360_v4 = vsel %vm6330_vm14, %v4757_v55, %v3359_v16  ;;  %v4759_v30 = vrot.slane %v3297_v18, 9  ;;  %5369 = vmatpush3.bf16.msra.mxu1 %v5586_v29  ;;  %v5589_v55 = vld [vmem:[%s7419_s5 + $0x20] sm:$0xff]   ;;  %v5596_v29 = vld [vmem:[%s7418_s4 + $0x28] sm:$0xff]  }
 0x11f   : > { %5356 = vmatprep.mubr.bf16.mxu0 %v4778_v10  ;;  %v3363_v5 = vsel %vm6330_vm14, %v3361_v50, %v3362_v47  ;;  %v3367_v21 = vsel %vm6330_vm14, %v4758_v19, %v3366_v63  ;;  %v3376_v38 = vrot.slane %v6730_v59, 5  ;;  %5370 = vmatprep.subr.bf16.mxu1 %v5587_v41 }
 0x120   : > { %v3370_v33 = vsel %vm6330_vm14, %v3368_v37, %v3369_v57  ;;  %v4781_v45 = vcombine.low %v3360_v4, %v3363_v5  ;;  %v3375_v42 = vrot.slane %v3373_v1, 4  ;;  %v3374_v49 = vsel %vm6330_vm14, %v4759_v30, %v3373_v1  ;;  %v5590_v57 = vld [vmem:[%s7419_s5 + $0x18] sm:$0xff]  }
 0x121   : > { %v4782_v24 = vcombine.low %v3367_v21, %v3370_v33  ;;  %v5591_v33 = vld [vmem:[%s7419_s5 + $0x10] sm:$0xff]  }
 0x122   : > { %v3377_v2 = vsel %vm6330_vm14, %v3375_v42, %v3376_v38  ;;  %5371 = vmatpush3.bf16.msra.mxu1 %v5587_v41  ;;  %v5592_v42 = vld [vmem:[%s7418_s4 + $0x38] sm:$0xff]  }
 0x123   : > { %v4783_v3 = vcombine.low %v3374_v49, %v3377_v2  ;;  %5372 = vmatprep.subr.bf16.mxu1 %v5588_v20  ;;  %5400 = vmatprep.subr.bf16.mxu0 %v5592_v42 }
 0x124   : > { %5401 = vmatpush3.bf16.msra.mxu0 %v5592_v42 }
 0x126   : > { %5357 = vmatmul.mubr.bf16.gmra.mxu0 %v4779_v44  ;;  %5373 = vmatpush3.bf16.msra.mxu1 %v5588_v20 }
 0x127   : > { %5360 = vmatprep.mubr.bf16.mxu0 %v4780_v48  ;;  %5374 = vmatprep.subr.bf16.mxu1 %v5589_v55 }
 0x12a   : > { %5375 = vmatpush3.bf16.msra.mxu1 %v5589_v55 }
 0x12b   : > { %5376 = vmatprep.subr.bf16.mxu1 %v5590_v57 }
 0x12e   : > { %5361 = vmatmul.mubr.bf16.gmra.mxu0 %v4781_v45  ;;  %5377 = vmatpush3.bf16.msra.mxu1 %v5590_v57 }
 0x12f   : > { %5364 = vmatprep.mubr.bf16.mxu0 %v4782_v24  ;;  %5378 = vmatprep.subr.bf16.mxu1 %v5591_v33 }
 0x132   : > { %5379 = vmatpush3.bf16.msra.mxu1 %v5591_v33 }
 0x136   : > { %5365 = vmatmul.mubr.bf16.gmra.mxu0 %v4783_v3 }
 0x157   : > { %v5098_v7 = vpop.f32.mrf.mxu0 }
 0x158   : > { %v5130_v52 = vpop.f32.mrf.mxu1 }
 0x159   : > { %v6796_v31 = vadd.f32 %v5130_v52, %v5098_v7  ;;  %v1106_v6 = vpop.f32.mrf.mxu0  ;;  %v5593_v7 = vld [vmem:[%s7419_s5 + $0x8] sm:$0xff]  }
 0x15a   : > { %v1299_v15 = vpop.f32.mrf.mxu1  ;;  %5380 = vmatprep.subr.bf16.mxu1 %v5593_v7 }
 0x15b   : > { %v6798_v36 = vadd.f32 %v1299_v15, %v1106_v6  ;;  %v5099_v23 = vpop.f32.mrf.mxu0  ;;  %5381 = vmatpush3.bf16.msra.mxu1 %v5593_v7 }
 0x15c   : > { %v5131_v59 = vpop.f32.mrf.mxu1 }
 0x15d   : > { %v6800_v17 = vadd.f32 %v5131_v59, %v5099_v23  ;;  %v1109_v51 = vpop.f32.mrf.mxu0 }
 0x15e   : > { %v1302_v32 = vpop.f32.mrf.mxu1 }
 0x15f   : > { %v6802_v53 = vadd.f32 %v1302_v32, %v1109_v51  ;;  %v5102_v35 = vpop.f32.mrf.mxu0 }
 0x160   : > { %v5134_v60 = vpop.f32.mrf.mxu1 }
 0x161   : > { %v6804_v25 = vadd.f32 %v5134_v60, %v5102_v35  ;;  %v1122_v9 = vpop.f32.mrf.mxu0  ;;  %v6883_v35 = vld [vmem:[%s5858_s23] sm:$0xff]  ;;  %v6886_v60 = vld [vmem:[%s5858_s23 + $0x8] sm:$0xff] }
 0x162   : > { %v1315_v22 = vpop.f32.mrf.mxu1  ;;  %7455 = vst [vmem:[#allocation7_spill] sm:$0xff] %v6883_v35  ;;  %7456 = vst [vmem:[#allocation8_spill] sm:$0xff] %v6886_v60 }
 0x163   : > { %v6806_v58 = vadd.f32 %v1315_v22, %v1122_v9  ;;  %v5103_v8 = vpop.f32.mrf.mxu0  ;;  %v6889_v22 = vld [vmem:[%s5858_s23 + $0x18] sm:$0xff] }
 0x164   : > { %v5135_v61 = vpop.f32.mrf.mxu1  ;;  %7457 = vst [vmem:[#allocation9_spill] sm:$0xff] %v6889_v22 }
 0x165   : > { %v6808_v12 = vadd.f32 %v5135_v61, %v5103_v8  ;;  %v1125_v13 = vpop.f32.mrf.mxu0  ;;  %v3621_v8 = vrot.slane %v6886_v60, 4 }
 0x166   : > { %v1318_v0 = vpop.f32.mrf.mxu1 }
 0x167   : > { %v6810_v11 = vadd.f32 %v1318_v0, %v1125_v13  ;;  %v3623_v0 = vrot.slane %v6889_v22, 4 }
 0x168   : > { %v5138_v62 = vpop.f32.mrf.mxu1 }
 0x169   : > { %v5106_v46 = vpop.f32.mrf.mxu0 }
 0x16a   : > { %v1331_v28 = vpop.f32.mrf.mxu1  ;;  %v6815_v27 = vadd.f32 %v5138_v62, %v5106_v46 }
 0x16b   : > { %v1138_v54 = vpop.f32.mrf.mxu0 }
 0x16c   : > { %v5139_v10 = vpop.f32.mrf.mxu1  ;;  %v6820_v26 = vadd.f32 %v1331_v28, %v1138_v54 }
 0x16d   : > { %v5107_v40 = vpop.f32.mrf.mxu0 }
 0x16e   : > { %v1334_v16 = vpop.f32.mrf.mxu1  ;;  %v6822_v34 = vadd.f32 %v5139_v10, %v5107_v40 }
 0x16f   : > { %v1141_v39 = vpop.f32.mrf.mxu0 }
 0x170   : > { %v5142_v56 = vpop.f32.mrf.mxu1  ;;  %v6827_v14 = vadd.f32 %v1334_v16, %v1141_v39 }
 0x172   : > { %v1347_v43 = vpop.f32.mrf.mxu1 }
 0x173   : > { %v5110_v63 = vpop.f32.mrf.mxu0 }
 0x174   : > { %v5143_v44 = vpop.f32.mrf.mxu1  ;;  %v6832_v50 = vadd.f32 %v5142_v56, %v5110_v63 }
 0x175   : > { %v1154_v47 = vpop.f32.mrf.mxu0 }
 0x176   : > { %v6834_v48 = vadd.f32 %v1347_v43, %v1154_v47  ;;  %v1350_v19 = vpop.f32.mrf.mxu1  ;;  %v6919_v43 = vld [vmem:[%s5858_s23 + $0x20] sm:$0xff]  ;;  %v6927_v47 = vld [vmem:[%s5858_s23 + $0x30] sm:$0xff] }
 0x177   : > { %v5111_v37 = vpop.f32.mrf.mxu0  ;;  %7458 = vst [vmem:[#allocation10_spill] sm:$0xff] %v6919_v43  ;;  %v3624_v63 = vrot.slane %v6919_v43, 4  ;;  %7460 = vst [vmem:[#allocation12_spill] sm:$0xff] %v6927_v47 }
 0x178   : > { %v6839_v1 = vadd.f32 %v5143_v44, %v5111_v37  ;;  %v5194_v18 = vpop.f32.mrf.mxu1  ;;  %v5598_v37 = vld [vmem:[%s7418_s4 + $0x18] sm:$0xff]  }
 0x179   : > { %v1157_v4 = vpop.f32.mrf.mxu0 }
 0x17a   : > { %v6841_v5 = vadd.f32 %v1350_v19, %v1157_v4  ;;  %v6843_v21 = vpop.f32.mrf.mxu1  ;;  %v6930_v19 = vld [vmem:[%s5858_s23 + $0x38] sm:$0xff] }
 0x17b   : > { %v5162_v45 = vpop.f32.mrf.mxu0  ;;  %7461 = vst [vmem:[#allocation13_spill] sm:$0xff] %v6930_v19  ;;  %v3627_v4 = vrot.slane %v6930_v19, 4 }
 0x17c   : > { %v1641_v24 = vadd.f32 %v5162_v45, %v6796_v31  ;;  %v6849_v30 = vpop.f32.mrf.mxu1  ;;  %v6865_v31 = vld [vmem:[%s5858_s23 + $0x10] sm:$0xff] }
 0x17d   : > { %v1576_v38 = vpop.f32.mrf.mxu0  ;;  %7454 = vst [vmem:[#allocation6_spill] sm:$0xff] %v6865_v31  ;;  %v3622_v32 = vrot.slane %v6865_v31, 4 }
 0x17e   : > { %v6855_v49 = vadd.f32 %v1576_v38, %v6798_v36  ;;  %v6857_v2 = vadd.f32 %v5194_v18, %v1641_v24  ;;  %v6859_v3 = vpop.f32.mrf.mxu1  ;;  %v5594_v36 = vld [vmem:[%s7418_s4 + $0x30] sm:$0xff]   ;;  %v3626_v18 = vrot.slane %v6927_v47, 4 }
 0x17f   : > { %v5163_v52 = vpop.f32.mrf.mxu0  ;;  %5402 = vmatprep.subr.bf16.mxu0 %v5594_v36 }
 0x180   : > { %v6868_v6 = vadd.f32 %v5163_v52, %v6800_v17  ;;  %v5198_v15 = vpop.f32.mrf.mxu1  ;;  %v5595_v17 = vld [vmem:[%s7419_s5] sm:$0xff]   ;;  %5403 = vmatpush3.bf16.msra.mxu0 %v5594_v36 }
 0x181   : > { %v1579_v23 = vpop.f32.mrf.mxu0  ;;  %5382 = vmatprep.subr.bf16.mxu1 %v5595_v17  ;;  %5404 = vmatprep.subr.bf16.mxu0 %v5596_v29 }
 0x182   : > { %v6874_v59 = vadd.f32 %v1579_v23, %v6802_v53  ;;  %v6876_v51 = vpop.f32.mrf.mxu1  ;;  %v3620_v53 = vrot.slane %v6883_v35, 4  ;;  %5383 = vmatpush3.bf16.msra.mxu1 %v5595_v17  ;;  %v6959_v17 = vld [vmem:[%s5858_s23 + $0x40] sm:$0xff] }
 0x183   : > { %v5166_v9 = vpop.f32.mrf.mxu0  ;;  %5432 = vmatprep.subr.bf16.mxu1 %v5592_v42  ;;  %7462 = vst [vmem:[#allocation14_spill] sm:$0xff] %v6959_v17 }
 0x184   : > { %v1645_v61 = vadd.f32 %v5166_v9, %v6804_v25  ;;  %v6894_v13 = vpop.f32.mrf.mxu1  ;;  %v4793_v46 = vcombine.low %v3620_v53, %v3621_v8  ;;  %v4794_v25 = vcombine.low %v3622_v32, %v3623_v0  ;;  %5405 = vmatpush3.bf16.msra.mxu0 %v5596_v29  ;;  %v6962_v9 = vld [vmem:[%s5858_s23 + $0x48] sm:$0xff]  ;;  %v6965_v53 = vld [vmem:[%s5858_s23 + $0x50] sm:$0xff]  ;;  %v6968_v8 = vld [vmem:[%s5858_s23 + $0x58] sm:$0xff] }
 0x185   : > { %v1592_v62 = vpop.f32.mrf.mxu0  ;;  %7463 = vst [vmem:[#allocation15_spill] sm:$0xff] %v6962_v9  ;;  %7464 = vst [vmem:[#allocation16_spill] sm:$0xff] %v6965_v53  ;;  %v3629_v0 = vrot.slane %v6962_v9, 4 }
 0x186   : > { %v6901_v28 = vadd.f32 %v1592_v62, %v6806_v58  ;;  %v6903_v41 = vadd.f32 %v5198_v15, %v1645_v61  ;;  %v6905_v54 = vpop.f32.mrf.mxu1  ;;  %5384 = vmatprep.mubr.bf16.mxu1 %v4793_v46  ;;  %v5597_v58 = vld [vmem:[%s7418_s4 + $0x20] sm:$0xff]   ;;  %7465 = vst [vmem:[#allocation17_spill] sm:$0xff] %v6968_v8  ;;  %v3628_v61 = vrot.slane %v6959_v17, 4  ;;  %v5600_v62 = vld [vmem:[%s7418_s4 + $0x8] sm:$0xff]   ;;  %v3630_v46 = vrot.slane %v6965_v53, 4 }
 0x187   : > { %v5167_v10 = vpop.f32.mrf.mxu0  ;;  %5385 = vmatmul.mubr.bf16.vlgmr.msra.gmra.mxu1 %v4794_v25  ;;  %5406 = vmatprep.subr.bf16.mxu0 %v5597_v58  ;;  %v3631_v25 = vrot.slane %v6968_v8, 4 }
 0x188   : > { %v6908_v40 = vadd.f32 %v5167_v10, %v6808_v12  ;;  %v5202_v16 = vpop.f32.mrf.mxu1  ;;  %5440 = vmatpush3.bf16.msra.mxu1 %v5592_v42  ;;  %v6922_v12 = vld [vmem:[%s5858_s23 + $0x28] sm:$0xff]  ;;  %5407 = vmatpush3.bf16.msra.mxu0 %v5597_v58 }
 0x189   : > { %v1595_v20 = vpop.f32.mrf.mxu0  ;;  %7459 = vst [vmem:[#allocation11_spill] sm:$0xff] %v6922_v12  ;;  %5433 = vmatprep.subr.bf16.mxu1 %v5594_v36  ;;  %v3625_v44 = vrot.slane %v6922_v12, 4  ;;  %5408 = vmatprep.subr.bf16.mxu0 %v5598_v37 }
 0x18a   : > { %v6914_v39 = vadd.f32 %v1595_v20, %v6810_v11  ;;  %v6916_v56 = vpop.f32.mrf.mxu1 }
 0x18b   : > { %v5170_v55 = vpop.f32.mrf.mxu0  ;;  %v4795_v45 = vcombine.low %v3624_v63, %v3625_v44 }
 0x18c   : > { %v1649_v11 = vadd.f32 %v5170_v55, %v6815_v27  ;;  %v6933_v57 = vpop.f32.mrf.mxu1  ;;  %5441 = vmatpush3.bf16.msra.mxu1 %v5594_v36  ;;  %v4796_v27 = vcombine.low %v3626_v18, %v3627_v4  ;;  %5409 = vmatpush3.bf16.msra.mxu0 %v5598_v37 }
 0x18d   : > { %v1608_v33 = vpop.f32.mrf.mxu0  ;;  %5434 = vmatprep.subr.bf16.mxu1 %v5596_v29  ;;  %5388 = vmatprep.mubr.bf16.mxu1 %v4795_v45  ;;  %v7001_v45 = vld [vmem:[%s5858_s23 + $0x60] sm:$0xff] }
 0x18e   : > { %v6941_v24 = vadd.f32 %v1608_v33, %v6820_v26  ;;  %v6943_v42 = vadd.f32 %v5202_v16, %v1649_v11  ;;  %v6945_v38 = vpop.f32.mrf.mxu1  ;;  %v5599_v26 = vld [vmem:[%s7418_s4 + $0x10] sm:$0xff]   ;;  %v4797_v16 = vcombine.low %v3628_v61, %v3629_v0  ;;  %7466 = vst [vmem:[#allocation18_spill] sm:$0xff] %v7001_v45 }
 0x18f   : > { %v5171_v7 = vpop.f32.mrf.mxu0  ;;  %5389 = vmatmul.mubr.bf16.gmra.mxu1 %v4796_v27  ;;  %5410 = vmatprep.subr.bf16.mxu0 %v5599_v26 }
 0x190   : > { %v6948_v52 = vadd.f32 %v5171_v7, %v6822_v34  ;;  %v5206_v15 = vpop.f32.mrf.mxu1  ;;  %5442 = vmatpush3.bf16.msra.mxu1 %v5596_v29  ;;  %5411 = vmatpush3.bf16.msra.mxu0 %v5599_v26  ;;  %v3632_v7 = vrot.slane %v7001_v45, 4 }
 0x191   : > { %v1611_v36 = vpop.f32.mrf.mxu0  ;;  %5435 = vmatprep.subr.bf16.mxu1 %v5597_v58  ;;  %5412 = vmatprep.subr.bf16.mxu0 %v5600_v62 }
 0x192   : > { %v6954_v23 = vadd.f32 %v1611_v36, %v6827_v14  ;;  %v6956_v32 = vpop.f32.mrf.mxu1  ;;  %5392 = vmatprep.mubr.bf16.mxu1 %v4797_v16  ;;  %v7009_v36 = vld [vmem:[%s5858_s23 + $0x70] sm:$0xff] }
 0x193   : > { %v5174_v34 = vpop.f32.mrf.mxu0  ;;  %7468 = vst [vmem:[#allocation20_spill] sm:$0xff] %v7009_v36  ;;  %v3634_v61 = vrot.slane %v7009_v36, 4 }
 0x194   : > { %v1653_v14 = vadd.f32 %v5174_v34, %v6832_v50  ;;  %v6973_v29 = vpop.f32.mrf.mxu1  ;;  %5443 = vmatpush3.bf16.msra.mxu1 %v5597_v58  ;;  %v4798_v50 = vcombine.low %v3630_v46, %v3631_v25  ;;  %5413 = vmatpush3.bf16.msra.mxu0 %v5600_v62 }
 0x195   : > { %v1624_v10 = vpop.f32.mrf.mxu0  ;;  %5436 = vmatprep.subr.bf16.mxu1 %v5598_v37 }
 0x196   : > { %v6981_v20 = vadd.f32 %v1624_v10, %v6834_v48  ;;  %v6983_v55 = vadd.f32 %v5206_v15, %v1653_v14  ;;  %v6985_v63 = vpop.f32.mrf.mxu1  ;;  %v5601_v48 = vld [vmem:[%s7418_s4] sm:$0xff]  }
 0x197   : > { %v5175_v44 = vpop.f32.mrf.mxu0  ;;  %5393 = vmatmul.mubr.bf16.gmra.mxu1 %v4798_v50  ;;  %5414 = vmatprep.subr.bf16.mxu0 %v5601_v48 }
 0x198   : > { %v6988_v11 = vadd.f32 %v5175_v44, %v6839_v1  ;;  %v6990_v58 = vpop.f32.mrf.mxu1  ;;  %5444 = vmatpush3.bf16.msra.mxu1 %v5598_v37  ;;  %v7004_v1 = vld [vmem:[%s5858_s23 + $0x68] sm:$0xff]  ;;  %5415 = vmatpush3.bf16.msra.mxu0 %v5601_v48  ;;  %v7012_v37 = vld [vmem:[%s5858_s23 + $0x78] sm:$0xff] }
 0x199   : > { %v1627_v18 = vpop.f32.mrf.mxu0  ;;  %7467 = vst [vmem:[#allocation19_spill] sm:$0xff] %v7004_v1  ;;  %5437 = vmatprep.subr.bf16.mxu1 %v5599_v26  ;;  %v3633_v15 = vrot.slane %v7004_v1, 4  ;;  %7469 = vst [vmem:[#allocation21_spill] sm:$0xff] %v7012_v37  ;;  %v3635_v46 = vrot.slane %v7012_v37, 4 }
 0x19a   : > { %v6996_v4 = vadd.f32 %v1627_v18, %v6841_v5  ;;  %v6998_v33 = vpop.f32.mrf.mxu1 }
 0x19b   : > { %v5226_v27 = vpop.f32.mrf.mxu0  ;;  %v4799_v14 = vcombine.low %v3632_v7, %v3633_v15  ;;  %v4800_v10 = vcombine.low %v3634_v61, %v3635_v46 }
 0x19c   : > { %v7015_v5 = vadd.f32 %v5226_v27, %v6857_v2  ;;  %v7017_v34 = vpop.f32.mrf.mxu1  ;;  %5445 = vmatpush3.bf16.msra.mxu1 %v5599_v26 }
 0x19d   : > { %v2244_v0 = vpop.f32.mrf.mxu0  ;;  %5438 = vmatprep.subr.bf16.mxu1 %v5600_v62  ;;  %5396 = vmatprep.mubr.bf16.mxu1 %v4799_v14 }
 0x19e   : > { %v7021_v16 = vpop.f32.mrf.mxu1 }
 0x19f   : > { %v5227_v25 = vpop.f32.mrf.mxu0  ;;  %5397 = vmatmul.mubr.bf16.gmra.mxu1 %v4800_v10 }
 0x1a0   : > { %5446 = vmatpush3.bf16.msra.mxu1 %v5600_v62  ;;  %v7028_v18 = vpop.f32.mrf.mxu1 }
 0x1a1   : > { %v7023_v50 = vpop.f32.mrf.mxu0  ;;  %5439 = vmatprep.subr.bf16.mxu1 %v5601_v48 }
 0x1a2   : > { %v7032_v26 = vpop.f32.mrf.mxu1 }
 0x1a3   : > { %v5230_v2 = vpop.f32.mrf.mxu0 }
 0x1a4   : > { %v7026_v44 = vadd.f32 %v5230_v2, %v6903_v41  ;;  %5447 = vmatpush3.bf16.msra.mxu1 %v5601_v48  ;;  %v7036_v15 = vpop.f32.mrf.mxu1 }
 0x1a5   : > { %v7030_v27 = vpop.f32.mrf.mxu0 }
 0x1a6   : > { %v7040_v14 = vpop.f32.mrf.mxu1 }
 0x1a7   : > { %v7034_v7 = vpop.f32.mrf.mxu0 }
 0x1a9   : > { %v7038_v61 = vpop.f32.mrf.mxu0 }
 0x1ab   : > { %v5234_v62 = vpop.f32.mrf.mxu0  ;;  %v7045_v41 = vpop.f32.mrf.mxu1 }
 0x1ac   : > { %v7043_v46 = vadd.f32 %v5234_v62, %v6943_v42 }
 0x1ad   : > { %v7047_v10 = vpop.f32.mrf.mxu0  ;;  %v7049_v2 = vpop.f32.mrf.mxu1 }
 0x1ae   : > { %7470 = vst [vmem:[#allocation22_spill] sm:$0xff] %v7049_v2 }
 0x1af   : > { %v7051_v1 = vpop.f32.mrf.mxu0  ;;  %v7053_v48 = vpop.f32.mrf.mxu1 }
 0x1b0   : > { %7471 = vst [vmem:[#allocation23_spill] sm:$0xff] %v7053_v48  ;;  %v1881_v48 = vadd.f32 %v6843_v21, %v6855_v49 }
 0x1b1   : > { %v7055_v37 = vpop.f32.mrf.mxu0  ;;  %v7057_v45 = vpop.f32.mrf.mxu1 }
 0x1b2   : > { %7472 = vst [vmem:[#allocation24_spill] sm:$0xff] %v7057_v45 }
 0x1b4   : > { %v7059_v9 = vpop.f32.mrf.mxu1 }
 0x1b5   : > { %7473 = vst [vmem:[#allocation25_spill] sm:$0xff] %v7059_v9 }
 0x1b6   : > { %v5238_v36 = vpop.f32.mrf.mxu0  ;;  %v7066_v8 = vpop.f32.mrf.mxu1 }
 0x1b7   : > { %v7062_v42 = vadd.f32 %v5238_v36, %v6983_v55  ;;  %7476 = vst [vmem:[#allocation28_spill] sm:$0xff] %v7066_v8 }
 0x1b8   : > { %v7064_v62 = vpop.f32.mrf.mxu0  ;;  %v7070_v53 = vpop.f32.mrf.mxu1 }
 0x1b9   : > { %7474 = vst [vmem:[#allocation26_spill] sm:$0xff] %v7062_v42  ;;  %7475 = vst [vmem:[#allocation27_spill] sm:$0xff] %v7064_v62 }
 0x1ba   : > { %v7068_v17 = vpop.f32.mrf.mxu0  ;;  %7478 = vst [vmem:[#allocation30_spill] sm:$0xff] %v7070_v53  ;;  %v7074_v19 = vpop.f32.mrf.mxu1 }
 0x1bb   : > { %7477 = vst [vmem:[#allocation29_spill] sm:$0xff] %v7068_v17  ;;  %7480 = vst [vmem:[#allocation32_spill] sm:$0xff] %v7074_v19 }
 0x1bc   : > { %v7072_v12 = vpop.f32.mrf.mxu0 }
 0x1bd   : > { %7479 = vst [vmem:[#allocation31_spill] sm:$0xff] %v7072_v12 }
 0x1be   : > { %v5290_v43 = vpop.f32.mrf.mxu0 }
 0x1c0   : > { %v2785_v47 = vpop.f32.mrf.mxu0  ;;  %v5322_v60 = vpop.f32.mrf.mxu1 }
 0x1c2   : > { %v5291_v22 = vpop.f32.mrf.mxu0  ;;  %v3211_v35 = vpop.f32.mrf.mxu1 }
 0x1c4   : > { %v2788_v31 = vpop.f32.mrf.mxu0  ;;  %v5323_v55 = vpop.f32.mrf.mxu1 }
 0x1c6   : > { %v5294_v36 = vpop.f32.mrf.mxu0  ;;  %v7076_v42 = vpop.f32.mrf.mxu1 }
 0x1c7   : > { %7481 = vst [vmem:[#allocation33_spill] sm:$0xff] %v7076_v42 }
 0x1c8   : > { %v2801_v9 = vpop.f32.mrf.mxu0 }
 0x1c9   : > { %v7082_v53 = vpop.f32.mrf.mxu1 }
 0x1ca   : > { %v7078_v8 = vpop.f32.mrf.mxu0  ;;  %7484 = vst [vmem:[#allocation36_spill] sm:$0xff] %v7082_v53 }
 0x1cb   : > { %7482 = vst [vmem:[#allocation34_spill] sm:$0xff] %v7078_v8  ;;  %v7088_v62 = vpop.f32.mrf.mxu1  ;;  %v2307_v8 = vadd.f32 %v2244_v0, %v1881_v48 }
 0x1cc   : > { %v7080_v17 = vpop.f32.mrf.mxu0  ;;  %7487 = vst [vmem:[#allocation39_spill] sm:$0xff] %v7088_v62 }
 0x1cd   : > { %7483 = vst [vmem:[#allocation35_spill] sm:$0xff] %v7080_v17  ;;  %v7096_v42 = vpop.f32.mrf.mxu1  ;;  %v1884_v17 = vadd.f32 %v6849_v30, %v6868_v6  ;;  %v2605_v49 = vadd.f32 %v6998_v33, %v2307_v8  ;;  %v1885_v30 = vadd.f32 %v6876_v51, %v6901_v28 }
 0x1ce   : > { %v7084_v12 = vpop.f32.mrf.mxu0  ;;  %7490 = vst [vmem:[#allocation42_spill] sm:$0xff] %v7096_v42 }
 0x1cf   : > { %7485 = vst [vmem:[#allocation37_spill] sm:$0xff] %v7084_v12  ;;  %v2310_v12 = vadd.f32 %v5227_v25, %v1884_v17  ;;  %v7108_v21 = vpop.f32.mrf.mxu1  ;;  %v1888_v17 = vadd.f32 %v6894_v13, %v6908_v40  ;;  %v2311_v51 = vadd.f32 %v7030_v27, %v1885_v30  ;;  %v1890_v13 = vadd.f32 %v6945_v38, %v6954_v23  ;;  %v7491_v27 = vld [vmem:[#allocation22_spill] sm:$0xff] }
 0x1d0   : > { %v7086_v19 = vpop.f32.mrf.mxu0  ;;  %v1893_v40 = vadd.f32 %v6956_v32, %v6981_v20 }
 0x1d1   : > { %7486 = vst [vmem:[#allocation38_spill] sm:$0xff] %v7086_v19  ;;  %v2607_v19 = vadd.f32 %v6990_v58, %v7015_v5  ;;  %v2608_v58 = vadd.f32 %v7017_v34, %v2310_v12  ;;  %v2848_v5 = vadd.f32 %v2785_v47, %v2605_v49  ;;  %v2609_v23 = vadd.f32 %v7032_v26, %v2311_v51  ;;  %v7495_v48 = vld [vmem:[#allocation36_spill] sm:$0xff] }
 0x1d2   : > { %v7090_v45 = vpop.f32.mrf.mxu0  ;;  %v7128_v28 = vpop.f32.mrf.mxu1  ;;  %v2316_v25 = vadd.f32 %v7055_v37, %v1890_v13  ;;  %v7496_v49 = vld [vmem:[#allocation24_spill] sm:$0xff] }
 0x1d3   : > { %7488 = vst [vmem:[#allocation40_spill] sm:$0xff] %v7090_v45  ;;  %v1882_v45 = vadd.f32 %v6859_v3, %v6874_v59  ;;  %v1886_v3 = vadd.f32 %v6905_v54, %v6914_v39  ;;  %v1889_v59 = vadd.f32 %v6916_v56, %v6941_v24  ;;  %v2851_v47 = vadd.f32 %v5291_v22, %v2608_v58  ;;  %v7144_v24 = vld [vmem:[%s7417_s3] ss:$0 sm:$0xff] }
 0x1d4   : > { %v7094_v2 = vpop.f32.mrf.mxu0  ;;  %v7136_v54 = vadd.f32 %v6973_v29, %v6988_v11  ;;  %v2314_v56 = vadd.f32 %v7034_v7, %v1888_v17  ;;  %v2611_v22 = vadd.f32 %v7028_v18, %v7026_v44  ;;  %v3274_v38 = vadd.f32 %v3211_v35, %v2848_v5  ;;  %v7155_v20 = vpop.f32.mrf.mxu1  ;;  %v7492_v7 = vld [vmem:[#allocation23_spill] sm:$0xff] }
 0x1d5   : > { %7489 = vst [vmem:[#allocation41_spill] sm:$0xff] %v7094_v2  ;;  %v2850_v2 = vadd.f32 %v5290_v43, %v2607_v19  ;;  %v2308_v6 = vadd.f32 %v7023_v50, %v1882_v45  ;;  %v1892_v43 = vadd.f32 %v6933_v57, %v6948_v52  ;;  %v2312_v19 = vadd.f32 %v7038_v61, %v1886_v3  ;;  %v7498_v58 = vld [vmem:[#allocation35_spill] sm:$0xff] }
 0x1d6   : > { %v7100_v53 = vpop.f32.mrf.mxu0  ;;  %v2315_v32 = vadd.f32 %v7047_v10, %v1889_v59  ;;  %v3277_v33 = vadd.f32 %v5323_v55, %v2851_v47  ;;  %v2854_v45 = vadd.f32 %v5294_v36, %v2611_v22  ;;  %v2612_v34 = vadd.f32 %v7036_v15, %v2314_v56  ;;  %v7493_v15 = vld [vmem:[#allocation33_spill] sm:$0xff]  ;;  %v5331_v37 = vpop.f32.mrf.mxu1 }
 0x1d7   : > { %v3276_v12 = vadd.f32 %v5322_v60, %v2850_v2  ;;  %v2606_v39 = vadd.f32 %v7021_v16, %v2308_v6  ;;  %v7148_v60 = vadd.f32 %v6985_v63, %v6996_v4  ;;  %v2318_v8 = vadd.f32 %v7051_v1, %v1892_v43  ;;  %v7497_v6 = vld [vmem:[#allocation39_spill] sm:$0xff]  ;;  %v7501_v56 = vld [vmem:[#allocation25_spill] sm:$0xff] }
 0x1d8   : > { %v7104_v62 = vpop.f32.mrf.mxu0  ;;  %v2610_v35 = vadd.f32 %v7040_v14, %v2312_v19  ;;  %v2852_v16 = vadd.f32 %v2801_v9, %v2609_v23  ;;  %v2613_v26 = vadd.f32 %v7491_v27, %v2315_v32  ;;  %v7494_v14 = vld [vmem:[#allocation34_spill] sm:$0xff]  ;;  %v3280_v55 = vadd.f32 %v7495_v48, %v2854_v45  ;;  %v7506_v27 = vld [vmem:[#allocation28_spill] sm:$0xff] }
 0x1d9   : > { %v2849_v29 = vadd.f32 %v2788_v31, %v2606_v39  ;;  %v2615_v31 = vadd.f32 %v7045_v41, %v7043_v46  ;;  %v2616_v61 = vadd.f32 %v7492_v7, %v2318_v8  ;;  %v2855_v2 = vadd.f32 %v7494_v14, %v2612_v34  ;;  %v7500_v39 = vld [vmem:[#allocation26_spill] sm:$0xff] }
 0x1da   : > { %v7111_v42 = vpop.f32.mrf.mxu0  ;;  %v2614_v30 = vadd.f32 %v7496_v49, %v2316_v25  ;;  %v3278_v17 = vadd.f32 %v7497_v6, %v2852_v16  ;;  %v2853_v5 = vadd.f32 %v7498_v58, %v2610_v35  ;;  %v2619_v19 = vadd.f32 %v7501_v56, %v7500_v39  ;;  %v7504_v45 = vld [vmem:[#allocation38_spill] sm:$0xff] }
 0x1db   : > { %v3275_v10 = vadd.f32 %v7493_v15, %v2849_v29  ;;  %v7509_v58 = vld [vmem:[#allocation30_spill] sm:$0xff] }
 0x1dc   : > { %v7119_v0 = vpop.f32.mrf.mxu0  ;;  %v2862_v56 = vadd.f32 %v7100_v53, %v2619_v19 }
 0x1de   : > { %v5354_v57 = vpop.f32.mrf.mxu0 }
 0x1df   : > { %v3574_v52 = vadd.f32 %v5354_v57, %v3276_v12  ;;  %v7499_v12 = vld [vmem:[#allocation27_spill] sm:$0xff]  ;;  %v7502_v57 = vld [vmem:[#allocation42_spill] sm:$0xff] }
 0x1e0   : > { %v3509_v11 = vpop.f32.mrf.mxu0  ;;  %v2319_v47 = vadd.f32 %v7499_v12, %v1893_v40  ;;  %v3281_v22 = vadd.f32 %v7502_v57, %v2855_v2  ;;  %v3279_v40 = vadd.f32 %v7108_v21, %v2853_v5 }
 0x1e1   : > { %v7158_v63 = vadd.f32 %v7144_v24, %v3574_v52  ;;  %v3572_v4 = vadd.f32 %v3509_v11, %v3274_v38  ;;  %v3246_v38 = vpop.f32.mrf.mxu1  ;;  %v7503_v11 = vld [vmem:[#allocation37_spill] sm:$0xff] }
 0x1e2   : > { %v5355_v50 = vpop.f32.mrf.mxu0  ;;  %v2617_v7 = vadd.f32 %v7506_v27, %v2319_v47  ;;  %v7511_v47 = vld [vmem:[#allocation32_spill] sm:$0xff] }
 0x1e3   : > { %v3661_v1 = vsub.f32 0.0, %v7158_v63  ;;  %v7167_v44 = vadd.f32 %v7144_v24, %v3572_v4  ;;  %v3575_v18 = vadd.f32 %v5355_v50, %v3277_v33  ;;  %v2858_v33 = vadd.f32 %v7503_v11, %v2615_v31  ;;  %v7507_v31 = vld [vmem:[#allocation40_spill] sm:$0xff]  ;;  %v5334_v21 = vpop.f32.mrf.mxu1 }
 0x1e4   : > { %v3512_v9 = vpop.f32.mrf.mxu0  ;;  %v2856_v4 = vadd.f32 %v7504_v45, %v2613_v26  ;;  %v2859_v15 = vadd.f32 %v7507_v31, %v2616_v61  ;;  %v2860_v57 = vadd.f32 %v7104_v62, %v2617_v7 }
 0x1e5   : > { %v3679_v36 = vmul.f32 1.442695, %v3661_v1  ;;  %v3659_v46 = vsub.f32 0.0, %v7167_v44  ;;  %v7176_v41 = vadd.f32 %v7144_v24, %v3575_v18  ;;  %v3573_v3 = vadd.f32 %v3512_v9, %v3275_v10  ;;  %v7505_v1 = vld [vmem:[#allocation29_spill] sm:$0xff] }
 0x1e6   : > { %v5358_v59 = vpop.f32.mrf.mxu0  ;;  %v2322_v18 = vadd.f32 %v7505_v1, %v7136_v54  ;;  %v3282_v54 = vadd.f32 %v7155_v20, %v2856_v4 }
 0x1e7   : > { %5602 = vpow2.f32 %v3679_v36  ;;  %v3675_v43 = vmul.f32 1.442695, %v3659_v46  ;;  %v3662_v51 = vsub.f32 0.0, %v7176_v41  ;;  %v3578_v13 = vadd.f32 %v5358_v59, %v3280_v55  ;;  %v7508_v55 = vld [vmem:[#allocation31_spill] sm:$0xff] }
 0x1e8   : > { %v7187_v52 = vadd.f32 %v7144_v24, %v3573_v3  ;;  %v3525_v23 = vpop.f32.mrf.mxu0  ;;  %v2320_v36 = vadd.f32 %v7508_v55, %v7148_v60  ;;  %v3284_v46 = vadd.f32 %v7128_v28, %v2858_v33  ;;  %v2620_v5 = vadd.f32 %v7509_v58, %v2322_v18  ;;  %v7510_v3 = vld [vmem:[#allocation41_spill] sm:$0xff] }
 0x1e9   : > { %5604 = vpow2.f32 %v3675_v43  ;;  %v3681_v32 = vmul.f32 1.442695, %v3662_v51  ;;  %v7190_v8 = vadd.f32 %v7144_v24, %v3578_v13  ;;  %v3576_v29 = vadd.f32 %v3525_v23, %v3278_v17  ;;  %v3259_v51 = vpop.f32.mrf.mxu1 }
 0x1ea   : > { %v3660_v34 = vsub.f32 0.0, %v7187_v52  ;;  %v5359_v35 = vpop.f32.mrf.mxu0  ;;  %v2857_v59 = vadd.f32 %v7510_v3, %v2614_v30  ;;  %v3285_v43 = vadd.f32 %v5331_v37, %v2859_v15  ;;  %v2618_v39 = vadd.f32 %v7511_v47, %v2320_v36 }
 0x1eb   : > { %5606 = vpow2.f32 %v3681_v32  ;;  %v3665_v25 = vsub.f32 0.0, %v7190_v8  ;;  %v7198_v16 = vadd.f32 %v7144_v24, %v3576_v29  ;;  %v3579_v50 = vadd.f32 %v5359_v35, %v3281_v22  ;;  %v5335_v45 = vpop.f32.mrf.mxu1 }
 0x1ec   : > { %v3677_v10 = vmul.f32 1.442695, %v3660_v34  ;;  %v3528_v26 = vpop.f32.mrf.mxu0  ;;  %v3283_v11 = vadd.f32 %v3246_v38, %v2857_v59  ;;  %v2863_v33 = vadd.f32 %v7111_v42, %v2620_v5 }
 0x1ed   : > { %v3687_v14 = vmul.f32 1.442695, %v3665_v25  ;;  %v3663_v2 = vsub.f32 0.0, %v7198_v16  ;;  %v7206_v9 = vadd.f32 %v7144_v24, %v3579_v50  ;;  %v3577_v48 = vadd.f32 %v3528_v26, %v3279_v40  ;;  %v3262_v15 = vpop.f32.mrf.mxu1 }
 0x1ee   : > { %5608 = vpow2.f32 %v3677_v10  ;;  %v5362_v49 = vpop.f32.mrf.mxu0  ;;  %v2861_v40 = vadd.f32 %v7119_v0, %v2618_v39  ;;  %v3288_v25 = vadd.f32 %v5334_v21, %v2862_v56  ;;  %v3286_v50 = vadd.f32 %v3259_v51, %v2860_v57 }
 0x1ef   : > { %5610 = vpow2.f32 %v3687_v14  ;;  %v3683_v61 = vmul.f32 1.442695, %v3663_v2  ;;  %v3666_v6 = vsub.f32 0.0, %v7206_v9  ;;  %v7214_v17 = vadd.f32 %v7144_v24, %v3577_v48 }
 0x1f0   : > { %v3582_v60 = vadd.f32 %v5362_v49, %v3284_v46  ;;  %v3541_v13 = vpop.f32.mrf.mxu0  ;;  %v3289_v31 = vadd.f32 %v5335_v45, %v2863_v33  ;;  %v3287_v49 = vadd.f32 %v3262_v15, %v2861_v40  ;;  %v7512_v33 = vld [vmem:[#allocation6_spill] sm:$0xff] }
 0x1f1   : > { %5612 = vpow2.f32 %v3683_v61  ;;  %v3689_v28 = vmul.f32 1.442695, %v3666_v6  ;;  %v3664_v20 = vsub.f32 0.0, %v7214_v17  ;;  %v3580_v12 = vadd.f32 %v3541_v13, %v3282_v54 }
 0x1f2   : > { %v7223_v22 = vadd.f32 %v7144_v24, %v3582_v60  ;;  %v5363_v23 = vpop.f32.mrf.mxu0  ;;  %v3757_v40 = vunpack.c.l.bf16 %v7512_v33 }
 0x1f3   : > { %5614 = vpow2.f32 %v3689_v28  ;;  %v3685_v37 = vmul.f32 1.442695, %v3664_v20  ;;  %v7226_v30 = vadd.f32 %v7144_v24, %v3580_v12  ;;  %v3583_v32 = vadd.f32 %v5363_v23, %v3285_v43 }
 0x1f4   : > { %v5603_v29 = vpop.eup %5602  ;;  %v3669_v53 = vsub.f32 0.0, %v7223_v22  ;;  %v3544_v62 = vpop.f32.mrf.mxu0 }
 0x1f5   : > { %v3709_v19 = vadd.f32 1.0, %v5603_v29  ;;  %5616 = vpow2.f32 %v3685_v37  ;;  %v3667_v4 = vsub.f32 0.0, %v7226_v30  ;;  %v7233_v34 = vadd.f32 %v7144_v24, %v3583_v32 }
 0x1f6   : > { %v5605_v35 = vpop.eup %5604  ;;  %v3695_v1 = vmul.f32 1.442695, %v3669_v53  ;;  %v3581_v38 = vadd.f32 %v3544_v62, %v3283_v11  ;;  %v5366_v18 = vpop.f32.mrf.mxu0 }
 0x1f7   : > { %5618 = vrcp.f32 %v3709_v19  ;;  %v3707_v42 = vadd.f32 1.0, %v5605_v35  ;;  %v3691_v0 = vmul.f32 1.442695, %v3667_v4  ;;  %v3670_v27 = vsub.f32 0.0, %v7233_v34 }
 0x1f8   : > { %v5607_v7 = vpop.eup %5606  ;;  %5620 = vpow2.f32 %v3695_v1  ;;  %v7237_v10 = vadd.f32 %v7144_v24, %v3581_v38  ;;  %v3586_v26 = vadd.f32 %v5366_v18, %v3288_v25  ;;  %v3557_v14 = vpop.f32.mrf.mxu0 }
 0x1f9   : > { %5622 = vrcp.f32 %v3707_v42  ;;  %v3710_v21 = vadd.f32 1.0, %v5607_v7  ;;  %v3697_v2 = vmul.f32 1.442695, %v3670_v27  ;;  %v3584_v48 = vadd.f32 %v3557_v14, %v3286_v50  ;;  %v7514_v42 = vld [vmem:[#allocation9_spill] sm:$0xff]  ;;  %v7515_v14 = vld [vmem:[#allocation8_spill] sm:$0xff] }
 0x1fa   : > { %5624 = vpow2.f32 %v3691_v0  ;;  %v3668_v55 = vsub.f32 0.0, %v7237_v10  ;;  %v7241_v36 = vadd.f32 %v7144_v24, %v3586_v26  ;;  %v5367_v46 = vpop.f32.mrf.mxu0  ;;  %v3758_v0 = vunpack.c.l.bf16 %v7514_v42 }
 0x1fb   : > { %v5609_v54 = vpop.eup %5608  ;;  %5626 = vrcp.f32 %v3710_v21  ;;  %v7244_v61 = vadd.f32 %v7144_v24, %v3584_v48  ;;  %v3587_v6 = vadd.f32 %v5367_v46, %v3289_v31  ;;  %v3756_v21 = vunpack.c.l.bf16 %v7515_v14 }
 0x1fc   : > { %v5611_v58 = vpop.eup %5610  ;;  %v3708_v5 = vadd.f32 1.0, %v5609_v54  ;;  %5628 = vpow2.f32 %v3697_v2  ;;  %v3693_v3 = vmul.f32 1.442695, %v3668_v55  ;;  %v3673_v59 = vsub.f32 0.0, %v7241_v36  ;;  %v3560_v43 = vpop.f32.mrf.mxu0  ;;  %v7516_v55 = vld [vmem:[#allocation12_spill] sm:$0xff] }
 0x1fd   : > { %v3713_v51 = vadd.f32 1.0, %v5611_v58  ;;  %v3671_v60 = vsub.f32 0.0, %v7244_v61  ;;  %v7249_v13 = vadd.f32 %v7144_v24, %v3587_v6  ;;  %v3585_v28 = vadd.f32 %v3560_v43, %v3287_v49 }
 0x1fe   : > { %v5613_v20 = vpop.eup %5612  ;;  %5630 = vrcp.f32 %v3708_v5  ;;  %v3703_v12 = vmul.f32 1.442695, %v3673_v59  ;;  %v3761_v46 = vunpack.c.l.bf16 %v7516_v55  ;;  %v7517_v5 = vld [vmem:[#allocation10_spill] sm:$0xff] }
 0x1ff   : > { %5632 = vrcp.f32 %v3713_v51  ;;  %v3711_v47 = vadd.f32 1.0, %v5613_v20  ;;  %v3674_v39 = vsub.f32 0.0, %v7249_v13  ;;  %v3699_v57 = vmul.f32 1.442695, %v3671_v60 }
 0x200   : > { %v5615_v56 = vpop.eup %5614  ;;  %5634 = vpow2.f32 %v3693_v3  ;;  %v7253_v23 = vadd.f32 %v7144_v24, %v3585_v28  ;;  %v7513_v24 = vld [vmem:[#allocation7_spill] sm:$0xff]  ;;  %v3759_v3 = vunpack.c.l.bf16 %v7517_v5  ;;  %v7518_v28 = vld [vmem:[#allocation13_spill] sm:$0xff] }
 0x201   : > { %5636 = vrcp.f32 %v3711_v47  ;;  %v3714_v37 = vadd.f32 1.0, %v5615_v56  ;;  %v3705_v29 = vmul.f32 1.442695, %v3674_v39  ;;  %v3755_v35 = vunpack.c.l.bf16 %v7513_v24  ;;  %v7526_v5 = vld [vmem:[#allocation21_spill] sm:$0xff] }
 0x202   : > { %v5617_v32 = vpop.eup %5616  ;;  %5638 = vpow2.f32 %v3703_v12  ;;  %v3672_v11 = vsub.f32 0.0, %v7253_v23  ;;  %v3762_v20 = vunpack.c.l.bf16 %v7518_v28 }
 0x203   : > { %5640 = vrcp.f32 %v3714_v37  ;;  %v3712_v45 = vadd.f32 1.0, %v5617_v32  ;;  %v7519_v37 = vld [vmem:[#allocation11_spill] sm:$0xff] }
 0x204   : > { %v5619_v53 = vpop.eup %5618  ;;  %5642 = vpow2.f32 %v3699_v57  ;;  %v3701_v62 = vmul.f32 1.442695, %v3672_v11 }
 0x205   : > { %v5621_v19 = vpop.eup %5620  ;;  %v3741_v4 = vmul.f32 %v5619_v53, %v7158_v63  ;;  %5644 = vrcp.f32 %v3712_v45  ;;  %v7520_v53 = vld [vmem:[#allocation16_spill] sm:$0xff] }
 0x206   : > { %v5623_v25 = vpop.eup %5622  ;;  %v3717_v50 = vadd.f32 1.0, %v5621_v19  ;;  %5646 = vpow2.f32 %v3705_v29 }
 0x207   : > { %v5625_v1 = vpop.eup %5624  ;;  %v3773_v38 = vadd.f32 %v3757_v40, %v3741_v4  ;;  %v3739_v18 = vmul.f32 %v5623_v25, %v7167_v44  ;;  %5648 = vpow2.f32 %v3701_v62  ;;  %v3765_v62 = vunpack.c.l.bf16 %v7520_v53 }
 0x208   : > { %v5627_v27 = vpop.eup %5626  ;;  %5650 = vrcp.f32 %v3717_v50  ;;  %v3715_v7 = vadd.f32 1.0, %v5625_v1  ;;  %v7521_v50 = vld [vmem:[#allocation14_spill] sm:$0xff] }
 0x209   : > { %v5629_v31 = vpop.eup %5628  ;;  %v3742_v15 = vmul.f32 %v5627_v27, %v7176_v41  ;;  %v3771_v63 = vadd.f32 %v3755_v35, %v3739_v18  ;;  %v3763_v1 = vunpack.c.l.bf16 %v7521_v50 }
 0x20a   : > { %5652 = vrcp.f32 %v3715_v7  ;;  %v3718_v26 = vadd.f32 1.0, %v5629_v31 }
 0x20b   : > { %v5631_v2 = vpop.eup %5630  ;;  %v3774_v48 = vadd.f32 %v3758_v0, %v3742_v15  ;;  %v7522_v0 = vld [vmem:[#allocation17_spill] sm:$0xff] }
 0x20c   : > { %v5633_v54 = vpop.eup %5632  ;;  %v3740_v44 = vmul.f32 %v5631_v2, %v7187_v52  ;;  %5654 = vrcp.f32 %v3718_v26  ;;  %v3766_v27 = vunpack.c.l.bf16 %v7522_v0  ;;  %v7523_v26 = vld [vmem:[#allocation15_spill] sm:$0xff] }
 0x20d   : > { %v5635_v49 = vpop.eup %5634  ;;  %v3788_v6 = vpack.c.bf16 %v3774_v48, %v3773_v38  ;;  %v3745_v58 = vmul.f32 %v5633_v54, %v7190_v8  ;;  %v3760_v8 = vunpack.c.l.bf16 %v7519_v37  ;;  %v7524_v48 = vld [vmem:[#allocation20_spill] sm:$0xff] }
 0x20e   : > { %v5637_v41 = vpop.eup %5636  ;;  %v3716_v59 = vadd.f32 1.0, %v5635_v49  ;;  %v3772_v43 = vadd.f32 %v3756_v21, %v3740_v44  ;;  %v3769_v55 = vunpack.c.l.bf16 %v7524_v48  ;;  %v7525_v44 = vld [vmem:[#allocation18_spill] sm:$0xff] }
 0x20f   : > { %v5639_v51 = vpop.eup %5638  ;;  %v3743_v60 = vmul.f32 %v5637_v41, %v7198_v16  ;;  %v3777_v12 = vadd.f32 %v3761_v46, %v3745_v58  ;;  %v3767_v49 = vunpack.c.l.bf16 %v7525_v44 }
 0x210   : > { %v5641_v47 = vpop.eup %5640  ;;  %5656 = vrcp.f32 %v3716_v59  ;;  %v3721_v39 = vadd.f32 1.0, %v5639_v51  ;;  %v3787_v52 = vpack.c.bf16 %v3772_v43, %v3771_v63  ;;  %v7527_v43 = vld [vmem:[#allocation19_spill] sm:$0xff] }
 0x211   : > { %v5643_v56 = vpop.eup %5642  ;;  %v3746_v57 = vmul.f32 %v5641_v47, %v7206_v9  ;;  %v3775_v32 = vadd.f32 %v3759_v3, %v3743_v60  ;;  %v3770_v3 = vunpack.c.l.bf16 %v7526_v5  ;;  %v3768_v51 = vunpack.c.l.bf16 %v7527_v43 }
 0x212   : > { %v5645_v29 = vpop.eup %5644  ;;  %5658 = vrcp.f32 %v3721_v39  ;;  %v3719_v11 = vadd.f32 1.0, %v5643_v56  ;;  %5416 = vmatprep.mubr.bf16.mxu0 %v3787_v52 }
 0x213   : > { %v5647_v33 = vpop.eup %5646  ;;  %v3744_v16 = vmul.f32 %v5645_v29, %v7214_v17  ;;  %5417 = vmatmul.mubr.bf16.vlgmr.msra.gmra.mxu0 %v3788_v6  ;;  %v3778_v40 = vadd.f32 %v3762_v20, %v3746_v57 }
 0x214   : > { %v5649_v45 = vpop.eup %5648  ;;  %5660 = vrcp.f32 %v3719_v11  ;;  %v3722_v19 = vadd.f32 1.0, %v5647_v33 }
 0x215   : > { %v5651_v4 = vpop.eup %5650  ;;  %v3720_v24 = vadd.f32 1.0, %v5649_v45  ;;  %v3776_v9 = vadd.f32 %v3760_v8, %v3744_v16  ;;  %v3790_v35 = vpack.c.bf16 %v3778_v40, %v3777_v12  ;;  %v7293_v16 = vld [vmem:[%s7420_s6] ss:$0 sm:$0xff] }
 0x216   : > { %v3749_v25 = vmul.f32 %v5651_v4, %v7223_v22  ;;  %5662 = vrcp.f32 %v3722_v19  ;;  %v3764_v22 = vunpack.c.l.bf16 %v7523_v26 }
 0x217   : > { %v5653_v38 = vpop.eup %5652  ;;  %5664 = vrcp.f32 %v3720_v24  ;;  %v3789_v18 = vpack.c.bf16 %v3776_v9, %v3775_v32 }
 0x218   : > { %v3781_v17 = vadd.f32 %v3765_v62, %v3749_v25  ;;  %v3747_v42 = vmul.f32 %v5653_v38, %v7226_v30 }
 0x219   : > { %v5655_v7 = vpop.eup %5654  ;;  %5420 = vmatprep.mubr.bf16.mxu0 %v3789_v18 }
 0x21a   : > { %v3750_v31 = vmul.f32 %v5655_v7, %v7233_v34  ;;  %v3779_v15 = vadd.f32 %v3763_v1, %v3747_v42 }
 0x21b   : > { %5421 = vmatmul.mubr.bf16.gmra.mxu0 %v3790_v35 }
 0x21c   : > { %v3782_v63 = vadd.f32 %v3766_v27, %v3750_v31 }
 0x21d   : > { %v5657_v14 = vpop.eup %5656 }
 0x21e   : > { %v3792_v21 = vpack.c.bf16 %v3782_v63, %v3781_v17  ;;  %v3748_v2 = vmul.f32 %v5657_v14, %v7237_v10 }
 0x21f   : > { %v5659_v46 = vpop.eup %5658 }
 0x220   : > { %v3753_v30 = vmul.f32 %v5659_v46, %v7241_v36  ;;  %v3780_v54 = vadd.f32 %v3764_v22, %v3748_v2 }
 0x221   : > { %v5661_v6 = vpop.eup %5660 }
 0x222   : > { %v3751_v34 = vmul.f32 %v5661_v6, %v7244_v61  ;;  %v3791_v58 = vpack.c.bf16 %v3780_v54, %v3779_v15  ;;  %v3785_v41 = vadd.f32 %v3769_v55, %v3753_v30 }
 0x223   : > { %v5663_v59 = vpop.eup %5662 }
 0x224   : > { %v5665_v60 = vpop.eup %5664  ;;  %v3754_v10 = vmul.f32 %v5663_v59, %v7249_v13  ;;  %5424 = vmatprep.mubr.bf16.mxu1 %v3791_v58  ;;  %v3783_v28 = vadd.f32 %v3767_v49, %v3751_v34 }
 0x225   : > { %v3752_v36 = vmul.f32 %v5665_v60, %v7253_v23  ;;  %5425 = vmatmul.mubr.bf16.vlgmr.msra.gmra.mxu1 %v3792_v21 }
 0x226   : > { %v3786_v20 = vadd.f32 %v3770_v3, %v3754_v10 }
 0x227   : > { %v3784_v12 = vadd.f32 %v3768_v51, %v3752_v36 }
 0x228   : > { %v3794_v47 = vpack.c.bf16 %v3786_v20, %v3785_v41 }
 0x229   : > { %v3793_v39 = vpack.c.bf16 %v3784_v12, %v3783_v28 }
 0x22b   : > { %5428 = vmatprep.mubr.bf16.mxu1 %v3793_v39 }
 0x22d   : > { %5429 = vmatmul.mubr.bf16.gmra.mxu1 %v3794_v47 }
 0x247   : > { %v5386_v61 = vpop.f32.mrf.mxu1 }
 0x249   : > { %v3941_v52 = vpop.f32.mrf.mxu1 }
 0x24b   : > { %v5387_v56 = vpop.f32.mrf.mxu1 }
 0x24d   : > { %v3944_v57 = vpop.f32.mrf.mxu1 }
 0x24f   : > { %v5390_v37 = vpop.f32.mrf.mxu1 }
 0x251   : > { %v3957_v8 = vpop.f32.mrf.mxu1 }
 0x253   : > { %v5391_v32 = vpop.f32.mrf.mxu1 }
 0x255   : > { %v3960_v29 = vpop.f32.mrf.mxu1 }
 0x257   : > { %v5394_v13 = vpop.f32.mrf.mxu1 }
 0x259   : > { %v3973_v11 = vpop.f32.mrf.mxu1 }
 0x25b   : > { %v7288_v33 = vpop.f32.mrf.mxu1 }
 0x25d   : > { %v7295_v40 = vpop.f32.mrf.mxu1 }
 0x25f   : > { %v7300_v4 = vpop.f32.mrf.mxu1 }
 0x261   : > { %v7310_v42 = vpop.f32.mrf.mxu1 }
 0x263   : > { %v7317_v21 = vpop.f32.mrf.mxu1 }
 0x265   : > { %v7330_v5 = vpop.f32.mrf.mxu1 }
 0x2d3   : > { %v5418_v23 = vpop.f32.mrf.mxu0 }
 0x2d4   : > { %v4095_v45 = vadd.f32 %v5418_v23, %v5386_v61 }
 0x2d5   : > { %v4086_v53 = vpop.f32.mrf.mxu0 }
 0x2d6   : > { %v7298_v62 = vadd.f32 %v7293_v16, %v4095_v45  ;;  %v4087_v19 = vadd.f32 %v4086_v53, %v3941_v52 }
 0x2d7   : > { %v5419_v24 = vpop.f32.mrf.mxu0 }
 0x2d8   : > { %v4174_v9 = vsub.f32 0.0, %v7298_v62  ;;  %v7304_v35 = vadd.f32 %v7293_v16, %v4087_v19  ;;  %v4098_v25 = vadd.f32 %v5419_v24, %v5387_v56 }
 0x2d9   : > { %v4089_v50 = vpop.f32.mrf.mxu0 }
 0x2da   : > { %v4192_v1 = vmul.f32 1.442695, %v4174_v9  ;;  %v4172_v38 = vsub.f32 0.0, %v7304_v35  ;;  %v7308_v18 = vadd.f32 %v7293_v16, %v4098_v25  ;;  %v4090_v17 = vadd.f32 %v4089_v50, %v3944_v57 }
 0x2db   : > { %v5422_v0 = vpop.f32.mrf.mxu0 }
 0x2dc   : > { %5666 = vpow2.f32 %v4192_v1  ;;  %v4188_v27 = vmul.f32 1.442695, %v4172_v38  ;;  %v4175_v7 = vsub.f32 0.0, %v7308_v18  ;;  %v7314_v31 = vadd.f32 %v7293_v16, %v4090_v17 }
 0x2dd   : > { %v4111_v15 = vadd.f32 %v5422_v0, %v5390_v37  ;;  %v4102_v63 = vpop.f32.mrf.mxu0 }
 0x2de   : > { %5668 = vpow2.f32 %v4188_v27  ;;  %v4194_v26 = vmul.f32 1.442695, %v4175_v7  ;;  %v4173_v22 = vsub.f32 0.0, %v7314_v31  ;;  %v4103_v14 = vadd.f32 %v4102_v63, %v3957_v8 }
 0x2df   : > { %v7320_v2 = vadd.f32 %v7293_v16, %v4111_v15  ;;  %v5423_v48 = vpop.f32.mrf.mxu0 }
 0x2e0   : > { %5670 = vpow2.f32 %v4194_v26  ;;  %v4190_v55 = vmul.f32 1.442695, %v4173_v22  ;;  %v7323_v46 = vadd.f32 %v7293_v16, %v4103_v14  ;;  %v4114_v30 = vadd.f32 %v5423_v48, %v5391_v32 }
 0x2e1   : > { %v4178_v54 = vsub.f32 0.0, %v7320_v2  ;;  %v4105_v44 = vpop.f32.mrf.mxu0 }
 0x2e2   : > { %5672 = vpow2.f32 %v4190_v55  ;;  %v4176_v49 = vsub.f32 0.0, %v7323_v46  ;;  %v7328_v6 = vadd.f32 %v7293_v16, %v4114_v30  ;;  %v4106_v34 = vadd.f32 %v4105_v44, %v3960_v29 }
 0x2e3   : > { %v4200_v58 = vmul.f32 1.442695, %v4178_v54 }
 0x2e4   : > { %v4196_v3 = vmul.f32 1.442695, %v4176_v49  ;;  %v4179_v41 = vsub.f32 0.0, %v7328_v6  ;;  %v7334_v59 = vadd.f32 %v7293_v16, %v4106_v34 }
 0x2e5   : > { %5674 = vpow2.f32 %v4200_v58  ;;  %v5426_v43 = vpop.f32.mrf.mxu1 }
 0x2e6   : > { %5676 = vpow2.f32 %v4196_v3  ;;  %v4202_v51 = vmul.f32 1.442695, %v4179_v41  ;;  %v4177_v60 = vsub.f32 0.0, %v7334_v59  ;;  %v4127_v10 = vadd.f32 %v5426_v43, %v5394_v13 }
 0x2e7   : > { %v4118_v28 = vpop.f32.mrf.mxu1 }
 0x2e8   : > { %5678 = vpow2.f32 %v4202_v51  ;;  %v4198_v36 = vmul.f32 1.442695, %v4177_v60  ;;  %v7338_v20 = vadd.f32 %v7293_v16, %v4127_v10  ;;  %v4119_v12 = vadd.f32 %v4118_v28, %v3973_v11 }
 0x2e9   : > { %v5667_v47 = vpop.eup %5666  ;;  %v5427_v39 = vpop.f32.mrf.mxu1 }
 0x2ea   : > { %v4222_v61 = vadd.f32 1.0, %v5667_v47  ;;  %5680 = vpow2.f32 %v4198_v36  ;;  %v4182_v52 = vsub.f32 0.0, %v7338_v20  ;;  %v7342_v56 = vadd.f32 %v7293_v16, %v4119_v12 }
 0x2eb   : > { %v5669_v57 = vpop.eup %5668  ;;  %v4130_v37 = vadd.f32 %v5427_v39, %v7288_v33  ;;  %v4121_v8 = vpop.f32.mrf.mxu1 }
 0x2ec   : > { %v4220_v32 = vadd.f32 1.0, %v5669_v57  ;;  %v4208_v29 = vmul.f32 1.442695, %v4182_v52  ;;  %v4180_v13 = vsub.f32 0.0, %v7342_v56  ;;  %5682 = vrcp.f32 %v4222_v61 }
 0x2ed   : > { %v5671_v23 = vpop.eup %5670  ;;  %v7347_v11 = vadd.f32 %v7293_v16, %v4130_v37  ;;  %v4122_v45 = vadd.f32 %v4121_v8, %v7295_v40  ;;  %v5430_v53 = vpop.f32.mrf.mxu1 }
 0x2ee   : > { %5684 = vrcp.f32 %v4220_v32  ;;  %v4223_v19 = vadd.f32 1.0, %v5671_v23  ;;  %v4204_v24 = vmul.f32 1.442695, %v4180_v13  ;;  %v4143_v9 = vadd.f32 %v5430_v53, %v7300_v4 }
 0x2ef   : > { %v5673_v25 = vpop.eup %5672  ;;  %5686 = vpow2.f32 %v4208_v29  ;;  %v4183_v33 = vsub.f32 0.0, %v7347_v11  ;;  %v7353_v50 = vadd.f32 %v7293_v16, %v4122_v45  ;;  %v4134_v1 = vpop.f32.mrf.mxu1 }
 0x2f0   : > { %5688 = vrcp.f32 %v4223_v19  ;;  %v4221_v38 = vadd.f32 1.0, %v5673_v25  ;;  %v7356_v17 = vadd.f32 %v7293_v16, %v4143_v9  ;;  %v4135_v40 = vadd.f32 %v4134_v1, %v7310_v42 }
 0x2f1   : > { %5690 = vpow2.f32 %v4204_v24  ;;  %v4210_v0 = vmul.f32 1.442695, %v4183_v33  ;;  %v4181_v27 = vsub.f32 0.0, %v7353_v50  ;;  %v5431_v4 = vpop.f32.mrf.mxu1 }
 0x2f2   : > { %v5675_v7 = vpop.eup %5674  ;;  %5692 = vrcp.f32 %v4221_v38  ;;  %v4186_v15 = vsub.f32 0.0, %v7356_v17  ;;  %v7362_v63 = vadd.f32 %v7293_v16, %v4135_v40  ;;  %v4146_v26 = vadd.f32 %v5431_v4, %v7317_v21 }
 0x2f3   : > { %v5677_v22 = vpop.eup %5676  ;;  %v4226_v14 = vadd.f32 1.0, %v5675_v7  ;;  %5694 = vpow2.f32 %v4210_v0  ;;  %v4206_v48 = vmul.f32 1.442695, %v4181_v27  ;;  %v4137_v55 = vpop.f32.mrf.mxu1 }
 0x2f4   : > { %v4224_v42 = vadd.f32 1.0, %v5677_v22  ;;  %v4184_v30 = vsub.f32 0.0, %v7362_v63  ;;  %v7367_v54 = vadd.f32 %v7293_v16, %v4146_v26  ;;  %v4216_v49 = vmul.f32 1.442695, %v4186_v15 }
 0x2f5   : > { %v5679_v44 = vpop.eup %5678  ;;  %5696 = vrcp.f32 %v4226_v14  ;;  %v4138_v34 = vadd.f32 %v4137_v55, %v7330_v5 }
 0x2f6   : > { %5698 = vrcp.f32 %v4224_v42  ;;  %v4227_v58 = vadd.f32 1.0, %v5679_v44  ;;  %v4187_v21 = vsub.f32 0.0, %v7367_v54  ;;  %v4212_v41 = vmul.f32 1.442695, %v4184_v30 }
 0x2f7   : > { %v5681_v3 = vpop.eup %5680  ;;  %5700 = vpow2.f32 %v4206_v48  ;;  %v7372_v43 = vadd.f32 %v7293_v16, %v4138_v34 }
 0x2f8   : > { %5702 = vrcp.f32 %v4227_v58  ;;  %v4225_v51 = vadd.f32 1.0, %v5681_v3  ;;  %v4218_v60 = vmul.f32 1.442695, %v4187_v21 }
 0x2f9   : > { %5704 = vpow2.f32 %v4216_v49  ;;  %v4185_v10 = vsub.f32 0.0, %v7372_v43  ;;  %v5683_v28 = vpop.eup %5682 }
 0x2fa   : > { %5706 = vrcp.f32 %v4225_v51  ;;  %v4254_v16 = vmul.f32 %v5683_v28, %v7298_v62 }
 0x2fb   : > { %v5685_v36 = vpop.eup %5684  ;;  %5708 = vpow2.f32 %v4212_v41  ;;  %v4214_v5 = vmul.f32 1.442695, %v4185_v10 }
 0x2fc   : > { %v5687_v12 = vpop.eup %5686  ;;  %5710 = vpow2.f32 %v4218_v60  ;;  %v4252_v8 = vmul.f32 %v5685_v36, %v7304_v35 }
 0x2fd   : > { %v5689_v47 = vpop.eup %5688  ;;  %v4230_v39 = vadd.f32 1.0, %v5687_v12  ;;  %5712 = vpow2.f32 %v4214_v5 }
 0x2fe   : > { %v5691_v61 = vpop.eup %5690  ;;  %v4255_v52 = vmul.f32 %v5689_v47, %v7308_v18 }
 0x2ff   : > { %v5693_v57 = vpop.eup %5692  ;;  %5714 = vrcp.f32 %v4230_v39  ;;  %v4228_v13 = vadd.f32 1.0, %v5691_v61 }
 0x300   : > { %v5695_v37 = vpop.eup %5694  ;;  %v4865_v32 = vpack.c.bf16 %v4255_v52, %v4254_v16  ;;  %v4253_v29 = vmul.f32 %v5693_v57, %v7314_v31 }
 0x301   : > { %v4231_v23 = vadd.f32 1.0, %v5695_v37 }
 0x302   : > { %v5697_v45 = vpop.eup %5696  ;;  %4897 = vst [vmem:[%s5866_s11 + $0x8] sm:$0xff] %v4865_v32   ;;  %v4860_v53 = vpack.c.bf16 %v4253_v29, %v4252_v8 }
 0x303   : > { %v5699_v19 = vpop.eup %5698  ;;  %5716 = vrcp.f32 %v4231_v23  ;;  %v4258_v35 = vmul.f32 %v5697_v45, %v7320_v2 }
 0x304   : > { %v5701_v24 = vpop.eup %5700  ;;  %4861 = vst [vmem:[%s5866_s11] sm:$0xff] %v4860_v53   ;;  %5718 = vrcp.f32 %v4228_v13  ;;  %v4256_v38 = vmul.f32 %v5699_v19, %v7323_v46 }
 0x305   : > { %v5703_v62 = vpop.eup %5702  ;;  %v4229_v18 = vadd.f32 1.0, %v5701_v24 }
 0x306   : > { %v5705_v9 = vpop.eup %5704  ;;  %v4259_v25 = vmul.f32 %v5703_v62, %v7328_v6 }
 0x307   : > { %v5707_v31 = vpop.eup %5706  ;;  %5720 = vrcp.f32 %v4229_v18  ;;  %v4234_v33 = vadd.f32 1.0, %v5705_v9 }
 0x308   : > { %v5709_v1 = vpop.eup %5708  ;;  %v4875_v40 = vpack.c.bf16 %v4259_v25, %v4258_v35  ;;  %v4257_v0 = vmul.f32 %v5707_v31, %v7334_v59 }
 0x309   : > { %v5711_v27 = vpop.eup %5710  ;;  %v4232_v4 = vadd.f32 1.0, %v5709_v1  ;;  %5722 = vrcp.f32 %v4234_v33 }
 0x30a   : > { %v5713_v7 = vpop.eup %5712  ;;  %4899 = vst [vmem:[%s5866_s11 + $0x18] sm:$0xff] %v4875_v40   ;;  %v4870_v15 = vpack.c.bf16 %v4257_v0, %v4256_v38  ;;  %v4235_v2 = vadd.f32 1.0, %v5711_v27 }
 0x30b   : > { %5724 = vrcp.f32 %v4232_v4  ;;  %v4233_v6 = vadd.f32 1.0, %v5713_v7 }
 0x30c   : > { %4898 = vst [vmem:[%s5866_s11 + $0x10] sm:$0xff] %v4870_v15   ;;  %5726 = vrcp.f32 %v4235_v2  ;;  %v5715_v26 = vpop.eup %5714 }
 0x30d   : > { %5728 = vrcp.f32 %v4233_v6  ;;  %v4262_v46 = vmul.f32 %v5715_v26, %v7338_v20 }
 0x310   : > { %v5717_v22 = vpop.eup %5716 }
 0x311   : > { %v4263_v59 = vmul.f32 %v5717_v22, %v7347_v11  ;;  %v5719_v14 = vpop.eup %5718 }
 0x312   : > { %v4260_v42 = vmul.f32 %v5719_v14, %v7342_v56 }
 0x313   : > { %v4885_v48 = vpack.c.bf16 %v4263_v59, %v4262_v46 }
 0x314   : > { %v5721_v55 = vpop.eup %5720 }
 0x315   : > { %4901 = vst [vmem:[%s5866_s11 + $0x28] sm:$0xff] %v4885_v48   ;;  %v4261_v30 = vmul.f32 %v5721_v55, %v7353_v50 }
 0x316   : > { %v5723_v44 = vpop.eup %5722 }
 0x317   : > { %v4880_v49 = vpack.c.bf16 %v4261_v30, %v4260_v42  ;;  %v4266_v20 = vmul.f32 %v5723_v44, %v7356_v17 }
 0x318   : > { %v5725_v34 = vpop.eup %5724 }
 0x319   : > { %v5727_v58 = vpop.eup %5726  ;;  %4900 = vst [vmem:[%s5866_s11 + $0x20] sm:$0xff] %v4880_v49   ;;  %v4264_v3 = vmul.f32 %v5725_v34, %v7362_v63 }
 0x31a   : > { %v5729_v21 = vpop.eup %5728  ;;  %v4267_v11 = vmul.f32 %v5727_v58, %v7367_v54 }
 0x31b   : > { %v4265_v41 = vmul.f32 %v5729_v21, %v7372_v43 }
 0x31c   : > { %v4895_v51 = vpack.c.bf16 %v4267_v11, %v4266_v20 }
 0x31d   : > { %v4890_v56 = vpack.c.bf16 %v4265_v41, %v4264_v3 }
 0x31e   : > { %4903 = vst [vmem:[%s5866_s11 + $0x38] sm:$0xff] %v4895_v51  }
 0x31f   : > { %4902 = vst [vmem:[%s5866_s11 + $0x30] sm:$0xff] %v4890_v56  }
 0x320 PF: > { %s17_s28 = sadd.s32 1, %s5768_s28   ;;  %s7528_s25 = sld [smem:[#allocation3_spill]] }
 0x321   : > { %p14_p11 = scmp.ge.s32.totalorder %s17_s28, 6   ;;  %s7529_s17 = sld [smem:[#allocation4_spill]] }
 0x322   : > { %s7530_s27 = sld [smem:[#allocation5_spill]]  ;;  %s7531_s24 = smov %s5760_s26 }
 0x323   :  { %16 = sbr.rel (!%p14_p11) target bundleno = 3 (0x3), region = 112 }
 0x327   : > { %s7532_s26 = smov %s7529_s17 }

</bundles_post_ra>
